<compile_context>
chip_gen: v6e
topology: v6e:2x2x1
jax: 0.10.0
libtpu: 0.0.40
codegen_flags: <defaults>
</compile_context>

<pallas_src>
import functools

import numpy as np
import jax
import jax.numpy as jnp
from jax.experimental import pallas as pl
from jax.experimental.pallas import tpu as pltpu

EPS = 1e-5
MATMUL_DTYPE = jnp.bfloat16      # MXU-native; set to jnp.float32 for exact runs


def _vmem_limit_bytes():
    """~half of physical VMEM: 64 MiB on v5e/v6e, 32 MiB on v7x."""
    try:
        cap = int(pltpu.get_tpu_info().vmem_capacity_bytes)
    except Exception:            # interpret mode / API drift -> safe default
        cap = 64 * 1024 * 1024
    return int(min(96 * 1024 * 1024, max(32 * 1024 * 1024, cap // 2)))


# ---------------------------------------------------------------------------
# pass 1: conv1 (1x1) per image tile.  Emits y1 in bf16 (consumed by pass 2,
# so conv1 is computed exactly once) plus per-tile sum / sum-of-squares from
# which the wrapper finishes the biased bn1 batch mean / variance.
# ---------------------------------------------------------------------------
def _conv1_kernel(x_ref, w1_ref, y1_ref, s_ref, ss_ref):
    y1 = jnp.dot(x_ref[...], w1_ref[...],
                 preferred_element_type=jnp.float32)             # (H*W, P) f32
    y1_ref[...] = y1.astype(y1_ref.dtype)                        # bf16 stream
    s_ref[...] = jnp.sum(y1, axis=0, keepdims=True)              # (1, P)
    ss_ref[...] = jnp.sum(y1 * y1, axis=0, keepdims=True)        # (1, P)


# ---------------------------------------------------------------------------
# pass 2: bn1 affine + conv2 (3x3, pad=1) per image tile.  Emits y2 (bf16)
# plus its per-tile first moment (sum) and second moment (Gram), from which
# the wrapper derives bn2 AND bn3 statistics analytically.
# ---------------------------------------------------------------------------
def _conv2_kernel(y1_ref, w2_ref, a1_ref, c1_ref,
                  y2_ref, s2_ref, g2_ref, pad_ref):
    Hp, Wp, P = pad_ref.shape
    H, W = Hp - 2, Wp - 2
    md = pad_ref.dtype

    # bn1 as a per-channel f32 affine on the bf16 conv1 activation.
    y1n = (y1_ref[...].astype(jnp.float32) * a1_ref[...]
           + c1_ref[...]).astype(md)                             # (H*W, P)

    # Zero only the 1-pixel border of the padded staging buffer, then write
    # the interior (avoids zeroing + overwriting the whole buffer).  Border
    # must be (re)zeroed every step: with "parallel" semantics each core gets
    # its own scratch, so a step-0-only init would be unsafe.
    pad_ref[0:1, :, :] = jnp.zeros((1, Wp, P), md)
    pad_ref[H + 1:H + 2, :, :] = jnp.zeros((1, Wp, P), md)
    pad_ref[1:H + 1, 0:1, :] = jnp.zeros((H, 1, P), md)
    pad_ref[1:H + 1, W + 1:W + 2, :] = jnp.zeros((H, 1, P), md)
    pad_ref[1:H + 1, 1:W + 1, :] = y1n.reshape(H, W, P)

    if P >= 128:
        # 9 accumulating K=P matmuls straight from the padded scratch: no
        # (H*W, 9P) patch materialization / concatenate, full MXU occupancy.
        y2 = None
        t = 0
        for dy in range(3):
            for dx in range(3):
                tap = pad_ref[dy:dy + H, dx:dx + W, :].reshape(H * W, P)
                part = jnp.dot(tap, w2_ref[t * P:(t + 1) * P, :],
                               preferred_element_type=jnp.float32)
                y2 = part if y2 is None else y2 + part
                t += 1
    else:
        # Narrow-channel path: single big-K im2col matmul keeps the MXU fed.
        taps = [pad_ref[dy:dy + H, dx:dx + W, :]
                for dy in range(3) for dx in range(3)]
        patches = jnp.concatenate(taps, axis=2).reshape(H * W, 9 * P)
        y2 = jnp.dot(patches, w2_ref[...], preferred_element_type=jnp.float32)

    y2_ref[...] = y2.astype(y2_ref.dtype)                        # bf16 stream
    s2_ref[...] = jnp.sum(y2, axis=0, keepdims=True)             # (1, P) f32
    # Gram matrix y2^T y2 (f32) -> second moments for bn2 and bn3 statistics.
    g2_ref[...] = jax.lax.dot_general(
        y2, y2, (((0,), (0,)), ((), ())),
        preferred_element_type=jnp.float32)                      # (P, P)


# ---------------------------------------------------------------------------
# pass 3: bn2 folded into the 1x1 conv3 weights, then the bn3 scale (f32) and
# bias, identity residual add and relu.  Output tiles are lane-dense.
# ---------------------------------------------------------------------------
def _finalize_kernel(y2_ref, x_ref, w3f_ref, a3_ref, bias_ref, o_ref):
    y3 = jnp.dot(y2_ref[...], w3f_ref[...],
                 preferred_element_type=jnp.float32)             # (H*W, Cout)
    o_ref[...] = jnp.maximum(y3 * a3_ref[...] + bias_ref[...] + x_ref[...],
                             0.0).astype(o_ref.dtype)


@functools.partial(jax.jit, static_argnames=("matmul_dtype", "out_dtype"))
def bottleneck_pallas(x_nhwc, params, *, matmul_dtype=MATMUL_DTYPE,
                      out_dtype=jnp.float32):
    """Bottleneck forward.  x_nhwc: (N, H, W, Cin) f32 -> (N, H, W, 4*plane).

    out_dtype can be set to bf16 when the consumer accepts it (halves the
    final writeback); the demo keeps f32 for the accuracy check.
    """
    (w1, w2, w3, g1, b1, g2, b2, g3, b3) = params
    N, H, W, Cin = x_nhwc.shape
    P = w1.shape[1]
    Cout = w3.shape[1]
    HW = H * W
    M = N * HW
    md = matmul_dtype
    assert Cin == Cout, "identity residual requires inplane == expansion*plane"

    x_img = x_nhwc.reshape(N, HW, Cin)            # f32: pass-3 residual stream
    x_bf = x_img.astype(md)                       # bf16: pass-1 input stream
    w1_md = w1.astype(md)                         # (Cin, P)
    w2_md = w2.reshape(9 * P, P).astype(md)       # (ky,kx,cin)->rows (im2col)

    fsz = 4
    msz = np.dtype(md).itemsize
    osz = np.dtype(out_dtype).itemsize
    cparams = pltpu.CompilerParams(
        dimension_semantics=("parallel",),        # megacore splits the images
        vmem_limit_bytes=_vmem_limit_bytes())

    # ---- pass 1: conv1 + bn1 batch statistics ------------------------------
    y1_img, s1_t, ss1_t = pl.pallas_call(
        _conv1_kernel,
        grid=(N,),
        in_specs=[pl.BlockSpec((None, HW, Cin), lambda n: (n, 0, 0)),
                  pl.BlockSpec((Cin, P), lambda n: (0, 0))],
        out_specs=(pl.BlockSpec((None, HW, P), lambda n: (n, 0, 0)),
                   pl.BlockSpec((None, 1, P), lambda n: (n, 0, 0)),
                   pl.BlockSpec((None, 1, P), lambda n: (n, 0, 0))),
        out_shape=(jax.ShapeDtypeStruct((N, HW, P), md),
                   jax.ShapeDtypeStruct((N, 1, P), jnp.float32),
                   jax.ShapeDtypeStruct((N, 1, P), jnp.float32)),
        compiler_params=cparams,
        cost_estimate=pl.CostEstimate(
            flops=2 * M * Cin * P, transcendentals=0,
            bytes_accessed=(M * Cin * msz + Cin * P * msz + M * P * msz
                            + 2 * N * P * fsz)),
    )(x_bf, w1_md)

    mean1 = jnp.sum(s1_t, axis=0) / M                           # (1, P)
    var1 = jnp.maximum(jnp.sum(ss1_t, axis=0) / M - mean1 * mean1, 0.0)
    a1 = g1 * jax.lax.rsqrt(var1 + EPS)                         # (1, P)
    c1 = b1 - mean1 * a1                                        # (1, P)

    # ---- pass 2: bn1 affine + conv2, plus y2 moments ------------------------
    y2_img, s2_t, g2_t = pl.pallas_call(
        _conv2_kernel,
        grid=(N,),
        in_specs=[pl.BlockSpec((None, HW, P), lambda n: (n, 0, 0)),
                  pl.BlockSpec((9 * P, P), lambda n: (0, 0)),
                  pl.BlockSpec((1, P), lambda n: (0, 0)),
                  pl.BlockSpec((1, P), lambda n: (0, 0))],
        out_specs=(pl.BlockSpec((None, HW, P), lambda n: (n, 0, 0)),
                   pl.BlockSpec((None, 1, P), lambda n: (n, 0, 0)),
                   pl.BlockSpec((None, P, P), lambda n: (n, 0, 0))),
        out_shape=(jax.ShapeDtypeStruct((N, HW, P), md),
                   jax.ShapeDtypeStruct((N, 1, P), jnp.float32),
                   jax.ShapeDtypeStruct((N, P, P), jnp.float32)),
        scratch_shapes=[pltpu.VMEM((H + 2, W + 2, P), md)],
        compiler_params=cparams,
        cost_estimate=pl.CostEstimate(
            flops=2 * M * (9 * P * P + P * P), transcendentals=0,
            bytes_accessed=(M * P * msz + 9 * P * P * msz + M * P * msz
                            + N * P * fsz + N * P * P * fsz)),
    )(y1_img, w2_md, a1, c1)

    # bn2 statistics from the accumulated moments.
    sum2 = jnp.sum(s2_t, axis=0)                                # (1, P)
    gram2 = jnp.sum(g2_t, axis=0)                               # (P, P)
    mean2 = sum2 / M
    var2 = jnp.maximum(jnp.diagonal(gram2)[None, :] / M - mean2 * mean2, 0.0)
    a2 = g2 * jax.lax.rsqrt(var2 + EPS)                         # (1, P)
    c2 = b2 - mean2 * a2                                        # (1, P)

    # bn3 statistics derived analytically (exact in the moments) :
    #   z = bn2(y2) = a2*y2 + c2,  y3 = z @ w3
    #   E[y3] = E[z] @ w3,  E[y3^2] = diag(w3^T E[z z^T] w3)
    ez = a2 * mean2 + c2                                        # (1, P)
    eyy = gram2 / M                                             # (P, P)
    am = a2 * mean2                                             # (1, P)
    ezz = (a2.T * eyy * a2) + am.T @ c2 + c2.T @ am + c2.T @ c2  # (P, P)
    mean3 = ez @ w3                                             # (1, Cout)
    ey3sq = jnp.sum(w3 * (ezz @ w3), axis=0, keepdims=True)     # (1, Cout)
    var3 = jnp.maximum(ey3sq - mean3 * mean3, 0.0)
    a3 = g3 * jax.lax.rsqrt(var3 + EPS)                         # (1, Cout)
    c3 = b3 - mean3 * a3                                        # (1, Cout)

    # Fold only bn2 into the bf16 conv3 weights; a3 (~1/sigma3, can be large)
    # is applied as an f32 per-channel scale in the epilogue for accuracy.
    w3f = (a2.T * w3).astype(md)                                # (P, Cout)
    bias3 = (c2 @ w3) * a3 + c3                                 # (1, Cout) f32

    # ---- pass 3: folded conv3 + bn3 scale/bias + residual + relu ------------
    out_img = pl.pallas_call(
        _finalize_kernel,
        grid=(N,),
        in_specs=[pl.BlockSpec((None, HW, P), lambda n: (n, 0, 0)),
                  pl.BlockSpec((None, HW, Cout), lambda n: (n, 0, 0)),
                  pl.BlockSpec((P, Cout), lambda n: (0, 0)),
                  pl.BlockSpec((1, Cout), lambda n: (0, 0)),
                  pl.BlockSpec((1, Cout), lambda n: (0, 0))],
        out_specs=pl.BlockSpec((None, HW, Cout), lambda n: (n, 0, 0)),
        out_shape=jax.ShapeDtypeStruct((N, HW, Cout), out_dtype),
        compiler_params=cparams,
        cost_estimate=pl.CostEstimate(
            flops=2 * M * P * Cout, transcendentals=0,
            bytes_accessed=(M * P * msz + M * Cout * fsz + M * Cout * osz
                            + P * Cout * msz + 2 * Cout * fsz)),
    )(y2_img, x_img, w3f, a3, bias3)

    return out_img.reshape(N, H, W, Cout)


def bottleneck_ref(x_nhwc, params):
    """Pure-JAX f32 reference (training-mode BatchNorm, biased variance)."""
    (w1, w2, w3, g1, b1, g2, b2, g3, b3) = params
    hp = jax.lax.Precision.HIGHEST

    def bn(y, g, b):
        mu = y.mean(axis=(0, 1, 2), keepdims=True)
        var = ((y - mu) ** 2).mean(axis=(0, 1, 2), keepdims=True)
        return (y - mu) * jax.lax.rsqrt(var + EPS) * g + b

    y = jnp.einsum('nhwc,co->nhwo', x_nhwc, w1, precision=hp)
    y = bn(y, g1, b1)
    y = jax.lax.conv_general_dilated(
        y, w2, window_strides=(1, 1), padding='SAME',
        dimension_numbers=('NHWC', 'HWIO', 'NHWC'), precision=hp)
    y = bn(y, g2, b2)
    y = jnp.einsum('nhwc,co->nhwo', y, w3, precision=hp)
    y = bn(y, g3, b3)
    return jnp.maximum(y + x_nhwc, 0.0)


def make_params(key, inplane, plane):
    expansion = 4
    ks = jax.random.split(key, 9)
    # Conv weights stored channels-last: 1x1 convs as [Cin, Cout], 3x3 as HWIO.
    w1 = 0.1 * jax.random.normal(ks[0], (inplane, plane), jnp.float32)
    w2 = 0.1 * jax.random.normal(ks[1], (3, 3, plane, plane), jnp.float32)
    w3 = 0.1 * jax.random.normal(ks[2], (plane, expansion * plane), jnp.float32)
    g1 = 1.0 + 0.1 * jax.random.normal(ks[3], (1, plane), jnp.float32)
    b1 = 0.1 * jax.random.normal(ks[4], (1, plane), jnp.float32)
    g2 = 1.0 + 0.1 * jax.random.normal(ks[5], (1, plane), jnp.float32)
    b2 = 0.1 * jax.random.normal(ks[6], (1, plane), jnp.float32)
    g3 = 1.0 + 0.1 * jax.random.normal(ks[7], (1, expansion * plane), jnp.float32)
    b3 = 0.1 * jax.random.normal(ks[8], (1, expansion * plane), jnp.float32)
    return (w1, w2, w3, g1, b1, g2, b2, g3, b3)


if __name__ == "__main__":
    key = jax.random.PRNGKey(0)
    k_x, k_p = jax.random.split(key)

    # Small demo shape with lane-dense channel counts (plane a multiple of
    # 128, per review) and inplane == expansion*plane so the identity residual
    # is valid (module defaults stride=1, downsample=None).
    N, H, W = 2, 16, 16
    plane = 128
    inplane = 4 * plane

    # PyTorch-style NCHW input, converted to NHWC for the kernels.
    x_nchw = jax.random.normal(k_x, (N, inplane, H, W), jnp.float32)
    x_nhwc = jnp.transpose(x_nchw, (0, 2, 3, 1))
    params = make_params(k_p, inplane, plane)

    out_nhwc = jax.block_until_ready(bottleneck_pallas(x_nhwc, params))
    out_nchw = jnp.transpose(out_nhwc, (0, 3, 1, 2))   # back to NCHW

    ref_nhwc = bottleneck_ref(x_nhwc, params)
    assert out_nchw.shape == (N, 4 * plane, H, W)
    scale = float(jnp.max(jnp.abs(ref_nhwc)))
    err = float(jnp.max(jnp.abs(out_nhwc - ref_nhwc)))
    # bf16 MXU matmuls + bf16 x/y1/y2 HBM streams (intentional, see header)
    # vs a float32 HIGHEST-precision reference: allow a few percent of scale.
    assert err <= 4e-2 * max(1.0, scale), (err, scale)
    print("KERNEL_OK")
</pallas_src>

<mosaic_0001>
module attributes {stable_mosaic.version = 11 : i64} {
  func.func @_conv1_kernel(%arg0: i32, %arg1: memref<1x256x512xbf16, #tpu.memory_space<vmem>>, %arg2: memref<512x128xbf16, #tpu.memory_space<vmem>>, %arg3: memref<1x256x128xbf16, #tpu.memory_space<vmem>>, %arg4: memref<1x1x128xf32, #tpu.memory_space<vmem>>, %arg5: memref<1x1x128xf32, #tpu.memory_space<vmem>>) attributes {dimension_semantics = [#tpu.dimension_semantics<parallel>], iteration_bounds = array<i64: 2>, scalar_prefetch = 0 : i64, scratch_operands = 0 : i64, tpu.core_type = #tpu.core_type<tc>, window_params = [{transform_indices = @transform_0, window_bounds = array<i64: 1, 256, 512>}, {pipeline_mode = #tpu.pipeline_mode<synchronous>, transform_indices = @transform_1, window_bounds = array<i64: 512, 128>}, {transform_indices = @transform_2, window_bounds = array<i64: 1, 256, 128>}, {transform_indices = @transform_3, window_bounds = array<i64: 1, 1, 128>}, {transform_indices = @transform_4, window_bounds = array<i64: 1, 1, 128>}]} {
    %c0 = arith.constant 0 : index
    %c0_0 = arith.constant 0 : index
    %c0_1 = arith.constant 0 : index
    %0 = vector.load %arg1[%c0, %c0_0, %c0_1] : memref<1x256x512xbf16, #tpu.memory_space<vmem>>, vector<1x256x512xbf16>
    %1 = vector.shape_cast %0 : vector<1x256x512xbf16> to vector<256x512xbf16>
    %c0_2 = arith.constant 0 : index
    %c0_3 = arith.constant 0 : index
    %2 = vector.load %arg2[%c0_2, %c0_3] : memref<512x128xbf16, #tpu.memory_space<vmem>>, vector<512x128xbf16>
    %cst = arith.constant dense<0.000000e+00> : vector<256x128xf32>
    %3 = tpu.matmul %1, %2, %cst {dimension_numbers = #tpu.dot_dimension_numbers<[1], [0], [0], [1], [0, 0, 1, 1], [], []>} : vector<256x512xbf16>, vector<512x128xbf16>, vector<256x128xf32> -> vector<256x128xf32>
    %4 = arith.truncf %3 : vector<256x128xf32> to vector<256x128xbf16>
    %c0_4 = arith.constant 0 : index
    %c0_5 = arith.constant 0 : index
    %c0_6 = arith.constant 0 : index
    %5 = vector.load %arg3[%c0_4, %c0_5, %c0_6] : memref<1x256x128xbf16, #tpu.memory_space<vmem>>, vector<1x256x128xbf16>
    %6 = vector.shape_cast %5 : vector<1x256x128xbf16> to vector<256x128xbf16>
    %7 = vector.shape_cast %4 : vector<256x128xbf16> to vector<1x256x128xbf16>
    tpu.vector_store %arg3[%c0_4, %c0_5, %c0_6], %7 {strides = array<i32>} : memref<1x256x128xbf16, #tpu.memory_space<vmem>>, vector<1x256x128xbf16>,
    %cst_7 = arith.constant dense<0.000000e+00> : vector<128xf32>
    %8 = vector.multi_reduction <add>, %3, %cst_7 [0] : vector<256x128xf32> to vector<128xf32>
    %9 = vector.shape_cast %8 : vector<128xf32> to vector<1x128xf32>
    %c0_8 = arith.constant 0 : index
    %c0_9 = arith.constant 0 : index
    %c0_10 = arith.constant 0 : index
    %10 = vector.load %arg4[%c0_8, %c0_9, %c0_10] : memref<1x1x128xf32, #tpu.memory_space<vmem>>, vector<1x1x128xf32>
    %11 = vector.shape_cast %10 : vector<1x1x128xf32> to vector<1x128xf32>
    %12 = vector.shape_cast %9 : vector<1x128xf32> to vector<1x1x128xf32>
    tpu.vector_store %arg4[%c0_8, %c0_9, %c0_10], %12 {strides = array<i32>} : memref<1x1x128xf32, #tpu.memory_space<vmem>>, vector<1x1x128xf32>,
    %13 = arith.mulf %3, %3 : vector<256x128xf32>
    %cst_11 = arith.constant dense<0.000000e+00> : vector<128xf32>
    %14 = vector.multi_reduction <add>, %13, %cst_11 [0] : vector<256x128xf32> to vector<128xf32>
    %15 = vector.shape_cast %14 : vector<128xf32> to vector<1x128xf32>
    %c0_12 = arith.constant 0 : index
    %c0_13 = arith.constant 0 : index
    %c0_14 = arith.constant 0 : index
    %16 = vector.load %arg5[%c0_12, %c0_13, %c0_14] : memref<1x1x128xf32, #tpu.memory_space<vmem>>, vector<1x1x128xf32>
    %17 = vector.shape_cast %16 : vector<1x1x128xf32> to vector<1x128xf32>
    %18 = vector.shape_cast %15 : vector<1x128xf32> to vector<1x1x128xf32>
    tpu.vector_store %arg5[%c0_12, %c0_13, %c0_14], %18 {strides = array<i32>} : memref<1x1x128xf32, #tpu.memory_space<vmem>>, vector<1x1x128xf32>,
    return
  }
  func.func @transform_0(%arg0: i32) -> (i32, i32, i32) {
    %c0_i32 = arith.constant 0 : i32
    %c0_i32_0 = arith.constant 0 : i32
    %c0_i32_1 = arith.constant 0 : i32
    return %arg0, %c0_i32, %c0_i32_0 : i32, i32, i32
  }
  func.func @transform_1(%arg0: i32) -> (i32, i32) {
    %c0_i32 = arith.constant 0 : i32
    %c0_i32_0 = arith.constant 0 : i32
    %c0_i32_1 = arith.constant 0 : i32
    return %c0_i32, %c0_i32_0 : i32, i32
  }
  func.func @transform_2(%arg0: i32) -> (i32, i32, i32) {
    %c0_i32 = arith.constant 0 : i32
    %c0_i32_0 = arith.constant 0 : i32
    %c0_i32_1 = arith.constant 0 : i32
    return %arg0, %c0_i32, %c0_i32_0 : i32, i32, i32
  }
  func.func @transform_3(%arg0: i32) -> (i32, i32, i32) {
    %c0_i32 = arith.constant 0 : i32
    %c0_i32_0 = arith.constant 0 : i32
    %c0_i32_1 = arith.constant 0 : i32
    return %arg0, %c0_i32, %c0_i32_0 : i32, i32, i32
  }
  func.func @transform_4(%arg0: i32) -> (i32, i32, i32) {
    %c0_i32 = arith.constant 0 : i32
    %c0_i32_0 = arith.constant 0 : i32
    %c0_i32_1 = arith.constant 0 : i32
    return %arg0, %c0_i32, %c0_i32_0 : i32, i32, i32
  }
}

module attributes {stable_mosaic.version = 11 : i64} {
  func.func @_conv2_kernel(%arg0: i32, %arg1: memref<1x256x128xbf16, #tpu.memory_space<vmem>>, %arg2: memref<1152x128xbf16, #tpu.memory_space<vmem>>, %arg3: memref<1x128xf32, #tpu.memory_space<vmem>>, %arg4: memref<1x128xf32, #tpu.memory_space<vmem>>, %arg5: memref<1x256x128xbf16, #tpu.memory_space<vmem>>, %arg6: memref<1x1x128xf32, #tpu.memory_space<vmem>>, %arg7: memref<1x128x128xf32, #tpu.memory_space<vmem>>, %arg8: memref<18x18x128xbf16, #tpu.memory_space<vmem>>) attributes {dimension_semantics = [#tpu.dimension_semantics<parallel>], iteration_bounds = array<i64: 2>, scalar_prefetch = 0 : i64, scratch_operands = 1 : i64, tpu.core_type = #tpu.core_type<tc>, window_params = [{transform_indices = @transform_0, window_bounds = array<i64: 1, 256, 128>}, {pipeline_mode = #tpu.pipeline_mode<synchronous>, transform_indices = @transform_1, window_bounds = array<i64: 1152, 128>}, {pipeline_mode = #tpu.pipeline_mode<synchronous>, transform_indices = @transform_2, window_bounds = array<i64: 1, 128>}, {pipeline_mode = #tpu.pipeline_mode<synchronous>, transform_indices = @transform_3, window_bounds = array<i64: 1, 128>}, {transform_indices = @transform_4, window_bounds = array<i64: 1, 256, 128>}, {transform_indices = @transform_5, window_bounds = array<i64: 1, 1, 128>}, {transform_indices = @transform_6, window_bounds = array<i64: 1, 128, 128>}]} {
    %c0 = arith.constant 0 : index
    %c0_0 = arith.constant 0 : index
    %c0_1 = arith.constant 0 : index
    %0 = vector.load %arg1[%c0, %c0_0, %c0_1] : memref<1x256x128xbf16, #tpu.memory_space<vmem>>, vector<1x256x128xbf16>
    %1 = vector.shape_cast %0 : vector<1x256x128xbf16> to vector<256x128xbf16>
    %2 = arith.extf %1 : vector<256x128xbf16> to vector<256x128xf32>
    %c0_2 = arith.constant 0 : index
    %c0_3 = arith.constant 0 : index
    %3 = vector.load %arg3[%c0_2, %c0_3] : memref<1x128xf32, #tpu.memory_space<vmem>>, vector<1x128xf32>
    %4 = vector.broadcast %3 : vector<1x128xf32> to vector<256x128xf32>
    %5 = arith.mulf %2, %4 : vector<256x128xf32>
    %c0_4 = arith.constant 0 : index
    %c0_5 = arith.constant 0 : index
    %6 = vector.load %arg4[%c0_4, %c0_5] : memref<1x128xf32, #tpu.memory_space<vmem>>, vector<1x128xf32>
    %7 = vector.broadcast %6 : vector<1x128xf32> to vector<256x128xf32>
    %8 = arith.addf %5, %7 : vector<256x128xf32>
    %9 = arith.truncf %8 : vector<256x128xf32> to vector<256x128xbf16>
    %cst = arith.constant 0.000000e+00 : bf16
    %10 = vector.broadcast %cst : bf16 to vector<1x18x128xbf16>
    %c0_6 = arith.constant 0 : index
    %c0_7 = arith.constant 0 : index
    %c0_8 = arith.constant 0 : index
    %11 = vector.load %arg8[%c0_6, %c0_7, %c0_8] : memref<18x18x128xbf16, #tpu.memory_space<vmem>>, vector<1x18x128xbf16>
    tpu.vector_store %arg8[%c0_6, %c0_7, %c0_8], %10 {strides = array<i32>} : memref<18x18x128xbf16, #tpu.memory_space<vmem>>, vector<1x18x128xbf16>,
    %cst_9 = arith.constant 0.000000e+00 : bf16
    %12 = vector.broadcast %cst_9 : bf16 to vector<1x18x128xbf16>
    %c17 = arith.constant 17 : index
    %c0_10 = arith.constant 0 : index
    %c0_11 = arith.constant 0 : index
    %13 = vector.load %arg8[%c17, %c0_10, %c0_11] : memref<18x18x128xbf16, #tpu.memory_space<vmem>>, vector<1x18x128xbf16>
    tpu.vector_store %arg8[%c17, %c0_10, %c0_11], %12 {strides = array<i32>} : memref<18x18x128xbf16, #tpu.memory_space<vmem>>, vector<1x18x128xbf16>,
    %cst_12 = arith.constant 0.000000e+00 : bf16
    %14 = vector.broadcast %cst_12 : bf16 to vector<16x1x128xbf16>
    %c1 = arith.constant 1 : index
    %c0_13 = arith.constant 0 : index
    %c0_14 = arith.constant 0 : index
    %15 = vector.load %arg8[%c1, %c0_13, %c0_14] : memref<18x18x128xbf16, #tpu.memory_space<vmem>>, vector<16x1x128xbf16>
    tpu.vector_store %arg8[%c1, %c0_13, %c0_14], %14 {strides = array<i32>} : memref<18x18x128xbf16, #tpu.memory_space<vmem>>, vector<16x1x128xbf16>,
    %cst_15 = arith.constant 0.000000e+00 : bf16
    %16 = vector.broadcast %cst_15 : bf16 to vector<16x1x128xbf16>
    %c1_16 = arith.constant 1 : index
    %c17_17 = arith.constant 17 : index
    %c0_18 = arith.constant 0 : index
    %17 = vector.load %arg8[%c1_16, %c17_17, %c0_18] : memref<18x18x128xbf16, #tpu.memory_space<vmem>>, vector<16x1x128xbf16>
    tpu.vector_store %arg8[%c1_16, %c17_17, %c0_18], %16 {strides = array<i32>} : memref<18x18x128xbf16, #tpu.memory_space<vmem>>, vector<16x1x128xbf16>,
    %18 = vector.shape_cast %9 : vector<256x128xbf16> to vector<16x16x128xbf16>
    %c1_19 = arith.constant 1 : index
    %c1_20 = arith.constant 1 : index
    %c0_21 = arith.constant 0 : index
    %19 = vector.load %arg8[%c1_19, %c1_20, %c0_21] : memref<18x18x128xbf16, #tpu.memory_space<vmem>>, vector<16x16x128xbf16>
    tpu.vector_store %arg8[%c1_19, %c1_20, %c0_21], %18 {strides = array<i32>} : memref<18x18x128xbf16, #tpu.memory_space<vmem>>, vector<16x16x128xbf16>,
    %c0_22 = arith.constant 0 : index
    %c0_23 = arith.constant 0 : index
    %c0_24 = arith.constant 0 : index
    %20 = vector.load %arg8[%c0_22, %c0_23, %c0_24] : memref<18x18x128xbf16, #tpu.memory_space<vmem>>, vector<16x16x128xbf16>
    %21 = vector.shape_cast %20 : vector<16x16x128xbf16> to vector<256x128xbf16>
    %c0_25 = arith.constant 0 : index
    %c0_26 = arith.constant 0 : index
    %22 = vector.load %arg2[%c0_25, %c0_26] : memref<1152x128xbf16, #tpu.memory_space<vmem>>, vector<128x128xbf16>
    %cst_27 = arith.constant dense<0.000000e+00> : vector<256x128xf32>
    %23 = tpu.matmul %21, %22, %cst_27 {dimension_numbers = #tpu.dot_dimension_numbers<[1], [0], [0], [1], [0, 0, 1, 1], [], []>} : vector<256x128xbf16>, vector<128x128xbf16>, vector<256x128xf32> -> vector<256x128xf32>
    %c0_28 = arith.constant 0 : index
    %c1_29 = arith.constant 1 : index
    %c0_30 = arith.constant 0 : index
    %24 = vector.load %arg8[%c0_28, %c1_29, %c0_30] : memref<18x18x128xbf16, #tpu.memory_space<vmem>>, vector<16x16x128xbf16>
    %25 = vector.shape_cast %24 : vector<16x16x128xbf16> to vector<256x128xbf16>
    %c128 = arith.constant 128 : index
    %c0_31 = arith.constant 0 : index
    %26 = vector.load %arg2[%c128, %c0_31] : memref<1152x128xbf16, #tpu.memory_space<vmem>>, vector<128x128xbf16>
    %cst_32 = arith.constant dense<0.000000e+00> : vector<256x128xf32>
    %27 = tpu.matmul %25, %26, %cst_32 {dimension_numbers = #tpu.dot_dimension_numbers<[1], [0], [0], [1], [0, 0, 1, 1], [], []>} : vector<256x128xbf16>, vector<128x128xbf16>, vector<256x128xf32> -> vector<256x128xf32>
    %28 = arith.addf %23, %27 : vector<256x128xf32>
    %c0_33 = arith.constant 0 : index
    %c2 = arith.constant 2 : index
    %c0_34 = arith.constant 0 : index
    %29 = vector.load %arg8[%c0_33, %c2, %c0_34] : memref<18x18x128xbf16, #tpu.memory_space<vmem>>, vector<16x16x128xbf16>
    %30 = vector.shape_cast %29 : vector<16x16x128xbf16> to vector<256x128xbf16>
    %c256 = arith.constant 256 : index
    %c0_35 = arith.constant 0 : index
    %31 = vector.load %arg2[%c256, %c0_35] : memref<1152x128xbf16, #tpu.memory_space<vmem>>, vector<128x128xbf16>
    %cst_36 = arith.constant dense<0.000000e+00> : vector<256x128xf32>
    %32 = tpu.matmul %30, %31, %cst_36 {dimension_numbers = #tpu.dot_dimension_numbers<[1], [0], [0], [1], [0, 0, 1, 1], [], []>} : vector<256x128xbf16>, vector<128x128xbf16>, vector<256x128xf32> -> vector<256x128xf32>
    %33 = arith.addf %28, %32 : vector<256x128xf32>
    %c1_37 = arith.constant 1 : index
    %c0_38 = arith.constant 0 : index
    %c0_39 = arith.constant 0 : index
    %34 = vector.load %arg8[%c1_37, %c0_38, %c0_39] : memref<18x18x128xbf16, #tpu.memory_space<vmem>>, vector<16x16x128xbf16>
    %35 = vector.shape_cast %34 : vector<16x16x128xbf16> to vector<256x128xbf16>
    %c384 = arith.constant 384 : index
    %c0_40 = arith.constant 0 : index
    %36 = vector.load %arg2[%c384, %c0_40] : memref<1152x128xbf16, #tpu.memory_space<vmem>>, vector<128x128xbf16>
    %cst_41 = arith.constant dense<0.000000e+00> : vector<256x128xf32>
    %37 = tpu.matmul %35, %36, %cst_41 {dimension_numbers = #tpu.dot_dimension_numbers<[1], [0], [0], [1], [0, 0, 1, 1], [], []>} : vector<256x128xbf16>, vector<128x128xbf16>, vector<256x128xf32> -> vector<256x128xf32>
    %38 = arith.addf %33, %37 : vector<256x128xf32>
    %c1_42 = arith.constant 1 : index
    %c1_43 = arith.constant 1 : index
    %c0_44 = arith.constant 0 : index
    %39 = vector.load %arg8[%c1_42, %c1_43, %c0_44] : memref<18x18x128xbf16, #tpu.memory_space<vmem>>, vector<16x16x128xbf16>
    %40 = vector.shape_cast %39 : vector<16x16x128xbf16> to vector<256x128xbf16>
    %c512 = arith.constant 512 : index
    %c0_45 = arith.constant 0 : index
    %41 = vector.load %arg2[%c512, %c0_45] : memref<1152x128xbf16, #tpu.memory_space<vmem>>, vector<128x128xbf16>
    %cst_46 = arith.constant dense<0.000000e+00> : vector<256x128xf32>
    %42 = tpu.matmul %40, %41, %cst_46 {dimension_numbers = #tpu.dot_dimension_numbers<[1], [0], [0], [1], [0, 0, 1, 1], [], []>} : vector<256x128xbf16>, vector<128x128xbf16>, vector<256x128xf32> -> vector<256x128xf32>
    %43 = arith.addf %38, %42 : vector<256x128xf32>
    %c1_47 = arith.constant 1 : index
    %c2_48 = arith.constant 2 : index
    %c0_49 = arith.constant 0 : index
    %44 = vector.load %arg8[%c1_47, %c2_48, %c0_49] : memref<18x18x128xbf16, #tpu.memory_space<vmem>>, vector<16x16x128xbf16>
    %45 = vector.shape_cast %44 : vector<16x16x128xbf16> to vector<256x128xbf16>
    %c640 = arith.constant 640 : index
    %c0_50 = arith.constant 0 : index
    %46 = vector.load %arg2[%c640, %c0_50] : memref<1152x128xbf16, #tpu.memory_space<vmem>>, vector<128x128xbf16>
    %cst_51 = arith.constant dense<0.000000e+00> : vector<256x128xf32>
    %47 = tpu.matmul %45, %46, %cst_51 {dimension_numbers = #tpu.dot_dimension_numbers<[1], [0], [0], [1], [0, 0, 1, 1], [], []>} : vector<256x128xbf16>, vector<128x128xbf16>, vector<256x128xf32> -> vector<256x128xf32>
    %48 = arith.addf %43, %47 : vector<256x128xf32>
    %c2_52 = arith.constant 2 : index
    %c0_53 = arith.constant 0 : index
    %c0_54 = arith.constant 0 : index
    %49 = vector.load %arg8[%c2_52, %c0_53, %c0_54] : memref<18x18x128xbf16, #tpu.memory_space<vmem>>, vector<16x16x128xbf16>
    %50 = vector.shape_cast %49 : vector<16x16x128xbf16> to vector<256x128xbf16>
    %c768 = arith.constant 768 : index
    %c0_55 = arith.constant 0 : index
    %51 = vector.load %arg2[%c768, %c0_55] : memref<1152x128xbf16, #tpu.memory_space<vmem>>, vector<128x128xbf16>
    %cst_56 = arith.constant dense<0.000000e+00> : vector<256x128xf32>
    %52 = tpu.matmul %50, %51, %cst_56 {dimension_numbers = #tpu.dot_dimension_numbers<[1], [0], [0], [1], [0, 0, 1, 1], [], []>} : vector<256x128xbf16>, vector<128x128xbf16>, vector<256x128xf32> -> vector<256x128xf32>
    %53 = arith.addf %48, %52 : vector<256x128xf32>
    %c2_57 = arith.constant 2 : index
    %c1_58 = arith.constant 1 : index
    %c0_59 = arith.constant 0 : index
    %54 = vector.load %arg8[%c2_57, %c1_58, %c0_59] : memref<18x18x128xbf16, #tpu.memory_space<vmem>>, vector<16x16x128xbf16>
    %55 = vector.shape_cast %54 : vector<16x16x128xbf16> to vector<256x128xbf16>
    %c896 = arith.constant 896 : index
    %c0_60 = arith.constant 0 : index
    %56 = vector.load %arg2[%c896, %c0_60] : memref<1152x128xbf16, #tpu.memory_space<vmem>>, vector<128x128xbf16>
    %cst_61 = arith.constant dense<0.000000e+00> : vector<256x128xf32>
    %57 = tpu.matmul %55, %56, %cst_61 {dimension_numbers = #tpu.dot_dimension_numbers<[1], [0], [0], [1], [0, 0, 1, 1], [], []>} : vector<256x128xbf16>, vector<128x128xbf16>, vector<256x128xf32> -> vector<256x128xf32>
    %58 = arith.addf %53, %57 : vector<256x128xf32>
    %c2_62 = arith.constant 2 : index
    %c2_63 = arith.constant 2 : index
    %c0_64 = arith.constant 0 : index
    %59 = vector.load %arg8[%c2_62, %c2_63, %c0_64] : memref<18x18x128xbf16, #tpu.memory_space<vmem>>, vector<16x16x128xbf16>
    %60 = vector.shape_cast %59 : vector<16x16x128xbf16> to vector<256x128xbf16>
    %c1024 = arith.constant 1024 : index
    %c0_65 = arith.constant 0 : index
    %61 = vector.load %arg2[%c1024, %c0_65] : memref<1152x128xbf16, #tpu.memory_space<vmem>>, vector<128x128xbf16>
    %cst_66 = arith.constant dense<0.000000e+00> : vector<256x128xf32>
    %62 = tpu.matmul %60, %61, %cst_66 {dimension_numbers = #tpu.dot_dimension_numbers<[1], [0], [0], [1], [0, 0, 1, 1], [], []>} : vector<256x128xbf16>, vector<128x128xbf16>, vector<256x128xf32> -> vector<256x128xf32>
    %63 = arith.addf %58, %62 : vector<256x128xf32>
    %64 = arith.truncf %63 : vector<256x128xf32> to vector<256x128xbf16>
    %c0_67 = arith.constant 0 : index
    %c0_68 = arith.constant 0 : index
    %c0_69 = arith.constant 0 : index
    %65 = vector.load %arg5[%c0_67, %c0_68, %c0_69] : memref<1x256x128xbf16, #tpu.memory_space<vmem>>, vector<1x256x128xbf16>
    %66 = vector.shape_cast %65 : vector<1x256x128xbf16> to vector<256x128xbf16>
    %67 = vector.shape_cast %64 : vector<256x128xbf16> to vector<1x256x128xbf16>
    tpu.vector_store %arg5[%c0_67, %c0_68, %c0_69], %67 {strides = array<i32>} : memref<1x256x128xbf16, #tpu.memory_space<vmem>>, vector<1x256x128xbf16>,
    %cst_70 = arith.constant dense<0.000000e+00> : vector<128xf32>
    %68 = vector.multi_reduction <add>, %63, %cst_70 [0] : vector<256x128xf32> to vector<128xf32>
    %69 = vector.shape_cast %68 : vector<128xf32> to vector<1x128xf32>
    %c0_71 = arith.constant 0 : index
    %c0_72 = arith.constant 0 : index
    %c0_73 = arith.constant 0 : index
    %70 = vector.load %arg6[%c0_71, %c0_72, %c0_73] : memref<1x1x128xf32, #tpu.memory_space<vmem>>, vector<1x1x128xf32>
    %71 = vector.shape_cast %70 : vector<1x1x128xf32> to vector<1x128xf32>
    %72 = vector.shape_cast %69 : vector<1x128xf32> to vector<1x1x128xf32>
    tpu.vector_store %arg6[%c0_71, %c0_72, %c0_73], %72 {strides = array<i32>} : memref<1x1x128xf32, #tpu.memory_space<vmem>>, vector<1x1x128xf32>,
    %cst_74 = arith.constant dense<0.000000e+00> : vector<128x128xf32>
    %73 = tpu.matmul %63, %63, %cst_74 {dimension_numbers = #tpu.dot_dimension_numbers<[0], [0], [1], [1], [0, 1, 1, 1], [], []>} : vector<256x128xf32>, vector<256x128xf32>, vector<128x128xf32> -> vector<128x128xf32>
    %c0_75 = arith.constant 0 : index
    %c0_76 = arith.constant 0 : index
    %c0_77 = arith.constant 0 : index
    %74 = vector.load %arg7[%c0_75, %c0_76, %c0_77] : memref<1x128x128xf32, #tpu.memory_space<vmem>>, vector<1x128x128xf32>
    %75 = vector.shape_cast %74 : vector<1x128x128xf32> to vector<128x128xf32>
    %76 = vector.shape_cast %73 : vector<128x128xf32> to vector<1x128x128xf32>
    tpu.vector_store %arg7[%c0_75, %c0_76, %c0_77], %76 {strides = array<i32>} : memref<1x128x128xf32, #tpu.memory_space<vmem>>, vector<1x128x128xf32>,
    return
  }
  func.func @transform_0(%arg0: i32) -> (i32, i32, i32) {
    %c0_i32 = arith.constant 0 : i32
    %c0_i32_0 = arith.constant 0 : i32
    %c0_i32_1 = arith.constant 0 : i32
    return %arg0, %c0_i32, %c0_i32_0 : i32, i32, i32
  }
  func.func @transform_1(%arg0: i32) -> (i32, i32) {
    %c0_i32 = arith.constant 0 : i32
    %c0_i32_0 = arith.constant 0 : i32
    %c0_i32_1 = arith.constant 0 : i32
    return %c0_i32, %c0_i32_0 : i32, i32
  }
  func.func @transform_2(%arg0: i32) -> (i32, i32) {
    %c0_i32 = arith.constant 0 : i32
    %c0_i32_0 = arith.constant 0 : i32
    %c0_i32_1 = arith.constant 0 : i32
    return %c0_i32, %c0_i32_0 : i32, i32
  }
  func.func @transform_3(%arg0: i32) -> (i32, i32) {
    %c0_i32 = arith.constant 0 : i32
    %c0_i32_0 = arith.constant 0 : i32
    %c0_i32_1 = arith.constant 0 : i32
    return %c0_i32, %c0_i32_0 : i32, i32
  }
  func.func @transform_4(%arg0: i32) -> (i32, i32, i32) {
    %c0_i32 = arith.constant 0 : i32
    %c0_i32_0 = arith.constant 0 : i32
    %c0_i32_1 = arith.constant 0 : i32
    return %arg0, %c0_i32, %c0_i32_0 : i32, i32, i32
  }
  func.func @transform_5(%arg0: i32) -> (i32, i32, i32) {
    %c0_i32 = arith.constant 0 : i32
    %c0_i32_0 = arith.constant 0 : i32
    %c0_i32_1 = arith.constant 0 : i32
    return %arg0, %c0_i32, %c0_i32_0 : i32, i32, i32
  }
  func.func @transform_6(%arg0: i32) -> (i32, i32, i32) {
    %c0_i32 = arith.constant 0 : i32
    %c0_i32_0 = arith.constant 0 : i32
    %c0_i32_1 = arith.constant 0 : i32
    return %arg0, %c0_i32, %c0_i32_0 : i32, i32, i32
  }
}

module attributes {stable_mosaic.version = 11 : i64} {
  func.func @_finalize_kernel(%arg0: i32, %arg1: memref<1x256x128xbf16, #tpu.memory_space<vmem>>, %arg2: memref<1x256x512xf32, #tpu.memory_space<vmem>>, %arg3: memref<128x512xbf16, #tpu.memory_space<vmem>>, %arg4: memref<1x512xf32, #tpu.memory_space<vmem>>, %arg5: memref<1x512xf32, #tpu.memory_space<vmem>>, %arg6: memref<1x256x512xf32, #tpu.memory_space<vmem>>) attributes {dimension_semantics = [#tpu.dimension_semantics<parallel>], iteration_bounds = array<i64: 2>, scalar_prefetch = 0 : i64, scratch_operands = 0 : i64, tpu.core_type = #tpu.core_type<tc>, window_params = [{transform_indices = @transform_0, window_bounds = array<i64: 1, 256, 128>}, {transform_indices = @transform_1, window_bounds = array<i64: 1, 256, 512>}, {pipeline_mode = #tpu.pipeline_mode<synchronous>, transform_indices = @transform_2, window_bounds = array<i64: 128, 512>}, {pipeline_mode = #tpu.pipeline_mode<synchronous>, transform_indices = @transform_3, window_bounds = array<i64: 1, 512>}, {pipeline_mode = #tpu.pipeline_mode<synchronous>, transform_indices = @transform_4, window_bounds = array<i64: 1, 512>}, {transform_indices = @transform_5, window_bounds = array<i64: 1, 256, 512>}]} {
    %c0 = arith.constant 0 : index
    %c0_0 = arith.constant 0 : index
    %c0_1 = arith.constant 0 : index
    %0 = vector.load %arg1[%c0, %c0_0, %c0_1] : memref<1x256x128xbf16, #tpu.memory_space<vmem>>, vector<1x256x128xbf16>
    %1 = vector.shape_cast %0 : vector<1x256x128xbf16> to vector<256x128xbf16>
    %c0_2 = arith.constant 0 : index
    %c0_3 = arith.constant 0 : index
    %2 = vector.load %arg3[%c0_2, %c0_3] : memref<128x512xbf16, #tpu.memory_space<vmem>>, vector<128x512xbf16>
    %cst = arith.constant dense<0.000000e+00> : vector<256x512xf32>
    %3 = tpu.matmul %1, %2, %cst {dimension_numbers = #tpu.dot_dimension_numbers<[1], [0], [0], [1], [0, 0, 1, 1], [], []>} : vector<256x128xbf16>, vector<128x512xbf16>, vector<256x512xf32> -> vector<256x512xf32>
    %c0_4 = arith.constant 0 : index
    %c0_5 = arith.constant 0 : index
    %4 = vector.load %arg4[%c0_4, %c0_5] : memref<1x512xf32, #tpu.memory_space<vmem>>, vector<1x512xf32>
    %5 = vector.broadcast %4 : vector<1x512xf32> to vector<256x512xf32>
    %6 = arith.mulf %3, %5 : vector<256x512xf32>
    %c0_6 = arith.constant 0 : index
    %c0_7 = arith.constant 0 : index
    %7 = vector.load %arg5[%c0_6, %c0_7] : memref<1x512xf32, #tpu.memory_space<vmem>>, vector<1x512xf32>
    %8 = vector.broadcast %7 : vector<1x512xf32> to vector<256x512xf32>
    %9 = arith.addf %6, %8 : vector<256x512xf32>
    %c0_8 = arith.constant 0 : index
    %c0_9 = arith.constant 0 : index
    %c0_10 = arith.constant 0 : index
    %10 = vector.load %arg2[%c0_8, %c0_9, %c0_10] : memref<1x256x512xf32, #tpu.memory_space<vmem>>, vector<1x256x512xf32>
    %11 = vector.shape_cast %10 : vector<1x256x512xf32> to vector<256x512xf32>
    %12 = arith.addf %9, %11 : vector<256x512xf32>
    %cst_11 = arith.constant 0.000000e+00 : f32
    %13 = vector.broadcast %cst_11 : f32 to vector<256x512xf32>
    %14 = arith.maximumf %12, %13 : vector<256x512xf32>
    %c0_12 = arith.constant 0 : index
    %c0_13 = arith.constant 0 : index
    %c0_14 = arith.constant 0 : index
    %15 = vector.load %arg6[%c0_12, %c0_13, %c0_14] : memref<1x256x512xf32, #tpu.memory_space<vmem>>, vector<1x256x512xf32>
    %16 = vector.shape_cast %15 : vector<1x256x512xf32> to vector<256x512xf32>
    %17 = vector.shape_cast %14 : vector<256x512xf32> to vector<1x256x512xf32>
    tpu.vector_store %arg6[%c0_12, %c0_13, %c0_14], %17 {strides = array<i32>} : memref<1x256x512xf32, #tpu.memory_space<vmem>>, vector<1x256x512xf32>,
    return
  }
  func.func @transform_0(%arg0: i32) -> (i32, i32, i32) {
    %c0_i32 = arith.constant 0 : i32
    %c0_i32_0 = arith.constant 0 : i32
    %c0_i32_1 = arith.constant 0 : i32
    return %arg0, %c0_i32, %c0_i32_0 : i32, i32, i32
  }
  func.func @transform_1(%arg0: i32) -> (i32, i32, i32) {
    %c0_i32 = arith.constant 0 : i32
    %c0_i32_0 = arith.constant 0 : i32
    %c0_i32_1 = arith.constant 0 : i32
    return %arg0, %c0_i32, %c0_i32_0 : i32, i32, i32
  }
  func.func @transform_2(%arg0: i32) -> (i32, i32) {
    %c0_i32 = arith.constant 0 : i32
    %c0_i32_0 = arith.constant 0 : i32
    %c0_i32_1 = arith.constant 0 : i32
    return %c0_i32, %c0_i32_0 : i32, i32
  }
  func.func @transform_3(%arg0: i32) -> (i32, i32) {
    %c0_i32 = arith.constant 0 : i32
    %c0_i32_0 = arith.constant 0 : i32
    %c0_i32_1 = arith.constant 0 : i32
    return %c0_i32, %c0_i32_0 : i32, i32
  }
  func.func @transform_4(%arg0: i32) -> (i32, i32) {
    %c0_i32 = arith.constant 0 : i32
    %c0_i32_0 = arith.constant 0 : i32
    %c0_i32_1 = arith.constant 0 : i32
    return %c0_i32, %c0_i32_0 : i32, i32
  }
  func.func @transform_5(%arg0: i32) -> (i32, i32, i32) {
    %c0_i32 = arith.constant 0 : i32
    %c0_i32_0 = arith.constant 0 : i32
    %c0_i32_1 = arith.constant 0 : i32
    return %arg0, %c0_i32, %c0_i32_0 : i32, i32, i32
  }
}

</mosaic_0001>

<bundles_post_ra>
// kernel: bottleneck_pallas.3
= control target key start
LH: loop header
LB: loop body
LE: loop exit
PB: predicated region body
PF: predicated region fallthrough
CT: control target
= control target key end

     0   :  { %s2212_s15 = smov 0   ;;  %s2557_s0 = inlined_call_operand.vmem [shape: bf16[2,256,512], index: 0, kind: input, shape index: {}]   ;;  %s2558_s1 = inlined_call_operand.vmem [shape: bf16[512,128], index: 1, kind: input, shape index: {}]   ;;  %s2559_s2 = inlined_call_operand.vmem [shape: bf16[2,256,128], index: 2, kind: output, shape index: {0}]   ;;  %s2560_s3 = inlined_call_operand.vmem [shape: f32[2,1,128], index: 3, kind: output, shape index: {1}]   ;;  %s2561_s4 = inlined_call_operand.vmem [shape: f32[2,1,128], index: 4, kind: output, shape index: {2}]  }
   0x1 LB: > { %s1551_s16 = sadd.s32 4294967295, %s2185_s15   ;;  %p1555_p0 = scmp.ge.s32.totalorder %s2185_s15, 1  ;;  %s2185_s15 = sphi %s2212_s15, %s15_s15  }
   0x2   : > { %p167_p1 = scmp.lt.s32.totalorder %s2185_s15, 3 }
   0x4   : > { %p168_p2 = pnand %p1555_p0, %p167_p1 }
   0x5   : > { %p199_p3 = scmp.lt.s32.totalorder (!%p168_p2), %s1551_s16, 1 }
   0x6   : > { %171 = sbr.rel (%p168_p2) target bundleno = 386 (0x182), region = 28 }
   0xb   : > { %v2051_v0 = vld [vmem:[%s2558_s1 + $0x78] sm:$0xff]   ;;  %v2055_v4 = vld [vmem:[%s2558_s1 + $0x70] sm:$0xff]   ;;  %v2059_v8 = vld [vmem:[%s2558_s1 + $0x68] sm:$0xff]   ;;  %s2563_s16 = smov (!%p199_p3, %s1551_s16), 1 }
   0xc   : > { %v2052_v1 = vld [vmem:[%s2558_s1 + $0xf8] sm:$0xff]   ;;  %1819 = vmatprep.subr.bf16.mxu0 %v2051_v0  ;;  %v2056_v5 = vld [vmem:[%s2558_s1 + $0xf0] sm:$0xff]   ;;  %v2060_v9 = vld [vmem:[%s2558_s1 + $0xe8] sm:$0xff]   ;;  %s1690_s23 = sshll.u32 %s2563_s16, 9  ;;  %s1691_s11 = sshll.u32 %s2563_s16, 7 }
   0xd   : > { %v2053_v2 = vld [vmem:[%s2558_s1 + $0x38] sm:$0xff]   ;;  %1931 = vmatprep.subr.bf16.mxu1 %v2052_v1  ;;  %v2057_v6 = vld [vmem:[%s2558_s1 + $0x30] sm:$0xff]   ;;  %v2061_v10 = vld [vmem:[%s2558_s1 + $0x28] sm:$0xff]   ;;  %s2320_s6 = scalar_lea.vmem %s2557_s0, %s1690_s23  ;;  %s2400_s14 = scalar_lea.vmem %s2559_s2, %s1691_s11 }
   0xe   : > { %v2054_v3 = vld [vmem:[%s2558_s1 + $0xb8] sm:$0xff]   ;;  %1820 = vmatpush3.bf16.msra.mxu0 %v2053_v2  ;;  %v2058_v7 = vld [vmem:[%s2558_s1 + $0xb0] sm:$0xff]   ;;  %v2062_v11 = vld [vmem:[%s2558_s1 + $0xa8] sm:$0xff]   ;;  %s211_s19 = scalar_lea.vmem %s2560_s3, %s2563_s16  ;;  %s214_s22 = scalar_lea.vmem %s2561_s4, %s2563_s16 }
   0xf   : > { %1932 = vmatpush3.bf16.msra.mxu1 %v2054_v3  ;;  %1821 = vmatprep.subr.bf16.mxu0 %v2055_v4  ;;  %v2063_v12 = vld [vmem:[%s2558_s1 + $0x60] sm:$0xff]   ;;  %v2067_v16 = vld [vmem:[%s2558_s1 + $0x58] sm:$0xff]   ;;  %v2071_v20 = vld [vmem:[%s2558_s1 + $0x50] sm:$0xff]  }
  0x10   : > { %1933 = vmatprep.subr.bf16.mxu1 %v2056_v5  ;;  %v2064_v13 = vld [vmem:[%s2558_s1 + $0xe0] sm:$0xff]   ;;  %v2068_v17 = vld [vmem:[%s2558_s1 + $0xd8] sm:$0xff]   ;;  %v2072_v21 = vld [vmem:[%s2558_s1 + $0xd0] sm:$0xff]  }
  0x11   : > { %v2065_v14 = vld [vmem:[%s2558_s1 + $0x20] sm:$0xff]   ;;  %v2069_v18 = vld [vmem:[%s2558_s1 + $0x18] sm:$0xff]   ;;  %v2073_v22 = vld [vmem:[%s2558_s1 + $0x10] sm:$0xff]  }
  0x12   : > { %1822 = vmatpush3.bf16.msra.mxu0 %v2057_v6  ;;  %v2066_v15 = vld [vmem:[%s2558_s1 + $0xa0] sm:$0xff]   ;;  %v2070_v19 = vld [vmem:[%s2558_s1 + $0x98] sm:$0xff]   ;;  %v2074_v23 = vld [vmem:[%s2558_s1 + $0x90] sm:$0xff]  }
  0x13   : > { %1934 = vmatpush3.bf16.msra.mxu1 %v2058_v7  ;;  %1823 = vmatprep.subr.bf16.mxu0 %v2059_v8  ;;  %v2075_v24 = vld [vmem:[%s2558_s1 + $0x48] sm:$0xff]   ;;  %v2079_v28 = vld [vmem:[%s2558_s1 + $0x40] sm:$0xff]  }
  0x14   : > { %1935 = vmatprep.subr.bf16.mxu1 %v2060_v9  ;;  %v2076_v25 = vld [vmem:[%s2558_s1 + $0xc8] sm:$0xff]   ;;  %v2080_v29 = vld [vmem:[%s2558_s1 + $0xc0] sm:$0xff]  }
  0x15   : > { %v2077_v26 = vld [vmem:[%s2558_s1 + $0x8] sm:$0xff]   ;;  %v2081_v30 = vld [vmem:[%s2558_s1] sm:$0xff]  }
  0x16   : > { %1824 = vmatpush3.bf16.msra.mxu0 %v2061_v10  ;;  %v2078_v27 = vld [vmem:[%s2558_s1 + $0x88] sm:$0xff]   ;;  %v2082_v31 = vld [vmem:[%s2558_s1 + $0x80] sm:$0xff]  }
  0x17   : > { %1936 = vmatpush3.bf16.msra.mxu1 %v2062_v11  ;;  %1825 = vmatprep.subr.bf16.mxu0 %v2063_v12  ;;  %v2083_v32 = vld [vmem:[%s2320_s6] ss:$16 sps:$4 sm:$0xff]   ;;  %v2085_v33 = vld [vmem:[%s2320_s6 + $0x4] ss:$16 sps:$4 sm:$0xff]   ;;  %v2086_v34 = vld [vmem:[%s2320_s6 + $0x8] ss:$16 sps:$4 sm:$0xff]  }
  0x18   : > { %1937 = vmatprep.subr.bf16.mxu1 %v2064_v13  ;;  %v2088_v35 = vld [vmem:[%s2320_s6 + $0xc] ss:$16 sps:$4 sm:$0xff]   ;;  %888 = vmatprep.mubr.bf16.mxu0 %v2085_v33  ;;  %v2089_v36 = vld [vmem:[%s2320_s6 + $0x24] ss:$16 sps:$4 sm:$0xff]   ;;  %v2093_v38 = vld [vmem:[%s2320_s6 + $0x20] ss:$16 sps:$4 sm:$0xff]  }
  0x19   : > { %1049 = vmatprep.mubr.bf16.mxu1 %v2088_v35  ;;  %v2091_v37 = vld [vmem:[%s2320_s6 + $0x2c] ss:$16 sps:$4 sm:$0xff]   ;;  %v2094_v39 = vld [vmem:[%s2320_s6 + $0x28] ss:$16 sps:$4 sm:$0xff]   ;;  %v2095_v40 = vld [vmem:[%s2320_s6 + $0x44] ss:$16 sps:$4 sm:$0xff]  }
  0x1a   : > { %1826 = vmatpush3.bf16.msra.mxu0 %v2065_v14  ;;  %v2097_v41 = vld [vmem:[%s2320_s6 + $0x4c] ss:$16 sps:$4 sm:$0xff]   ;;  %v2099_v42 = vld [vmem:[%s2320_s6 + $0x40] ss:$16 sps:$4 sm:$0xff]   ;;  %v2100_v43 = vld [vmem:[%s2320_s6 + $0x48] ss:$16 sps:$4 sm:$0xff]  }
  0x1b   : > { %1938 = vmatpush3.bf16.msra.mxu1 %v2066_v15  ;;  %1827 = vmatprep.subr.bf16.mxu0 %v2067_v16  ;;  %v2101_v44 = vld [vmem:[%s2320_s6 + $0x64] ss:$16 sps:$4 sm:$0xff]   ;;  %v2103_v45 = vld [vmem:[%s2320_s6 + $0x6c] ss:$16 sps:$4 sm:$0xff]   ;;  %v2105_v46 = vld [vmem:[%s2320_s6 + $0x60] ss:$16 sps:$4 sm:$0xff]  }
  0x1c   : > { %1939 = vmatprep.subr.bf16.mxu1 %v2068_v17  ;;  %v2106_v47 = vld [vmem:[%s2320_s6 + $0x68] ss:$16 sps:$4 sm:$0xff]   ;;  %v2107_v48 = vld [vmem:[%s2320_s6 + $0x84] ss:$16 sps:$4 sm:$0xff]   ;;  %v2109_v49 = vld [vmem:[%s2320_s6 + $0x8c] ss:$16 sps:$4 sm:$0xff]  }
  0x1d   : > { %v2111_v50 = vld [vmem:[%s2320_s6 + $0x80] ss:$16 sps:$4 sm:$0xff]   ;;  %v2112_v51 = vld [vmem:[%s2320_s6 + $0x88] ss:$16 sps:$4 sm:$0xff]   ;;  %v2113_v52 = vld [vmem:[%s2320_s6 + $0xa4] ss:$16 sps:$4 sm:$0xff]  }
  0x1e   : > { %1828 = vmatpush3.bf16.msra.mxu0 %v2069_v18  ;;  %v2115_v53 = vld [vmem:[%s2320_s6 + $0xac] ss:$16 sps:$4 sm:$0xff]   ;;  %v2117_v54 = vld [vmem:[%s2320_s6 + $0xa0] ss:$16 sps:$4 sm:$0xff]   ;;  %v2118_v55 = vld [vmem:[%s2320_s6 + $0xa8] ss:$16 sps:$4 sm:$0xff]  }
  0x1f   : > { %1940 = vmatpush3.bf16.msra.mxu1 %v2070_v19  ;;  %1829 = vmatprep.subr.bf16.mxu0 %v2071_v20  ;;  %v2119_v56 = vld [vmem:[%s2320_s6 + $0xc4] ss:$16 sps:$4 sm:$0xff]   ;;  %v2121_v57 = vld [vmem:[%s2320_s6 + $0xcc] ss:$16 sps:$4 sm:$0xff]   ;;  %v2123_v58 = vld [vmem:[%s2320_s6 + $0xc0] ss:$16 sps:$4 sm:$0xff]  }
  0x20   : > { %1941 = vmatprep.subr.bf16.mxu1 %v2072_v21  ;;  %v2124_v59 = vld [vmem:[%s2320_s6 + $0xc8] ss:$16 sps:$4 sm:$0xff]   ;;  %v2125_v60 = vld [vmem:[%s2320_s6 + $0xe4] ss:$16 sps:$4 sm:$0xff]   ;;  %v2127_v61 = vld [vmem:[%s2320_s6 + $0xec] ss:$16 sps:$4 sm:$0xff]  }
  0x21   : > { %v2129_v62 = vld [vmem:[%s2320_s6 + $0xe0] ss:$16 sps:$4 sm:$0xff]   ;;  %v2130_v63 = vld [vmem:[%s2320_s6 + $0xe8] ss:$16 sps:$4 sm:$0xff]   ;;  %v2131_v0 = vld [vmem:[%s2320_s6 + $0x104] ss:$16 sps:$4 sm:$0xff]  }
  0x22   : > { %1830 = vmatpush3.bf16.msra.mxu0 %v2073_v22  ;;  %v2133_v1 = vld [vmem:[%s2320_s6 + $0x10c] ss:$16 sps:$4 sm:$0xff]   ;;  %v2135_v2 = vld [vmem:[%s2320_s6 + $0x100] ss:$16 sps:$4 sm:$0xff]   ;;  %v2136_v3 = vld [vmem:[%s2320_s6 + $0x108] ss:$16 sps:$4 sm:$0xff]  }
  0x23   : > { %1942 = vmatpush3.bf16.msra.mxu1 %v2074_v23  ;;  %1831 = vmatprep.subr.bf16.mxu0 %v2075_v24  ;;  %v2137_v4 = vld [vmem:[%s2320_s6 + $0x124] ss:$16 sps:$4 sm:$0xff]   ;;  %v2139_v5 = vld [vmem:[%s2320_s6 + $0x12c] ss:$16 sps:$4 sm:$0xff]   ;;  %v2141_v6 = vld [vmem:[%s2320_s6 + $0x120] ss:$16 sps:$4 sm:$0xff]  }
  0x24   : > { %1943 = vmatprep.subr.bf16.mxu1 %v2076_v25  ;;  %v2142_v7 = vld [vmem:[%s2320_s6 + $0x128] ss:$16 sps:$4 sm:$0xff]   ;;  %v2143_v8 = vld [vmem:[%s2320_s6 + $0x144] ss:$16 sps:$4 sm:$0xff]   ;;  %v2145_v9 = vld [vmem:[%s2320_s6 + $0x14c] ss:$16 sps:$4 sm:$0xff]  }
  0x25   : > { %v2147_v10 = vld [vmem:[%s2320_s6 + $0x140] ss:$16 sps:$4 sm:$0xff]   ;;  %v2148_v11 = vld [vmem:[%s2320_s6 + $0x148] ss:$16 sps:$4 sm:$0xff]   ;;  %v2149_v12 = vld [vmem:[%s2320_s6 + $0x164] ss:$16 sps:$4 sm:$0xff]  }
  0x26   : > { %1832 = vmatpush3.bf16.msra.mxu0 %v2077_v26  ;;  %v2151_v13 = vld [vmem:[%s2320_s6 + $0x16c] ss:$16 sps:$4 sm:$0xff]   ;;  %v2153_v14 = vld [vmem:[%s2320_s6 + $0x160] ss:$16 sps:$4 sm:$0xff]   ;;  %v2154_v15 = vld [vmem:[%s2320_s6 + $0x168] ss:$16 sps:$4 sm:$0xff]  }
  0x27   : > { %1944 = vmatpush3.bf16.msra.mxu1 %v2078_v27  ;;  %1833 = vmatprep.subr.bf16.mxu0 %v2079_v28  ;;  %v2155_v16 = vld [vmem:[%s2320_s6 + $0x184] ss:$16 sps:$4 sm:$0xff]   ;;  %v2157_v17 = vld [vmem:[%s2320_s6 + $0x18c] ss:$16 sps:$4 sm:$0xff]   ;;  %v2159_v18 = vld [vmem:[%s2320_s6 + $0x180] ss:$16 sps:$4 sm:$0xff]  }
  0x28   : > { %1945 = vmatprep.subr.bf16.mxu1 %v2080_v29  ;;  %v2160_v19 = vld [vmem:[%s2320_s6 + $0x188] ss:$16 sps:$4 sm:$0xff]   ;;  %v2161_v20 = vld [vmem:[%s2320_s6 + $0x1a4] ss:$16 sps:$4 sm:$0xff]   ;;  %v2163_v21 = vld [vmem:[%s2320_s6 + $0x1ac] ss:$16 sps:$4 sm:$0xff]  }
  0x29   : > { %v2165_v22 = vld [vmem:[%s2320_s6 + $0x1a0] ss:$16 sps:$4 sm:$0xff]   ;;  %v2166_v23 = vld [vmem:[%s2320_s6 + $0x1a8] ss:$16 sps:$4 sm:$0xff]   ;;  %v2167_v24 = vld [vmem:[%s2320_s6 + $0x1c4] ss:$16 sps:$4 sm:$0xff]  }
  0x2a   : > { %1834 = vmatpush3.bf16.msra.mxu0 %v2081_v30  ;;  %v2169_v25 = vld [vmem:[%s2320_s6 + $0x1cc] ss:$16 sps:$4 sm:$0xff]   ;;  %v2171_v26 = vld [vmem:[%s2320_s6 + $0x1c0] ss:$16 sps:$4 sm:$0xff]   ;;  %v2172_v27 = vld [vmem:[%s2320_s6 + $0x1c8] ss:$16 sps:$4 sm:$0xff]  }
  0x2b   : > { %1946 = vmatpush3.bf16.msra.mxu1 %v2082_v31  ;;  %v2173_v28 = vld [vmem:[%s2320_s6 + $0x1e4] ss:$16 sps:$4 sm:$0xff]   ;;  %v2175_v29 = vld [vmem:[%s2320_s6 + $0x1ec] ss:$16 sps:$4 sm:$0xff]   ;;  %v2177_v30 = vld [vmem:[%s2320_s6 + $0x1e0] ss:$16 sps:$4 sm:$0xff]  }
  0x2c   : > { %v2178_v31 = vld [vmem:[%s2320_s6 + $0x1e8] ss:$16 sps:$4 sm:$0xff]  }
  0x2d   : > { %889 = vmatmul.mubr.bf16.vlgmr.msra.gmra.mxu0 %v2083_v32 }
  0x2e   : > { %1050 = vmatmul.mubr.bf16.vlgmr.msra.gmra.mxu1 %v2086_v34  ;;  %896 = vmatprep.mubr.bf16.mxu0 %v2089_v36 }
  0x2f   : > { %1057 = vmatprep.mubr.bf16.mxu1 %v2091_v37 }
  0x35   : > { %897 = vmatmul.mubr.bf16.gmra.mxu0 %v2093_v38 }
  0x36   : > { %1058 = vmatmul.mubr.bf16.gmra.mxu1 %v2094_v39  ;;  %904 = vmatprep.mubr.bf16.mxu0 %v2095_v40 }
  0x37   : > { %1065 = vmatprep.mubr.bf16.mxu1 %v2097_v41 }
  0x3d   : > { %905 = vmatmul.mubr.bf16.gmra.mxu0 %v2099_v42 }
  0x3e   : > { %1066 = vmatmul.mubr.bf16.gmra.mxu1 %v2100_v43  ;;  %912 = vmatprep.mubr.bf16.mxu0 %v2101_v44 }
  0x3f   : > { %1073 = vmatprep.mubr.bf16.mxu1 %v2103_v45 }
  0x45   : > { %913 = vmatmul.mubr.bf16.gmra.mxu0 %v2105_v46 }
  0x46   : > { %1074 = vmatmul.mubr.bf16.gmra.mxu1 %v2106_v47  ;;  %920 = vmatprep.mubr.bf16.mxu0 %v2107_v48 }
  0x47   : > { %1081 = vmatprep.mubr.bf16.mxu1 %v2109_v49 }
  0x4d   : > { %921 = vmatmul.mubr.bf16.gmra.mxu0 %v2111_v50 }
  0x4e   : > { %1082 = vmatmul.mubr.bf16.gmra.mxu1 %v2112_v51  ;;  %928 = vmatprep.mubr.bf16.mxu0 %v2113_v52 }
  0x4f   : > { %1089 = vmatprep.mubr.bf16.mxu1 %v2115_v53 }
  0x55   : > { %929 = vmatmul.mubr.bf16.gmra.mxu0 %v2117_v54 }
  0x56   : > { %1090 = vmatmul.mubr.bf16.gmra.mxu1 %v2118_v55  ;;  %936 = vmatprep.mubr.bf16.mxu0 %v2119_v56 }
  0x57   : > { %1097 = vmatprep.mubr.bf16.mxu1 %v2121_v57 }
  0x5d   : > { %937 = vmatmul.mubr.bf16.gmra.mxu0 %v2123_v58 }
  0x5e   : > { %1098 = vmatmul.mubr.bf16.gmra.mxu1 %v2124_v59  ;;  %944 = vmatprep.mubr.bf16.mxu0 %v2125_v60 }
  0x5f   : > { %1105 = vmatprep.mubr.bf16.mxu1 %v2127_v61 }
  0x65   : > { %945 = vmatmul.mubr.bf16.gmra.mxu0 %v2129_v62 }
  0x66   : > { %1106 = vmatmul.mubr.bf16.gmra.mxu1 %v2130_v63  ;;  %952 = vmatprep.mubr.bf16.mxu0 %v2131_v0 }
  0x67   : > { %1113 = vmatprep.mubr.bf16.mxu1 %v2133_v1 }
  0x6d   : > { %953 = vmatmul.mubr.bf16.gmra.mxu0 %v2135_v2 }
  0x6e   : > { %1114 = vmatmul.mubr.bf16.gmra.mxu1 %v2136_v3  ;;  %960 = vmatprep.mubr.bf16.mxu0 %v2137_v4 }
  0x6f   : > { %1121 = vmatprep.mubr.bf16.mxu1 %v2139_v5 }
  0x75   : > { %961 = vmatmul.mubr.bf16.gmra.mxu0 %v2141_v6 }
  0x76   : > { %1122 = vmatmul.mubr.bf16.gmra.mxu1 %v2142_v7  ;;  %968 = vmatprep.mubr.bf16.mxu0 %v2143_v8 }
  0x77   : > { %1129 = vmatprep.mubr.bf16.mxu1 %v2145_v9 }
  0x7d   : > { %969 = vmatmul.mubr.bf16.gmra.mxu0 %v2147_v10 }
  0x7e   : > { %1130 = vmatmul.mubr.bf16.gmra.mxu1 %v2148_v11  ;;  %976 = vmatprep.mubr.bf16.mxu0 %v2149_v12 }
  0x7f   : > { %1137 = vmatprep.mubr.bf16.mxu1 %v2151_v13 }
  0x85   : > { %977 = vmatmul.mubr.bf16.gmra.mxu0 %v2153_v14 }
  0x86   : > { %1138 = vmatmul.mubr.bf16.gmra.mxu1 %v2154_v15  ;;  %984 = vmatprep.mubr.bf16.mxu0 %v2155_v16 }
  0x87   : > { %1145 = vmatprep.mubr.bf16.mxu1 %v2157_v17 }
  0x8d   : > { %985 = vmatmul.mubr.bf16.gmra.mxu0 %v2159_v18 }
  0x8e   : > { %1146 = vmatmul.mubr.bf16.gmra.mxu1 %v2160_v19  ;;  %992 = vmatprep.mubr.bf16.mxu0 %v2161_v20 }
  0x8f   : > { %1153 = vmatprep.mubr.bf16.mxu1 %v2163_v21 }
  0x95   : > { %993 = vmatmul.mubr.bf16.gmra.mxu0 %v2165_v22 }
  0x96   : > { %1154 = vmatmul.mubr.bf16.gmra.mxu1 %v2166_v23  ;;  %1000 = vmatprep.mubr.bf16.mxu0 %v2167_v24 }
  0x97   : > { %1161 = vmatprep.mubr.bf16.mxu1 %v2169_v25 }
  0x9d   : > { %1001 = vmatmul.mubr.bf16.gmra.mxu0 %v2171_v26 }
  0x9e   : > { %1162 = vmatmul.mubr.bf16.gmra.mxu1 %v2172_v27  ;;  %1008 = vmatprep.mubr.bf16.mxu0 %v2173_v28 }
  0x9f   : > { %1169 = vmatprep.mubr.bf16.mxu1 %v2175_v29 }
  0xa5   : > { %1009 = vmatmul.mubr.bf16.gmra.mxu0 %v2177_v30 }
  0xa6   : > { %1170 = vmatmul.mubr.bf16.gmra.mxu1 %v2178_v31 }
  0xed   : > { %v1835_v32 = vpop.f32.mrf.mxu0 }
  0xee   : > { %v1947_v33 = vpop.f32.mrf.mxu1 }
  0xef   : > { %v1836_v34 = vpop.f32.mrf.mxu0 }
  0xf0   : > { %v1948_v35 = vpop.f32.mrf.mxu1  ;;  %v1837_v38 = vadd.f32 %v1836_v34, %v1835_v32 }
  0xf1   : > { %v1838_v36 = vpop.f32.mrf.mxu0  ;;  %v1949_v39 = vadd.f32 %v1948_v35, %v1947_v33 }
  0xf2   : > { %v1950_v37 = vpop.f32.mrf.mxu1 }
  0xf3   : > { %v1839_v40 = vpop.f32.mrf.mxu0  ;;  %v2393_v46 = vadd.f32 %v1949_v39, %v1837_v38 }
  0xf4   : > { %v1840_v41 = vadd.f32 %v1839_v40, %v1838_v36  ;;  %v1951_v42 = vpop.f32.mrf.mxu1 }
  0xf5   : > { %v1952_v43 = vadd.f32 %v1951_v42, %v1950_v37  ;;  %v1841_v44 = vpop.f32.mrf.mxu0 }
  0xf6   : > { %v1953_v45 = vpop.f32.mrf.mxu1 }
  0xf7   : > { %v2395_v47 = vadd.f32 %v1952_v43, %v1840_v41  ;;  %v1842_v48 = vpop.f32.mrf.mxu0 }
  0xf8   : > { %v1954_v49 = vpop.f32.mrf.mxu1  ;;  %v1843_v53 = vadd.f32 %v1842_v48, %v1841_v44 }
  0xf9   : > { %v1727_v50 = vpack.c.bf16 %v2395_v47, %v2393_v46  ;;  %v1844_v51 = vpop.f32.mrf.mxu0  ;;  %v1955_v54 = vadd.f32 %v1954_v49, %v1953_v45 }
  0xfa   : > { %v1956_v52 = vpop.f32.mrf.mxu1 }
  0xfb   : > { %1728 = vst [vmem:[%s2400_s14] sm:$0xff] %v1727_v50   ;;  %v1845_v55 = vpop.f32.mrf.mxu0  ;;  %v2405_v61 = vadd.f32 %v1955_v54, %v1843_v53 }
  0xfc   : > { %v1846_v56 = vadd.f32 %v1845_v55, %v1844_v51  ;;  %v1957_v57 = vpop.f32.mrf.mxu1 }
  0xfd   : > { %v1958_v58 = vadd.f32 %v1957_v57, %v1956_v52  ;;  %v1847_v59 = vpop.f32.mrf.mxu0 }
  0xfe   : > { %v1959_v60 = vpop.f32.mrf.mxu1 }
  0xff   : > { %v2407_v62 = vadd.f32 %v1958_v58, %v1846_v56  ;;  %v1848_v63 = vpop.f32.mrf.mxu0 }
 0x100   : > { %v1960_v0 = vpop.f32.mrf.mxu1  ;;  %v1849_v4 = vadd.f32 %v1848_v63, %v1847_v59 }
 0x101   : > { %v1732_v1 = vpack.c.bf16 %v2407_v62, %v2405_v61  ;;  %v1850_v2 = vpop.f32.mrf.mxu0  ;;  %v1961_v5 = vadd.f32 %v1960_v0, %v1959_v60 }
 0x102   : > { %v1962_v3 = vpop.f32.mrf.mxu1 }
 0x103   : > { %1804 = vst [vmem:[%s2400_s14 + $0x8] sm:$0xff] %v1732_v1   ;;  %v1851_v6 = vpop.f32.mrf.mxu0  ;;  %v2412_v12 = vadd.f32 %v1961_v5, %v1849_v4 }
 0x104   : > { %v1852_v7 = vadd.f32 %v1851_v6, %v1850_v2  ;;  %v1963_v8 = vpop.f32.mrf.mxu1 }
 0x105   : > { %v1964_v9 = vadd.f32 %v1963_v8, %v1962_v3  ;;  %v1853_v10 = vpop.f32.mrf.mxu0 }
 0x106   : > { %v1965_v11 = vpop.f32.mrf.mxu1 }
 0x107   : > { %v2414_v13 = vadd.f32 %v1964_v9, %v1852_v7  ;;  %v1854_v14 = vpop.f32.mrf.mxu0 }
 0x108   : > { %v1966_v15 = vpop.f32.mrf.mxu1  ;;  %v1855_v19 = vadd.f32 %v1854_v14, %v1853_v10 }
 0x109   : > { %v1737_v16 = vpack.c.bf16 %v2414_v13, %v2412_v12  ;;  %v1856_v17 = vpop.f32.mrf.mxu0  ;;  %v1967_v20 = vadd.f32 %v1966_v15, %v1965_v11 }
 0x10a   : > { %v1968_v18 = vpop.f32.mrf.mxu1 }
 0x10b   : > { %1805 = vst [vmem:[%s2400_s14 + $0x10] sm:$0xff] %v1737_v16   ;;  %v1857_v21 = vpop.f32.mrf.mxu0  ;;  %v2419_v27 = vadd.f32 %v1967_v20, %v1855_v19 }
 0x10c   : > { %v1858_v22 = vadd.f32 %v1857_v21, %v1856_v17  ;;  %v1969_v23 = vpop.f32.mrf.mxu1 }
 0x10d   : > { %v1970_v24 = vadd.f32 %v1969_v23, %v1968_v18  ;;  %v1859_v25 = vpop.f32.mrf.mxu0 }
 0x10e   : > { %v1971_v26 = vpop.f32.mrf.mxu1 }
 0x10f   : > { %v2421_v28 = vadd.f32 %v1970_v24, %v1858_v22  ;;  %v1860_v29 = vpop.f32.mrf.mxu0 }
 0x110   : > { %v1972_v30 = vpop.f32.mrf.mxu1  ;;  %v1861_v34 = vadd.f32 %v1860_v29, %v1859_v25 }
 0x111   : > { %v1742_v31 = vpack.c.bf16 %v2421_v28, %v2419_v27  ;;  %v1862_v32 = vpop.f32.mrf.mxu0  ;;  %v1973_v35 = vadd.f32 %v1972_v30, %v1971_v26 }
 0x112   : > { %v1974_v33 = vpop.f32.mrf.mxu1 }
 0x113   : > { %1806 = vst [vmem:[%s2400_s14 + $0x18] sm:$0xff] %v1742_v31   ;;  %v1863_v36 = vpop.f32.mrf.mxu0  ;;  %v2426_v42 = vadd.f32 %v1973_v35, %v1861_v34 }
 0x114   : > { %v1864_v37 = vadd.f32 %v1863_v36, %v1862_v32  ;;  %v1975_v38 = vpop.f32.mrf.mxu1 }
 0x115   : > { %v1976_v39 = vadd.f32 %v1975_v38, %v1974_v33  ;;  %v1865_v40 = vpop.f32.mrf.mxu0 }
 0x116   : > { %v1977_v41 = vpop.f32.mrf.mxu1 }
 0x117   : > { %v2428_v43 = vadd.f32 %v1976_v39, %v1864_v37  ;;  %v1866_v44 = vpop.f32.mrf.mxu0  ;;  %v1377_v37 = vmul.f32 %v2395_v47, %v2395_v47 }
 0x118   : > { %v1978_v45 = vpop.f32.mrf.mxu1  ;;  %v1867_v51 = vadd.f32 %v1866_v44, %v1865_v40  ;;  %v1376_v44 = vmul.f32 %v2393_v46, %v2393_v46 }
 0x119   : > { %v1747_v48 = vpack.c.bf16 %v2428_v43, %v2426_v42  ;;  %v1868_v49 = vpop.f32.mrf.mxu0  ;;  %v1979_v52 = vadd.f32 %v1978_v45, %v1977_v41  ;;  %v1378_v45 = vmul.f32 %v2405_v61, %v2405_v61 }
 0x11a   : > { %v1980_v50 = vpop.f32.mrf.mxu1 }
 0x11b   : > { %1807 = vst [vmem:[%s2400_s14 + $0x20] sm:$0xff] %v1747_v48   ;;  %v1869_v53 = vpop.f32.mrf.mxu0  ;;  %v2433_v59 = vadd.f32 %v1979_v52, %v1867_v51 }
 0x11c   : > { %v1870_v54 = vadd.f32 %v1869_v53, %v1868_v49  ;;  %v1981_v55 = vpop.f32.mrf.mxu1  ;;  %v1408_v53 = vadd.f32 %v1377_v37, %v1376_v44 }
 0x11d   : > { %v1982_v56 = vadd.f32 %v1981_v55, %v1980_v50  ;;  %v1871_v57 = vpop.f32.mrf.mxu0  ;;  %v1338_v50 = vadd.f32 %v2395_v47, %v2393_v46  ;;  %v1386_v44 = vmul.f32 %v2433_v59, %v2433_v59 }
 0x11e   : > { %v1983_v58 = vpop.f32.mrf.mxu1 }
 0x11f   : > { %v2435_v60 = vadd.f32 %v1982_v56, %v1870_v54  ;;  %v1872_v63 = vpop.f32.mrf.mxu0  ;;  %v1379_v54 = vmul.f32 %v2407_v62, %v2407_v62  ;;  %v1339_v56 = vadd.f32 %v1338_v50, %v2405_v61  ;;  %v1381_v61 = vmul.f32 %v2414_v13, %v2414_v13 }
 0x120   : > { %v1984_v0 = vpop.f32.mrf.mxu1  ;;  %v1873_v4 = vadd.f32 %v1872_v63, %v1871_v57 }
 0x121   : > { %v1752_v1 = vpack.c.bf16 %v2435_v60, %v2433_v59  ;;  %v1874_v2 = vpop.f32.mrf.mxu0  ;;  %v1985_v5 = vadd.f32 %v1984_v0, %v1983_v58  ;;  %v1409_v0 = vadd.f32 %v1408_v53, %v1378_v45  ;;  %v1340_v47 = vadd.f32 %v1339_v56, %v2407_v62 }
 0x122   : > { %v1986_v3 = vpop.f32.mrf.mxu1 }
 0x123   : > { %1808 = vst [vmem:[%s2400_s14 + $0x28] sm:$0xff] %v1752_v1   ;;  %v1875_v6 = vpop.f32.mrf.mxu0  ;;  %v2440_v14 = vadd.f32 %v1985_v5, %v1873_v4  ;;  %v1380_v1 = vmul.f32 %v2412_v12, %v2412_v12  ;;  %v1410_v4 = vadd.f32 %v1409_v0, %v1379_v54 }
 0x124   : > { %v1876_v7 = vadd.f32 %v1875_v6, %v1874_v2  ;;  %v1987_v8 = vpop.f32.mrf.mxu1  ;;  %v1341_v6 = vadd.f32 %v1340_v47, %v2412_v12 }
 0x125   : > { %v1988_v9 = vadd.f32 %v1987_v8, %v1986_v3  ;;  %v1877_v10 = vpop.f32.mrf.mxu0  ;;  %v1388_v0 = vmul.f32 %v2440_v14, %v2440_v14 }
 0x126   : > { %v1989_v11 = vpop.f32.mrf.mxu1 }
 0x127   : > { %v2442_v15 = vadd.f32 %v1988_v9, %v1876_v7  ;;  %v1878_v16 = vpop.f32.mrf.mxu0 }
 0x128   : > { %v1990_v17 = vpop.f32.mrf.mxu1  ;;  %v1879_v21 = vadd.f32 %v1878_v16, %v1877_v10  ;;  %v1411_v10 = vadd.f32 %v1410_v4, %v1380_v1 }
 0x129   : > { %v1757_v18 = vpack.c.bf16 %v2442_v15, %v2440_v14  ;;  %v1880_v19 = vpop.f32.mrf.mxu0  ;;  %v1991_v22 = vadd.f32 %v1990_v17, %v1989_v11  ;;  %v1382_v11 = vmul.f32 %v2419_v27, %v2419_v27  ;;  %v1342_v17 = vadd.f32 %v1341_v6, %v2414_v13 }
 0x12a   : > { %v1992_v20 = vpop.f32.mrf.mxu1 }
 0x12b   : > { %1809 = vst [vmem:[%s2400_s14 + $0x30] sm:$0xff] %v1757_v18   ;;  %v1881_v23 = vpop.f32.mrf.mxu0  ;;  %v2447_v31 = vadd.f32 %v1991_v22, %v1879_v21  ;;  %v1383_v21 = vmul.f32 %v2421_v28, %v2421_v28  ;;  %v1343_v22 = vadd.f32 %v1342_v17, %v2419_v27  ;;  %v1385_v27 = vmul.f32 %v2428_v43, %v2428_v43 }
 0x12c   : > { %v1882_v24 = vadd.f32 %v1881_v23, %v1880_v19  ;;  %v1993_v25 = vpop.f32.mrf.mxu1 }
 0x12d   : > { %v1994_v26 = vadd.f32 %v1993_v25, %v1992_v20  ;;  %v1883_v29 = vpop.f32.mrf.mxu0  ;;  %v1412_v20 = vadd.f32 %v1411_v10, %v1381_v61 }
 0x12e   : > { %v1995_v30 = vpop.f32.mrf.mxu1 }
 0x12f   : > { %v2449_v32 = vadd.f32 %v1994_v26, %v1882_v24  ;;  %v1884_v33 = vpop.f32.mrf.mxu0  ;;  %v1413_v26 = vadd.f32 %v1412_v20, %v1382_v11 }
 0x130   : > { %v1996_v34 = vpop.f32.mrf.mxu1  ;;  %v1885_v39 = vadd.f32 %v1884_v33, %v1883_v29  ;;  %v1384_v29 = vmul.f32 %v2426_v42, %v2426_v42 }
 0x131   : > { %v1762_v35 = vpack.c.bf16 %v2449_v32, %v2447_v31  ;;  %v1886_v36 = vpop.f32.mrf.mxu0  ;;  %v1997_v40 = vadd.f32 %v1996_v34, %v1995_v30  ;;  %v1344_v30 = vadd.f32 %v1343_v22, %v2421_v28  ;;  %v1391_v17 = vmul.f32 %v2449_v32, %v2449_v32 }
 0x132   : > { %v1998_v38 = vpop.f32.mrf.mxu1 }
 0x133   : > { %1810 = vst [vmem:[%s2400_s14 + $0x38] sm:$0xff] %v1762_v35   ;;  %v1887_v41 = vpop.f32.mrf.mxu0  ;;  %v2465_v57 = vadd.f32 %v1997_v40, %v1885_v39  ;;  %v1414_v35 = vadd.f32 %v1413_v26, %v1383_v21  ;;  %v1345_v37 = vadd.f32 %v1344_v30, %v2426_v42 }
 0x134   : > { %v1888_v48 = vadd.f32 %v1887_v41, %v1886_v36  ;;  %v1999_v49 = vpop.f32.mrf.mxu1 }
 0x135   : > { %v2000_v51 = vadd.f32 %v1999_v49, %v1998_v38  ;;  %v1889_v52 = vpop.f32.mrf.mxu0  ;;  %v1415_v41 = vadd.f32 %v1414_v35, %v1384_v29  ;;  %v1392_v22 = vmul.f32 %v2465_v57, %v2465_v57 }
 0x136   : > { %v2001_v55 = vpop.f32.mrf.mxu1 }
 0x137   : > { %v2467_v58 = vadd.f32 %v2000_v51, %v1888_v48  ;;  %v1890_v63 = vpop.f32.mrf.mxu0  ;;  %v1346_v48 = vadd.f32 %v1345_v37, %v2428_v43  ;;  %v1416_v51 = vadd.f32 %v1415_v41, %v1385_v27 }
 0x138   : > { %v2002_v46 = vpop.f32.mrf.mxu1  ;;  %v1891_v7 = vadd.f32 %v1890_v63, %v1889_v52  ;;  %v1387_v52 = vmul.f32 %v2435_v60, %v2435_v60 }
 0x139   : > { %v1767_v2 = vpack.c.bf16 %v2467_v58, %v2465_v57  ;;  %v1892_v3 = vpop.f32.mrf.mxu0  ;;  %v2003_v8 = vadd.f32 %v2002_v46, %v2001_v55  ;;  %v1347_v53 = vadd.f32 %v1346_v48, %v2433_v59  ;;  %v1417_v63 = vadd.f32 %v1416_v51, %v1386_v44 }
 0x13a   : > { %v2004_v5 = vpop.f32.mrf.mxu1  ;;  %v1389_v59 = vmul.f32 %v2442_v15, %v2442_v15  ;;  %v1393_v30 = vmul.f32 %v2467_v58, %v2467_v58 }
 0x13b   : > { %1811 = vst [vmem:[%s2400_s14 + $0x40] sm:$0xff] %v1767_v2   ;;  %v1893_v9 = vpop.f32.mrf.mxu0  ;;  %v2484_v23 = vadd.f32 %v2003_v8, %v1891_v7  ;;  %v1348_v1 = vadd.f32 %v1347_v53, %v2435_v60  ;;  %v1418_v2 = vadd.f32 %v1417_v63, %v1387_v52  ;;  %v1390_v8 = vmul.f32 %v2447_v31, %v2447_v31 }
 0x13c   : > { %v1894_v62 = vadd.f32 %v1893_v9, %v1892_v3  ;;  %v2005_v16 = vpop.f32.mrf.mxu1 }
 0x13d   : > { %v2006_v18 = vadd.f32 %v2005_v16, %v2004_v5  ;;  %v1895_v19 = vpop.f32.mrf.mxu0  ;;  %v1349_v4 = vadd.f32 %v1348_v1, %v2440_v14  ;;  %v1419_v7 = vadd.f32 %v1418_v2, %v1388_v0  ;;  %v1394_v37 = vmul.f32 %v2484_v23, %v2484_v23 }
 0x13e   : > { %v2007_v12 = vpop.f32.mrf.mxu1 }
 0x13f   : > { %v2486_v24 = vadd.f32 %v2006_v18, %v1894_v62  ;;  %v1896_v25 = vpop.f32.mrf.mxu0  ;;  %v1350_v10 = vadd.f32 %v1349_v4, %v2442_v15  ;;  %v1420_v16 = vadd.f32 %v1419_v7, %v1389_v59 }
 0x140   : > { %v2008_v13 = vpop.f32.mrf.mxu1  ;;  %v1897_v38 = vadd.f32 %v1896_v25, %v1895_v19 }
 0x141   : > { %v1772_v33 = vpack.c.bf16 %v2486_v24, %v2484_v23  ;;  %v1898_v34 = vpop.f32.mrf.mxu0  ;;  %v2009_v39 = vadd.f32 %v2008_v13, %v2007_v12  ;;  %v1351_v18 = vadd.f32 %v1350_v10, %v2447_v31  ;;  %v1421_v12 = vadd.f32 %v1420_v16, %v1390_v8 }
 0x142   : > { %v2010_v36 = vpop.f32.mrf.mxu1 }
 0x143   : > { %1812 = vst [vmem:[%s2400_s14 + $0x48] sm:$0xff] %v1772_v33   ;;  %v1899_v40 = vpop.f32.mrf.mxu0  ;;  %v2503_v54 = vadd.f32 %v2009_v39, %v1897_v38  ;;  %v1352_v15 = vadd.f32 %v1351_v18, %v2449_v32  ;;  %v1422_v13 = vadd.f32 %v1421_v12, %v1391_v17 }
 0x144   : > { %v1900_v28 = vadd.f32 %v1899_v40, %v1898_v34  ;;  %v2011_v45 = vpop.f32.mrf.mxu1 }
 0x145   : > { %v2012_v49 = vadd.f32 %v2011_v45, %v2010_v36  ;;  %v1901_v50 = vpop.f32.mrf.mxu0  ;;  %v1353_v34 = vadd.f32 %v1352_v15, %v2465_v57  ;;  %v1423_v36 = vadd.f32 %v1422_v13, %v1392_v22  ;;  %v1396_v52 = vmul.f32 %v2503_v54, %v2503_v54 }
 0x146   : > { %v2013_v42 = vpop.f32.mrf.mxu1 }
 0x147   : > { %v2505_v55 = vadd.f32 %v2012_v49, %v1900_v28  ;;  %v1902_v56 = vpop.f32.mrf.mxu0  ;;  %v1354_v32 = vadd.f32 %v1353_v34, %v2467_v58  ;;  %v1424_v44 = vadd.f32 %v1423_v36, %v1393_v30  ;;  %v1395_v28 = vmul.f32 %v2486_v24, %v2486_v24 }
 0x148   : > { %v2014_v43 = vpop.f32.mrf.mxu1  ;;  %v1903_v61 = vadd.f32 %v1902_v56, %v1901_v50 }
 0x149   : > { %v1777_v46 = vpack.c.bf16 %v2505_v55, %v2503_v54  ;;  %v1904_v47 = vpop.f32.mrf.mxu0  ;;  %v2015_v5 = vadd.f32 %v2014_v43, %v2013_v42  ;;  %v1355_v45 = vadd.f32 %v1354_v32, %v2484_v23  ;;  %v1425_v51 = vadd.f32 %v1424_v44, %v1394_v37 }
 0x14a   : > { %v2016_v3 = vpop.f32.mrf.mxu1  ;;  %v1397_v0 = vmul.f32 %v2505_v55, %v2505_v55 }
 0x14b   : > { %1813 = vst [vmem:[%s2400_s14 + $0x50] sm:$0xff] %v1777_v46   ;;  %v1905_v6 = vpop.f32.mrf.mxu0  ;;  %v1140_v19 = vadd.f32 %v2015_v5, %v1903_v61  ;;  %v1356_v58 = vadd.f32 %v1355_v45, %v2486_v24  ;;  %v1426_v63 = vadd.f32 %v1425_v51, %v1395_v28 }
 0x14c   : > { %v1906_v60 = vadd.f32 %v1905_v6, %v1904_v47  ;;  %v2017_v9 = vpop.f32.mrf.mxu1 }
 0x14d   : > { %v2018_v11 = vadd.f32 %v2017_v9, %v2016_v3  ;;  %v1907_v62 = vpop.f32.mrf.mxu0  ;;  %v1357_v1 = vadd.f32 %v1356_v58, %v2503_v54  ;;  %v1427_v2 = vadd.f32 %v1426_v63, %v1396_v52  ;;  %v1398_v59 = vmul.f32 %v1140_v19, %v1140_v19 }
 0x14e   : > { %v2019_v14 = vpop.f32.mrf.mxu1 }
 0x14f   : > { %v1143_v20 = vadd.f32 %v2018_v11, %v1906_v60  ;;  %v1908_v21 = vpop.f32.mrf.mxu0  ;;  %v1358_v61 = vadd.f32 %v1357_v1, %v2505_v55  ;;  %v1428_v6 = vadd.f32 %v1427_v2, %v1397_v0 }
 0x150   : > { %v2020_v25 = vpop.f32.mrf.mxu1  ;;  %v1909_v31 = vadd.f32 %v1908_v21, %v1907_v62 }
 0x151   : > { %v1782_v26 = vpack.c.bf16 %v1143_v20, %v1140_v19  ;;  %v1910_v29 = vpop.f32.mrf.mxu0  ;;  %v2021_v35 = vadd.f32 %v2020_v25, %v2019_v14  ;;  %v1399_v7 = vmul.f32 %v1143_v20, %v1143_v20  ;;  %v1359_v60 = vadd.f32 %v1358_v61, %v1140_v19 }
 0x152   : > { %v2022_v33 = vpop.f32.mrf.mxu1  ;;  %v1429_v11 = vadd.f32 %v1428_v6, %v1398_v59 }
 0x153   : > { %1814 = vst [vmem:[%s2400_s14 + $0x58] sm:$0xff] %v1782_v26   ;;  %v1911_v27 = vpop.f32.mrf.mxu0  ;;  %v1148_v48 = vadd.f32 %v2021_v35, %v1909_v31  ;;  %v1360_v17 = vadd.f32 %v1359_v60, %v1143_v20 }
 0x154   : > { %v1912_v38 = vadd.f32 %v1911_v27, %v1910_v29  ;;  %v2023_v39 = vpop.f32.mrf.mxu1  ;;  %v1430_v22 = vadd.f32 %v1429_v11, %v1399_v7 }
 0x155   : > { %v2024_v40 = vadd.f32 %v2023_v39, %v2022_v33  ;;  %v1913_v41 = vpop.f32.mrf.mxu0  ;;  %v1400_v62 = vmul.f32 %v1148_v48, %v1148_v48  ;;  %v1361_v15 = vadd.f32 %v1360_v17, %v1148_v48 }
 0x156   : > { %v2025_v57 = vpop.f32.mrf.mxu1 }
 0x157   : > { %v1151_v49 = vadd.f32 %v2024_v40, %v1912_v38  ;;  %v1914_v50 = vpop.f32.mrf.mxu0  ;;  %v1431_v29 = vadd.f32 %v1430_v22, %v1400_v62 }
 0x158   : > { %v2026_v42 = vpop.f32.mrf.mxu1  ;;  %v1915_v23 = vadd.f32 %v1914_v50, %v1913_v41 }
 0x159   : > { %v1787_v53 = vpack.c.bf16 %v1151_v49, %v1148_v48  ;;  %v1916_v56 = vpop.f32.mrf.mxu0  ;;  %v2027_v46 = vadd.f32 %v2026_v42, %v2025_v57  ;;  %v1401_v55 = vmul.f32 %v1151_v49, %v1151_v49  ;;  %v1362_v33 = vadd.f32 %v1361_v15, %v1151_v49 }
 0x15a   : > { %v2028_v43 = vpop.f32.mrf.mxu1 }
 0x15b   : > { %1815 = vst [vmem:[%s2400_s14 + $0x60] sm:$0xff] %v1787_v53   ;;  %v1917_v47 = vpop.f32.mrf.mxu0  ;;  %v1156_v9 = vadd.f32 %v2027_v46, %v1915_v23  ;;  %v1432_v27 = vadd.f32 %v1431_v29, %v1401_v55 }
 0x15c   : > { %v1918_v3 = vadd.f32 %v1917_v47, %v1916_v56  ;;  %v2029_v4 = vpop.f32.mrf.mxu1 }
 0x15d   : > { %v2030_v24 = vadd.f32 %v2029_v4, %v2028_v43  ;;  %v1919_v5 = vpop.f32.mrf.mxu0  ;;  %v1402_v19 = vmul.f32 %v1156_v9, %v1156_v9  ;;  %v1363_v36 = vadd.f32 %v1362_v33, %v1156_v9 }
 0x15e   : > { %v2031_v8 = vpop.f32.mrf.mxu1 }
 0x15f   : > { %v1159_v10 = vadd.f32 %v2030_v24, %v1918_v3  ;;  %v1920_v54 = vpop.f32.mrf.mxu0  ;;  %v1433_v32 = vadd.f32 %v1432_v27, %v1402_v19 }
 0x160   : > { %v2032_v16 = vpop.f32.mrf.mxu1  ;;  %v1921_v18 = vadd.f32 %v1920_v54, %v1919_v5 }
 0x161   : > { %v1792_v14 = vpack.c.bf16 %v1159_v10, %v1156_v9  ;;  %v2033_v21 = vadd.f32 %v2032_v16, %v2031_v8  ;;  %v1922_v12 = vpop.f32.mrf.mxu0  ;;  %v1403_v37 = vmul.f32 %v1159_v10, %v1159_v10  ;;  %v1364_v44 = vadd.f32 %v1363_v36, %v1159_v10 }
 0x162   : > { %v2034_v25 = vpop.f32.mrf.mxu1 }
 0x163   : > { %1816 = vst [vmem:[%s2400_s14 + $0x68] sm:$0xff] %v1792_v14   ;;  %v1923_v26 = vpop.f32.mrf.mxu0  ;;  %v1164_v34 = vadd.f32 %v2033_v21, %v1921_v18  ;;  %v1434_v49 = vadd.f32 %v1433_v32, %v1403_v37 }
 0x164   : > { %v1924_v13 = vadd.f32 %v1923_v26, %v1922_v12  ;;  %v2035_v30 = vpop.f32.mrf.mxu1 }
 0x165   : > { %v2036_v31 = vadd.f32 %v2035_v30, %v2034_v25  ;;  %v1925_v35 = vpop.f32.mrf.mxu0  ;;  %v1404_v28 = vmul.f32 %v1164_v34, %v1164_v34  ;;  %v1365_v51 = vadd.f32 %v1364_v44, %v1164_v34 }
 0x166   : > { %v2037_v20 = vpop.f32.mrf.mxu1 }
 0x167   : > { %v1167_v38 = vadd.f32 %v2036_v31, %v1924_v13  ;;  %v1926_v39 = vpop.f32.mrf.mxu0  ;;  %v1435_v63 = vadd.f32 %v1434_v49, %v1404_v28 }
 0x168   : > { %v1927_v40 = vadd.f32 %v1926_v39, %v1925_v35  ;;  %v2038_v41 = vpop.f32.mrf.mxu1 }
 0x169   : > { %v1797_v57 = vpack.c.bf16 %v1167_v38, %v1164_v34  ;;  %v2039_v45 = vadd.f32 %v2038_v41, %v2037_v20  ;;  %v1928_v48 = vpop.f32.mrf.mxu0  ;;  %v1405_v52 = vmul.f32 %v1167_v38, %v1167_v38  ;;  %v1366_v0 = vadd.f32 %v1365_v51, %v1167_v38 }
 0x16a   : > { %v2040_v50 = vpop.f32.mrf.mxu1 }
 0x16b   : > { %1817 = vst [vmem:[%s2400_s14 + $0x70] sm:$0xff] %v1797_v57   ;;  %v1172_v42 = vadd.f32 %v2039_v45, %v1927_v40  ;;  %v1929_v58 = vpop.f32.mrf.mxu0  ;;  %v1436_v23 = vadd.f32 %v1435_v63, %v1405_v52 }
 0x16c   : > { %v1930_v53 = vadd.f32 %v1929_v58, %v1928_v48  ;;  %v2041_v56 = vpop.f32.mrf.mxu1 }
 0x16d   : > { %v1406_v43 = vmul.f32 %v1172_v42, %v1172_v42  ;;  %v2042_v1 = vadd.f32 %v2041_v56, %v2040_v50  ;;  %v1367_v46 = vadd.f32 %v1366_v0, %v1172_v42 }
 0x16f   : > { %v1175_v47 = vadd.f32 %v2042_v1, %v1930_v53  ;;  %v1437_v2 = vadd.f32 %v1436_v23, %v1406_v43 }
 0x171   : > { %v1802_v59 = vpack.c.bf16 %v1175_v47, %v1172_v42  ;;  %v1368_v3 = vadd.f32 %v1367_v46, %v1175_v47  ;;  %v1407_v4 = vmul.f32 %v1175_v47, %v1175_v47 }
 0x173   : > { %1818 = vst [vmem:[%s2400_s14 + $0x78] sm:$0xff] %v1802_v59   ;;  %v1369_v61 = vrot.slane %v1368_v3, 4  ;;  %v1438_v24 = vadd.f32 %v1437_v2, %v1407_v4 }
 0x175   : > { %v1370_v5 = vadd.f32 %v1369_v61, %v1368_v3  ;;  %v1439_v6 = vrot.slane %v1438_v24, 4 }
 0x177   : > { %v1371_v7 = vrot.slane %v1370_v5, 2  ;;  %v1440_v8 = vadd.f32 %v1439_v6, %v1438_v24 }
 0x179   : > { %v1372_v60 = vadd.f32 %v1371_v7, %v1370_v5  ;;  %v1441_v9 = vrot.slane %v1440_v8, 2 }
 0x17b   : > { %v1373_v10 = vrot.slane %v1372_v60, 1  ;;  %v1442_v54 = vadd.f32 %v1441_v9, %v1440_v8 }
 0x17d   : > { %v1374_v11 = vadd.f32 %v1373_v10, %v1372_v60  ;;  %v1443_v62 = vrot.slane %v1442_v54, 1 }
 0x17f   : > { %1375 = vst [vmem:[%s211_s19] sm:$0x1] %v1374_v11  ;;  %v1444_v16 = vadd.f32 %v1443_v62, %v1442_v54 }
 0x181   : > { %1445 = vst [vmem:[%s214_s22] sm:$0x1] %v1444_v16 }
 0x182 PF: > { %s15_s15 = sadd.s32 1, %s2185_s15  }
 0x183   : > { %p12_p4 = scmp.ge.s32.totalorder %s15_s15, 4  }
 0x185   :  { %14 = sbr.rel (!%p12_p4) target bundleno = 1 (0x1), region = 82 }

// kernel: bottleneck_pallas.5
= control target key start
LH: loop header
LB: loop body
LE: loop exit
PB: predicated region body
PF: predicated region fallthrough
CT: control target
= control target key end

     0   :  { %10 = vsyncpa [#allocation3], 0  ;;  %s2915_s0 = inlined_call_operand.vmem [shape: bf16[2,256,128], index: 0, kind: input, shape index: {}]   ;;  %s2916_s1 = inlined_call_operand.vmem [shape: f32[2,256,512], index: 1, kind: input, shape index: {}]   ;;  %s2917_s2 = inlined_call_operand.vmem [shape: bf16[128,512], index: 2, kind: input, shape index: {}]   ;;  %s2918_s3 = inlined_call_operand.vmem [shape: f32[1,512], index: 3, kind: input, shape index: {}]   ;;  %s2919_s4 = inlined_call_operand.vmem [shape: f32[1,512], index: 4, kind: input, shape index: {}]   ;;  %s2920_s5 = inlined_call_operand.hbm [shape: f32[2,256,512], index: 5, kind: output, shape index: {}]  }
   0x1   :  { %12 = vsyncpa [#allocation3 + $0x1], 0  ;;  %s2117_s18 = smov 0   ;;  %s2119_s19 = smov 0  }
   0x2   :  { %s2121_s20 = smov 0   ;;  %s2123_s21 = smov 0  }
   0x3 LB: > { %s2138_s22 = sadd.s32 4294967295, %s2081_s21   ;;  %s1850_s23 = sadd.s32 4294967294, %s2081_s21   ;;  %s2081_s21 = sphi %s2123_s21, %s2926_s21   ;;  %s2077_s20 = sphi %s2121_s20, %s2925_s20   ;;  %s2073_s19 = sphi %s2119_s19, %s2924_s19   ;;  %s2069_s18 = sphi %s2117_s18, %s2923_s18  }
   0x4   : > { %s2142_s24 = sadd.s32 1, %s2081_s21   ;;  %s140_s25 = sadd.s32 1, %s2077_s20 }
   0x5   : > { %s137_s26 = ssub.s32 %s2081_s21, %s2142_s24  ;;  %p150_p0 = scmp.ne.s32.totalorder %s2077_s20, %s2073_s19 }
   0x6   : > { %p138_p1 = scmp.eq.s32.totalorder %s137_s26, 0  ;;  %p151_p2 = scmp.eq.s32.totalorder %s2138_s22, 1 }
   0x7   : > { %p156_p3 = scmp.ne.s32.totalorder %s2073_s19, %s2069_s18  ;;  %p157_p4 = scmp.eq.s32.totalorder %s1850_s23, 1 }
   0x8   : > { %s2153_s27 = scalar_select %p138_p1, %s2077_s20, %s140_s25  }
   0x9   : > { %p2155_p5 = por %p151_p2, %p150_p0  ;;  %p2159_p6 = por %p157_p4, %p156_p3 }
   0xa   : > { %p1853_p7 = scmp.ge.s32.totalorder %s2081_s21, 1  ;;  %p200_p8 = scmp.lt.s32.totalorder %s2081_s21, 3 }
   0xc   : > { %p201_p9 = pnand %p1853_p7, %p200_p8 }
   0xd   : > { %p233_p10 = scmp.lt.s32.totalorder (!%p201_p9), %s2138_s22, 1  ;;  %s1914_s6 = sshll.u32 (!%p201_p9), %s2138_s22, 14 }
   0xe   : > { %204 = sbr.rel (%p201_p9) target bundleno = 396 (0x18c), region = 40  ;;  %s2865_s11 = scalar_lea.hbm (!%p201_p9), %s2920_s5, %s1914_s6 }
   0xf   : > { %s2084_s14 = smov (!%p201_p9), [#allocation2]  }
  0x13   : > { %v1957_v0 = vld [vmem:[%s2917_s2 + $0xe4] ss:$16 sps:$4 sm:$0xff]   ;;  %v1959_v1 = vld [vmem:[%s2917_s2 + $0xec] ss:$16 sps:$4 sm:$0xff]   ;;  %v2083_v2 = vmov 0   ;;  %s2223_s9 = scalar_select %p233_p10, %s2138_s22, 1  ;;  %v952_v49 = vlaneseq }
  0x14   : > { %596 = vmatprep.mubr.bf16.mxu0 %v2083_v2  ;;  %789 = vmatprep.mubr.bf16.mxu1 %v2083_v2  ;;  %v1961_v3 = vld [vmem:[%s2917_s2 + $0xe0] ss:$16 sps:$4 sm:$0xff]   ;;  %v1962_v4 = vld [vmem:[%s2917_s2 + $0xe8] ss:$16 sps:$4 sm:$0xff]   ;;  %v1963_v5 = vld [vmem:[%s2917_s2 + $0xc4] ss:$16 sps:$4 sm:$0xff]  }
  0x15   : > { %564 = vmatprep.subr.bf16.mxu0 %v1957_v0  ;;  %757 = vmatprep.subr.bf16.mxu1 %v1959_v1  ;;  %v1965_v6 = vld [vmem:[%s2917_s2 + $0xcc] ss:$16 sps:$4 sm:$0xff]   ;;  %v1967_v7 = vld [vmem:[%s2917_s2 + $0xc0] ss:$16 sps:$4 sm:$0xff]   ;;  %v1968_v8 = vld [vmem:[%s2917_s2 + $0xc8] ss:$16 sps:$4 sm:$0xff]  }
  0x16   : > { %565 = vmatpush1.bf16.msra.mxu0 %v1961_v3  ;;  %758 = vmatpush1.bf16.msra.mxu1 %v1962_v4  ;;  %v1969_v9 = vld [vmem:[%s2917_s2 + $0xa4] ss:$16 sps:$4 sm:$0xff]   ;;  %v1971_v10 = vld [vmem:[%s2917_s2 + $0xac] ss:$16 sps:$4 sm:$0xff]   ;;  %v1973_v11 = vld [vmem:[%s2917_s2 + $0xa0] ss:$16 sps:$4 sm:$0xff]  }
  0x17   : > { %566 = vmatprep.subr.bf16.mxu0 %v1963_v5  ;;  %759 = vmatprep.subr.bf16.mxu1 %v1965_v6  ;;  %v1974_v12 = vld [vmem:[%s2917_s2 + $0xa8] ss:$16 sps:$4 sm:$0xff]   ;;  %v1975_v13 = vld [vmem:[%s2917_s2 + $0x84] ss:$16 sps:$4 sm:$0xff]   ;;  %v1977_v14 = vld [vmem:[%s2917_s2 + $0x8c] ss:$16 sps:$4 sm:$0xff]  }
  0x18   : > { %v1979_v15 = vld [vmem:[%s2917_s2 + $0x80] ss:$16 sps:$4 sm:$0xff]   ;;  %v1980_v16 = vld [vmem:[%s2917_s2 + $0x88] ss:$16 sps:$4 sm:$0xff]   ;;  %v1981_v17 = vld [vmem:[%s2917_s2 + $0x64] ss:$16 sps:$4 sm:$0xff]  }
  0x19   : > { %v1983_v18 = vld [vmem:[%s2917_s2 + $0x6c] ss:$16 sps:$4 sm:$0xff]   ;;  %v1985_v19 = vld [vmem:[%s2917_s2 + $0x60] ss:$16 sps:$4 sm:$0xff]   ;;  %v1986_v20 = vld [vmem:[%s2917_s2 + $0x68] ss:$16 sps:$4 sm:$0xff]  }
  0x1a   : > { %567 = vmatpush1.bf16.msra.mxu0 %v1967_v7  ;;  %760 = vmatpush1.bf16.msra.mxu1 %v1968_v8  ;;  %v1987_v21 = vld [vmem:[%s2917_s2 + $0x44] ss:$16 sps:$4 sm:$0xff]   ;;  %v1989_v22 = vld [vmem:[%s2917_s2 + $0x4c] ss:$16 sps:$4 sm:$0xff]   ;;  %s1912_s23 = sshll.u32 %s2223_s9, 7  ;;  %v953_v50 = vshrl.u32 %v952_v49, 7 }
  0x1b   : > { %568 = vmatprep.subr.bf16.mxu0 %v1969_v9  ;;  %761 = vmatprep.subr.bf16.mxu1 %v1971_v10  ;;  %v1991_v23 = vld [vmem:[%s2917_s2 + $0x40] ss:$16 sps:$4 sm:$0xff]   ;;  %v1992_v24 = vld [vmem:[%s2917_s2 + $0x48] ss:$16 sps:$4 sm:$0xff]   ;;  %v1993_v25 = vld [vmem:[%s2917_s2 + $0x24] ss:$16 sps:$4 sm:$0xff]   ;;  %s2250_s12 = scalar_lea.vmem %s2915_s0, %s1912_s23 }
  0x1c   : > { %v1995_v26 = vld [vmem:[%s2917_s2 + $0x2c] ss:$16 sps:$4 sm:$0xff]   ;;  %v1997_v27 = vld [vmem:[%s2917_s2 + $0x20] ss:$16 sps:$4 sm:$0xff]   ;;  %v1998_v28 = vld [vmem:[%s2917_s2 + $0x28] ss:$16 sps:$4 sm:$0xff]  }
  0x1d   : > { %v1999_v29 = vld [vmem:[%s2917_s2 + $0x4] ss:$16 sps:$4 sm:$0xff]   ;;  %v2001_v30 = vld [vmem:[%s2917_s2 + $0xc] ss:$16 sps:$4 sm:$0xff]   ;;  %v2003_v31 = vld [vmem:[%s2917_s2] ss:$16 sps:$4 sm:$0xff]  }
  0x1e   : > { %569 = vmatpush1.bf16.msra.mxu0 %v1973_v11  ;;  %762 = vmatpush1.bf16.msra.mxu1 %v1974_v12  ;;  %v2004_v32 = vld [vmem:[%s2917_s2 + $0x8] ss:$16 sps:$4 sm:$0xff]   ;;  %v2005_v33 = vld [vmem:[%s2250_s12] sm:$0xff]   ;;  %v2007_v35 = vld [vmem:[%s2250_s12 + $0x10] sm:$0xff]   ;;  %v954_v51 = vsub.s32 0, %v953_v50  ;;  %v962_v52 = vsub.s32 2, %v953_v50 }
  0x1f   : > { %570 = vmatprep.subr.bf16.mxu0 %v1975_v13  ;;  %763 = vmatprep.subr.bf16.mxu1 %v1977_v14  ;;  %v2006_v34 = vld [vmem:[%s2250_s12 + $0x8] sm:$0xff]   ;;  %v2008_v36 = vld [vmem:[%s2250_s12 + $0x18] sm:$0xff]   ;;  %v2009_v37 = vld [vmem:[%s2250_s12 + $0x20] sm:$0xff]   ;;  %v958_v54 = vsub.s32 1, %v953_v50  ;;  %v966_v55 = vsub.s32 3, %v953_v50  ;;  %s1913_s15 = sshll.u32 %s2223_s9, 10 }
  0x20   : > { %v2010_v38 = vld [vmem:[%s2250_s12 + $0x28] sm:$0xff]   ;;  %v2011_v39 = vld [vmem:[%s2250_s12 + $0x30] sm:$0xff]   ;;  %v2012_v40 = vld [vmem:[%s2250_s12 + $0x38] sm:$0xff]   ;;  %s2333_s26 = scalar_lea.vmem %s2916_s1, %s1913_s15  ;;  %s230_s9 = sand.u32 1, %s2073_s19  }
  0x21   : > { %v2013_v41 = vld [vmem:[%s2250_s12 + $0x40] sm:$0xff]   ;;  %v2014_v42 = vld [vmem:[%s2250_s12 + $0x48] sm:$0xff]   ;;  %v2015_v43 = vld [vmem:[%s2250_s12 + $0x50] sm:$0xff]   ;;  %s1854_s23 = sshll.u32 %s230_s9, 10  ;;  %s2875_s22 = scalar_lea.sflag [#allocation3], %s230_s9 }
  0x22   : > { %571 = vmatpush1.bf16.msra.mxu0 %v1979_v15  ;;  %764 = vmatpush1.bf16.msra.mxu1 %v1980_v16  ;;  %v2016_v44 = vld [vmem:[%s2250_s12 + $0x58] sm:$0xff]   ;;  %v2017_v45 = vld [vmem:[%s2250_s12 + $0x60] sm:$0xff]   ;;  %v2018_v46 = vld [vmem:[%s2250_s12 + $0x68] sm:$0xff]   ;;  %s2370_s30 = scalar_lea.vmem [#allocation2], %s1854_s23  ;;  %s2025_s15 = sshll.u32 %s2084_s14, 4  ;;  %s2026_s15 = int_to_ptr.vmem [resolvable:$false] %s2025_s15 }
  0x23   : > { %572 = vmatprep.subr.bf16.mxu0 %v1981_v17  ;;  %765 = vmatprep.subr.bf16.mxu1 %v1983_v18  ;;  %v2019_v47 = vld [vmem:[%s2250_s12 + $0x70] sm:$0xff]   ;;  %v2020_v48 = vld [vmem:[%s2250_s12 + $0x78] sm:$0xff]   ;;  %v950_v53 = vld [vmem:[%s2918_s3] sm:$0xf]  ;;  %s1776_s7 = sshll.u32 %s2370_s30, 4  ;;  %s2027_s16 = scalar_lea.vmem %s2026_s15, 32768  ;;  %s2867_s7 = int_to_ptr.vmem [resolvable:$true] %s1776_s7 }
  0x24   : > { %v1100_v56 = vld [vmem:[%s2919_s4] sm:$0xf]  ;;  %v2326_v57 = vrot.slane %v950_v53, %v954_v51  ;;  %v2328_v58 = vrot.slane %v950_v53, %v962_v52  ;;  %v2339_v61 = vrot.slane %v950_v53, %v958_v54  ;;  %v2341_v62 = vrot.slane %v950_v53, %v966_v55  ;;  %v1252_v6 = vld [vmem:[%s2333_s26 + $0x10] sm:$0xff]  ;;  %v1251_v13 = vld [vmem:[%s2333_s26 + $0x8] sm:$0xff]  ;;  %s2021_s13 = scalar_lea.vmem %s2867_s7, 16384  ;;  %p2028_p0 = scmp.lt.s32.totalorder %s2867_s7, %s2026_s15 }
  0x25   : > { %v2335_v59 = vrot.slane %v1100_v56, %v954_v51  ;;  %v2337_v60 = vrot.slane %v1100_v56, %v962_v52  ;;  %v2346_v3 = vrot.slane %v1100_v56, %v958_v54  ;;  %v2348_v4 = vrot.slane %v1100_v56, %v966_v55  ;;  %v1250_v5 = vld [vmem:[%s2333_s26] sm:$0xff]  ;;  %v1253_v14 = vld [vmem:[%s2333_s26 + $0x18] sm:$0xff]  ;;  %p2022_p11 = scmp.ne.s32.totalorder %s2867_s7, %s2021_s13  ;;  %p2029_p1 = scmp.lt.s32.totalorder %s2027_s16, %s2021_s13 }
  0x26   : > { %573 = vmatpush1.bf16.msra.mxu0 %v1985_v19  ;;  %766 = vmatpush1.bf16.msra.mxu1 %v1986_v20 }
  0x27   : > { %574 = vmatprep.subr.bf16.mxu0 %v1987_v21  ;;  %767 = vmatprep.subr.bf16.mxu1 %v1989_v22  ;;  %p2023_p12 = pnand %p2022_p11, %p2155_p5  ;;  %p2030_p2 = por %p2029_p1, %p2028_p0 }
  0x29   : > { %p2024_p13 = pneg %p2023_p12 }
  0x2a   : > { %575 = vmatpush1.bf16.msra.mxu0 %v1991_v23  ;;  %768 = vmatpush1.bf16.msra.mxu1 %v1992_v24 }
  0x2b   : > { %576 = vmatprep.subr.bf16.mxu0 %v1993_v25  ;;  %769 = vmatprep.subr.bf16.mxu1 %v1995_v26  ;;  %p2031_p3 = pnand %p2030_p2, %p2024_p13 }
  0x2e   : > { %577 = vmatpush1.bf16.msra.mxu0 %v1997_v27  ;;  %770 = vmatpush1.bf16.msra.mxu1 %v1998_v28 }
  0x2f   : > { %578 = vmatprep.subr.bf16.mxu0 %v1999_v29  ;;  %771 = vmatprep.subr.bf16.mxu1 %v2001_v30  ;;  %v1254_v29 = vld [vmem:[%s2333_s26 + $0x20] sm:$0xff]  ;;  %v1256_v30 = vld [vmem:[%s2333_s26 + $0x30] sm:$0xff] }
  0x32   : > { %579 = vmatpush1.bf16.msra.mxu0 %v2003_v31  ;;  %772 = vmatpush1.bf16.msra.mxu1 %v2004_v32 }
  0x35   : > { %597 = vmatmul.mubr.bf16.vlgmr.msra.gmra.mxu0 %v2005_v33  ;;  %790 = vmatmul.mubr.bf16.vlgmr.msra.gmra.mxu1 %v2005_v33 }
  0x36   : > { %606 = vmatprep.mubr.bf16.mxu0 %v2083_v2  ;;  %799 = vmatprep.mubr.bf16.mxu1 %v2083_v2 }
  0x3d   : > { %607 = vmatmul.mubr.bf16.gmra.mxu0 %v2006_v34  ;;  %800 = vmatmul.mubr.bf16.gmra.mxu1 %v2006_v34 }
  0x3e   : > { %616 = vmatprep.mubr.bf16.mxu0 %v2083_v2  ;;  %809 = vmatprep.mubr.bf16.mxu1 %v2083_v2 }
  0x45   : > { %617 = vmatmul.mubr.bf16.gmra.mxu0 %v2007_v35  ;;  %810 = vmatmul.mubr.bf16.gmra.mxu1 %v2007_v35 }
  0x46   : > { %626 = vmatprep.mubr.bf16.mxu0 %v2083_v2  ;;  %819 = vmatprep.mubr.bf16.mxu1 %v2083_v2 }
  0x4d   : > { %627 = vmatmul.mubr.bf16.gmra.mxu0 %v2008_v36  ;;  %820 = vmatmul.mubr.bf16.gmra.mxu1 %v2008_v36 }
  0x4e   : > { %636 = vmatprep.mubr.bf16.mxu0 %v2083_v2  ;;  %829 = vmatprep.mubr.bf16.mxu1 %v2083_v2 }
  0x55   : > { %637 = vmatmul.mubr.bf16.gmra.mxu0 %v2009_v37  ;;  %830 = vmatmul.mubr.bf16.gmra.mxu1 %v2009_v37 }
  0x56   : > { %646 = vmatprep.mubr.bf16.mxu0 %v2083_v2  ;;  %839 = vmatprep.mubr.bf16.mxu1 %v2083_v2 }
  0x5d   : > { %647 = vmatmul.mubr.bf16.gmra.mxu0 %v2010_v38  ;;  %840 = vmatmul.mubr.bf16.gmra.mxu1 %v2010_v38 }
  0x5e   : > { %656 = vmatprep.mubr.bf16.mxu0 %v2083_v2  ;;  %849 = vmatprep.mubr.bf16.mxu1 %v2083_v2 }
  0x65   : > { %657 = vmatmul.mubr.bf16.gmra.mxu0 %v2011_v39  ;;  %850 = vmatmul.mubr.bf16.gmra.mxu1 %v2011_v39  ;;  %v1255_v39 = vld [vmem:[%s2333_s26 + $0x28] sm:$0xff] }
  0x66   : > { %666 = vmatprep.mubr.bf16.mxu0 %v2083_v2  ;;  %859 = vmatprep.mubr.bf16.mxu1 %v2083_v2 }
  0x6d   : > { %667 = vmatmul.mubr.bf16.gmra.mxu0 %v2012_v40  ;;  %860 = vmatmul.mubr.bf16.gmra.mxu1 %v2012_v40  ;;  %v1257_v40 = vld [vmem:[%s2333_s26 + $0x38] sm:$0xff] }
  0x6e   : > { %676 = vmatprep.mubr.bf16.mxu0 %v2083_v2  ;;  %869 = vmatprep.mubr.bf16.mxu1 %v2083_v2 }
  0x75   : > { %677 = vmatmul.mubr.bf16.gmra.mxu0 %v2013_v41  ;;  %870 = vmatmul.mubr.bf16.gmra.mxu1 %v2013_v41 }
  0x76   : > { %686 = vmatprep.mubr.bf16.mxu0 %v2083_v2  ;;  %879 = vmatprep.mubr.bf16.mxu1 %v2083_v2 }
  0x7d   : > { %687 = vmatmul.mubr.bf16.gmra.mxu0 %v2014_v42  ;;  %880 = vmatmul.mubr.bf16.gmra.mxu1 %v2014_v42 }
  0x7e   : > { %696 = vmatprep.mubr.bf16.mxu0 %v2083_v2  ;;  %889 = vmatprep.mubr.bf16.mxu1 %v2083_v2 }
  0x85   : > { %697 = vmatmul.mubr.bf16.gmra.mxu0 %v2015_v43  ;;  %890 = vmatmul.mubr.bf16.gmra.mxu1 %v2015_v43 }
  0x86   : > { %706 = vmatprep.mubr.bf16.mxu0 %v2083_v2  ;;  %899 = vmatprep.mubr.bf16.mxu1 %v2083_v2 }
  0x8d   : > { %707 = vmatmul.mubr.bf16.gmra.mxu0 %v2016_v44  ;;  %900 = vmatmul.mubr.bf16.gmra.mxu1 %v2016_v44 }
  0x8e   : > { %716 = vmatprep.mubr.bf16.mxu0 %v2083_v2  ;;  %909 = vmatprep.mubr.bf16.mxu1 %v2083_v2 }
  0x95   : > { %717 = vmatmul.mubr.bf16.gmra.mxu0 %v2017_v45  ;;  %910 = vmatmul.mubr.bf16.gmra.mxu1 %v2017_v45 }
  0x96   : > { %726 = vmatprep.mubr.bf16.mxu0 %v2083_v2  ;;  %919 = vmatprep.mubr.bf16.mxu1 %v2083_v2 }
  0x9d   : > { %727 = vmatmul.mubr.bf16.gmra.mxu0 %v2018_v46  ;;  %920 = vmatmul.mubr.bf16.gmra.mxu1 %v2018_v46 }
  0x9e   : > { %736 = vmatprep.mubr.bf16.mxu0 %v2083_v2  ;;  %929 = vmatprep.mubr.bf16.mxu1 %v2083_v2 }
  0xa5   : > { %737 = vmatmul.mubr.bf16.gmra.mxu0 %v2019_v47  ;;  %930 = vmatmul.mubr.bf16.gmra.mxu1 %v2019_v47  ;;  %v1258_v47 = vld [vmem:[%s2333_s26 + $0x40] sm:$0xff] }
  0xa6   : > { %746 = vmatprep.mubr.bf16.mxu0 %v2083_v2  ;;  %939 = vmatprep.mubr.bf16.mxu1 %v2083_v2 }
  0xad   : > { %747 = vmatmul.mubr.bf16.gmra.mxu0 %v2020_v48  ;;  %940 = vmatmul.mubr.bf16.gmra.mxu1 %v2020_v48  ;;  %v1260_v48 = vld [vmem:[%s2333_s26 + $0x50] sm:$0xff] }
  0xf5   : > { %v598_v63 = vpop.f32.mrf.mxu0  ;;  %v791_v0 = vpop.f32.mrf.mxu1 }
  0xf6   : > { %v972_v1 = vmul.f32 %v2326_v57, %v598_v63  ;;  %v974_v2 = vmul.f32 %v2328_v58, %v791_v0 }
  0xf7   : > { %v600_v7 = vpop.f32.mrf.mxu0  ;;  %v793_v8 = vpop.f32.mrf.mxu1 }
  0xf8   : > { %v1122_v9 = vadd.f32 %v2335_v59, %v972_v1  ;;  %v1124_v10 = vadd.f32 %v2337_v60, %v974_v2  ;;  %v973_v11 = vmul.f32 %v2339_v61, %v600_v7  ;;  %v975_v12 = vmul.f32 %v2341_v62, %v793_v8  ;;  %v1259_v1 = vld [vmem:[%s2333_s26 + $0x48] sm:$0xff]  ;;  %v1261_v2 = vld [vmem:[%s2333_s26 + $0x58] sm:$0xff] }
  0xf9   : > { %v602_v15 = vpop.f32.mrf.mxu0  ;;  %v795_v16 = vpop.f32.mrf.mxu1 }
  0xfa   : > { %v1378_v17 = vadd.f32 %v1250_v5, %v1122_v9  ;;  %v1380_v18 = vadd.f32 %v1252_v6, %v1124_v10  ;;  %v1123_v19 = vadd.f32 %v2346_v3, %v973_v11  ;;  %v1125_v20 = vadd.f32 %v2348_v4, %v975_v12 }
  0xfb   : > { %v976_v21 = vmul.f32 %v2326_v57, %v602_v15  ;;  %v978_v22 = vmul.f32 %v2328_v58, %v795_v16  ;;  %v604_v23 = vpop.f32.mrf.mxu0  ;;  %v797_v24 = vpop.f32.mrf.mxu1 }
  0xfc   : > { %v1506_v25 = vmax.f32 %v1378_v17, 0.0  ;;  %v1508_v26 = vmax.f32 %v1380_v18, 0.0  ;;  %v1379_v27 = vadd.f32 %v1251_v13, %v1123_v19  ;;  %v1381_v28 = vadd.f32 %v1253_v14, %v1125_v20 }
  0xfd   : > { %v1126_v31 = vadd.f32 %v2335_v59, %v976_v21  ;;  %v1128_v32 = vadd.f32 %v2337_v60, %v978_v22  ;;  %v977_v33 = vmul.f32 %v2339_v61, %v604_v23  ;;  %v979_v34 = vmul.f32 %v2341_v62, %v797_v24  ;;  %v608_v35 = vpop.f32.mrf.mxu0  ;;  %v801_v36 = vpop.f32.mrf.mxu1  ;;  %v1262_v21 = vld [vmem:[%s2333_s26 + $0x60] sm:$0xff]  ;;  %v1264_v22 = vld [vmem:[%s2333_s26 + $0x70] sm:$0xff] }
  0xfe   : > { %1634 = vst [vmem:[%s2370_s30] sm:$0xff] %v1506_v25  ;;  %1636 = vst [vmem:[%s2370_s30 + $0x10] sm:$0xff] %v1508_v26  ;;  %v1507_v37 = vmax.f32 %v1379_v27, 0.0  ;;  %v1509_v38 = vmax.f32 %v1381_v28, 0.0  ;;  %v980_v41 = vmul.f32 %v2326_v57, %v608_v35  ;;  %v982_v42 = vmul.f32 %v2328_v58, %v801_v36 }
  0xff   : > { %v1382_v43 = vadd.f32 %v1254_v29, %v1126_v31  ;;  %v1384_v44 = vadd.f32 %v1256_v30, %v1128_v32  ;;  %v1127_v45 = vadd.f32 %v2346_v3, %v977_v33  ;;  %v1129_v46 = vadd.f32 %v2348_v4, %v979_v34  ;;  %v610_v49 = vpop.f32.mrf.mxu0  ;;  %v803_v50 = vpop.f32.mrf.mxu1  ;;  %v1263_v31 = vld [vmem:[%s2333_s26 + $0x68] sm:$0xff]  ;;  %v1265_v32 = vld [vmem:[%s2333_s26 + $0x78] sm:$0xff] }
 0x100   : > { %1635 = vst [vmem:[%s2370_s30 + $0x8] sm:$0xff] %v1507_v37  ;;  %1637 = vst [vmem:[%s2370_s30 + $0x18] sm:$0xff] %v1509_v38  ;;  %v1130_v51 = vadd.f32 %v2335_v59, %v980_v41  ;;  %v1132_v52 = vadd.f32 %v2337_v60, %v982_v42  ;;  %v981_v53 = vmul.f32 %v2339_v61, %v610_v49 }
 0x101   : > { %v983_v54 = vmul.f32 %v2341_v62, %v803_v50  ;;  %v1510_v55 = vmax.f32 %v1382_v43, 0.0  ;;  %v1512_v56 = vmax.f32 %v1384_v44, 0.0  ;;  %v1383_v63 = vadd.f32 %v1255_v39, %v1127_v45  ;;  %v612_v5 = vpop.f32.mrf.mxu0  ;;  %v805_v6 = vpop.f32.mrf.mxu1  ;;  %v1266_v39 = vld [vmem:[%s2333_s26 + $0x80] sm:$0xff] }
 0x102   : > { %v1385_v0 = vadd.f32 %v1257_v40, %v1129_v46  ;;  %v1386_v7 = vadd.f32 %v1258_v47, %v1130_v51  ;;  %v1388_v8 = vadd.f32 %v1260_v48, %v1132_v52  ;;  %v1131_v9 = vadd.f32 %v2346_v3, %v981_v53  ;;  %v1268_v40 = vld [vmem:[%s2333_s26 + $0x90] sm:$0xff]  ;;  %v1267_v51 = vld [vmem:[%s2333_s26 + $0x88] sm:$0xff]  ;;  %v1269_v52 = vld [vmem:[%s2333_s26 + $0x98] sm:$0xff] }
 0x103   : > { %v1133_v10 = vadd.f32 %v2348_v4, %v983_v54  ;;  %1638 = vst [vmem:[%s2370_s30 + $0x20] sm:$0xff] %v1510_v55  ;;  %1640 = vst [vmem:[%s2370_s30 + $0x30] sm:$0xff] %v1512_v56  ;;  %v1511_v11 = vmax.f32 %v1383_v63, 0.0  ;;  %v984_v13 = vmul.f32 %v2326_v57, %v612_v5  ;;  %v986_v14 = vmul.f32 %v2328_v58, %v805_v6  ;;  %v614_v15 = vpop.f32.mrf.mxu0  ;;  %v807_v16 = vpop.f32.mrf.mxu1 }
 0x104   : > { %v1513_v12 = vmax.f32 %v1385_v0, 0.0  ;;  %v1514_v17 = vmax.f32 %v1386_v7, 0.0  ;;  %v1516_v18 = vmax.f32 %v1388_v8, 0.0  ;;  %v1387_v19 = vadd.f32 %v1259_v1, %v1131_v9 }
 0x105   : > { %v1389_v20 = vadd.f32 %v1261_v2, %v1133_v10  ;;  %1639 = vst [vmem:[%s2370_s30 + $0x28] sm:$0xff] %v1511_v11  ;;  %v1134_v23 = vadd.f32 %v2335_v59, %v984_v13  ;;  %v1136_v24 = vadd.f32 %v2337_v60, %v986_v14  ;;  %v985_v25 = vmul.f32 %v2339_v61, %v614_v15  ;;  %v618_v27 = vpop.f32.mrf.mxu0  ;;  %v811_v28 = vpop.f32.mrf.mxu1  ;;  %v1270_v13 = vld [vmem:[%s2333_s26 + $0xa0] sm:$0xff]  ;;  %v1272_v14 = vld [vmem:[%s2333_s26 + $0xb0] sm:$0xff] }
 0x106   : > { %1641 = vst [vmem:[%s2370_s30 + $0x38] sm:$0xff] %v1513_v12  ;;  %v987_v26 = vmul.f32 %v2341_v62, %v807_v16  ;;  %1642 = vst [vmem:[%s2370_s30 + $0x40] sm:$0xff] %v1514_v17  ;;  %v1515_v29 = vmax.f32 %v1387_v19, 0.0  ;;  %v988_v33 = vmul.f32 %v2326_v57, %v618_v27  ;;  %v990_v34 = vmul.f32 %v2328_v58, %v811_v28 }
 0x107   : > { %1644 = vst [vmem:[%s2370_s30 + $0x50] sm:$0xff] %v1516_v18  ;;  %v1517_v30 = vmax.f32 %v1389_v20, 0.0  ;;  %v1390_v35 = vadd.f32 %v1262_v21, %v1134_v23  ;;  %v1392_v36 = vadd.f32 %v1264_v22, %v1136_v24  ;;  %v1135_v37 = vadd.f32 %v2346_v3, %v985_v25  ;;  %v620_v41 = vpop.f32.mrf.mxu0  ;;  %v813_v42 = vpop.f32.mrf.mxu1  ;;  %v1271_v23 = vld [vmem:[%s2333_s26 + $0xa8] sm:$0xff]  ;;  %v1273_v24 = vld [vmem:[%s2333_s26 + $0xb8] sm:$0xff] }
 0x108   : > { %v1137_v38 = vadd.f32 %v2348_v4, %v987_v26  ;;  %1643 = vst [vmem:[%s2370_s30 + $0x48] sm:$0xff] %v1515_v29  ;;  %v1138_v43 = vadd.f32 %v2335_v59, %v988_v33  ;;  %v1140_v44 = vadd.f32 %v2337_v60, %v990_v34  ;;  %v989_v45 = vmul.f32 %v2339_v61, %v620_v41 }
 0x109   : > { %1645 = vst [vmem:[%s2370_s30 + $0x58] sm:$0xff] %v1517_v30  ;;  %v991_v46 = vmul.f32 %v2341_v62, %v813_v42  ;;  %v1518_v47 = vmax.f32 %v1390_v35, 0.0  ;;  %v1520_v48 = vmax.f32 %v1392_v36, 0.0  ;;  %v1391_v49 = vadd.f32 %v1263_v31, %v1135_v37  ;;  %v622_v53 = vpop.f32.mrf.mxu0  ;;  %v815_v54 = vpop.f32.mrf.mxu1  ;;  %v1274_v31 = vld [vmem:[%s2333_s26 + $0xc0] sm:$0xff] }
 0x10a   : > { %v1393_v50 = vadd.f32 %v1265_v32, %v1137_v38  ;;  %v1394_v55 = vadd.f32 %v1266_v39, %v1138_v43  ;;  %v1396_v56 = vadd.f32 %v1268_v40, %v1140_v44  ;;  %v1139_v63 = vadd.f32 %v2346_v3, %v989_v45  ;;  %v1276_v32 = vld [vmem:[%s2333_s26 + $0xd0] sm:$0xff]  ;;  %v1275_v43 = vld [vmem:[%s2333_s26 + $0xc8] sm:$0xff]  ;;  %v1277_v44 = vld [vmem:[%s2333_s26 + $0xd8] sm:$0xff] }
 0x10b   : > { %v1141_v0 = vadd.f32 %v2348_v4, %v991_v46  ;;  %1646 = vst [vmem:[%s2370_s30 + $0x60] sm:$0xff] %v1518_v47  ;;  %1648 = vst [vmem:[%s2370_s30 + $0x70] sm:$0xff] %v1520_v48  ;;  %v1519_v1 = vmax.f32 %v1391_v49, 0.0  ;;  %v992_v5 = vmul.f32 %v2326_v57, %v622_v53  ;;  %v994_v6 = vmul.f32 %v2328_v58, %v815_v54  ;;  %v624_v7 = vpop.f32.mrf.mxu0  ;;  %v817_v8 = vpop.f32.mrf.mxu1 }
 0x10c   : > { %v1521_v2 = vmax.f32 %v1393_v50, 0.0  ;;  %v1522_v9 = vmax.f32 %v1394_v55, 0.0  ;;  %v1524_v10 = vmax.f32 %v1396_v56, 0.0  ;;  %v1395_v11 = vadd.f32 %v1267_v51, %v1139_v63 }
 0x10d   : > { %v1397_v12 = vadd.f32 %v1269_v52, %v1141_v0  ;;  %1647 = vst [vmem:[%s2370_s30 + $0x68] sm:$0xff] %v1519_v1  ;;  %v1142_v15 = vadd.f32 %v2335_v59, %v992_v5  ;;  %v1144_v16 = vadd.f32 %v2337_v60, %v994_v6  ;;  %v993_v17 = vmul.f32 %v2339_v61, %v624_v7  ;;  %v628_v19 = vpop.f32.mrf.mxu0  ;;  %v821_v20 = vpop.f32.mrf.mxu1  ;;  %v1278_v5 = vld [vmem:[%s2333_s26 + $0xe0] sm:$0xff]  ;;  %v1280_v6 = vld [vmem:[%s2333_s26 + $0xf0] sm:$0xff] }
 0x10e   : > { %1649 = vst [vmem:[%s2370_s30 + $0x78] sm:$0xff] %v1521_v2  ;;  %v995_v18 = vmul.f32 %v2341_v62, %v817_v8  ;;  %1650 = vst [vmem:[%s2370_s30 + $0x80] sm:$0xff] %v1522_v9  ;;  %v1523_v21 = vmax.f32 %v1395_v11, 0.0  ;;  %v996_v25 = vmul.f32 %v2326_v57, %v628_v19  ;;  %v998_v26 = vmul.f32 %v2328_v58, %v821_v20 }
 0x10f   : > { %1652 = vst [vmem:[%s2370_s30 + $0x90] sm:$0xff] %v1524_v10  ;;  %v1525_v22 = vmax.f32 %v1397_v12, 0.0  ;;  %v1398_v27 = vadd.f32 %v1270_v13, %v1142_v15  ;;  %v1400_v28 = vadd.f32 %v1272_v14, %v1144_v16  ;;  %v1143_v29 = vadd.f32 %v2346_v3, %v993_v17  ;;  %v630_v33 = vpop.f32.mrf.mxu0  ;;  %v823_v34 = vpop.f32.mrf.mxu1  ;;  %v1279_v15 = vld [vmem:[%s2333_s26 + $0xe8] sm:$0xff]  ;;  %v1281_v16 = vld [vmem:[%s2333_s26 + $0xf8] sm:$0xff] }
 0x110   : > { %v1145_v30 = vadd.f32 %v2348_v4, %v995_v18  ;;  %1651 = vst [vmem:[%s2370_s30 + $0x88] sm:$0xff] %v1523_v21  ;;  %v1146_v35 = vadd.f32 %v2335_v59, %v996_v25  ;;  %v1148_v36 = vadd.f32 %v2337_v60, %v998_v26  ;;  %v997_v37 = vmul.f32 %v2339_v61, %v630_v33 }
 0x111   : > { %1653 = vst [vmem:[%s2370_s30 + $0x98] sm:$0xff] %v1525_v22  ;;  %v999_v38 = vmul.f32 %v2341_v62, %v823_v34  ;;  %v1526_v39 = vmax.f32 %v1398_v27, 0.0  ;;  %v1528_v40 = vmax.f32 %v1400_v28, 0.0  ;;  %v1399_v41 = vadd.f32 %v1271_v23, %v1143_v29  ;;  %v632_v45 = vpop.f32.mrf.mxu0  ;;  %v825_v46 = vpop.f32.mrf.mxu1  ;;  %v1282_v23 = vld [vmem:[%s2333_s26 + $0x100] sm:$0xff] }
 0x112   : > { %v1401_v42 = vadd.f32 %v1273_v24, %v1145_v30  ;;  %v1402_v47 = vadd.f32 %v1274_v31, %v1146_v35  ;;  %v1404_v48 = vadd.f32 %v1276_v32, %v1148_v36  ;;  %v1147_v49 = vadd.f32 %v2346_v3, %v997_v37  ;;  %v1284_v24 = vld [vmem:[%s2333_s26 + $0x110] sm:$0xff]  ;;  %v1283_v35 = vld [vmem:[%s2333_s26 + $0x108] sm:$0xff]  ;;  %v1285_v36 = vld [vmem:[%s2333_s26 + $0x118] sm:$0xff] }
 0x113   : > { %v1149_v50 = vadd.f32 %v2348_v4, %v999_v38  ;;  %1654 = vst [vmem:[%s2370_s30 + $0xa0] sm:$0xff] %v1526_v39  ;;  %1656 = vst [vmem:[%s2370_s30 + $0xb0] sm:$0xff] %v1528_v40  ;;  %v1527_v51 = vmax.f32 %v1399_v41, 0.0  ;;  %v1000_v53 = vmul.f32 %v2326_v57, %v632_v45  ;;  %v1002_v54 = vmul.f32 %v2328_v58, %v825_v46  ;;  %v634_v55 = vpop.f32.mrf.mxu0  ;;  %v827_v56 = vpop.f32.mrf.mxu1 }
 0x114   : > { %v1529_v52 = vmax.f32 %v1401_v42, 0.0  ;;  %v1530_v63 = vmax.f32 %v1402_v47, 0.0  ;;  %v1532_v0 = vmax.f32 %v1404_v48, 0.0  ;;  %v1403_v1 = vadd.f32 %v1275_v43, %v1147_v49 }
 0x115   : > { %v1405_v2 = vadd.f32 %v1277_v44, %v1149_v50  ;;  %1655 = vst [vmem:[%s2370_s30 + $0xa8] sm:$0xff] %v1527_v51  ;;  %v1150_v7 = vadd.f32 %v2335_v59, %v1000_v53  ;;  %v1152_v8 = vadd.f32 %v2337_v60, %v1002_v54  ;;  %v1001_v9 = vmul.f32 %v2339_v61, %v634_v55  ;;  %v638_v11 = vpop.f32.mrf.mxu0  ;;  %v831_v12 = vpop.f32.mrf.mxu1  ;;  %v1286_v53 = vld [vmem:[%s2333_s26 + $0x120] sm:$0xff]  ;;  %v1288_v54 = vld [vmem:[%s2333_s26 + $0x130] sm:$0xff] }
 0x116   : > { %1657 = vst [vmem:[%s2370_s30 + $0xb8] sm:$0xff] %v1529_v52  ;;  %v1003_v10 = vmul.f32 %v2341_v62, %v827_v56  ;;  %1658 = vst [vmem:[%s2370_s30 + $0xc0] sm:$0xff] %v1530_v63  ;;  %v1531_v13 = vmax.f32 %v1403_v1, 0.0  ;;  %v1004_v17 = vmul.f32 %v2326_v57, %v638_v11  ;;  %v1006_v18 = vmul.f32 %v2328_v58, %v831_v12 }
 0x117   : > { %1660 = vst [vmem:[%s2370_s30 + $0xd0] sm:$0xff] %v1532_v0  ;;  %v1533_v14 = vmax.f32 %v1405_v2, 0.0  ;;  %v1406_v19 = vadd.f32 %v1278_v5, %v1150_v7  ;;  %v1408_v20 = vadd.f32 %v1280_v6, %v1152_v8  ;;  %v1151_v21 = vadd.f32 %v2346_v3, %v1001_v9  ;;  %v640_v25 = vpop.f32.mrf.mxu0  ;;  %v833_v26 = vpop.f32.mrf.mxu1  ;;  %v1287_v7 = vld [vmem:[%s2333_s26 + $0x128] sm:$0xff]  ;;  %v1289_v8 = vld [vmem:[%s2333_s26 + $0x138] sm:$0xff] }
 0x118   : > { %v1153_v22 = vadd.f32 %v2348_v4, %v1003_v10  ;;  %1659 = vst [vmem:[%s2370_s30 + $0xc8] sm:$0xff] %v1531_v13  ;;  %v1154_v27 = vadd.f32 %v2335_v59, %v1004_v17  ;;  %v1156_v28 = vadd.f32 %v2337_v60, %v1006_v18  ;;  %v1005_v29 = vmul.f32 %v2339_v61, %v640_v25 }
 0x119   : > { %1661 = vst [vmem:[%s2370_s30 + $0xd8] sm:$0xff] %v1533_v14  ;;  %v1007_v30 = vmul.f32 %v2341_v62, %v833_v26  ;;  %v1534_v31 = vmax.f32 %v1406_v19, 0.0  ;;  %v1536_v32 = vmax.f32 %v1408_v20, 0.0  ;;  %v1407_v33 = vadd.f32 %v1279_v15, %v1151_v21  ;;  %v642_v37 = vpop.f32.mrf.mxu0  ;;  %v835_v38 = vpop.f32.mrf.mxu1  ;;  %v1290_v15 = vld [vmem:[%s2333_s26 + $0x140] sm:$0xff] }
 0x11a   : > { %v1409_v34 = vadd.f32 %v1281_v16, %v1153_v22  ;;  %v1410_v39 = vadd.f32 %v1282_v23, %v1154_v27  ;;  %v1412_v40 = vadd.f32 %v1284_v24, %v1156_v28  ;;  %v1155_v41 = vadd.f32 %v2346_v3, %v1005_v29  ;;  %v1292_v16 = vld [vmem:[%s2333_s26 + $0x150] sm:$0xff]  ;;  %v1291_v27 = vld [vmem:[%s2333_s26 + $0x148] sm:$0xff]  ;;  %v1293_v28 = vld [vmem:[%s2333_s26 + $0x158] sm:$0xff] }
 0x11b   : > { %v1157_v42 = vadd.f32 %v2348_v4, %v1007_v30  ;;  %1662 = vst [vmem:[%s2370_s30 + $0xe0] sm:$0xff] %v1534_v31  ;;  %1664 = vst [vmem:[%s2370_s30 + $0xf0] sm:$0xff] %v1536_v32  ;;  %v1535_v43 = vmax.f32 %v1407_v33, 0.0  ;;  %v1008_v45 = vmul.f32 %v2326_v57, %v642_v37  ;;  %v1010_v46 = vmul.f32 %v2328_v58, %v835_v38  ;;  %v644_v47 = vpop.f32.mrf.mxu0  ;;  %v837_v48 = vpop.f32.mrf.mxu1 }
 0x11c   : > { %v1537_v44 = vmax.f32 %v1409_v34, 0.0  ;;  %v1538_v49 = vmax.f32 %v1410_v39, 0.0  ;;  %v1540_v50 = vmax.f32 %v1412_v40, 0.0  ;;  %v1411_v51 = vadd.f32 %v1283_v35, %v1155_v41 }
 0x11d   : > { %v1413_v52 = vadd.f32 %v1285_v36, %v1157_v42  ;;  %1663 = vst [vmem:[%s2370_s30 + $0xe8] sm:$0xff] %v1535_v43  ;;  %v1158_v55 = vadd.f32 %v2335_v59, %v1008_v45  ;;  %v1160_v56 = vadd.f32 %v2337_v60, %v1010_v46  ;;  %v1009_v63 = vmul.f32 %v2339_v61, %v644_v47  ;;  %v648_v1 = vpop.f32.mrf.mxu0  ;;  %v841_v2 = vpop.f32.mrf.mxu1  ;;  %v1294_v45 = vld [vmem:[%s2333_s26 + $0x160] sm:$0xff]  ;;  %v1296_v46 = vld [vmem:[%s2333_s26 + $0x170] sm:$0xff] }
 0x11e   : > { %1665 = vst [vmem:[%s2370_s30 + $0xf8] sm:$0xff] %v1537_v44  ;;  %v1011_v0 = vmul.f32 %v2341_v62, %v837_v48  ;;  %1666 = vst [vmem:[%s2370_s30 + $0x100] sm:$0xff] %v1538_v49  ;;  %v1539_v5 = vmax.f32 %v1411_v51, 0.0  ;;  %v1012_v9 = vmul.f32 %v2326_v57, %v648_v1  ;;  %v1014_v10 = vmul.f32 %v2328_v58, %v841_v2 }
 0x11f   : > { %1668 = vst [vmem:[%s2370_s30 + $0x110] sm:$0xff] %v1540_v50  ;;  %v1541_v6 = vmax.f32 %v1413_v52, 0.0  ;;  %v1414_v11 = vadd.f32 %v1286_v53, %v1158_v55  ;;  %v1416_v12 = vadd.f32 %v1288_v54, %v1160_v56  ;;  %v1159_v13 = vadd.f32 %v2346_v3, %v1009_v63  ;;  %v650_v17 = vpop.f32.mrf.mxu0  ;;  %v843_v18 = vpop.f32.mrf.mxu1  ;;  %v1295_v55 = vld [vmem:[%s2333_s26 + $0x168] sm:$0xff]  ;;  %v1297_v56 = vld [vmem:[%s2333_s26 + $0x178] sm:$0xff] }
 0x120   : > { %v1161_v14 = vadd.f32 %v2348_v4, %v1011_v0  ;;  %1667 = vst [vmem:[%s2370_s30 + $0x108] sm:$0xff] %v1539_v5  ;;  %v1162_v19 = vadd.f32 %v2335_v59, %v1012_v9  ;;  %v1164_v20 = vadd.f32 %v2337_v60, %v1014_v10  ;;  %v1013_v21 = vmul.f32 %v2339_v61, %v650_v17 }
 0x121   : > { %1669 = vst [vmem:[%s2370_s30 + $0x118] sm:$0xff] %v1541_v6  ;;  %v1015_v22 = vmul.f32 %v2341_v62, %v843_v18  ;;  %v1542_v23 = vmax.f32 %v1414_v11, 0.0  ;;  %v1544_v24 = vmax.f32 %v1416_v12, 0.0  ;;  %v1415_v25 = vadd.f32 %v1287_v7, %v1159_v13  ;;  %v652_v29 = vpop.f32.mrf.mxu0  ;;  %v845_v30 = vpop.f32.mrf.mxu1  ;;  %v1298_v7 = vld [vmem:[%s2333_s26 + $0x180] sm:$0xff] }
 0x122   : > { %v1417_v26 = vadd.f32 %v1289_v8, %v1161_v14  ;;  %v1418_v31 = vadd.f32 %v1290_v15, %v1162_v19  ;;  %v1420_v32 = vadd.f32 %v1292_v16, %v1164_v20  ;;  %v1163_v33 = vadd.f32 %v2346_v3, %v1013_v21  ;;  %v1300_v8 = vld [vmem:[%s2333_s26 + $0x190] sm:$0xff]  ;;  %v1299_v19 = vld [vmem:[%s2333_s26 + $0x188] sm:$0xff]  ;;  %v1301_v20 = vld [vmem:[%s2333_s26 + $0x198] sm:$0xff] }
 0x123   : > { %v1165_v34 = vadd.f32 %v2348_v4, %v1015_v22  ;;  %1670 = vst [vmem:[%s2370_s30 + $0x120] sm:$0xff] %v1542_v23  ;;  %1672 = vst [vmem:[%s2370_s30 + $0x130] sm:$0xff] %v1544_v24  ;;  %v1543_v35 = vmax.f32 %v1415_v25, 0.0  ;;  %v1016_v37 = vmul.f32 %v2326_v57, %v652_v29  ;;  %v1018_v38 = vmul.f32 %v2328_v58, %v845_v30  ;;  %v654_v39 = vpop.f32.mrf.mxu0  ;;  %v847_v40 = vpop.f32.mrf.mxu1 }
 0x124   : > { %v1545_v36 = vmax.f32 %v1417_v26, 0.0  ;;  %v1546_v41 = vmax.f32 %v1418_v31, 0.0  ;;  %v1548_v42 = vmax.f32 %v1420_v32, 0.0  ;;  %v1419_v43 = vadd.f32 %v1291_v27, %v1163_v33 }
 0x125   : > { %v1421_v44 = vadd.f32 %v1293_v28, %v1165_v34  ;;  %1671 = vst [vmem:[%s2370_s30 + $0x128] sm:$0xff] %v1543_v35  ;;  %v1166_v47 = vadd.f32 %v2335_v59, %v1016_v37  ;;  %v1168_v48 = vadd.f32 %v2337_v60, %v1018_v38  ;;  %v1017_v49 = vmul.f32 %v2339_v61, %v654_v39  ;;  %v658_v51 = vpop.f32.mrf.mxu0  ;;  %v851_v52 = vpop.f32.mrf.mxu1  ;;  %v1302_v37 = vld [vmem:[%s2333_s26 + $0x1a0] sm:$0xff]  ;;  %v1304_v38 = vld [vmem:[%s2333_s26 + $0x1b0] sm:$0xff] }
 0x126   : > { %1673 = vst [vmem:[%s2370_s30 + $0x138] sm:$0xff] %v1545_v36  ;;  %v1019_v50 = vmul.f32 %v2341_v62, %v847_v40  ;;  %1674 = vst [vmem:[%s2370_s30 + $0x140] sm:$0xff] %v1546_v41  ;;  %v1547_v53 = vmax.f32 %v1419_v43, 0.0  ;;  %v1020_v63 = vmul.f32 %v2326_v57, %v658_v51  ;;  %v1022_v0 = vmul.f32 %v2328_v58, %v851_v52 }
 0x127   : > { %1676 = vst [vmem:[%s2370_s30 + $0x150] sm:$0xff] %v1548_v42  ;;  %v1549_v54 = vmax.f32 %v1421_v44, 0.0  ;;  %v1422_v1 = vadd.f32 %v1294_v45, %v1166_v47  ;;  %v1424_v2 = vadd.f32 %v1296_v46, %v1168_v48  ;;  %v1167_v5 = vadd.f32 %v2346_v3, %v1017_v49  ;;  %v660_v9 = vpop.f32.mrf.mxu0  ;;  %v853_v10 = vpop.f32.mrf.mxu1  ;;  %v1303_v47 = vld [vmem:[%s2333_s26 + $0x1a8] sm:$0xff]  ;;  %v1305_v48 = vld [vmem:[%s2333_s26 + $0x1b8] sm:$0xff] }
 0x128   : > { %v1169_v6 = vadd.f32 %v2348_v4, %v1019_v50  ;;  %1675 = vst [vmem:[%s2370_s30 + $0x148] sm:$0xff] %v1547_v53  ;;  %v1170_v11 = vadd.f32 %v2335_v59, %v1020_v63  ;;  %v1172_v12 = vadd.f32 %v2337_v60, %v1022_v0  ;;  %v1021_v13 = vmul.f32 %v2339_v61, %v660_v9 }
 0x129   : > { %1677 = vst [vmem:[%s2370_s30 + $0x158] sm:$0xff] %v1549_v54  ;;  %v1023_v14 = vmul.f32 %v2341_v62, %v853_v10  ;;  %v1550_v15 = vmax.f32 %v1422_v1, 0.0  ;;  %v1552_v16 = vmax.f32 %v1424_v2, 0.0  ;;  %v1423_v17 = vadd.f32 %v1295_v55, %v1167_v5  ;;  %v662_v21 = vpop.f32.mrf.mxu0  ;;  %v855_v22 = vpop.f32.mrf.mxu1  ;;  %v1306_v55 = vld [vmem:[%s2333_s26 + $0x1c0] sm:$0xff] }
 0x12a   : > { %v1425_v18 = vadd.f32 %v1297_v56, %v1169_v6  ;;  %v1426_v23 = vadd.f32 %v1298_v7, %v1170_v11  ;;  %v1428_v24 = vadd.f32 %v1300_v8, %v1172_v12  ;;  %v1171_v25 = vadd.f32 %v2346_v3, %v1021_v13  ;;  %v1308_v56 = vld [vmem:[%s2333_s26 + $0x1d0] sm:$0xff]  ;;  %v1307_v11 = vld [vmem:[%s2333_s26 + $0x1c8] sm:$0xff]  ;;  %v1309_v12 = vld [vmem:[%s2333_s26 + $0x1d8] sm:$0xff] }
 0x12b   : > { %v1173_v26 = vadd.f32 %v2348_v4, %v1023_v14  ;;  %1678 = vst [vmem:[%s2370_s30 + $0x160] sm:$0xff] %v1550_v15  ;;  %1680 = vst [vmem:[%s2370_s30 + $0x170] sm:$0xff] %v1552_v16  ;;  %v1551_v27 = vmax.f32 %v1423_v17, 0.0  ;;  %v1024_v29 = vmul.f32 %v2326_v57, %v662_v21  ;;  %v1026_v30 = vmul.f32 %v2328_v58, %v855_v22  ;;  %v664_v31 = vpop.f32.mrf.mxu0  ;;  %v857_v32 = vpop.f32.mrf.mxu1 }
 0x12c   : > { %v1553_v28 = vmax.f32 %v1425_v18, 0.0  ;;  %v1554_v33 = vmax.f32 %v1426_v23, 0.0  ;;  %v1556_v34 = vmax.f32 %v1428_v24, 0.0  ;;  %v1427_v35 = vadd.f32 %v1299_v19, %v1171_v25 }
 0x12d   : > { %v1429_v36 = vadd.f32 %v1301_v20, %v1173_v26  ;;  %1679 = vst [vmem:[%s2370_s30 + $0x168] sm:$0xff] %v1551_v27  ;;  %v1174_v39 = vadd.f32 %v2335_v59, %v1024_v29  ;;  %v1176_v40 = vadd.f32 %v2337_v60, %v1026_v30  ;;  %v1025_v41 = vmul.f32 %v2339_v61, %v664_v31  ;;  %v668_v43 = vpop.f32.mrf.mxu0  ;;  %v861_v44 = vpop.f32.mrf.mxu1  ;;  %v1310_v29 = vld [vmem:[%s2333_s26 + $0x1e0] sm:$0xff]  ;;  %v1312_v30 = vld [vmem:[%s2333_s26 + $0x1f0] sm:$0xff] }
 0x12e   : > { %1681 = vst [vmem:[%s2370_s30 + $0x178] sm:$0xff] %v1553_v28  ;;  %v1027_v42 = vmul.f32 %v2341_v62, %v857_v32  ;;  %1682 = vst [vmem:[%s2370_s30 + $0x180] sm:$0xff] %v1554_v33  ;;  %v1555_v45 = vmax.f32 %v1427_v35, 0.0  ;;  %v1028_v49 = vmul.f32 %v2326_v57, %v668_v43  ;;  %v1030_v50 = vmul.f32 %v2328_v58, %v861_v44 }
 0x12f   : > { %1684 = vst [vmem:[%s2370_s30 + $0x190] sm:$0xff] %v1556_v34  ;;  %v1557_v46 = vmax.f32 %v1429_v36, 0.0  ;;  %v1430_v51 = vadd.f32 %v1302_v37, %v1174_v39  ;;  %v1432_v52 = vadd.f32 %v1304_v38, %v1176_v40  ;;  %v1175_v53 = vadd.f32 %v2346_v3, %v1025_v41  ;;  %v670_v63 = vpop.f32.mrf.mxu0  ;;  %v863_v0 = vpop.f32.mrf.mxu1  ;;  %v1311_v39 = vld [vmem:[%s2333_s26 + $0x1e8] sm:$0xff]  ;;  %v1313_v40 = vld [vmem:[%s2333_s26 + $0x1f8] sm:$0xff] }
 0x130   : > { %v1177_v54 = vadd.f32 %v2348_v4, %v1027_v42  ;;  %1683 = vst [vmem:[%s2370_s30 + $0x188] sm:$0xff] %v1555_v45  ;;  %v1178_v1 = vadd.f32 %v2335_v59, %v1028_v49  ;;  %v1180_v2 = vadd.f32 %v2337_v60, %v1030_v50  ;;  %v1029_v5 = vmul.f32 %v2339_v61, %v670_v63 }
 0x131   : > { %1685 = vst [vmem:[%s2370_s30 + $0x198] sm:$0xff] %v1557_v46  ;;  %v1031_v6 = vmul.f32 %v2341_v62, %v863_v0  ;;  %v1558_v7 = vmax.f32 %v1430_v51, 0.0  ;;  %v1560_v8 = vmax.f32 %v1432_v52, 0.0  ;;  %v1431_v9 = vadd.f32 %v1303_v47, %v1175_v53  ;;  %v672_v13 = vpop.f32.mrf.mxu0  ;;  %v865_v14 = vpop.f32.mrf.mxu1  ;;  %v1314_v47 = vld [vmem:[%s2333_s26 + $0x200] sm:$0xff] }
 0x132   : > { %v1433_v10 = vadd.f32 %v1305_v48, %v1177_v54  ;;  %v1434_v15 = vadd.f32 %v1306_v55, %v1178_v1  ;;  %v1436_v16 = vadd.f32 %v1308_v56, %v1180_v2  ;;  %v1179_v17 = vadd.f32 %v2346_v3, %v1029_v5  ;;  %v1316_v48 = vld [vmem:[%s2333_s26 + $0x210] sm:$0xff]  ;;  %v1315_v1 = vld [vmem:[%s2333_s26 + $0x208] sm:$0xff]  ;;  %v1317_v2 = vld [vmem:[%s2333_s26 + $0x218] sm:$0xff] }
 0x133   : > { %v1181_v18 = vadd.f32 %v2348_v4, %v1031_v6  ;;  %1686 = vst [vmem:[%s2370_s30 + $0x1a0] sm:$0xff] %v1558_v7  ;;  %1688 = vst [vmem:[%s2370_s30 + $0x1b0] sm:$0xff] %v1560_v8  ;;  %v1559_v19 = vmax.f32 %v1431_v9, 0.0  ;;  %v1032_v21 = vmul.f32 %v2326_v57, %v672_v13  ;;  %v1034_v22 = vmul.f32 %v2328_v58, %v865_v14  ;;  %v674_v23 = vpop.f32.mrf.mxu0  ;;  %v867_v24 = vpop.f32.mrf.mxu1 }
 0x134   : > { %v1561_v20 = vmax.f32 %v1433_v10, 0.0  ;;  %v1562_v25 = vmax.f32 %v1434_v15, 0.0  ;;  %v1564_v26 = vmax.f32 %v1436_v16, 0.0  ;;  %v1435_v27 = vadd.f32 %v1307_v11, %v1179_v17 }
 0x135   : > { %v1437_v28 = vadd.f32 %v1309_v12, %v1181_v18  ;;  %1687 = vst [vmem:[%s2370_s30 + $0x1a8] sm:$0xff] %v1559_v19  ;;  %v1182_v31 = vadd.f32 %v2335_v59, %v1032_v21  ;;  %v1184_v32 = vadd.f32 %v2337_v60, %v1034_v22  ;;  %v1033_v33 = vmul.f32 %v2339_v61, %v674_v23  ;;  %v678_v35 = vpop.f32.mrf.mxu0  ;;  %v871_v36 = vpop.f32.mrf.mxu1  ;;  %v1318_v21 = vld [vmem:[%s2333_s26 + $0x220] sm:$0xff]  ;;  %v1320_v22 = vld [vmem:[%s2333_s26 + $0x230] sm:$0xff] }
 0x136   : > { %1689 = vst [vmem:[%s2370_s30 + $0x1b8] sm:$0xff] %v1561_v20  ;;  %v1035_v34 = vmul.f32 %v2341_v62, %v867_v24  ;;  %1690 = vst [vmem:[%s2370_s30 + $0x1c0] sm:$0xff] %v1562_v25  ;;  %v1563_v37 = vmax.f32 %v1435_v27, 0.0  ;;  %v1036_v41 = vmul.f32 %v2326_v57, %v678_v35  ;;  %v1038_v42 = vmul.f32 %v2328_v58, %v871_v36 }
 0x137   : > { %1692 = vst [vmem:[%s2370_s30 + $0x1d0] sm:$0xff] %v1564_v26  ;;  %v1565_v38 = vmax.f32 %v1437_v28, 0.0  ;;  %v1438_v43 = vadd.f32 %v1310_v29, %v1182_v31  ;;  %v1440_v44 = vadd.f32 %v1312_v30, %v1184_v32  ;;  %v1183_v45 = vadd.f32 %v2346_v3, %v1033_v33  ;;  %v680_v49 = vpop.f32.mrf.mxu0  ;;  %v873_v50 = vpop.f32.mrf.mxu1  ;;  %v1319_v31 = vld [vmem:[%s2333_s26 + $0x228] sm:$0xff]  ;;  %v1321_v32 = vld [vmem:[%s2333_s26 + $0x238] sm:$0xff] }
 0x138   : > { %v1185_v46 = vadd.f32 %v2348_v4, %v1035_v34  ;;  %1691 = vst [vmem:[%s2370_s30 + $0x1c8] sm:$0xff] %v1563_v37  ;;  %v1186_v51 = vadd.f32 %v2335_v59, %v1036_v41  ;;  %v1188_v52 = vadd.f32 %v2337_v60, %v1038_v42  ;;  %v1037_v53 = vmul.f32 %v2339_v61, %v680_v49 }
 0x139   : > { %1693 = vst [vmem:[%s2370_s30 + $0x1d8] sm:$0xff] %v1565_v38  ;;  %v1039_v54 = vmul.f32 %v2341_v62, %v873_v50  ;;  %v1566_v55 = vmax.f32 %v1438_v43, 0.0  ;;  %v1568_v56 = vmax.f32 %v1440_v44, 0.0  ;;  %v1439_v63 = vadd.f32 %v1311_v39, %v1183_v45  ;;  %v682_v5 = vpop.f32.mrf.mxu0  ;;  %v875_v6 = vpop.f32.mrf.mxu1  ;;  %v1322_v39 = vld [vmem:[%s2333_s26 + $0x240] sm:$0xff] }
 0x13a   : > { %v1441_v0 = vadd.f32 %v1313_v40, %v1185_v46  ;;  %v1442_v7 = vadd.f32 %v1314_v47, %v1186_v51  ;;  %v1444_v8 = vadd.f32 %v1316_v48, %v1188_v52  ;;  %v1187_v9 = vadd.f32 %v2346_v3, %v1037_v53  ;;  %v1324_v40 = vld [vmem:[%s2333_s26 + $0x250] sm:$0xff]  ;;  %v1323_v51 = vld [vmem:[%s2333_s26 + $0x248] sm:$0xff]  ;;  %v1325_v52 = vld [vmem:[%s2333_s26 + $0x258] sm:$0xff] }
 0x13b   : > { %v1189_v10 = vadd.f32 %v2348_v4, %v1039_v54  ;;  %1694 = vst [vmem:[%s2370_s30 + $0x1e0] sm:$0xff] %v1566_v55  ;;  %1696 = vst [vmem:[%s2370_s30 + $0x1f0] sm:$0xff] %v1568_v56  ;;  %v1567_v11 = vmax.f32 %v1439_v63, 0.0  ;;  %v1040_v13 = vmul.f32 %v2326_v57, %v682_v5  ;;  %v1042_v14 = vmul.f32 %v2328_v58, %v875_v6  ;;  %v684_v15 = vpop.f32.mrf.mxu0  ;;  %v877_v16 = vpop.f32.mrf.mxu1 }
 0x13c   : > { %v1569_v12 = vmax.f32 %v1441_v0, 0.0  ;;  %v1570_v17 = vmax.f32 %v1442_v7, 0.0  ;;  %v1572_v18 = vmax.f32 %v1444_v8, 0.0  ;;  %v1443_v19 = vadd.f32 %v1315_v1, %v1187_v9 }
 0x13d   : > { %v1445_v20 = vadd.f32 %v1317_v2, %v1189_v10  ;;  %1695 = vst [vmem:[%s2370_s30 + $0x1e8] sm:$0xff] %v1567_v11  ;;  %v1190_v23 = vadd.f32 %v2335_v59, %v1040_v13  ;;  %v1192_v24 = vadd.f32 %v2337_v60, %v1042_v14  ;;  %v1041_v25 = vmul.f32 %v2339_v61, %v684_v15  ;;  %v688_v27 = vpop.f32.mrf.mxu0  ;;  %v881_v28 = vpop.f32.mrf.mxu1  ;;  %v1326_v13 = vld [vmem:[%s2333_s26 + $0x260] sm:$0xff]  ;;  %v1328_v14 = vld [vmem:[%s2333_s26 + $0x270] sm:$0xff] }
 0x13e   : > { %1697 = vst [vmem:[%s2370_s30 + $0x1f8] sm:$0xff] %v1569_v12  ;;  %v1043_v26 = vmul.f32 %v2341_v62, %v877_v16  ;;  %1698 = vst [vmem:[%s2370_s30 + $0x200] sm:$0xff] %v1570_v17  ;;  %v1571_v29 = vmax.f32 %v1443_v19, 0.0  ;;  %v1044_v33 = vmul.f32 %v2326_v57, %v688_v27  ;;  %v1046_v34 = vmul.f32 %v2328_v58, %v881_v28 }
 0x13f   : > { %1700 = vst [vmem:[%s2370_s30 + $0x210] sm:$0xff] %v1572_v18  ;;  %v1573_v30 = vmax.f32 %v1445_v20, 0.0  ;;  %v1446_v35 = vadd.f32 %v1318_v21, %v1190_v23  ;;  %v1448_v36 = vadd.f32 %v1320_v22, %v1192_v24  ;;  %v1191_v37 = vadd.f32 %v2346_v3, %v1041_v25  ;;  %v690_v41 = vpop.f32.mrf.mxu0  ;;  %v883_v42 = vpop.f32.mrf.mxu1  ;;  %v1327_v23 = vld [vmem:[%s2333_s26 + $0x268] sm:$0xff]  ;;  %v1329_v24 = vld [vmem:[%s2333_s26 + $0x278] sm:$0xff] }
 0x140   : > { %v1193_v38 = vadd.f32 %v2348_v4, %v1043_v26  ;;  %1699 = vst [vmem:[%s2370_s30 + $0x208] sm:$0xff] %v1571_v29  ;;  %v1194_v43 = vadd.f32 %v2335_v59, %v1044_v33  ;;  %v1196_v44 = vadd.f32 %v2337_v60, %v1046_v34  ;;  %v1045_v45 = vmul.f32 %v2339_v61, %v690_v41 }
 0x141   : > { %1701 = vst [vmem:[%s2370_s30 + $0x218] sm:$0xff] %v1573_v30  ;;  %v1047_v46 = vmul.f32 %v2341_v62, %v883_v42  ;;  %v1574_v47 = vmax.f32 %v1446_v35, 0.0  ;;  %v1576_v48 = vmax.f32 %v1448_v36, 0.0  ;;  %v1447_v49 = vadd.f32 %v1319_v31, %v1191_v37  ;;  %v692_v53 = vpop.f32.mrf.mxu0  ;;  %v885_v54 = vpop.f32.mrf.mxu1  ;;  %v1330_v31 = vld [vmem:[%s2333_s26 + $0x280] sm:$0xff] }
 0x142   : > { %v1449_v50 = vadd.f32 %v1321_v32, %v1193_v38  ;;  %v1450_v55 = vadd.f32 %v1322_v39, %v1194_v43  ;;  %v1452_v56 = vadd.f32 %v1324_v40, %v1196_v44  ;;  %v1195_v63 = vadd.f32 %v2346_v3, %v1045_v45  ;;  %v1332_v32 = vld [vmem:[%s2333_s26 + $0x290] sm:$0xff]  ;;  %v1331_v43 = vld [vmem:[%s2333_s26 + $0x288] sm:$0xff]  ;;  %v1333_v44 = vld [vmem:[%s2333_s26 + $0x298] sm:$0xff] }
 0x143   : > { %v1197_v0 = vadd.f32 %v2348_v4, %v1047_v46  ;;  %1702 = vst [vmem:[%s2370_s30 + $0x220] sm:$0xff] %v1574_v47  ;;  %1704 = vst [vmem:[%s2370_s30 + $0x230] sm:$0xff] %v1576_v48  ;;  %v1575_v1 = vmax.f32 %v1447_v49, 0.0  ;;  %v1048_v5 = vmul.f32 %v2326_v57, %v692_v53  ;;  %v1050_v6 = vmul.f32 %v2328_v58, %v885_v54  ;;  %v694_v7 = vpop.f32.mrf.mxu0  ;;  %v887_v8 = vpop.f32.mrf.mxu1 }
 0x144   : > { %v1577_v2 = vmax.f32 %v1449_v50, 0.0  ;;  %v1578_v9 = vmax.f32 %v1450_v55, 0.0  ;;  %v1580_v10 = vmax.f32 %v1452_v56, 0.0  ;;  %v1451_v11 = vadd.f32 %v1323_v51, %v1195_v63 }
 0x145   : > { %v1453_v12 = vadd.f32 %v1325_v52, %v1197_v0  ;;  %1703 = vst [vmem:[%s2370_s30 + $0x228] sm:$0xff] %v1575_v1  ;;  %v1198_v15 = vadd.f32 %v2335_v59, %v1048_v5  ;;  %v1200_v16 = vadd.f32 %v2337_v60, %v1050_v6  ;;  %v1049_v17 = vmul.f32 %v2339_v61, %v694_v7  ;;  %v698_v19 = vpop.f32.mrf.mxu0  ;;  %v891_v20 = vpop.f32.mrf.mxu1  ;;  %v1334_v5 = vld [vmem:[%s2333_s26 + $0x2a0] sm:$0xff]  ;;  %v1336_v6 = vld [vmem:[%s2333_s26 + $0x2b0] sm:$0xff] }
 0x146   : > { %1705 = vst [vmem:[%s2370_s30 + $0x238] sm:$0xff] %v1577_v2  ;;  %v1051_v18 = vmul.f32 %v2341_v62, %v887_v8  ;;  %1706 = vst [vmem:[%s2370_s30 + $0x240] sm:$0xff] %v1578_v9  ;;  %v1579_v21 = vmax.f32 %v1451_v11, 0.0  ;;  %v1052_v25 = vmul.f32 %v2326_v57, %v698_v19  ;;  %v1054_v26 = vmul.f32 %v2328_v58, %v891_v20 }
 0x147   : > { %1708 = vst [vmem:[%s2370_s30 + $0x250] sm:$0xff] %v1580_v10  ;;  %v1581_v22 = vmax.f32 %v1453_v12, 0.0  ;;  %v1454_v27 = vadd.f32 %v1326_v13, %v1198_v15  ;;  %v1456_v28 = vadd.f32 %v1328_v14, %v1200_v16  ;;  %v1199_v29 = vadd.f32 %v2346_v3, %v1049_v17  ;;  %v700_v33 = vpop.f32.mrf.mxu0  ;;  %v893_v34 = vpop.f32.mrf.mxu1  ;;  %v1335_v15 = vld [vmem:[%s2333_s26 + $0x2a8] sm:$0xff]  ;;  %v1337_v16 = vld [vmem:[%s2333_s26 + $0x2b8] sm:$0xff] }
 0x148   : > { %v1201_v30 = vadd.f32 %v2348_v4, %v1051_v18  ;;  %1707 = vst [vmem:[%s2370_s30 + $0x248] sm:$0xff] %v1579_v21  ;;  %v1202_v35 = vadd.f32 %v2335_v59, %v1052_v25  ;;  %v1204_v36 = vadd.f32 %v2337_v60, %v1054_v26  ;;  %v1053_v37 = vmul.f32 %v2339_v61, %v700_v33 }
 0x149   : > { %1709 = vst [vmem:[%s2370_s30 + $0x258] sm:$0xff] %v1581_v22  ;;  %v1055_v38 = vmul.f32 %v2341_v62, %v893_v34  ;;  %v1582_v39 = vmax.f32 %v1454_v27, 0.0  ;;  %v1584_v40 = vmax.f32 %v1456_v28, 0.0  ;;  %v1455_v41 = vadd.f32 %v1327_v23, %v1199_v29  ;;  %v702_v45 = vpop.f32.mrf.mxu0  ;;  %v895_v46 = vpop.f32.mrf.mxu1  ;;  %v1338_v23 = vld [vmem:[%s2333_s26 + $0x2c0] sm:$0xff] }
 0x14a   : > { %v1457_v42 = vadd.f32 %v1329_v24, %v1201_v30  ;;  %v1458_v47 = vadd.f32 %v1330_v31, %v1202_v35  ;;  %v1460_v48 = vadd.f32 %v1332_v32, %v1204_v36  ;;  %v1203_v49 = vadd.f32 %v2346_v3, %v1053_v37  ;;  %v1340_v24 = vld [vmem:[%s2333_s26 + $0x2d0] sm:$0xff]  ;;  %v1339_v35 = vld [vmem:[%s2333_s26 + $0x2c8] sm:$0xff]  ;;  %v1341_v36 = vld [vmem:[%s2333_s26 + $0x2d8] sm:$0xff] }
 0x14b   : > { %v1205_v50 = vadd.f32 %v2348_v4, %v1055_v38  ;;  %1710 = vst [vmem:[%s2370_s30 + $0x260] sm:$0xff] %v1582_v39  ;;  %1712 = vst [vmem:[%s2370_s30 + $0x270] sm:$0xff] %v1584_v40  ;;  %v1583_v51 = vmax.f32 %v1455_v41, 0.0  ;;  %v1056_v53 = vmul.f32 %v2326_v57, %v702_v45  ;;  %v1058_v54 = vmul.f32 %v2328_v58, %v895_v46  ;;  %v704_v55 = vpop.f32.mrf.mxu0  ;;  %v897_v56 = vpop.f32.mrf.mxu1 }
 0x14c   : > { %v1585_v52 = vmax.f32 %v1457_v42, 0.0  ;;  %v1586_v63 = vmax.f32 %v1458_v47, 0.0  ;;  %v1588_v0 = vmax.f32 %v1460_v48, 0.0  ;;  %v1459_v1 = vadd.f32 %v1331_v43, %v1203_v49 }
 0x14d   : > { %v1461_v2 = vadd.f32 %v1333_v44, %v1205_v50  ;;  %1711 = vst [vmem:[%s2370_s30 + $0x268] sm:$0xff] %v1583_v51  ;;  %v1206_v7 = vadd.f32 %v2335_v59, %v1056_v53  ;;  %v1208_v8 = vadd.f32 %v2337_v60, %v1058_v54  ;;  %v1057_v9 = vmul.f32 %v2339_v61, %v704_v55  ;;  %v708_v11 = vpop.f32.mrf.mxu0  ;;  %v901_v12 = vpop.f32.mrf.mxu1  ;;  %v1342_v53 = vld [vmem:[%s2333_s26 + $0x2e0] sm:$0xff]  ;;  %v1344_v54 = vld [vmem:[%s2333_s26 + $0x2f0] sm:$0xff] }
 0x14e   : > { %1713 = vst [vmem:[%s2370_s30 + $0x278] sm:$0xff] %v1585_v52  ;;  %v1059_v10 = vmul.f32 %v2341_v62, %v897_v56  ;;  %1714 = vst [vmem:[%s2370_s30 + $0x280] sm:$0xff] %v1586_v63  ;;  %v1587_v13 = vmax.f32 %v1459_v1, 0.0  ;;  %v1060_v17 = vmul.f32 %v2326_v57, %v708_v11  ;;  %v1062_v18 = vmul.f32 %v2328_v58, %v901_v12 }
 0x14f   : > { %1716 = vst [vmem:[%s2370_s30 + $0x290] sm:$0xff] %v1588_v0  ;;  %v1589_v14 = vmax.f32 %v1461_v2, 0.0  ;;  %v1462_v19 = vadd.f32 %v1334_v5, %v1206_v7  ;;  %v1464_v20 = vadd.f32 %v1336_v6, %v1208_v8  ;;  %v1207_v21 = vadd.f32 %v2346_v3, %v1057_v9  ;;  %v710_v25 = vpop.f32.mrf.mxu0  ;;  %v903_v26 = vpop.f32.mrf.mxu1  ;;  %v1343_v7 = vld [vmem:[%s2333_s26 + $0x2e8] sm:$0xff]  ;;  %v1345_v8 = vld [vmem:[%s2333_s26 + $0x2f8] sm:$0xff] }
 0x150   : > { %v1209_v22 = vadd.f32 %v2348_v4, %v1059_v10  ;;  %1715 = vst [vmem:[%s2370_s30 + $0x288] sm:$0xff] %v1587_v13  ;;  %v1210_v27 = vadd.f32 %v2335_v59, %v1060_v17  ;;  %v1212_v28 = vadd.f32 %v2337_v60, %v1062_v18  ;;  %v1061_v29 = vmul.f32 %v2339_v61, %v710_v25 }
 0x151   : > { %1717 = vst [vmem:[%s2370_s30 + $0x298] sm:$0xff] %v1589_v14  ;;  %v1063_v30 = vmul.f32 %v2341_v62, %v903_v26  ;;  %v1590_v31 = vmax.f32 %v1462_v19, 0.0  ;;  %v1592_v32 = vmax.f32 %v1464_v20, 0.0  ;;  %v1463_v33 = vadd.f32 %v1335_v15, %v1207_v21  ;;  %v712_v37 = vpop.f32.mrf.mxu0  ;;  %v905_v38 = vpop.f32.mrf.mxu1  ;;  %v1346_v15 = vld [vmem:[%s2333_s26 + $0x300] sm:$0xff] }
 0x152   : > { %v1465_v34 = vadd.f32 %v1337_v16, %v1209_v22  ;;  %v1466_v39 = vadd.f32 %v1338_v23, %v1210_v27  ;;  %v1468_v40 = vadd.f32 %v1340_v24, %v1212_v28  ;;  %v1211_v41 = vadd.f32 %v2346_v3, %v1061_v29  ;;  %v1348_v16 = vld [vmem:[%s2333_s26 + $0x310] sm:$0xff]  ;;  %v1347_v27 = vld [vmem:[%s2333_s26 + $0x308] sm:$0xff]  ;;  %v1349_v28 = vld [vmem:[%s2333_s26 + $0x318] sm:$0xff] }
 0x153   : > { %v1213_v42 = vadd.f32 %v2348_v4, %v1063_v30  ;;  %1718 = vst [vmem:[%s2370_s30 + $0x2a0] sm:$0xff] %v1590_v31  ;;  %1720 = vst [vmem:[%s2370_s30 + $0x2b0] sm:$0xff] %v1592_v32  ;;  %v1591_v43 = vmax.f32 %v1463_v33, 0.0  ;;  %v1064_v45 = vmul.f32 %v2326_v57, %v712_v37  ;;  %v1066_v46 = vmul.f32 %v2328_v58, %v905_v38  ;;  %v714_v47 = vpop.f32.mrf.mxu0  ;;  %v907_v48 = vpop.f32.mrf.mxu1 }
 0x154   : > { %v1593_v44 = vmax.f32 %v1465_v34, 0.0  ;;  %v1594_v49 = vmax.f32 %v1466_v39, 0.0  ;;  %v1596_v50 = vmax.f32 %v1468_v40, 0.0  ;;  %v1467_v51 = vadd.f32 %v1339_v35, %v1211_v41 }
 0x155   : > { %v1469_v52 = vadd.f32 %v1341_v36, %v1213_v42  ;;  %1719 = vst [vmem:[%s2370_s30 + $0x2a8] sm:$0xff] %v1591_v43  ;;  %v1214_v55 = vadd.f32 %v2335_v59, %v1064_v45  ;;  %v1216_v56 = vadd.f32 %v2337_v60, %v1066_v46  ;;  %v1065_v63 = vmul.f32 %v2339_v61, %v714_v47  ;;  %v718_v1 = vpop.f32.mrf.mxu0  ;;  %v911_v2 = vpop.f32.mrf.mxu1  ;;  %v1350_v45 = vld [vmem:[%s2333_s26 + $0x320] sm:$0xff]  ;;  %v1352_v46 = vld [vmem:[%s2333_s26 + $0x330] sm:$0xff] }
 0x156   : > { %1721 = vst [vmem:[%s2370_s30 + $0x2b8] sm:$0xff] %v1593_v44  ;;  %v1067_v0 = vmul.f32 %v2341_v62, %v907_v48  ;;  %1722 = vst [vmem:[%s2370_s30 + $0x2c0] sm:$0xff] %v1594_v49  ;;  %v1595_v5 = vmax.f32 %v1467_v51, 0.0  ;;  %v1068_v9 = vmul.f32 %v2326_v57, %v718_v1  ;;  %v1070_v10 = vmul.f32 %v2328_v58, %v911_v2 }
 0x157   : > { %1724 = vst [vmem:[%s2370_s30 + $0x2d0] sm:$0xff] %v1596_v50  ;;  %v1597_v6 = vmax.f32 %v1469_v52, 0.0  ;;  %v1470_v11 = vadd.f32 %v1342_v53, %v1214_v55  ;;  %v1472_v12 = vadd.f32 %v1344_v54, %v1216_v56  ;;  %v1215_v13 = vadd.f32 %v2346_v3, %v1065_v63  ;;  %v720_v17 = vpop.f32.mrf.mxu0  ;;  %v913_v18 = vpop.f32.mrf.mxu1  ;;  %v1351_v55 = vld [vmem:[%s2333_s26 + $0x328] sm:$0xff]  ;;  %v1353_v56 = vld [vmem:[%s2333_s26 + $0x338] sm:$0xff] }
 0x158   : > { %v1217_v14 = vadd.f32 %v2348_v4, %v1067_v0  ;;  %1723 = vst [vmem:[%s2370_s30 + $0x2c8] sm:$0xff] %v1595_v5  ;;  %v1218_v19 = vadd.f32 %v2335_v59, %v1068_v9  ;;  %v1220_v20 = vadd.f32 %v2337_v60, %v1070_v10  ;;  %v1069_v21 = vmul.f32 %v2339_v61, %v720_v17 }
 0x159   : > { %1725 = vst [vmem:[%s2370_s30 + $0x2d8] sm:$0xff] %v1597_v6  ;;  %v1071_v22 = vmul.f32 %v2341_v62, %v913_v18  ;;  %v1598_v23 = vmax.f32 %v1470_v11, 0.0  ;;  %v1600_v24 = vmax.f32 %v1472_v12, 0.0  ;;  %v1471_v25 = vadd.f32 %v1343_v7, %v1215_v13  ;;  %v722_v29 = vpop.f32.mrf.mxu0  ;;  %v915_v30 = vpop.f32.mrf.mxu1  ;;  %v1354_v7 = vld [vmem:[%s2333_s26 + $0x340] sm:$0xff] }
 0x15a   : > { %v1473_v26 = vadd.f32 %v1345_v8, %v1217_v14  ;;  %v1474_v31 = vadd.f32 %v1346_v15, %v1218_v19  ;;  %v1476_v32 = vadd.f32 %v1348_v16, %v1220_v20  ;;  %v1219_v33 = vadd.f32 %v2346_v3, %v1069_v21  ;;  %v1356_v8 = vld [vmem:[%s2333_s26 + $0x350] sm:$0xff]  ;;  %v1355_v19 = vld [vmem:[%s2333_s26 + $0x348] sm:$0xff]  ;;  %v1357_v20 = vld [vmem:[%s2333_s26 + $0x358] sm:$0xff] }
 0x15b   : > { %v1221_v34 = vadd.f32 %v2348_v4, %v1071_v22  ;;  %1726 = vst [vmem:[%s2370_s30 + $0x2e0] sm:$0xff] %v1598_v23  ;;  %1728 = vst [vmem:[%s2370_s30 + $0x2f0] sm:$0xff] %v1600_v24  ;;  %v1599_v35 = vmax.f32 %v1471_v25, 0.0  ;;  %v1072_v37 = vmul.f32 %v2326_v57, %v722_v29  ;;  %v1074_v38 = vmul.f32 %v2328_v58, %v915_v30  ;;  %v724_v39 = vpop.f32.mrf.mxu0  ;;  %v917_v40 = vpop.f32.mrf.mxu1 }
 0x15c   : > { %v1601_v36 = vmax.f32 %v1473_v26, 0.0  ;;  %v1602_v41 = vmax.f32 %v1474_v31, 0.0  ;;  %v1604_v42 = vmax.f32 %v1476_v32, 0.0  ;;  %v1475_v43 = vadd.f32 %v1347_v27, %v1219_v33 }
 0x15d   : > { %v1477_v44 = vadd.f32 %v1349_v28, %v1221_v34  ;;  %1727 = vst [vmem:[%s2370_s30 + $0x2e8] sm:$0xff] %v1599_v35  ;;  %v1222_v47 = vadd.f32 %v2335_v59, %v1072_v37  ;;  %v1224_v48 = vadd.f32 %v2337_v60, %v1074_v38  ;;  %v1073_v49 = vmul.f32 %v2339_v61, %v724_v39  ;;  %v728_v51 = vpop.f32.mrf.mxu0  ;;  %v921_v52 = vpop.f32.mrf.mxu1  ;;  %v1358_v37 = vld [vmem:[%s2333_s26 + $0x360] sm:$0xff]  ;;  %v1360_v38 = vld [vmem:[%s2333_s26 + $0x370] sm:$0xff] }
 0x15e   : > { %1729 = vst [vmem:[%s2370_s30 + $0x2f8] sm:$0xff] %v1601_v36  ;;  %v1075_v50 = vmul.f32 %v2341_v62, %v917_v40  ;;  %1730 = vst [vmem:[%s2370_s30 + $0x300] sm:$0xff] %v1602_v41  ;;  %v1603_v53 = vmax.f32 %v1475_v43, 0.0  ;;  %v1076_v63 = vmul.f32 %v2326_v57, %v728_v51  ;;  %v1078_v0 = vmul.f32 %v2328_v58, %v921_v52 }
 0x15f   : > { %1732 = vst [vmem:[%s2370_s30 + $0x310] sm:$0xff] %v1604_v42  ;;  %v1605_v54 = vmax.f32 %v1477_v44, 0.0  ;;  %v1478_v1 = vadd.f32 %v1350_v45, %v1222_v47  ;;  %v1480_v2 = vadd.f32 %v1352_v46, %v1224_v48  ;;  %v1223_v5 = vadd.f32 %v2346_v3, %v1073_v49  ;;  %v730_v9 = vpop.f32.mrf.mxu0  ;;  %v923_v10 = vpop.f32.mrf.mxu1  ;;  %v1359_v47 = vld [vmem:[%s2333_s26 + $0x368] sm:$0xff]  ;;  %v1361_v48 = vld [vmem:[%s2333_s26 + $0x378] sm:$0xff] }
 0x160   : > { %v1225_v6 = vadd.f32 %v2348_v4, %v1075_v50  ;;  %1731 = vst [vmem:[%s2370_s30 + $0x308] sm:$0xff] %v1603_v53  ;;  %v1226_v11 = vadd.f32 %v2335_v59, %v1076_v63  ;;  %v1228_v12 = vadd.f32 %v2337_v60, %v1078_v0  ;;  %v1077_v13 = vmul.f32 %v2339_v61, %v730_v9 }
 0x161   : > { %1733 = vst [vmem:[%s2370_s30 + $0x318] sm:$0xff] %v1605_v54  ;;  %v1079_v14 = vmul.f32 %v2341_v62, %v923_v10  ;;  %v1606_v15 = vmax.f32 %v1478_v1, 0.0  ;;  %v1608_v16 = vmax.f32 %v1480_v2, 0.0  ;;  %v1479_v17 = vadd.f32 %v1351_v55, %v1223_v5  ;;  %v732_v21 = vpop.f32.mrf.mxu0  ;;  %v925_v22 = vpop.f32.mrf.mxu1  ;;  %v1362_v55 = vld [vmem:[%s2333_s26 + $0x380] sm:$0xff] }
 0x162   : > { %v1481_v18 = vadd.f32 %v1353_v56, %v1225_v6  ;;  %v1482_v23 = vadd.f32 %v1354_v7, %v1226_v11  ;;  %v1484_v24 = vadd.f32 %v1356_v8, %v1228_v12  ;;  %v1227_v25 = vadd.f32 %v2346_v3, %v1077_v13  ;;  %v1364_v56 = vld [vmem:[%s2333_s26 + $0x390] sm:$0xff]  ;;  %v1363_v11 = vld [vmem:[%s2333_s26 + $0x388] sm:$0xff]  ;;  %v1365_v12 = vld [vmem:[%s2333_s26 + $0x398] sm:$0xff] }
 0x163   : > { %v1229_v26 = vadd.f32 %v2348_v4, %v1079_v14  ;;  %1734 = vst [vmem:[%s2370_s30 + $0x320] sm:$0xff] %v1606_v15  ;;  %1736 = vst [vmem:[%s2370_s30 + $0x330] sm:$0xff] %v1608_v16  ;;  %v1607_v27 = vmax.f32 %v1479_v17, 0.0  ;;  %v1080_v29 = vmul.f32 %v2326_v57, %v732_v21  ;;  %v1082_v30 = vmul.f32 %v2328_v58, %v925_v22  ;;  %v734_v31 = vpop.f32.mrf.mxu0  ;;  %v927_v32 = vpop.f32.mrf.mxu1 }
 0x164   : > { %v1609_v28 = vmax.f32 %v1481_v18, 0.0  ;;  %v1610_v33 = vmax.f32 %v1482_v23, 0.0  ;;  %v1612_v34 = vmax.f32 %v1484_v24, 0.0  ;;  %v1483_v35 = vadd.f32 %v1355_v19, %v1227_v25 }
 0x165   : > { %v1485_v36 = vadd.f32 %v1357_v20, %v1229_v26  ;;  %1735 = vst [vmem:[%s2370_s30 + $0x328] sm:$0xff] %v1607_v27  ;;  %v1230_v39 = vadd.f32 %v2335_v59, %v1080_v29  ;;  %v1232_v40 = vadd.f32 %v2337_v60, %v1082_v30  ;;  %v1081_v41 = vmul.f32 %v2339_v61, %v734_v31  ;;  %v738_v43 = vpop.f32.mrf.mxu0  ;;  %v931_v44 = vpop.f32.mrf.mxu1  ;;  %v1366_v29 = vld [vmem:[%s2333_s26 + $0x3a0] sm:$0xff]  ;;  %v1368_v30 = vld [vmem:[%s2333_s26 + $0x3b0] sm:$0xff] }
 0x166   : > { %1737 = vst [vmem:[%s2370_s30 + $0x338] sm:$0xff] %v1609_v28  ;;  %v1083_v42 = vmul.f32 %v2341_v62, %v927_v32  ;;  %1738 = vst [vmem:[%s2370_s30 + $0x340] sm:$0xff] %v1610_v33  ;;  %v1611_v45 = vmax.f32 %v1483_v35, 0.0  ;;  %v1084_v49 = vmul.f32 %v2326_v57, %v738_v43  ;;  %v1086_v50 = vmul.f32 %v2328_v58, %v931_v44 }
 0x167   : > { %1740 = vst [vmem:[%s2370_s30 + $0x350] sm:$0xff] %v1612_v34  ;;  %v1613_v46 = vmax.f32 %v1485_v36, 0.0  ;;  %v1486_v51 = vadd.f32 %v1358_v37, %v1230_v39  ;;  %v1488_v52 = vadd.f32 %v1360_v38, %v1232_v40  ;;  %v1231_v53 = vadd.f32 %v2346_v3, %v1081_v41  ;;  %v740_v63 = vpop.f32.mrf.mxu0  ;;  %v933_v0 = vpop.f32.mrf.mxu1  ;;  %v1367_v39 = vld [vmem:[%s2333_s26 + $0x3a8] sm:$0xff]  ;;  %v1369_v40 = vld [vmem:[%s2333_s26 + $0x3b8] sm:$0xff] }
 0x168   : > { %v1233_v54 = vadd.f32 %v2348_v4, %v1083_v42  ;;  %1739 = vst [vmem:[%s2370_s30 + $0x348] sm:$0xff] %v1611_v45  ;;  %v1234_v1 = vadd.f32 %v2335_v59, %v1084_v49  ;;  %v1236_v2 = vadd.f32 %v2337_v60, %v1086_v50  ;;  %v1085_v5 = vmul.f32 %v2339_v61, %v740_v63 }
 0x169   : > { %1741 = vst [vmem:[%s2370_s30 + $0x358] sm:$0xff] %v1613_v46  ;;  %v1087_v6 = vmul.f32 %v2341_v62, %v933_v0  ;;  %v1614_v7 = vmax.f32 %v1486_v51, 0.0  ;;  %v1616_v8 = vmax.f32 %v1488_v52, 0.0  ;;  %v1487_v9 = vadd.f32 %v1359_v47, %v1231_v53  ;;  %v742_v13 = vpop.f32.mrf.mxu0  ;;  %v935_v14 = vpop.f32.mrf.mxu1  ;;  %v1370_v47 = vld [vmem:[%s2333_s26 + $0x3c0] sm:$0xff] }
 0x16a   : > { %v1489_v10 = vadd.f32 %v1361_v48, %v1233_v54  ;;  %v1490_v15 = vadd.f32 %v1362_v55, %v1234_v1  ;;  %v1492_v16 = vadd.f32 %v1364_v56, %v1236_v2  ;;  %v1235_v17 = vadd.f32 %v2346_v3, %v1085_v5  ;;  %v1372_v48 = vld [vmem:[%s2333_s26 + $0x3d0] sm:$0xff]  ;;  %v1371_v1 = vld [vmem:[%s2333_s26 + $0x3c8] sm:$0xff]  ;;  %v1373_v2 = vld [vmem:[%s2333_s26 + $0x3d8] sm:$0xff] }
 0x16b   : > { %v1237_v18 = vadd.f32 %v2348_v4, %v1087_v6  ;;  %1742 = vst [vmem:[%s2370_s30 + $0x360] sm:$0xff] %v1614_v7  ;;  %1744 = vst [vmem:[%s2370_s30 + $0x370] sm:$0xff] %v1616_v8  ;;  %v1615_v19 = vmax.f32 %v1487_v9, 0.0  ;;  %v1088_v21 = vmul.f32 %v2326_v57, %v742_v13  ;;  %v1090_v22 = vmul.f32 %v2328_v58, %v935_v14  ;;  %v744_v23 = vpop.f32.mrf.mxu0  ;;  %v937_v24 = vpop.f32.mrf.mxu1 }
 0x16c   : > { %v1617_v20 = vmax.f32 %v1489_v10, 0.0  ;;  %v1618_v25 = vmax.f32 %v1490_v15, 0.0  ;;  %v1620_v26 = vmax.f32 %v1492_v16, 0.0  ;;  %v1491_v27 = vadd.f32 %v1363_v11, %v1235_v17 }
 0x16d   : > { %v1493_v28 = vadd.f32 %v1365_v12, %v1237_v18  ;;  %1743 = vst [vmem:[%s2370_s30 + $0x368] sm:$0xff] %v1615_v19  ;;  %v1238_v31 = vadd.f32 %v2335_v59, %v1088_v21  ;;  %v1240_v32 = vadd.f32 %v2337_v60, %v1090_v22  ;;  %v1089_v33 = vmul.f32 %v2339_v61, %v744_v23  ;;  %v748_v35 = vpop.f32.mrf.mxu0  ;;  %v941_v36 = vpop.f32.mrf.mxu1  ;;  %v1374_v21 = vld [vmem:[%s2333_s26 + $0x3e0] sm:$0xff]  ;;  %v1376_v22 = vld [vmem:[%s2333_s26 + $0x3f0] sm:$0xff] }
 0x16e   : > { %1745 = vst [vmem:[%s2370_s30 + $0x378] sm:$0xff] %v1617_v20  ;;  %v1091_v34 = vmul.f32 %v2341_v62, %v937_v24  ;;  %1746 = vst [vmem:[%s2370_s30 + $0x380] sm:$0xff] %v1618_v25  ;;  %v1619_v37 = vmax.f32 %v1491_v27, 0.0  ;;  %v1092_v41 = vmul.f32 %v2326_v57, %v748_v35  ;;  %v1094_v42 = vmul.f32 %v2328_v58, %v941_v36  ;;  %v1375_v27 = vld [vmem:[%s2333_s26 + $0x3e8] sm:$0xff] }
 0x16f   : > { %1748 = vst [vmem:[%s2370_s30 + $0x390] sm:$0xff] %v1620_v26  ;;  %v1621_v38 = vmax.f32 %v1493_v28, 0.0  ;;  %v1494_v43 = vadd.f32 %v1366_v29, %v1238_v31  ;;  %v1496_v44 = vadd.f32 %v1368_v30, %v1240_v32  ;;  %v1239_v45 = vadd.f32 %v2346_v3, %v1089_v33  ;;  %v750_v49 = vpop.f32.mrf.mxu0  ;;  %v943_v50 = vpop.f32.mrf.mxu1  ;;  %v1377_v28 = vld [vmem:[%s2333_s26 + $0x3f8] sm:$0xff] }
 0x170   : > { %v1241_v46 = vadd.f32 %v2348_v4, %v1091_v34  ;;  %1747 = vst [vmem:[%s2370_s30 + $0x388] sm:$0xff] %v1619_v37  ;;  %v1242_v51 = vadd.f32 %v2335_v59, %v1092_v41  ;;  %v1244_v52 = vadd.f32 %v2337_v60, %v1094_v42  ;;  %v1093_v53 = vmul.f32 %v2339_v61, %v750_v49 }
 0x171   : > { %1749 = vst [vmem:[%s2370_s30 + $0x398] sm:$0xff] %v1621_v38  ;;  %v1095_v54 = vmul.f32 %v2341_v62, %v943_v50  ;;  %v1622_v55 = vmax.f32 %v1494_v43, 0.0  ;;  %v1624_v56 = vmax.f32 %v1496_v44, 0.0  ;;  %v1495_v63 = vadd.f32 %v1367_v39, %v1239_v45  ;;  %v752_v5 = vpop.f32.mrf.mxu0  ;;  %v945_v6 = vpop.f32.mrf.mxu1 }
 0x172   : > { %v1497_v0 = vadd.f32 %v1369_v40, %v1241_v46  ;;  %v1498_v7 = vadd.f32 %v1370_v47, %v1242_v51  ;;  %v1500_v8 = vadd.f32 %v1372_v48, %v1244_v52  ;;  %v1243_v9 = vadd.f32 %v2346_v3, %v1093_v53 }
 0x173   : > { %v1245_v10 = vadd.f32 %v2348_v4, %v1095_v54  ;;  %1750 = vst [vmem:[%s2370_s30 + $0x3a0] sm:$0xff] %v1622_v55  ;;  %1752 = vst [vmem:[%s2370_s30 + $0x3b0] sm:$0xff] %v1624_v56  ;;  %v1623_v11 = vmax.f32 %v1495_v63, 0.0  ;;  %v1096_v13 = vmul.f32 %v2326_v57, %v752_v5  ;;  %v1098_v14 = vmul.f32 %v2328_v58, %v945_v6  ;;  %v754_v15 = vpop.f32.mrf.mxu0  ;;  %v947_v16 = vpop.f32.mrf.mxu1 }
 0x174   : > { %v1625_v12 = vmax.f32 %v1497_v0, 0.0  ;;  %v1626_v17 = vmax.f32 %v1498_v7, 0.0  ;;  %v1628_v18 = vmax.f32 %v1500_v8, 0.0  ;;  %v1499_v19 = vadd.f32 %v1371_v1, %v1243_v9 }
 0x175   : > { %v1501_v20 = vadd.f32 %v1373_v2, %v1245_v10  ;;  %1751 = vst [vmem:[%s2370_s30 + $0x3a8] sm:$0xff] %v1623_v11  ;;  %v1246_v57 = vadd.f32 %v2335_v59, %v1096_v13  ;;  %v1248_v58 = vadd.f32 %v2337_v60, %v1098_v14  ;;  %v1097_v23 = vmul.f32 %v2339_v61, %v754_v15 }
 0x176   : > { %1753 = vst [vmem:[%s2370_s30 + $0x3b8] sm:$0xff] %v1625_v12  ;;  %v1099_v24 = vmul.f32 %v2341_v62, %v947_v16  ;;  %1754 = vst [vmem:[%s2370_s30 + $0x3c0] sm:$0xff] %v1626_v17  ;;  %v1627_v25 = vmax.f32 %v1499_v19, 0.0 }
 0x177   : > { %1756 = vst [vmem:[%s2370_s30 + $0x3d0] sm:$0xff] %v1628_v18  ;;  %v1629_v26 = vmax.f32 %v1501_v20, 0.0  ;;  %v1502_v29 = vadd.f32 %v1374_v21, %v1246_v57  ;;  %v1504_v30 = vadd.f32 %v1376_v22, %v1248_v58  ;;  %v1247_v59 = vadd.f32 %v2346_v3, %v1097_v23 }
 0x178   : > { %v1249_v60 = vadd.f32 %v2348_v4, %v1099_v24  ;;  %1755 = vst [vmem:[%s2370_s30 + $0x3c8] sm:$0xff] %v1627_v25 }
 0x179   : > { %1757 = vst [vmem:[%s2370_s30 + $0x3d8] sm:$0xff] %v1629_v26  ;;  %v1630_v61 = vmax.f32 %v1502_v29, 0.0  ;;  %v1632_v62 = vmax.f32 %v1504_v30, 0.0  ;;  %v1503_v31 = vadd.f32 %v1375_v27, %v1247_v59 }
 0x17a   : > { %v1505_v32 = vadd.f32 %v1377_v28, %v1249_v60 }
 0x17b   : > { %1758 = vst [vmem:[%s2370_s30 + $0x3e0] sm:$0xff] %v1630_v61  ;;  %1760 = vst [vmem:[%s2370_s30 + $0x3f0] sm:$0xff] %v1632_v62  ;;  %v1631_v3 = vmax.f32 %v1503_v31, 0.0 }
 0x17c   : > { %v1633_v4 = vmax.f32 %v1505_v32, 0.0 }
 0x17d   : > { %1759 = vst [vmem:[%s2370_s30 + $0x3e8] sm:$0xff] %v1631_v3 }
 0x17e   : > { %1761 = vst [vmem:[%s2370_s30 + $0x3f8] sm:$0xff] %v1633_v4 }
 0x17f   : > { %2034 = shalt.err (!%p2031_p3)
}
 0x180   : > { %s2035_s17 = scalar_lea.hbm %s2865_s11, 16384  ;;  %s2039_s26 = scalar_lea.hbm %s2920_s5, 32768 }
 0x181   : > { %p2036_p4 = scmp.ne.s32.totalorder %s2865_s11, %s2035_s17  ;;  %p2040_p9 = scmp.lt.s32.totalorder %s2865_s11, %s2920_s5 }
 0x182   : > { %p2041_p10 = scmp.lt.s32.totalorder %s2039_s26, %s2035_s17 }
 0x183   : > { %p2037_p7 = pnand %p2036_p4, %p2155_p5 }
 0x184   : > { %p2042_p11 = por %p2041_p10, %p2040_p9 }
 0x185   : > { %p2038_p8 = pneg %p2037_p7 }
 0x187   : > { %p2043_p12 = pnand %p2042_p11, %p2038_p8 }
 0x189   : > { %2046 = shalt.err (!%p2043_p12)
}
 0x18a   : > { %s2085_s30 = smov 512   ;;  %s2086_s6 = smov 32  }
 0x18b   : > { %1915 = dma.vmem_to_hbm [thread:$0]  (%p2155_p5), %s2867_s7, 16384, %s2865_s11, %s2875_s22, %s2085_s30, %s2085_s30, %s2086_s6  }
 0x18c PF: > { %p1921_p13 = scmp.ge.s32.totalorder %s2081_s21, 2  ;;  %s1791_s8 = sand.u32 1, %s2069_s18  }
 0x18d   : > { %s1792_s10 = scalar_lea.sflag [#allocation3], %s1791_s8 }
 0x18e   : > { %p1918_p0 = pnand %p1921_p13, %p2159_p6 }
 0x190   : > { %p1919_p1 = pneg %p1918_p0 }
 0x192   : > { %2064 = dma.done.wait (%p1919_p1), %s1792_s10, 16384  }
 0x193   : > { %2066 = vsyncadd (%p1919_p1), %s1792_s10, 4294950912  ;;  %p15_p2 = scmp.ge.s32.totalorder %s2142_s24, 4   ;;  %s2923_s18 = smov %s2073_s19 }
 0x194   : > { %s2924_s19 = smov %s2077_s20  ;;  %s2925_s20 = smov %s2153_s27 }
 0x195   : > { %s2926_s21 = smov %s2142_s24  ;;  %17 = sbr.rel (!%p15_p2) target bundleno = 3 (0x3), region = 78 }
 0x19a   :  { %1797 = vsyncpa [#allocation3], 1 }
 0x19b   :  { %1799 = vsyncpa [#allocation3 + $0x1], 1 }

// kernel: bottleneck_pallas.4
= control target key start
LH: loop header
LB: loop body
LE: loop exit
PB: predicated region body
PF: predicated region fallthrough
CT: control target
= control target key end

     0   :  { %s8010_s21 = smov 0   ;;  %s10645_s0 = inlined_call_operand.vmem [shape: bf16[2,256,128], index: 0, kind: input, shape index: {}]   ;;  %s10646_s1 = inlined_call_operand.vmem [shape: bf16[1152,128], index: 1, kind: input, shape index: {}]   ;;  %s10647_s2 = inlined_call_operand.vmem [shape: f32[1,128], index: 2, kind: input, shape index: {}]   ;;  %s10648_s3 = inlined_call_operand.vmem [shape: f32[1,128], index: 3, kind: input, shape index: {}]   ;;  %s10649_s4 = inlined_call_operand.vmem [shape: bf16[2,256,128], index: 4, kind: output, shape index: {0}]   ;;  %s10650_s5 = inlined_call_operand.vmem [shape: f32[2,1,128], index: 5, kind: output, shape index: {1}]   ;;  %s10651_s6 = inlined_call_operand.vmem [shape: f32[2,128,128], index: 6, kind: output, shape index: {2}]  }
   0x1 LB: > { %s6393_s22 = sadd.s32 4294967295, %s7972_s21   ;;  %p6397_p0 = scmp.ge.s32.totalorder %s7972_s21, 1  ;;  %s7972_s21 = sphi %s8010_s21, %s17_s21  }
   0x2   : > { %p217_p1 = scmp.lt.s32.totalorder %s7972_s21, 3 }
   0x4   : > { %p218_p2 = pnand %p6397_p0, %p217_p1 }
   0x6   : > { %221 = sbr.rel (%p218_p2) target bundleno = 1015 (0x3f7), region = 36 }
   0xb   : > { %v7826_v0 = vld [vmem:[%s10646_s1 + $0x78] sm:$0xff]   ;;  %v7974_v2 = vmov 0   ;;  %v7828_v3 = vld [vmem:[%s10646_s1 + $0x70] sm:$0xff]   ;;  %v7830_v5 = vld [vmem:[%s10646_s1 + $0x68] sm:$0xff]   ;;  %p255_p3 = scmp.lt.s32.totalorder %s6393_s22, 1  ;;  %vm440_vm0 = vcmask 1040384  }
   0xc   : > { %v7827_v1 = vld [vmem:[%s10646_s1 + $0x38] sm:$0xff]   ;;  %432 = vst [vmem:[#allocation2] sm:$0xf] %v7974_v2  ;;  %433 = vst [vmem:[#allocation2 + $0x4] sm:$0xf] %v7974_v2  ;;  %7273 = vmatprep.subr.bf16.mxu0 %v7826_v0  ;;  %v7829_v4 = vld [vmem:[%s10646_s1 + $0x30] sm:$0xff]  }
   0xd   : > { %434 = vst [vmem:[#allocation2 + $0x8] sm:$0x1] %v7974_v2  ;;  %436 = vst [vmem:[#allocation2 + $0xcc] sm:$0xf] %v7974_v2  ;;  %7274 = vmatpush3.bf16.msra.mxu0 %v7826_v0  ;;  %7321 = vmatprep.subr.bf16.mxu1 %v7827_v1  ;;  %v7831_v6 = vld [vmem:[%s10646_s1 + $0x28] sm:$0xff]   ;;  %v7832_v7 = vld [vmem:[%s10646_s1 + $0x60] sm:$0xff]  }
   0xe   : > { %437 = vst [vmem:[#allocation2 + $0xd0] sm:$0xf] %v7974_v2  ;;  %438 = vst [vmem:[#allocation2 + $0xd4] sm:$0x1] %v7974_v2  ;;  %7322 = vmatpush3.bf16.msra.mxu1 %v7827_v1  ;;  %7275 = vmatprep.subr.bf16.mxu0 %v7828_v3  ;;  %v7833_v8 = vld [vmem:[%s10646_s1 + $0x20] sm:$0xff]   ;;  %s10855_s22 = smov (!%p255_p3, %s6393_s22), 1 }
   0xf   : > { %7323 = vmatprep.subr.bf16.mxu1 %v7829_v4  ;;  %v7834_v9 = vld [vmem:[%s10646_s1 + $0x58] sm:$0xff]   ;;  %s8055_s19 = sshll.u32 %s10855_s22, 7  ;;  %v7836_v11 = vld [vmem:[%s10646_s1 + $0x50] sm:$0xff]   ;;  %vm1121_vm1 = vsmask.f32 3328  ;;  %v8074_v18 = vld [vmem:[%s10646_s1 + $0x48] sm:$0xff]   ;;  %s267_s25 = scalar_lea.vmem %s10650_s5, %s10855_s22 }
  0x10   : > { %v7835_v10 = vld [vmem:[%s10646_s1 + $0x18] sm:$0xff]   ;;  %v7837_v12 = vld [vmem:[%s10646_s1 + $0x10] sm:$0xff]   ;;  %s8069_s28 = scalar_lea.vmem %s10645_s0, %s8055_s19  ;;  %vm1122_vm2 = vsmask.f32 7440  ;;  %v8080_v22 = vld [vmem:[%s10646_s1 + $0x8] sm:$0xff]   ;;  %vm943_vm3 = vcmask 1043456   ;;  %s10323_s20 = scalar_lea.vmem %s10649_s4, %s8055_s19 }
  0x11   : > { %7276 = vmatpush3.bf16.msra.mxu0 %v7828_v3  ;;  %v6804_v27 = vld [vmem:[%s8069_s28] sm:$0xff]   ;;  %v6947_v33 = vld [vmem:[%s8069_s28 + $0x8] sm:$0xff]   ;;  %vm8092_vm4 = vmor %vm1121_vm1, %vm1122_vm2  ;;  %vm441_vm5 = vsmask.f32 256  ;;  %vm491_vm7 = vsmask.f32 7938  ;;  %s10624_s27 = scalar_lea.vmem %s10651_s6, %s8055_s19 }
  0x12   : > { %7324 = vmatpush3.bf16.msra.mxu1 %v7829_v4  ;;  %7277 = vmatprep.subr.bf16.mxu0 %v7830_v5  ;;  %v6805_v31 = vunpack.c.l.bf16 %v6804_v27  ;;  %v8087_v32 = vld [vmem:[%s10647_s2] ss:$0 sm:$0xff]  ;;  %v6806_v36 = vunpack.c.h.bf16 %v6804_v27  ;;  %v443_v38 = vld [vmem:[#allocation2 + $0xc] sm:$0x1]  ;;  %v6809_v39 = vunpack.c.l.bf16 %v6947_v33  ;;  %vm8107_vm6 = vmand %vm440_vm0, %vm441_vm5  ;;  %vm621_vm8 = vsmask.f32 4368 }
  0x13   : > { %7325 = vmatprep.subr.bf16.mxu1 %v7831_v6  ;;  %v1057_v13 = vld [vmem:[#allocation2] sm:$0xf]  ;;  %v1058_v14 = vld [vmem:[#allocation2 + $0x4] sm:$0xf]  ;;  %v493_v44 = vld [vmem:[#allocation2 + $0x14] sm:$0x1]  ;;  %v6810_v49 = vunpack.c.h.bf16 %v6947_v33 }
  0x14   : > { %v8063_v15 = vld [vmem:[#allocation2 + $0x8] sm:$0x1]  ;;  %v1125_v16 = vshrl.u32 %v1057_v13, 16  ;;  %v1128_v17 = vshll.u32 %v1057_v13, 16  ;;  %v1134_v19 = vshll.u32 %v1058_v14, 16  ;;  %v1138_v20 = vshrl.u32 %v1058_v14, 16  ;;  %vm8116_vm9 = vmand %vm440_vm0, %vm491_vm7 }
  0x15   : > { %7278 = vmatpush3.bf16.msra.mxu0 %v7830_v5  ;;  %v1144_v21 = vshll.u32 %v8063_v15, 16  ;;  %v2158_v25 = vrot.slane %v8063_v15, 5  ;;  %v6462_v26 = vcombine.low %v1057_v13, %v1058_v14  ;;  %v8099_v37 = vld [vmem:[%s10648_s3] ss:$0 sm:$0xff]  ;;  %v345_v42 = vmul.f32 %v6805_v31, %v8087_v32  ;;  %v446_v50 = vld [vmem:[#allocation2 + $0x18] sm:$0x1]  ;;  %vm8153_vm10 = vmand %vm943_vm3, %vm491_vm7 }
  0x16   : > { %7326 = vmatpush3.bf16.msra.mxu1 %v7831_v6  ;;  %7279 = vmatprep.subr.bf16.mxu0 %v7832_v7  ;;  %v1127_v23 = vrot.slane %v1125_v16, 4  ;;  %v1130_v24 = vrot.slane %v1128_v17, 5  ;;  %v1136_v28 = vrot.slane %v1134_v19, 5  ;;  %v1140_v29 = vrot.slane %v1138_v20, 4  ;;  %v7840_v40 = vld [vmem:[%s10646_s1 + $0x40] sm:$0xff]   ;;  %v6948_v61 = vld [vmem:[%s8069_s28 + $0x10] sm:$0xff]   ;;  %vm8161_vm11 = vmor %vm441_vm5, %vm621_vm8 }
  0x17   : > { %7327 = vmatprep.subr.bf16.mxu1 %v7833_v8  ;;  %v1146_v30 = vrot.slane %v1144_v21, 5  ;;  %7337 = vmatprep.mubr.bf16.mxu1 %v6462_v26  ;;  %v346_v46 = vmul.f32 %v6806_v36, %v8087_v32  ;;  %v444_v47 = vsel %vm8107_vm6, 0, %v443_v38  ;;  %v496_v51 = vld [vmem:[#allocation2 + $0x20] sm:$0x1]  ;;  %v384_v53 = vadd.f32 %v8099_v37, %v345_v42  ;;  %v8147_v6 = vld [vmem:[%s10646_s1 + $0xb8] sm:$0xff]  }
  0x18   : > { %v1131_v35 = vor.u32 %v1130_v24, %v1127_v23  ;;  %v1141_v41 = vor.u32 %v1140_v29, %v1136_v28  ;;  %445 = vst [vmem:[#allocation2 + $0xc] sm:$0x1] %v444_v47  ;;  %v494_v54 = vsel %vm8116_vm9, 0, %v493_v44  ;;  %v347_v55 = vmul.f32 %v6809_v39, %v8087_v32  ;;  %v7841_v56 = vld [vmem:[%s10646_s1] sm:$0xff]   ;;  %v499_v21 = vld [vmem:[#allocation2 + $0x2c] sm:$0x1] }
  0x19   : > { %7280 = vmatpush3.bf16.msra.mxu0 %v7832_v7  ;;  %v385_v58 = vadd.f32 %v8099_v37, %v346_v46  ;;  %495 = vst [vmem:[#allocation2 + $0x14] sm:$0x1] %v494_v54  ;;  %v348_v59 = vmul.f32 %v6810_v49, %v8087_v32  ;;  %v447_v60 = vsel %vm8107_vm6, 0, %v446_v50  ;;  %v6739_v63 = vpack.c.bf16 %v384_v53, %v384_v53  ;;  %v449_v16 = vld [vmem:[#allocation2 + $0x24] sm:$0x1] }
  0x1a   : > { %7328 = vmatpush3.bf16.msra.mxu1 %v7833_v8  ;;  %7281 = vmatprep.subr.bf16.mxu0 %v7834_v9  ;;  %v1132_v45 = vrot.slane %v1131_v35, 4  ;;  %v1142_v52 = vrot.slane %v1141_v41, 4  ;;  %v386_v0 = vadd.f32 %v8099_v37, %v347_v55  ;;  %448 = vst [vmem:[#allocation2 + $0x18] sm:$0x1] %v447_v60  ;;  %v497_v1 = vsel %vm8116_vm9, 0, %v496_v51 }
  0x1b   : > { %7329 = vmatprep.subr.bf16.mxu1 %v7835_v10  ;;  %v6740_v3 = vpack.c.bf16 %v385_v58, %v385_v58  ;;  %v387_v4 = vadd.f32 %v8099_v37, %v348_v59  ;;  %498 = vst [vmem:[#allocation2 + $0x20] sm:$0x1] %v497_v1  ;;  %v6813_v5 = vunpack.c.l.bf16 %v6948_v61  ;;  %v624_v7 = vshrl.u32 %v6739_v63, 16  ;;  %v452_v38 = vld [vmem:[#allocation2 + $0x30] sm:$0x1] }
  0x1c   : > { %v1137_v57 = vsel %vm8092_vm4, %v1132_v45, %v1136_v28  ;;  %v1147_v62 = vsel %vm8092_vm4, %v1142_v52, %v1146_v30  ;;  %v627_v8 = vshll.u32 %v6739_v63, 16  ;;  %v450_v44 = vsel %vm8107_vm6, 0, %v449_v16  ;;  %v6949_v45 = vld [vmem:[%s8069_s28 + $0x18] sm:$0xff]   ;;  %v505_v63 = vld [vmem:[#allocation2 + $0x44] sm:$0x1] }
  0x1d   : > { %7282 = vmatpush3.bf16.msra.mxu0 %v7834_v9  ;;  %v6438_v2 = vcombine.low %v1137_v57, %v1147_v62  ;;  %v6741_v9 = vpack.c.bf16 %v386_v0, %v386_v0  ;;  %v6742_v13 = vpack.c.bf16 %v387_v4, %v387_v4  ;;  %v349_v14 = vmul.f32 %v6813_v5, %v8087_v32  ;;  %v455_v62 = vld [vmem:[#allocation2 + $0x3c] sm:$0x1] }
  0x1e   : > { %7330 = vmatpush3.bf16.msra.mxu1 %v7835_v10  ;;  %7283 = vmatprep.subr.bf16.mxu0 %v7836_v11  ;;  %v6814_v10 = vunpack.c.h.bf16 %v6948_v61  ;;  %v626_v17 = vrot.slane %v624_v7, 7  ;;  %451 = vst [vmem:[#allocation2 + $0x24] sm:$0x1] %v450_v44  ;;  %v500_v51 = vsel %vm8116_vm9, 0, %v499_v21  ;;  %v6817_v60 = vunpack.c.l.bf16 %v6949_v45  ;;  %v8180_v61 = vld [vmem:[%s8069_s28 + $0x20] sm:$0xff]  }
  0x1f   : > { %7331 = vmatprep.subr.bf16.mxu1 %v7837_v12  ;;  %7289 = vmatprep.mubr.bf16.mxu0 %v6438_v2  ;;  %v644_v19 = vshll.u32 %v6741_v9, 16  ;;  %v945_v24 = vld [vmem:[#allocation2 + $0xc] sm:$0xf]  ;;  %v649_v26 = vshrl.u32 %v6742_v13, 16  ;;  %v652_v27 = vshll.u32 %v6742_v13, 16  ;;  %v388_v28 = vadd.f32 %v8099_v37, %v349_v14 }
  0x20   : > { %v350_v20 = vmul.f32 %v6814_v10, %v8087_v32  ;;  %v629_v30 = vor.u32 %v627_v8, %v626_v17  ;;  %v630_v31 = vrot.slane %v626_v17, 4  ;;  %v949_v33 = vld [vmem:[#allocation2 + $0x14] sm:$0x1]  ;;  %501 = vst [vmem:[#allocation2 + $0x2c] sm:$0x1] %v500_v51  ;;  %v6818_v2 = vunpack.c.h.bf16 %v6949_v45 }
  0x21   : > { %7284 = vmatpush3.bf16.msra.mxu0 %v7836_v11  ;;  %v632_v11 = vshrl.u32 %v6740_v3, 16  ;;  %v651_v41 = vrot.slane %v649_v26, 7  ;;  %v952_v42 = vld [vmem:[#allocation2 + $0x18] sm:$0xf]  ;;  %v6743_v58 = vpack.c.bf16 %v388_v28, %v388_v28  ;;  %v351_v10 = vmul.f32 %v6817_v60, %v8087_v32 }
  0x22   : > { %7332 = vmatpush3.bf16.msra.mxu1 %v7837_v12  ;;  %7285 = vmatprep.subr.bf16.mxu0 %v8074_v18  ;;  %v635_v12 = vshll.u32 %v6740_v3, 16  ;;  %v389_v36 = vadd.f32 %v8099_v37, %v350_v20  ;;  %v946_v46 = vsel %vm8153_vm10, %v629_v30, %v945_v24  ;;  %v956_v50 = vld [vmem:[#allocation2 + $0x20] sm:$0x1]  ;;  %v453_v3 = vsel %vm8107_vm6, 0, %v452_v38 }
  0x23   : > { %7333 = vmatprep.subr.bf16.mxu1 %v8080_v22  ;;  %947 = vst [vmem:[#allocation2 + $0xc] sm:$0xf] %v946_v46  ;;  %v654_v54 = vor.u32 %v652_v27, %v651_v41  ;;  %v656_v55 = vrot.slane %v651_v41, 4  ;;  %v658_v4 = vshrl.u32 %v6743_v58, 16  ;;  %v661_v5 = vshll.u32 %v6743_v58, 16 }
  0x24   : > { %v6744_v59 = vpack.c.bf16 %v389_v36, %v389_v36  ;;  %454 = vst [vmem:[#allocation2 + $0x30] sm:$0x1] %v453_v3  ;;  %v6821_v13 = vunpack.c.l.bf16 %v8180_v61  ;;  %v6822_v17 = vunpack.c.h.bf16 %v8180_v61  ;;  %vm2150_vm12 = vcmask 1042432  }
  0x25   : > { %7286 = vmatpush3.bf16.msra.mxu0 %v8074_v18  ;;  %v641_v18 = vshrl.u32 %v6741_v9, 16  ;;  %v957_v1 = vsel %vm8107_vm6, %v656_v55, %v956_v50  ;;  %v7857_v9 = vld [vmem:[%s10646_s1 + $0xf8] sm:$0xff]   ;;  %v660_v14 = vrot.slane %v658_v4, 7  ;;  %v959_v58 = vld [vmem:[#allocation2 + $0x24] sm:$0xf]  ;;  %vm2151_vm13 = vcmask 1046532  }
  0x26   : > { %7334 = vmatpush3.bf16.msra.mxu1 %v8080_v22  ;;  %7287 = vmatprep.subr.bf16.mxu0 %v7840_v40  ;;  %v634_v22 = vrot.slane %v632_v11, 7  ;;  %958 = vst [vmem:[#allocation2 + $0x20] sm:$0x1] %v957_v1  ;;  %v666_v7 = vshrl.u32 %v6744_v59, 16  ;;  %v669_v8 = vshll.u32 %v6744_v59, 16  ;;  %v352_v11 = vmul.f32 %v6818_v2, %v8087_v32  ;;  %vm8570_vm14 = vmor %vm2150_vm12, %vm2151_vm13 }
  0x27   : > { %7335 = vmatprep.subr.bf16.mxu1 %v7841_v56  ;;  %v643_v35 = vrot.slane %v641_v18, 7  ;;  %v456_v18 = vsel %vm8107_vm6, 0, %v455_v62  ;;  %v8202_v21 = vmul.f32 %v6821_v13, %v8087_v32  ;;  %v663_v26 = vor.u32 %v661_v5, %v660_v14 }
  0x28   : > { %v637_v39 = vor.u32 %v635_v12, %v634_v22  ;;  %v668_v16 = vrot.slane %v666_v7, 7  ;;  %v391_v20 = vadd.f32 %v8099_v37, %v352_v11  ;;  %457 = vst [vmem:[#allocation2 + $0x3c] sm:$0x1] %v456_v18  ;;  %v664_v27 = vrot.slane %v660_v14, 4 }
  0x29   : > { %7288 = vmatpush3.bf16.msra.mxu0 %v7840_v40  ;;  %v639_v40 = vrot.slane %v634_v22, 4  ;;  %v646_v47 = vor.u32 %v644_v19, %v643_v35  ;;  %v647_v49 = vrot.slane %v643_v35, 4  ;;  %v390_v19 = vadd.f32 %v8099_v37, %v351_v10 }
  0x2a   : > { %7336 = vmatpush3.bf16.msra.mxu1 %v7841_v56  ;;  %7369 = vmatprep.subr.bf16.mxu0 %v8147_v6  ;;  %v638_v52 = vsel %vm8161_vm11, %v630_v31, %v637_v39  ;;  %v502_v56 = vld [vmem:[#allocation2 + $0x38] sm:$0x1]  ;;  %v506_v22 = vsel %vm8116_vm9, 0, %v505_v63  ;;  %v1059_v24 = vld [vmem:[#allocation2 + $0xc] sm:$0xf]  ;;  %v671_v28 = vor.u32 %v669_v8, %v668_v16  ;;  %v673_v30 = vrot.slane %v668_v16, 4 }
  0x2b   : > { %v950_v53 = vsel %vm8107_vm6, %v639_v40, %v949_v33  ;;  %948 = vst [vmem:[#allocation2 + $0x10] sm:$0xf] %v638_v52  ;;  %v953_v57 = vsel %vm8153_vm10, %v646_v47, %v952_v42  ;;  %v655_v0 = vsel %vm8161_vm11, %v647_v49, %v654_v54  ;;  %v503_v12 = vsel %vm8116_vm9, 0, %v502_v56  ;;  %7417 = vmatprep.subr.bf16.mxu1 %v7857_v9  ;;  %v7858_v40 = vld [vmem:[%s10646_s1 + $0xf0] sm:$0xff]  }
  0x2c   : > { %951 = vst [vmem:[#allocation2 + $0x14] sm:$0x1] %v950_v53  ;;  %954 = vst [vmem:[#allocation2 + $0x18] sm:$0xf] %v953_v57  ;;  %v1149_v35 = vshrl.u32 %v1059_v24, 16  ;;  %v1152_v36 = vshll.u32 %v1059_v24, 16  ;;  %v8208_v38 = vpack.c.bf16 %v390_v19, %v390_v19  ;;  %v8210_v39 = vpack.c.bf16 %v391_v20, %v391_v20 }
  0x2d   : > { %955 = vst [vmem:[#allocation2 + $0x1c] sm:$0xf] %v655_v0  ;;  %504 = vst [vmem:[#allocation2 + $0x38] sm:$0x1] %v503_v12  ;;  %v1107_v52 = vld [vmem:[#allocation2 + $0x20] sm:$0x1]  ;;  %v672_v53 = vsel %vm8161_vm11, %v664_v27, %v671_v28  ;;  %v960_v13 = vsel %vm8153_vm10, %v663_v26, %v959_v58 }
  0x2e   : > { %507 = vst [vmem:[#allocation2 + $0x44] sm:$0x1] %v506_v22  ;;  %v1151_v47 = vrot.slane %v1149_v35, 4  ;;  %v1154_v49 = vrot.slane %v1152_v36, 5  ;;  %962 = vst [vmem:[#allocation2 + $0x28] sm:$0xf] %v672_v53 }
  0x2f   : > { %v963_v0 = vld [vmem:[#allocation2 + $0x2c] sm:$0x1]  ;;  %v1192_v3 = vshll.u32 %v1107_v52, 16  ;;  %961 = vst [vmem:[#allocation2 + $0x24] sm:$0xf] %v960_v13  ;;  %v678_v26 = vshll.u32 %v8208_v38, 16 }
  0x30   : > { %v1155_v59 = vor.u32 %v1154_v49, %v1151_v47  ;;  %v964_v14 = vsel %vm8107_vm6, %v673_v30, %v963_v0  ;;  %v7862_v20 = vld [vmem:[%s10646_s1 + $0xe8] sm:$0xff]   ;;  %v683_v27 = vshrl.u32 %v8210_v39, 16  ;;  %v686_v28 = vshll.u32 %v8210_v39, 16 }
  0x31   : > { %v1194_v12 = vrot.slane %v1192_v3, 5  ;;  %965 = vst [vmem:[#allocation2 + $0x2c] sm:$0x1] %v964_v14  ;;  %v354_v39 = vmul.f32 %v6822_v17, %v8087_v32  ;;  %v6951_v52 = vld [vmem:[%s8069_s28 + $0x28] sm:$0xff]   ;;  %v7867_v3 = vld [vmem:[%s10646_s1 + $0xd8] sm:$0xff]  }
  0x32   : > { %v1060_v31 = vld [vmem:[#allocation2 + $0x10] sm:$0xf]  ;;  %v1156_v5 = vrot.slane %v1155_v59, 4  ;;  %v685_v47 = vrot.slane %v683_v27, 7  ;;  %v7849_v58 = vld [vmem:[%s10646_s1 + $0xa8] sm:$0xff]   ;;  %v392_v59 = vadd.f32 %v8099_v37, %v8202_v21 }
  0x33   : > { %v8206_v33 = vld [vmem:[#allocation2 + $0x14] sm:$0x1]  ;;  %v1158_v41 = vshll.u32 %v1060_v31, 16  ;;  %v1162_v42 = vshrl.u32 %v1060_v31, 16  ;;  %v1061_v46 = vld [vmem:[#allocation2 + $0x18] sm:$0xf]  ;;  %v6463_v50 = vcombine.low %v1059_v24, %v1060_v31 }
  0x34   : > { %v1168_v44 = vshll.u32 %v8206_v33, 16  ;;  %v2165_v45 = vrot.slane %v8206_v33, 5  ;;  %v1062_v51 = vld [vmem:[#allocation2 + $0x1c] sm:$0xf]  ;;  %v1173_v57 = vshrl.u32 %v1061_v46, 16  ;;  %v1176_v60 = vshll.u32 %v1061_v46, 16 }
  0x35   : > { %v1160_v54 = vrot.slane %v1158_v41, 5  ;;  %v1164_v55 = vrot.slane %v1162_v42, 4  ;;  %7338 = vmatmul.mubr.bf16.vlgmr.msra.gmra.mxu1 %v6463_v50  ;;  %v1182_v62 = vshll.u32 %v1062_v51, 16  ;;  %v1186_v63 = vshrl.u32 %v1062_v51, 16  ;;  %v7846_v24 = vld [vmem:[%s10646_s1 + $0xb0] sm:$0xff]   ;;  %v7863_v42 = vld [vmem:[%s10646_s1 + $0xe0] sm:$0xff]  }
  0x36   : > { %v1170_v56 = vrot.slane %v1168_v44, 5  ;;  %v1175_v2 = vrot.slane %v1173_v57, 4  ;;  %v6464_v4 = vcombine.low %v1061_v46, %v1062_v51  ;;  %7418 = vmatpush3.bf16.msra.mxu1 %v7857_v9  ;;  %v1178_v7 = vrot.slane %v1176_v60, 5  ;;  %v1064_v36 = vld [vmem:[#allocation2 + $0x28] sm:$0xf] }
  0x37   : > { %v1165_v1 = vor.u32 %v1164_v55, %v1160_v54  ;;  %v1184_v8 = vrot.slane %v1182_v62, 5  ;;  %v1188_v10 = vrot.slane %v1186_v63, 4  ;;  %7419 = vmatprep.subr.bf16.mxu1 %v7858_v40  ;;  %v1161_v16 = vsel %vm8092_vm4, %v1156_v5, %v1160_v54  ;;  %v970_v57 = vld [vmem:[#allocation2 + $0x38] sm:$0x1]  ;;  %v1063_v60 = vld [vmem:[#allocation2 + $0x24] sm:$0xf] }
  0x38   : > { %7341 = vmatprep.mubr.bf16.mxu1 %v6464_v4  ;;  %v1179_v18 = vor.u32 %v1178_v7, %v1175_v2  ;;  %v675_v9 = vshrl.u32 %v8208_v38, 16  ;;  %v1206_v44 = vshll.u32 %v1064_v36, 16  ;;  %v1210_v46 = vshrl.u32 %v1064_v36, 16  ;;  %v966_v38 = vld [vmem:[#allocation2 + $0x30] sm:$0xf] }
  0x39   : > { %v1166_v11 = vrot.slane %v1165_v1, 4  ;;  %v1189_v19 = vor.u32 %v1188_v10, %v1184_v8  ;;  %v690_v61 = vrot.slane %v685_v47, 4  ;;  %v1108_v62 = vld [vmem:[#allocation2 + $0x2c] sm:$0x1]  ;;  %v6825_v1 = vunpack.c.l.bf16 %v6951_v52  ;;  %v508_v14 = vld [vmem:[#allocation2 + $0x50] sm:$0x1] }
  0x3a   : > { %7420 = vmatpush3.bf16.msra.mxu1 %v7858_v40  ;;  %v1180_v31 = vrot.slane %v1179_v18, 4  ;;  %v677_v41 = vrot.slane %v675_v9, 7  ;;  %v8249_v54 = vrot.slane %v1206_v44, 5  ;;  %v1212_v55 = vrot.slane %v1210_v46, 4  ;;  %v7954_v33 = vld [vmem:[#allocation2 + $0x2c] sm:$0x1] }
  0x3b   : > { %v1171_v22 = vsel %vm8092_vm4, %v1166_v11, %v1170_v56  ;;  %v1190_v35 = vrot.slane %v1189_v19, 4  ;;  %7421 = vmatprep.subr.bf16.mxu1 %v7862_v20  ;;  %v688_v56 = vor.u32 %v686_v28, %v685_v47  ;;  %v6826_v2 = vunpack.c.h.bf16 %v6951_v52  ;;  %v7855_v52 = vld [vmem:[%s10646_s1 + $0x98] sm:$0xff]   ;;  %v9479_v43 = vld [vmem:[#allocation2 + $0x2c] sm:$0x1] }
  0x3c   : > { %v6439_v30 = vcombine.low %v1161_v16, %v1171_v22  ;;  %v1185_v40 = vsel %vm8092_vm4, %v1180_v31, %v1184_v8  ;;  %v680_v50 = vor.u32 %v678_v26, %v677_v41  ;;  %v681_v51 = vrot.slane %v677_v41, 4  ;;  %v458_v8 = vld [vmem:[#allocation2 + $0x48] sm:$0x1]  ;;  %v8272_v22 = vld [vmem:[%s8069_s28 + $0x30] sm:$0xff]  }
  0x3d   : > { %v1195_v49 = vsel %vm8092_vm4, %v1190_v35, %v1194_v12  ;;  %v1213_v63 = vor.u32 %v1212_v55, %v8249_v54  ;;  %v1197_v4 = vshrl.u32 %v1063_v60, 16  ;;  %v1200_v21 = vshll.u32 %v1063_v60, 16 }
  0x3e   : > { %7290 = vmatmul.mubr.bf16.vlgmr.msra.gmra.mxu0 %v6439_v30  ;;  %v6440_v53 = vcombine.low %v1185_v40, %v1195_v49  ;;  %7422 = vmatpush3.bf16.msra.mxu1 %v7862_v20  ;;  %v967_v17 = vsel %vm8153_vm10, %v680_v50, %v966_v38  ;;  %v689_v0 = vsel %vm8161_vm11, %v681_v51, %v688_v56  ;;  %v1216_v5 = vshll.u32 %v1108_v62, 16  ;;  %v7852_v20 = vld [vmem:[%s10646_s1 + $0xa0] sm:$0xff]   ;;  %v973_v40 = vld [vmem:[#allocation2 + $0x3c] sm:$0xf] }
  0x3f   : > { %7370 = vmatpush3.bf16.msra.mxu0 %v8147_v6  ;;  %v393_v6 = vadd.f32 %v8099_v37, %v354_v39  ;;  %7423 = vmatprep.subr.bf16.mxu1 %v7863_v42  ;;  %968 = vst [vmem:[#allocation2 + $0x30] sm:$0xf] %v967_v17  ;;  %v6465_v7 = vcombine.low %v1063_v60, %v1064_v36  ;;  %969 = vst [vmem:[#allocation2 + $0x34] sm:$0xf] %v689_v0  ;;  %v1214_v10 = vrot.slane %v1213_v63, 4 }
  0x40   : > { %7371 = vmatprep.subr.bf16.mxu0 %v7846_v24  ;;  %7293 = vmatprep.mubr.bf16.mxu0 %v6440_v53  ;;  %v971_v11 = vsel %vm8107_vm6, %v690_v61, %v970_v57  ;;  %v6747_v12 = vpack.c.bf16 %v392_v59, %v392_v59  ;;  %v1199_v16 = vrot.slane %v1197_v4, 4  ;;  %v1202_v18 = vrot.slane %v1200_v21, 5  ;;  %v7872_v57 = vld [vmem:[%s10646_s1 + $0xc8] sm:$0xff]  }
  0x41   : > { %v6748_v13 = vpack.c.bf16 %v393_v6, %v393_v6  ;;  %v1218_v19 = vrot.slane %v1216_v5, 5  ;;  %7342 = vmatmul.mubr.bf16.gmra.mxu1 %v6465_v7  ;;  %972 = vst [vmem:[#allocation2 + $0x38] sm:$0x1] %v971_v11  ;;  %v355_v9 = vmul.f32 %v6825_v1, %v8087_v32  ;;  %v356_v36 = vmul.f32 %v6826_v2, %v8087_v32 }
  0x42   : > { %7424 = vmatpush3.bf16.msra.mxu1 %v7863_v42  ;;  %v692_v26 = vshrl.u32 %v6747_v12, 16  ;;  %v695_v27 = vshll.u32 %v6747_v12, 16  ;;  %v1203_v31 = vor.u32 %v1202_v18, %v1199_v16  ;;  %v459_v46 = vsel %vm8107_vm6, 0, %v458_v8  ;;  %v461_v8 = vld [vmem:[#allocation2 + $0x54] sm:$0x1] }
  0x43   : > { %7372 = vmatpush3.bf16.msra.mxu0 %v7846_v24  ;;  %v7868_v24 = vld [vmem:[%s10646_s1 + $0xd0] sm:$0xff]   ;;  %v700_v28 = vshrl.u32 %v6748_v13, 16  ;;  %v703_v30 = vshll.u32 %v6748_v13, 16  ;;  %7425 = vmatprep.subr.bf16.mxu1 %v7867_v3  ;;  %v1219_v35 = vsel %vm8092_vm4, %v1214_v10, %v1218_v19  ;;  %v394_v41 = vadd.f32 %v8099_v37, %v355_v9  ;;  %460 = vst [vmem:[#allocation2 + $0x48] sm:$0x1] %v459_v46 }
  0x44   : > { %7373 = vmatprep.subr.bf16.mxu0 %v7849_v58  ;;  %v694_v42 = vrot.slane %v692_v26, 7  ;;  %v509_v47 = vsel %vm8116_vm9, 0, %v508_v14  ;;  %v1204_v38 = vrot.slane %v1203_v31, 4  ;;  %v395_v49 = vadd.f32 %v8099_v37, %v356_v36  ;;  %v511_v10 = vld [vmem:[#allocation2 + $0x5c] sm:$0x1] }
  0x45   : > { %v702_v44 = vrot.slane %v700_v28, 7  ;;  %510 = vst [vmem:[#allocation2 + $0x50] sm:$0x1] %v509_v47  ;;  %v8286_v50 = vpack.c.bf16 %v394_v41, %v394_v41  ;;  %v6829_v51 = vunpack.c.l.bf16 %v8272_v22  ;;  %v6830_v36 = vunpack.c.h.bf16 %v8272_v22  ;;  %v6953_v22 = vld [vmem:[%s8069_s28 + $0x38] sm:$0xff]  }
  0x46   : > { %7426 = vmatpush3.bf16.msra.mxu1 %v7867_v3  ;;  %v1065_v39 = vld [vmem:[#allocation2 + $0x30] sm:$0xf]  ;;  %v1066_v53 = vld [vmem:[#allocation2 + $0x34] sm:$0xf]  ;;  %v697_v61 = vor.u32 %v695_v27, %v694_v42  ;;  %v698_v17 = vrot.slane %v694_v42, 4  ;;  %v6750_v14 = vpack.c.bf16 %v395_v49, %v395_v49 }
  0x47   : > { %7374 = vmatpush3.bf16.msra.mxu0 %v7849_v58  ;;  %7427 = vmatprep.subr.bf16.mxu1 %v7868_v24  ;;  %v1221_v55 = vshrl.u32 %v1065_v39, 16  ;;  %v1224_v56 = vshll.u32 %v1065_v39, 16  ;;  %v1209_v58 = vsel %vm8092_vm4, %v1204_v38, %v8249_v54  ;;  %v1230_v59 = vshll.u32 %v1066_v53, 16  ;;  %v977_v3 = vld [vmem:[#allocation2 + $0x44] sm:$0x1]  ;;  %v7860_v54 = vld [vmem:[%s10646_s1 + $0x90] sm:$0xff]  }
  0x48   : > { %7375 = vmatprep.subr.bf16.mxu0 %v7852_v20  ;;  %v1234_v6 = vshrl.u32 %v1066_v53, 16  ;;  %v6466_v60 = vcombine.low %v1065_v39, %v1066_v53  ;;  %v6441_v62 = vcombine.low %v1209_v58, %v1219_v35  ;;  %v1109_v63 = vld [vmem:[#allocation2 + $0x38] sm:$0x1]  ;;  %v705_v2 = vor.u32 %v703_v30, %v702_v44  ;;  %v464_v42 = vld [vmem:[#allocation2 + $0x60] sm:$0x1] }
  0x49   : > { %v1223_v0 = vrot.slane %v1221_v55, 4  ;;  %v1226_v1 = vrot.slane %v1224_v56, 5  ;;  %v1232_v4 = vrot.slane %v1230_v59, 5  ;;  %v1240_v5 = vshll.u32 %v1109_v63, 16 }
  0x4a   : > { %7428 = vmatpush3.bf16.msra.mxu1 %v7868_v24  ;;  %v1236_v21 = vrot.slane %v1234_v6, 4  ;;  %7345 = vmatprep.mubr.bf16.mxu1 %v6466_v60  ;;  %v707_v7 = vrot.slane %v702_v44, 4  ;;  %v706_v12 = vsel %vm8161_vm11, %v698_v17, %v705_v2  ;;  %v974_v13 = vsel %vm8153_vm10, %v697_v61, %v973_v40  ;;  %v980_v35 = vld [vmem:[#allocation2 + $0x48] sm:$0xf]  ;;  %v7870_v6 = vld [vmem:[%s10646_s1 + $0x80] sm:$0xff]  }
  0x4b   : > { %7376 = vmatpush3.bf16.msra.mxu0 %v7852_v20  ;;  %v1227_v11 = vor.u32 %v1226_v1, %v1223_v0  ;;  %v1242_v18 = vrot.slane %v1240_v5, 5  ;;  %975 = vst [vmem:[#allocation2 + $0x3c] sm:$0xf] %v974_v13  ;;  %976 = vst [vmem:[#allocation2 + $0x40] sm:$0xf] %v706_v12  ;;  %v709_v9 = vshrl.u32 %v8286_v50, 16  ;;  %7429 = vmatprep.subr.bf16.mxu1 %v7872_v57  ;;  %v6833_v58 = vunpack.c.l.bf16 %v6953_v22 }
  0x4c   : > { %7377 = vmatprep.subr.bf16.mxu0 %v7855_v52  ;;  %7294 = vmatmul.mubr.bf16.gmra.mxu0 %v6441_v62  ;;  %v1237_v16 = vor.u32 %v1236_v21, %v1232_v4  ;;  %v978_v19 = vsel %vm8107_vm6, %v707_v7, %v977_v3  ;;  %v7873_v20 = vld [vmem:[%s10646_s1 + $0xc0] sm:$0xff]   ;;  %v712_v26 = vshll.u32 %v8286_v50, 16  ;;  %v717_v27 = vshrl.u32 %v6750_v14, 16  ;;  %v7865_v44 = vld [vmem:[%s10646_s1 + $0x88] sm:$0xff]  }
  0x4d   : > { %v1228_v24 = vrot.slane %v1227_v11, 4  ;;  %979 = vst [vmem:[#allocation2 + $0x44] sm:$0x1] %v978_v19  ;;  %v720_v28 = vshll.u32 %v6750_v14, 16  ;;  %v711_v31 = vrot.slane %v709_v9, 7  ;;  %v357_v41 = vmul.f32 %v6829_v51, %v8087_v32 }
  0x4e   : > { %7430 = vmatpush3.bf16.msra.mxu1 %v7872_v57  ;;  %v1238_v30 = vrot.slane %v1237_v16, 4  ;;  %v719_v47 = vrot.slane %v717_v27, 7  ;;  %v462_v38 = vsel %vm8107_vm6, 0, %v461_v8  ;;  %v512_v39 = vsel %vm8116_vm9, 0, %v511_v10  ;;  %v984_v51 = vld [vmem:[#allocation2 + $0x50] sm:$0x1] }
  0x4f   : > { %7378 = vmatpush3.bf16.msra.mxu0 %v7855_v52  ;;  %7431 = vmatprep.subr.bf16.mxu1 %v7873_v20  ;;  %v1233_v46 = vsel %vm8092_vm4, %v1228_v24, %v1232_v4  ;;  %v714_v49 = vor.u32 %v712_v26, %v711_v31  ;;  %v715_v50 = vrot.slane %v711_v31, 4  ;;  %v358_v52 = vmul.f32 %v6830_v36, %v8087_v32  ;;  %v514_v26 = vld [vmem:[#allocation2 + $0x68] sm:$0x1] }
  0x50   : > { %7379 = vmatprep.subr.bf16.mxu0 %v7860_v54  ;;  %v1243_v40 = vsel %vm8092_vm4, %v1238_v30, %v1242_v18  ;;  %463 = vst [vmem:[#allocation2 + $0x54] sm:$0x1] %v462_v38  ;;  %513 = vst [vmem:[#allocation2 + $0x5c] sm:$0x1] %v512_v39  ;;  %v722_v55 = vor.u32 %v720_v28, %v719_v47  ;;  %v724_v56 = vrot.slane %v719_v47, 4  ;;  %v6834_v59 = vunpack.c.h.bf16 %v6953_v22  ;;  %v7874_v18 = vld [vmem:[%s10646_s1 + $0x138] sm:$0xff]  }
  0x51   : > { %v6442_v53 = vcombine.low %v1233_v46, %v1243_v40  ;;  %v396_v61 = vadd.f32 %v8099_v37, %v357_v41  ;;  %v981_v17 = vsel %vm8153_vm10, %v714_v49, %v980_v35  ;;  %v397_v57 = vadd.f32 %v8099_v37, %v358_v52 }
  0x52   : > { %7432 = vmatpush3.bf16.msra.mxu1 %v7873_v20  ;;  %v1067_v60 = vld [vmem:[#allocation2 + $0x3c] sm:$0xf]  ;;  %v1068_v62 = vld [vmem:[#allocation2 + $0x40] sm:$0xf]  ;;  %v723_v63 = vsel %vm8161_vm11, %v715_v50, %v722_v55  ;;  %982 = vst [vmem:[#allocation2 + $0x48] sm:$0xf] %v981_v17  ;;  %v985_v0 = vsel %vm8107_vm6, %v724_v56, %v984_v51  ;;  %v359_v35 = vmul.f32 %v6833_v58, %v8087_v32 }
  0x53   : > { %7380 = vmatpush3.bf16.msra.mxu0 %v7860_v54  ;;  %7297 = vmatprep.mubr.bf16.mxu0 %v6442_v53  ;;  %v6751_v1 = vpack.c.bf16 %v396_v61, %v396_v61  ;;  %v465_v2 = vsel %vm8107_vm6, 0, %v464_v42  ;;  %v1245_v4 = vshrl.u32 %v1067_v60, 16  ;;  %v1248_v21 = vshll.u32 %v1067_v60, 16  ;;  %983 = vst [vmem:[#allocation2 + $0x4c] sm:$0xf] %v723_v63 }
  0x54   : > { %7381 = vmatprep.subr.bf16.mxu0 %v7865_v44  ;;  %v1110_v3 = vld [vmem:[#allocation2 + $0x44] sm:$0x1]  ;;  %v1254_v5 = vshll.u32 %v1068_v62, 16  ;;  %v1258_v7 = vshrl.u32 %v1068_v62, 16  ;;  %986 = vst [vmem:[#allocation2 + $0x50] sm:$0x1] %v985_v0  ;;  %v6467_v10 = vcombine.low %v1067_v60, %v1068_v62  ;;  %v6752_v54 = vpack.c.bf16 %v397_v57, %v397_v57 }
  0x55   : > { %466 = vst [vmem:[#allocation2 + $0x60] sm:$0x1] %v465_v2  ;;  %v1264_v8 = vshll.u32 %v1110_v3, 16  ;;  %v726_v11 = vshrl.u32 %v6751_v1, 16  ;;  %v1247_v12 = vrot.slane %v1245_v4, 4  ;;  %v1250_v13 = vrot.slane %v1248_v21, 5 }
  0x56   : > { %v1256_v14 = vrot.slane %v1254_v5, 5  ;;  %v1260_v16 = vrot.slane %v1258_v7, 4  ;;  %7346 = vmatmul.mubr.bf16.gmra.mxu1 %v6467_v10  ;;  %v729_v20 = vshll.u32 %v6751_v1, 16  ;;  %v734_v24 = vshrl.u32 %v6752_v54, 16  ;;  %v467_v17 = vld [vmem:[#allocation2 + $0x6c] sm:$0x1] }
  0x57   : > { %7382 = vmatpush3.bf16.msra.mxu0 %v7865_v44  ;;  %v1266_v19 = vrot.slane %v1264_v8, 5  ;;  %v728_v9 = vrot.slane %v726_v11, 7  ;;  %v1251_v27 = vor.u32 %v1250_v13, %v1247_v12  ;;  %v737_v30 = vshll.u32 %v6752_v54, 16  ;;  %v987_v31 = vld [vmem:[#allocation2 + $0x54] sm:$0xf]  ;;  %v6954_v62 = vld [vmem:[%s8069_s28 + $0x40] sm:$0xff]  }
  0x58   : > { %7383 = vmatprep.subr.bf16.mxu0 %v7870_v6  ;;  %v1261_v28 = vor.u32 %v1260_v16, %v1256_v14  ;;  %v736_v42 = vrot.slane %v734_v24, 7  ;;  %v360_v44 = vmul.f32 %v6834_v59, %v8087_v32  ;;  %v398_v39 = vadd.f32 %v8099_v37, %v359_v35  ;;  %v991_v60 = vld [vmem:[#allocation2 + $0x5c] sm:$0x1] }
  0x59   : > { %v731_v36 = vor.u32 %v729_v20, %v728_v9  ;;  %v732_v41 = vrot.slane %v728_v9, 4  ;;  %v1252_v46 = vrot.slane %v1251_v27, 4  ;;  %v1069_v38 = vld [vmem:[#allocation2 + $0x48] sm:$0xf]  ;;  %v515_v22 = vsel %vm8116_vm9, 0, %v514_v26 }
  0x5a   : > { %v1262_v47 = vrot.slane %v1261_v28, 4  ;;  %v1070_v40 = vld [vmem:[#allocation2 + $0x4c] sm:$0xf]  ;;  %v1269_v50 = vshrl.u32 %v1069_v38, 16  ;;  %v1272_v51 = vshll.u32 %v1069_v38, 16  ;;  %v739_v52 = vor.u32 %v737_v30, %v736_v42 }
  0x5b   : > { %7384 = vmatpush3.bf16.msra.mxu0 %v7870_v6  ;;  %v1111_v49 = vld [vmem:[#allocation2 + $0x50] sm:$0x1]  ;;  %v988_v53 = vsel %vm8153_vm10, %v731_v36, %v987_v31  ;;  %516 = vst [vmem:[#allocation2 + $0x68] sm:$0x1] %v515_v22  ;;  %v1257_v32 = vsel %vm8092_vm4, %v1252_v46, %v1256_v14  ;;  %v1278_v56 = vshll.u32 %v1070_v40, 16  ;;  %v1282_v61 = vshrl.u32 %v1070_v40, 16 }
  0x5c   : > { %7465 = vmatprep.subr.bf16.mxu0 %v7874_v18  ;;  %v1267_v55 = vsel %vm8092_vm4, %v1262_v47, %v1266_v19  ;;  %989 = vst [vmem:[#allocation2 + $0x54] sm:$0xf] %v988_v53  ;;  %v1271_v58 = vrot.slane %v1269_v50, 4  ;;  %v1274_v59 = vrot.slane %v1272_v51, 5  ;;  %v1288_v6 = vshll.u32 %v1111_v49, 16  ;;  %v6955_v53 = vld [vmem:[%s8069_s28 + $0x48] sm:$0xff]  }
  0x5d   : > { %v6443_v57 = vcombine.low %v1257_v32, %v1267_v55  ;;  %v1280_v63 = vrot.slane %v1278_v56, 5  ;;  %v1284_v0 = vrot.slane %v1282_v61, 4  ;;  %v6468_v1 = vcombine.low %v1069_v38, %v1070_v40  ;;  %v994_v28 = vld [vmem:[#allocation2 + $0x60] sm:$0xf]  ;;  %v517_v31 = vld [vmem:[#allocation2 + $0x74] sm:$0x1] }
  0x5e   : > { %v740_v2 = vsel %vm8161_vm11, %v732_v41, %v739_v52  ;;  %v1275_v3 = vor.u32 %v1274_v59, %v1271_v58  ;;  %v1290_v4 = vrot.slane %v1288_v6, 5  ;;  %v741_v21 = vrot.slane %v736_v42, 4  ;;  %v8376_v38 = vld [vmem:[%s10648_s3] ss:$0 sm:$0xff] }
  0x5f   : > { %7298 = vmatmul.mubr.bf16.gmra.mxu0 %v6443_v57  ;;  %990 = vst [vmem:[#allocation2 + $0x58] sm:$0xf] %v740_v2  ;;  %v399_v5 = vadd.f32 %v8099_v37, %v360_v44  ;;  %v1285_v7 = vor.u32 %v1284_v0, %v1280_v63  ;;  %7349 = vmatprep.mubr.bf16.mxu1 %v6468_v1  ;;  %v6837_v10 = vunpack.c.l.bf16 %v6954_v62  ;;  %v6838_v54 = vunpack.c.h.bf16 %v6954_v62  ;;  %v8365_v37 = vld [vmem:[%s10647_s2] ss:$0 sm:$0xff]  ;;  %v470_v1 = vld [vmem:[#allocation2 + $0x78] sm:$0x1] }
  0x60   : > { %v6753_v8 = vpack.c.bf16 %v398_v39, %v398_v39  ;;  %v1276_v11 = vrot.slane %v1275_v3, 4  ;;  %v992_v12 = vsel %vm8107_vm6, %v741_v21, %v991_v60  ;;  %v468_v14 = vsel %vm8107_vm6, 0, %v467_v17  ;;  %v8388_v2 = vld [vmem:[%s8069_s28 + $0x50] sm:$0xff]  }
  0x61   : > { %v6754_v13 = vpack.c.bf16 %v399_v5, %v399_v5  ;;  %v1286_v16 = vrot.slane %v1285_v7, 4  ;;  %993 = vst [vmem:[#allocation2 + $0x5c] sm:$0x1] %v992_v12  ;;  %v361_v9 = vmul.f32 %v8365_v37, %v6837_v10  ;;  %469 = vst [vmem:[#allocation2 + $0x6c] sm:$0x1] %v468_v14  ;;  %v362_v30 = vmul.f32 %v8365_v37, %v6838_v54 }
  0x62   : > { %v743_v18 = vshrl.u32 %v6753_v8, 16  ;;  %v746_v19 = vshll.u32 %v6753_v8, 16  ;;  %v1281_v20 = vsel %vm8092_vm4, %v1276_v11, %v1280_v63  ;;  %v998_v47 = vld [vmem:[#allocation2 + $0x68] sm:$0x1]  ;;  %v518_v59 = vsel %vm8116_vm9, 0, %v517_v31 }
  0x63   : > { %v1071_v24 = vld [vmem:[#allocation2 + $0x54] sm:$0xf]  ;;  %v751_v26 = vshrl.u32 %v6754_v13, 16  ;;  %v754_v27 = vshll.u32 %v6754_v13, 16  ;;  %v1291_v35 = vsel %vm8092_vm4, %v1286_v16, %v1290_v4  ;;  %v400_v39 = vadd.f32 %v8376_v38, %v361_v9  ;;  %519 = vst [vmem:[#allocation2 + $0x74] sm:$0x1] %v518_v59 }
  0x64   : > { %v1293_v36 = vshrl.u32 %v1071_v24, 16  ;;  %v1296_v41 = vshll.u32 %v1071_v24, 16  ;;  %v745_v42 = vrot.slane %v743_v18, 7  ;;  %v6444_v44 = vcombine.low %v1281_v20, %v1291_v35  ;;  %v520_v7 = vld [vmem:[#allocation2 + $0x80] sm:$0x1] }
  0x65   : > { %v753_v46 = vrot.slane %v751_v26, 7  ;;  %v401_v22 = vadd.f32 %v8376_v38, %v362_v30  ;;  %v6755_v0 = vpack.c.bf16 %v400_v39, %v400_v39  ;;  %v6841_v11 = vunpack.c.l.bf16 %v6955_v53  ;;  %v7889_v26 = vld [vmem:[%s10646_s1 + $0x178] sm:$0xff]  }
  0x66   : > { %v1072_v40 = vld [vmem:[#allocation2 + $0x58] sm:$0xf]  ;;  %v1295_v49 = vrot.slane %v1293_v36, 4  ;;  %v1298_v50 = vrot.slane %v1296_v41, 5  ;;  %v748_v51 = vor.u32 %v746_v19, %v745_v42  ;;  %v749_v52 = vrot.slane %v745_v42, 4  ;;  %7301 = vmatprep.mubr.bf16.mxu0 %v6444_v44  ;;  %7513 = vmatprep.subr.bf16.mxu1 %v7889_v26 }
  0x67   : > { %v1302_v32 = vshll.u32 %v1072_v40, 16  ;;  %v1306_v55 = vshrl.u32 %v1072_v40, 16  ;;  %v6469_v56 = vcombine.low %v1071_v24, %v1072_v40  ;;  %v756_v61 = vor.u32 %v754_v27, %v753_v46 }
  0x68   : > { %v1299_v17 = vor.u32 %v1298_v50, %v1295_v49  ;;  %v758_v57 = vrot.slane %v753_v46, 4  ;;  %v995_v58 = vsel %vm8153_vm10, %v748_v51, %v994_v28  ;;  %v1112_v6 = vld [vmem:[#allocation2 + $0x5c] sm:$0x1]  ;;  %v6756_v5 = vpack.c.bf16 %v401_v22, %v401_v22  ;;  %v1001_v18 = vld [vmem:[#allocation2 + $0x6c] sm:$0xf] }
  0x69   : > { %v1304_v60 = vrot.slane %v1302_v32, 5  ;;  %v1308_v62 = vrot.slane %v1306_v55, 4  ;;  %7350 = vmatmul.mubr.bf16.gmra.mxu1 %v6469_v56  ;;  %v757_v63 = vsel %vm8161_vm11, %v749_v52, %v756_v61  ;;  %996 = vst [vmem:[#allocation2 + $0x60] sm:$0xf] %v995_v58  ;;  %v1312_v4 = vshll.u32 %v1112_v6, 16 }
  0x6a   : > { %v1300_v3 = vrot.slane %v1299_v17, 4  ;;  %997 = vst [vmem:[#allocation2 + $0x64] sm:$0xf] %v757_v63  ;;  %v999_v21 = vsel %vm8107_vm6, %v758_v57, %v998_v47  ;;  %v760_v10 = vshrl.u32 %v6755_v0, 16  ;;  %v763_v54 = vshll.u32 %v6755_v0, 16 }
  0x6b   : > { %v1309_v8 = vor.u32 %v1308_v62, %v1304_v60  ;;  %1000 = vst [vmem:[#allocation2 + $0x68] sm:$0x1] %v999_v21  ;;  %v1314_v13 = vrot.slane %v1312_v4, 5  ;;  %v768_v14 = vshrl.u32 %v6756_v5, 16  ;;  %v771_v16 = vshll.u32 %v6756_v5, 16 }
  0x6c   : > { %v1305_v12 = vsel %vm8092_vm4, %v1300_v3, %v1304_v60  ;;  %v762_v9 = vrot.slane %v760_v10, 7  ;;  %v6842_v20 = vunpack.c.h.bf16 %v6955_v53  ;;  %v363_v24 = vmul.f32 %v8365_v37, %v6841_v11  ;;  %v1005_v22 = vld [vmem:[#allocation2 + $0x74] sm:$0x1]  ;;  %v473_v5 = vld [vmem:[#allocation2 + $0x84] sm:$0x1] }
  0x6d   : > { %v1310_v19 = vrot.slane %v1309_v8, 4  ;;  %v770_v27 = vrot.slane %v768_v14, 7  ;;  %v471_v28 = vsel %vm8107_vm6, 0, %v470_v1  ;;  %v521_v30 = vsel %vm8116_vm9, 0, %v520_v7  ;;  %v523_v11 = vld [vmem:[#allocation2 + $0x8c] sm:$0x1] }
  0x6e   : > { %v6845_v31 = vunpack.c.l.bf16 %v8388_v2  ;;  %v765_v36 = vor.u32 %v763_v54, %v762_v9  ;;  %v766_v41 = vrot.slane %v762_v9, 4  ;;  %v364_v42 = vmul.f32 %v8365_v37, %v6842_v20  ;;  %472 = vst [vmem:[#allocation2 + $0x78] sm:$0x1] %v471_v28  ;;  %522 = vst [vmem:[#allocation2 + $0x80] sm:$0x1] %v521_v30 }
  0x6f   : > { %v1315_v35 = vsel %vm8092_vm4, %v1310_v19, %v1314_v13  ;;  %v773_v47 = vor.u32 %v771_v16, %v770_v27  ;;  %v775_v39 = vrot.slane %v770_v27, 4  ;;  %v402_v40 = vadd.f32 %v8376_v38, %v363_v24 }
  0x70   : > { %v6445_v44 = vcombine.low %v1305_v12, %v1315_v35  ;;  %v1073_v46 = vld [vmem:[#allocation2 + $0x60] sm:$0xf]  ;;  %v1002_v52 = vsel %vm8153_vm10, %v765_v36, %v1001_v18  ;;  %v403_v53 = vadd.f32 %v8376_v38, %v364_v42  ;;  %v6846_v4 = vunpack.c.h.bf16 %v8388_v2 }
  0x71   : > { %v8407_v49 = vld [vmem:[#allocation2 + $0x64] sm:$0xf]  ;;  %v1317_v50 = vshrl.u32 %v1073_v46, 16  ;;  %v1320_v51 = vshll.u32 %v1073_v46, 16  ;;  %v774_v17 = vsel %vm8161_vm11, %v766_v41, %v773_v47  ;;  %1003 = vst [vmem:[#allocation2 + $0x6c] sm:$0xf] %v1002_v52  ;;  %v1006_v6 = vsel %vm8107_vm6, %v775_v39, %v1005_v22 }
  0x72   : > { %7302 = vmatmul.mubr.bf16.gmra.mxu0 %v6445_v44  ;;  %v8412_v32 = vld [vmem:[#allocation2 + $0x68] sm:$0x1]  ;;  %v1326_v55 = vshll.u32 %v8407_v49, 16  ;;  %v1330_v56 = vshrl.u32 %v8407_v49, 16  ;;  %v6470_v61 = vcombine.low %v1073_v46, %v8407_v49  ;;  %1004 = vst [vmem:[#allocation2 + $0x70] sm:$0xf] %v774_v17  ;;  %v6757_v63 = vpack.c.bf16 %v402_v40, %v402_v40 }
  0x73   : > { %v1319_v57 = vrot.slane %v1317_v50, 4  ;;  %v1322_v58 = vrot.slane %v1320_v51, 5  ;;  %v1336_v59 = vshll.u32 %v8412_v32, 16  ;;  %1007 = vst [vmem:[#allocation2 + $0x74] sm:$0x1] %v1006_v6  ;;  %v6758_v0 = vpack.c.bf16 %v403_v53, %v403_v53 }
  0x74   : > { %v1328_v60 = vrot.slane %v1326_v55, 5  ;;  %v1332_v62 = vrot.slane %v1330_v56, 4  ;;  %7353 = vmatprep.mubr.bf16.mxu1 %v6470_v61  ;;  %v365_v21 = vmul.f32 %v8365_v37, %v6845_v31  ;;  %v777_v8 = vshrl.u32 %v6757_v63, 16 }
  0x75   : > { %v1323_v1 = vor.u32 %v1322_v58, %v1319_v57  ;;  %v1338_v3 = vrot.slane %v1336_v59, 5  ;;  %v780_v10 = vshll.u32 %v6757_v63, 16  ;;  %v785_v54 = vshrl.u32 %v6758_v0, 16  ;;  %v1008_v26 = vld [vmem:[#allocation2 + $0x78] sm:$0xf] }
  0x76   : > { %v1333_v7 = vor.u32 %v1332_v62, %v1328_v60  ;;  %v788_v13 = vshll.u32 %v6758_v0, 16  ;;  %v366_v14 = vmul.f32 %v8365_v37, %v6846_v4  ;;  %v404_v16 = vadd.f32 %v8376_v38, %v365_v21  ;;  %v1012_v53 = vld [vmem:[#allocation2 + $0x80] sm:$0x1]  ;;  %v476_v57 = vld [vmem:[#allocation2 + $0x90] sm:$0x1]  ;;  %v6957_v63 = vld [vmem:[%s8069_s28 + $0x58] sm:$0xff]  }
  0x77   : > { %v1324_v12 = vrot.slane %v1323_v1, 4  ;;  %v779_v19 = vrot.slane %v777_v8, 7  ;;  %v787_v9 = vrot.slane %v785_v54, 7  ;;  %v474_v2 = vsel %vm8107_vm6, 0, %v473_v5  ;;  %v526_v58 = vld [vmem:[#allocation2 + $0x98] sm:$0x1] }
  0x78   : > { %v1334_v18 = vrot.slane %v1333_v7, 4  ;;  %v1075_v24 = vld [vmem:[#allocation2 + $0x6c] sm:$0xf]  ;;  %v405_v27 = vadd.f32 %v8376_v38, %v366_v14  ;;  %475 = vst [vmem:[#allocation2 + $0x84] sm:$0x1] %v474_v2  ;;  %v524_v28 = vsel %vm8116_vm9, 0, %v523_v11  ;;  %v6759_v30 = vpack.c.bf16 %v404_v16, %v404_v16 }
  0x79   : > { %v1329_v20 = vsel %vm8092_vm4, %v1324_v12, %v1328_v60  ;;  %v8435_v35 = vld [vmem:[#allocation2 + $0x70] sm:$0xf]  ;;  %v1341_v36 = vshrl.u32 %v1075_v24, 16  ;;  %v1344_v41 = vshll.u32 %v1075_v24, 16  ;;  %v782_v42 = vor.u32 %v780_v10, %v779_v19  ;;  %525 = vst [vmem:[#allocation2 + $0x8c] sm:$0x1] %v524_v28 }
  0x7a   : > { %v1339_v31 = vsel %vm8092_vm4, %v1334_v18, %v1338_v3  ;;  %v8437_v46 = vld [vmem:[#allocation2 + $0x74] sm:$0x1]  ;;  %v1350_v47 = vshll.u32 %v8435_v35, 16  ;;  %v1354_v39 = vshrl.u32 %v8435_v35, 16  ;;  %v6471_v22 = vcombine.low %v1075_v24, %v8435_v35  ;;  %v479_v16 = vld [vmem:[#allocation2 + $0x9c] sm:$0x1] }
  0x7b   : > { %v6446_v44 = vcombine.low %v1329_v20, %v1339_v31  ;;  %v1343_v40 = vrot.slane %v1341_v36, 4  ;;  %v1346_v50 = vrot.slane %v1344_v41, 5  ;;  %v1360_v51 = vshll.u32 %v8437_v46, 16  ;;  %v6958_v20 = vld [vmem:[%s8069_s28 + $0x60] sm:$0xff]  }
  0x7c   : > { %v783_v52 = vrot.slane %v779_v19, 4  ;;  %v1352_v55 = vrot.slane %v1350_v47, 5  ;;  %v1356_v56 = vrot.slane %v1354_v39, 4  ;;  %7354 = vmatmul.mubr.bf16.gmra.mxu1 %v6471_v22  ;;  %v790_v61 = vor.u32 %v788_v13, %v787_v9 }
  0x7d   : > { %7305 = vmatprep.mubr.bf16.mxu0 %v6446_v44  ;;  %v792_v17 = vrot.slane %v787_v9, 4  ;;  %v1347_v59 = vor.u32 %v1346_v50, %v1343_v40  ;;  %v1362_v6 = vrot.slane %v1360_v51, 5  ;;  %v1009_v60 = vsel %vm8153_vm10, %v782_v42, %v1008_v26 }
  0x7e   : > { %v6760_v62 = vpack.c.bf16 %v405_v27, %v405_v27  ;;  %v1357_v0 = vor.u32 %v1356_v56, %v1352_v55  ;;  %v791_v1 = vsel %vm8161_vm11, %v783_v52, %v790_v61  ;;  %1010 = vst [vmem:[#allocation2 + $0x78] sm:$0xf] %v1009_v60  ;;  %v794_v4 = vshrl.u32 %v6759_v30, 16 }
  0x7f   : > { %v1013_v3 = vsel %vm8107_vm6, %v792_v17, %v1012_v53  ;;  %v1348_v21 = vrot.slane %v1347_v59, 4  ;;  %1011 = vst [vmem:[#allocation2 + $0x7c] sm:$0xf] %v791_v1  ;;  %v797_v5 = vshll.u32 %v6759_v30, 16  ;;  %v1015_v11 = vld [vmem:[#allocation2 + $0x84] sm:$0xf]  ;;  %v6849_v13 = vunpack.c.l.bf16 %v6957_v63 }
  0x80   : > { %1014 = vst [vmem:[#allocation2 + $0x80] sm:$0x1] %v1013_v3  ;;  %v802_v7 = vshrl.u32 %v6760_v62, 16  ;;  %v805_v8 = vshll.u32 %v6760_v62, 16  ;;  %v1358_v10 = vrot.slane %v1357_v0, 4  ;;  %v796_v54 = vrot.slane %v794_v4, 7 }
  0x81   : > { %v1019_v12 = vld [vmem:[#allocation2 + $0x8c] sm:$0x1]  ;;  %v6850_v14 = vunpack.c.h.bf16 %v6957_v63  ;;  %v1353_v18 = vsel %vm8092_vm4, %v1348_v21, %v1352_v55  ;;  %v477_v9 = vsel %vm8107_vm6, 0, %v476_v57  ;;  %v527_v2 = vsel %vm8116_vm9, 0, %v526_v58  ;;  %v529_v3 = vld [vmem:[#allocation2 + $0xa4] sm:$0x1] }
  0x82   : > { %v804_v19 = vrot.slane %v802_v7, 7  ;;  %v1363_v24 = vsel %vm8092_vm4, %v1358_v10, %v1362_v6  ;;  %v799_v26 = vor.u32 %v797_v5, %v796_v54  ;;  %v800_v27 = vrot.slane %v796_v54, 4  ;;  %478 = vst [vmem:[#allocation2 + $0x90] sm:$0x1] %v477_v9  ;;  %528 = vst [vmem:[#allocation2 + $0x98] sm:$0x1] %v527_v2 }
  0x83   : > { %v367_v28 = vmul.f32 %v8365_v37, %v6849_v13  ;;  %v6447_v30 = vcombine.low %v1353_v18, %v1363_v24  ;;  %v368_v41 = vmul.f32 %v8365_v37, %v6850_v14  ;;  %v6853_v47 = vunpack.c.l.bf16 %v6958_v20 }
  0x84   : > { %v807_v31 = vor.u32 %v805_v8, %v804_v19  ;;  %v809_v36 = vrot.slane %v804_v19, 4  ;;  %v1016_v42 = vsel %vm8153_vm10, %v799_v26, %v1015_v11  ;;  %v6854_v39 = vunpack.c.h.bf16 %v6958_v20 }
  0x85   : > { %v406_v44 = vadd.f32 %v8376_v38, %v367_v28  ;;  %7306 = vmatmul.mubr.bf16.gmra.mxu0 %v6447_v30  ;;  %v1077_v22 = vld [vmem:[#allocation2 + $0x78] sm:$0xf]  ;;  %1017 = vst [vmem:[#allocation2 + $0x84] sm:$0xf] %v1016_v42  ;;  %v407_v51 = vadd.f32 %v8376_v38, %v368_v41  ;;  %v480_v52 = vsel %vm8107_vm6, 0, %v479_v16  ;;  %v369_v57 = vmul.f32 %v8365_v37, %v6853_v47 }
  0x86   : > { %v808_v40 = vsel %vm8161_vm11, %v800_v27, %v807_v31  ;;  %v1020_v50 = vsel %vm8107_vm6, %v809_v36, %v1019_v12  ;;  %v8471_v53 = vld [vmem:[#allocation2 + $0x7c] sm:$0xf]  ;;  %v1365_v56 = vshrl.u32 %v1077_v22, 16  ;;  %v1368_v61 = vshll.u32 %v1077_v22, 16  ;;  %481 = vst [vmem:[#allocation2 + $0x9c] sm:$0x1] %v480_v52 }
  0x87   : > { %v8473_v55 = vld [vmem:[#allocation2 + $0x80] sm:$0x1]  ;;  %1018 = vst [vmem:[#allocation2 + $0x88] sm:$0xf] %v808_v40  ;;  %1021 = vst [vmem:[#allocation2 + $0x8c] sm:$0x1] %v1020_v50  ;;  %v6761_v17 = vpack.c.bf16 %v406_v44, %v406_v44  ;;  %v6472_v60 = vcombine.low %v1077_v22, %v8471_v53  ;;  %v6762_v0 = vpack.c.bf16 %v407_v51, %v407_v51 }
  0x88   : > { %v1374_v58 = vshll.u32 %v8471_v53, 16  ;;  %v1378_v59 = vshrl.u32 %v8471_v53, 16  ;;  %v1384_v6 = vshll.u32 %v8473_v55, 16  ;;  %v1367_v62 = vrot.slane %v1365_v56, 4 }
  0x89   : > { %v1370_v63 = vrot.slane %v1368_v61, 5  ;;  %v811_v1 = vshrl.u32 %v6761_v17, 16  ;;  %7357 = vmatprep.mubr.bf16.mxu1 %v6472_v60  ;;  %v814_v7 = vshll.u32 %v6761_v17, 16  ;;  %v819_v54 = vshrl.u32 %v6762_v0, 16  ;;  %v1022_v47 = vld [vmem:[#allocation2 + $0x90] sm:$0xf] }
  0x8a   : > { %v1376_v4 = vrot.slane %v1374_v58, 5  ;;  %v1380_v21 = vrot.slane %v1378_v59, 4  ;;  %v1386_v5 = vrot.slane %v1384_v6, 5  ;;  %v822_v11 = vshll.u32 %v6762_v0, 16  ;;  %v1026_v51 = vld [vmem:[#allocation2 + $0x98] sm:$0x1] }
  0x8b   : > { %v1371_v8 = vor.u32 %v1370_v63, %v1367_v62  ;;  %v813_v10 = vrot.slane %v811_v1, 7  ;;  %v370_v13 = vmul.f32 %v8365_v37, %v6854_v39  ;;  %v408_v14 = vadd.f32 %v8376_v38, %v369_v57  ;;  %v6959_v57 = vld [vmem:[%s8069_s28 + $0x68] sm:$0xff]  }
  0x8c   : > { %v1381_v12 = vor.u32 %v1380_v21, %v1376_v4  ;;  %v530_v16 = vsel %vm8116_vm9, 0, %v529_v3  ;;  %v1079_v19 = vld [vmem:[#allocation2 + $0x84] sm:$0xf]  ;;  %v821_v20 = vrot.slane %v819_v54, 7  ;;  %v482_v3 = vld [vmem:[#allocation2 + $0xa8] sm:$0x1] }
  0x8d   : > { %v1372_v18 = vrot.slane %v1371_v8, 4  ;;  %v816_v9 = vor.u32 %v814_v7, %v813_v10  ;;  %v817_v2 = vrot.slane %v813_v10, 4  ;;  %531 = vst [vmem:[#allocation2 + $0xa4] sm:$0x1] %v530_v16  ;;  %v1389_v28 = vshrl.u32 %v1079_v19, 16 }
  0x8e   : > { %v1382_v24 = vrot.slane %v1381_v12, 4  ;;  %v8484_v26 = vld [vmem:[#allocation2 + $0x88] sm:$0xf]  ;;  %v8486_v27 = vld [vmem:[#allocation2 + $0x8c] sm:$0x1]  ;;  %v409_v30 = vadd.f32 %v8376_v38, %v370_v13  ;;  %v6763_v31 = vpack.c.bf16 %v408_v14, %v408_v14  ;;  %v1392_v41 = vshll.u32 %v1079_v19, 16 }
  0x8f   : > { %v1377_v36 = vsel %vm8092_vm4, %v1372_v18, %v1376_v4  ;;  %v1398_v42 = vshll.u32 %v8484_v26, 16  ;;  %v1402_v44 = vshrl.u32 %v8484_v26, 16  ;;  %v1391_v22 = vrot.slane %v1389_v28, 4  ;;  %v532_v12 = vld [vmem:[#allocation2 + $0xb0] sm:$0x1] }
  0x90   : > { %v1387_v39 = vsel %vm8092_vm4, %v1382_v24, %v1386_v5  ;;  %v1408_v40 = vshll.u32 %v8486_v27, 16  ;;  %v6473_v50 = vcombine.low %v1079_v19, %v8484_v26  ;;  %v1394_v56 = vrot.slane %v1392_v41, 5  ;;  %v1029_v14 = vld [vmem:[#allocation2 + $0x9c] sm:$0xf] }
  0x91   : > { %v6448_v52 = vcombine.low %v1377_v36, %v1387_v39  ;;  %v1400_v61 = vrot.slane %v1398_v42, 5  ;;  %v1404_v17 = vrot.slane %v1402_v44, 4  ;;  %v824_v59 = vor.u32 %v822_v11, %v821_v20 }
  0x92   : > { %v1410_v58 = vrot.slane %v1408_v40, 5  ;;  %7358 = vmatmul.mubr.bf16.gmra.mxu1 %v6473_v50  ;;  %v826_v6 = vrot.slane %v821_v20, 4  ;;  %v1023_v60 = vsel %vm8153_vm10, %v816_v9, %v1022_v47  ;;  %v1395_v62 = vor.u32 %v1394_v56, %v1391_v22  ;;  %v6960_v9 = vld [vmem:[%s8069_s28 + $0x70] sm:$0xff]  }
  0x93   : > { %7309 = vmatprep.mubr.bf16.mxu0 %v6448_v52  ;;  %v1405_v63 = vor.u32 %v1404_v17, %v1400_v61  ;;  %1024 = vst [vmem:[#allocation2 + $0x90] sm:$0xf] %v1023_v60  ;;  %v6764_v0 = vpack.c.bf16 %v409_v30, %v409_v30  ;;  %v828_v1 = vshrl.u32 %v6763_v31, 16  ;;  %v825_v4 = vsel %vm8161_vm11, %v817_v2, %v824_v59 }
  0x94   : > { %v1027_v21 = vsel %vm8107_vm6, %v826_v6, %v1026_v51  ;;  %v831_v5 = vshll.u32 %v6763_v31, 16  ;;  %v6857_v7 = vunpack.c.l.bf16 %v6959_v57  ;;  %v1396_v8 = vrot.slane %v1395_v62, 4  ;;  %1025 = vst [vmem:[#allocation2 + $0x94] sm:$0xf] %v825_v4  ;;  %v1033_v44 = vld [vmem:[#allocation2 + $0xa4] sm:$0x1] }
  0x95   : > { %v1406_v10 = vrot.slane %v1405_v63, 4  ;;  %1028 = vst [vmem:[#allocation2 + $0x98] sm:$0x1] %v1027_v21  ;;  %v830_v54 = vrot.slane %v828_v1, 7  ;;  %v836_v11 = vshrl.u32 %v6764_v0, 16  ;;  %v839_v13 = vshll.u32 %v6764_v0, 16 }
  0x96   : > { %v6858_v16 = vunpack.c.h.bf16 %v6959_v57  ;;  %v371_v18 = vmul.f32 %v8365_v37, %v6857_v7  ;;  %v483_v19 = vsel %vm8107_vm6, 0, %v482_v3  ;;  %v1401_v2 = vsel %vm8092_vm4, %v1396_v8, %v1400_v61 }
  0x97   : > { %v1411_v20 = vsel %vm8092_vm4, %v1406_v10, %v1410_v58  ;;  %v833_v24 = vor.u32 %v831_v5, %v830_v54  ;;  %v834_v28 = vrot.slane %v830_v54, 4  ;;  %484 = vst [vmem:[#allocation2 + $0xa8] sm:$0x1] %v483_v19  ;;  %v838_v31 = vrot.slane %v836_v11, 7 }
  0x98   : > { %v6449_v30 = vcombine.low %v1401_v2, %v1411_v20  ;;  %v372_v36 = vmul.f32 %v8365_v37, %v6858_v16  ;;  %v410_v41 = vadd.f32 %v8376_v38, %v371_v18  ;;  %v533_v47 = vsel %vm8116_vm9, 0, %v532_v12 }
  0x99   : > { %v1030_v42 = vsel %vm8153_vm10, %v833_v24, %v1029_v14  ;;  %v6861_v39 = vunpack.c.l.bf16 %v6960_v9  ;;  %v6862_v22 = vunpack.c.h.bf16 %v6960_v9  ;;  %v841_v50 = vor.u32 %v839_v13, %v838_v31  ;;  %534 = vst [vmem:[#allocation2 + $0xb0] sm:$0x1] %v533_v47 }
  0x9a   : > { %7310 = vmatmul.mubr.bf16.gmra.mxu0 %v6449_v30  ;;  %v1081_v40 = vld [vmem:[#allocation2 + $0x90] sm:$0xf]  ;;  %v843_v51 = vrot.slane %v838_v31, 4  ;;  %1031 = vst [vmem:[#allocation2 + $0x9c] sm:$0xf] %v1030_v42  ;;  %v411_v52 = vadd.f32 %v8376_v38, %v372_v36  ;;  %v6765_v56 = vpack.c.bf16 %v410_v41, %v410_v41 }
  0x9b   : > { %v1413_v61 = vshrl.u32 %v1081_v40, 16  ;;  %v1416_v17 = vshll.u32 %v1081_v40, 16  ;;  %v373_v57 = vmul.f32 %v8365_v37, %v6861_v39  ;;  %v374_v58 = vmul.f32 %v8365_v37, %v6862_v22  ;;  %v8521_v59 = vld [vmem:[#allocation2 + $0x94] sm:$0xf] }
  0x9c   : > { %v8523_v6 = vld [vmem:[#allocation2 + $0x98] sm:$0x1]  ;;  %v842_v60 = vsel %vm8161_vm11, %v834_v28, %v841_v50  ;;  %v1034_v62 = vsel %vm8107_vm6, %v843_v51, %v1033_v44  ;;  %v6766_v63 = vpack.c.bf16 %v411_v52, %v411_v52  ;;  %v845_v0 = vshrl.u32 %v6765_v56, 16  ;;  %v535_v50 = vld [vmem:[#allocation2 + $0xbc] sm:$0x1] }
  0x9d   : > { %v1415_v1 = vrot.slane %v1413_v61, 4  ;;  %v1418_v3 = vrot.slane %v1416_v17, 5  ;;  %v1422_v4 = vshll.u32 %v8521_v59, 16  ;;  %v1426_v21 = vshrl.u32 %v8521_v59, 16  ;;  %1032 = vst [vmem:[#allocation2 + $0xa0] sm:$0xf] %v842_v60 }
  0x9e   : > { %1035 = vst [vmem:[#allocation2 + $0xa4] sm:$0x1] %v1034_v62  ;;  %v1432_v37 = vshll.u32 %v8523_v6, 16  ;;  %v6474_v5 = vcombine.low %v1081_v40, %v8521_v59  ;;  %v847_v7 = vrot.slane %v845_v0, 7  ;;  %v848_v8 = vshll.u32 %v6765_v56, 16 }
  0x9f   : > { %v1419_v10 = vor.u32 %v1418_v3, %v1415_v1  ;;  %v1424_v54 = vrot.slane %v1422_v4, 5  ;;  %v1428_v11 = vrot.slane %v1426_v21, 4  ;;  %v853_v12 = vshrl.u32 %v6766_v63, 16  ;;  %v1036_v13 = vld [vmem:[#allocation2 + $0xa8] sm:$0xf] }
  0xa0   : > { %v1434_v14 = vrot.slane %v1432_v37, 5  ;;  %7361 = vmatprep.mubr.bf16.mxu1 %v6474_v5  ;;  %v850_v16 = vor.u32 %v848_v8, %v847_v7  ;;  %v851_v18 = vrot.slane %v847_v7, 4  ;;  %v856_v19 = vshll.u32 %v6766_v63, 16  ;;  %v1040_v22 = vld [vmem:[#allocation2 + $0xb0] sm:$0x1] }
  0xa1   : > { %v1420_v9 = vrot.slane %v1419_v10, 4  ;;  %v1429_v2 = vor.u32 %v1428_v11, %v1424_v54  ;;  %v1083_v20 = vld [vmem:[#allocation2 + $0x9c] sm:$0xf]  ;;  %v855_v24 = vrot.slane %v853_v12, 7  ;;  %v412_v28 = vadd.f32 %v8376_v38, %v373_v57  ;;  %v485_v40 = vld [vmem:[#allocation2 + $0xb4] sm:$0x1] }
  0xa2   : > { %v1437_v30 = vshrl.u32 %v1083_v20, 16  ;;  %v1440_v31 = vshll.u32 %v1083_v20, 16  ;;  %v1037_v36 = vsel %vm8153_vm10, %v850_v16, %v1036_v13  ;;  %v413_v41 = vadd.f32 %v8376_v38, %v374_v58  ;;  %v2102_v16 = vld [vmem:[#allocation2] sm:$0xe] }
  0xa3   : > { %v1425_v42 = vsel %vm8092_vm4, %v1420_v9, %v1424_v54  ;;  %v1430_v44 = vrot.slane %v1429_v2, 4  ;;  %v858_v47 = vor.u32 %v856_v19, %v855_v24  ;;  %v860_v39 = vrot.slane %v855_v24, 4  ;;  %1038 = vst [vmem:[#allocation2 + $0xa8] sm:$0xf] %v1037_v36 }
  0xa4   : > { %v8539_v51 = vld [vmem:[#allocation2 + $0xa0] sm:$0xf]  ;;  %v1439_v56 = vrot.slane %v1437_v30, 4  ;;  %v1442_v61 = vrot.slane %v1440_v31, 5  ;;  %v6767_v17 = vpack.c.bf16 %v412_v28, %v412_v28  ;;  %v6768_v57 = vpack.c.bf16 %v413_v41, %v413_v41  ;;  %v7948_v41 = vld [vmem:[#allocation2 + $0x4] sm:$0xf] }
  0xa5   : > { %v8541_v52 = vld [vmem:[#allocation2 + $0xa4] sm:$0x1]  ;;  %v1435_v38 = vsel %vm8092_vm4, %v1430_v44, %v1434_v14  ;;  %v1446_v58 = vshll.u32 %v8539_v51, 16  ;;  %v1450_v60 = vshrl.u32 %v8539_v51, 16  ;;  %v6475_v1 = vcombine.low %v1083_v20, %v8539_v51 }
  0xa6   : > { %v1456_v62 = vshll.u32 %v8541_v52, 16  ;;  %v6450_v63 = vcombine.low %v1425_v42, %v1435_v38  ;;  %v1443_v0 = vor.u32 %v1442_v61, %v1439_v56  ;;  %v859_v3 = vsel %vm8161_vm11, %v851_v18, %v858_v47 }
  0xa7   : > { %v1448_v4 = vrot.slane %v1446_v58, 5  ;;  %v1452_v21 = vrot.slane %v1450_v60, 4  ;;  %1039 = vst [vmem:[#allocation2 + $0xac] sm:$0xf] %v859_v3  ;;  %v1041_v5 = vsel %vm8107_vm6, %v860_v39, %v1040_v22  ;;  %7362 = vmatmul.mubr.bf16.gmra.mxu1 %v6475_v1  ;;  %v486_v8 = vsel %vm8107_vm6, 0, %v485_v40 }
  0xa8   : > { %v1458_v37 = vrot.slane %v1456_v62, 5  ;;  %7313 = vmatprep.mubr.bf16.mxu0 %v6450_v63  ;;  %v1444_v7 = vrot.slane %v1443_v0, 4  ;;  %1042 = vst [vmem:[#allocation2 + $0xb0] sm:$0x1] %v1041_v5  ;;  %v536_v10 = vsel %vm8116_vm9, 0, %v535_v50  ;;  %v862_v54 = vshrl.u32 %v6767_v17, 16 }
  0xa9   : > { %v1453_v11 = vor.u32 %v1452_v21, %v1448_v4  ;;  %487 = vst [vmem:[#allocation2 + $0xb4] sm:$0x1] %v486_v8  ;;  %537 = vst [vmem:[#allocation2 + $0xbc] sm:$0x1] %v536_v10  ;;  %v865_v12 = vshll.u32 %v6767_v17, 16  ;;  %v870_v13 = vshrl.u32 %v6768_v57, 16 }
  0xaa   : > { %v873_v14 = vshll.u32 %v6768_v57, 16  ;;  %v1449_v18 = vsel %vm8092_vm4, %v1444_v7, %v1448_v4  ;;  %v1085_v19 = vld [vmem:[#allocation2 + $0xa8] sm:$0xf]  ;;  %v864_v9 = vrot.slane %v862_v54, 7  ;;  %v6486_v36 = vrot.slane %v2102_v16, 9 }
  0xab   : > { %v1454_v2 = vrot.slane %v1453_v11, 4  ;;  %v1461_v20 = vshrl.u32 %v1085_v19, 16  ;;  %v1464_v24 = vshll.u32 %v1085_v19, 16  ;;  %v872_v28 = vrot.slane %v870_v13, 7  ;;  %v2103_v40 = vld [vmem:[#allocation2 + $0xc] sm:$0xe] }
  0xac   : > { %v867_v30 = vor.u32 %v865_v12, %v864_v9  ;;  %v868_v31 = vrot.slane %v864_v9, 4  ;;  %v2155_v42 = vrot.slane %v7948_v41, 5  ;;  %v2104_v0 = vld [vmem:[#allocation2 + $0x18] sm:$0xe]  ;;  %v2105_v54 = vld [vmem:[#allocation2 + $0x24] sm:$0xe] }
  0xad   : > { %v1459_v44 = vsel %vm8092_vm4, %v1454_v2, %v1458_v37  ;;  %v1463_v47 = vrot.slane %v1461_v20, 4  ;;  %v1466_v39 = vrot.slane %v1464_v24, 5  ;;  %v875_v22 = vor.u32 %v873_v14, %v872_v28  ;;  %v7949_v14 = vld [vmem:[#allocation2 + $0x10] sm:$0xf]  ;;  %v7950_v2 = vld [vmem:[#allocation2 + $0x1c] sm:$0xf] }
  0xae   : > { %v6451_v50 = vcombine.low %v1449_v18, %v1459_v44  ;;  %v8561_v56 = vld [vmem:[#allocation2 + $0xac] sm:$0xf]  ;;  %v877_v61 = vrot.slane %v872_v28, 4  ;;  %v2157_v17 = vrot.slane %v2155_v42, 4  ;;  %v6487_v37 = vrot.slane %v2103_v40, 9 }
  0xaf   : > { %v8563_v57 = vld [vmem:[#allocation2 + $0xb0] sm:$0x1]  ;;  %v1467_v38 = vor.u32 %v1466_v39, %v1463_v47  ;;  %v1470_v58 = vshll.u32 %v8561_v56, 16  ;;  %v1474_v60 = vshrl.u32 %v8561_v56, 16  ;;  %v6476_v62 = vcombine.low %v1085_v19, %v8561_v56  ;;  %v2106_v47 = vld [vmem:[#allocation2 + $0x30] sm:$0xe] }
  0xb0   : > { %7314 = vmatmul.mubr.bf16.gmra.mxu0 %v6451_v50  ;;  %v1480_v1 = vshll.u32 %v8563_v57, 16  ;;  %v876_v3 = vsel %vm8161_vm11, %v868_v31, %v875_v22  ;;  %v1043_v4 = vld [vmem:[#allocation2 + $0xb4] sm:$0xf]  ;;  %v1047_v21 = vld [vmem:[#allocation2 + $0xbc] sm:$0x1]  ;;  %v8583_v12 = vsel %vm8570_vm14, %v6486_v36, %v2155_v42  ;;  %v8589_v13 = vsel %vm8570_vm14, %v2157_v17, %v2158_v25 }
  0xb1   : > { %v1468_v5 = vrot.slane %v1467_v38, 4  ;;  %v1472_v7 = vrot.slane %v1470_v58, 5  ;;  %v1476_v8 = vrot.slane %v1474_v60, 4  ;;  %7365 = vmatprep.mubr.bf16.mxu1 %v6476_v62  ;;  %v1044_v10 = vsel %vm8153_vm10, %v867_v30, %v1043_v4  ;;  %1046 = vst [vmem:[#allocation2 + $0xb8] sm:$0xf] %v876_v3 }
  0xb2   : > { %1045 = vst [vmem:[#allocation2 + $0xb4] sm:$0xf] %v1044_v10  ;;  %v1048_v11 = vsel %vm8107_vm6, %v877_v61, %v1047_v21  ;;  %v2162_v16 = vrot.slane %v7949_v14, 5  ;;  %v1482_v19 = vrot.slane %v1480_v1, 5  ;;  %v6488_v9 = vrot.slane %v2104_v0, 9 }
  0xb3   : > { %v1477_v18 = vor.u32 %v1476_v8, %v1472_v7  ;;  %1049 = vst [vmem:[#allocation2 + $0xbc] sm:$0x1] %v1048_v11  ;;  %v2169_v20 = vrot.slane %v7950_v2, 5  ;;  %v1473_v24 = vsel %vm8092_vm4, %v1468_v5, %v1472_v7  ;;  %v7951_v30 = vld [vmem:[#allocation2 + $0x20] sm:$0x1]  ;;  %v6489_v36 = vrot.slane %v2105_v54, 9 }
  0xb4   : > { %v2164_v28 = vrot.slane %v2162_v16, 4  ;;  %v2172_v31 = vrot.slane %v7951_v30, 5  ;;  %v8595_v25 = vsel %vm8570_vm14, %v6487_v37, %v2162_v16  ;;  %v7952_v42 = vld [vmem:[#allocation2 + $0x28] sm:$0xf]  ;;  %v7953_v40 = vld [vmem:[#allocation2 + $0x34] sm:$0xf]  ;;  %v6502_v17 = vcombine.low %v8583_v12, %v8589_v13 }
  0xb5   : > { %v1478_v15 = vrot.slane %v1477_v18, 4  ;;  %v2171_v41 = vrot.slane %v2169_v20, 4  ;;  %v2176_v44 = vrot.slane %v7952_v42, 5  ;;  %v8605_v22 = vsel %vm8570_vm14, %v6488_v9, %v2169_v20  ;;  %v7875_v5 = vld [vmem:[#allocation2 + $0xc] sm:$0xff]   ;;  %v2108_v10 = vld [vmem:[#allocation2 + $0x48] sm:$0xe] }
  0xb6   : > { %v8601_v39 = vsel %vm8570_vm14, %v2164_v28, %v2165_v45  ;;  %v2183_v50 = vrot.slane %v7953_v40, 5  ;;  %v2179_v58 = vrot.slane %v7954_v33, 5  ;;  %v2107_v45 = vld [vmem:[#allocation2 + $0x3c] sm:$0xe]  ;;  %v6490_v3 = vrot.slane %v2106_v47, 9 }
  0xb7   : > { %v1483_v61 = vsel %vm8092_vm4, %v1478_v15, %v1482_v19  ;;  %v8613_v38 = vsel %vm8570_vm14, %v2171_v41, %v2172_v31  ;;  %v6503_v0 = vcombine.low %v8595_v25, %v8601_v39  ;;  %v8621_v1 = vsel %vm8570_vm14, %v6489_v36, %v2176_v44  ;;  %v7955_v20 = vld [vmem:[#allocation2 + $0x38] sm:$0x1]  ;;  %v2109_v15 = vld [vmem:[#allocation2 + $0x54] sm:$0xe]  ;;  %v7956_v47 = vld [vmem:[#allocation2 + $0x40] sm:$0xf] }
  0xb8   : > { %v6452_v60 = vcombine.low %v1473_v24, %v1483_v61  ;;  %v8615_v62 = vld [vmem:[#allocation2 + $0xb8] sm:$0xf]  ;;  %v6504_v7 = vcombine.low %v8605_v22, %v8613_v38  ;;  %v2178_v8 = vrot.slane %v2176_v44, 4  ;;  %v2185_v18 = vrot.slane %v2183_v50, 4  ;;  %v7957_v33 = vld [vmem:[#allocation2 + $0x44] sm:$0x1] }
  0xb9   : > { %v1087_v4 = vld [vmem:[#allocation2 + $0xb4] sm:$0xf]  ;;  %v1494_v21 = vshll.u32 %v8615_v62, 16  ;;  %v1498_v37 = vshrl.u32 %v8615_v62, 16  ;;  %v2186_v24 = vrot.slane %v7955_v20, 5  ;;  %v8633_v31 = vsel %vm8570_vm14, %v6490_v3, %v2183_v50  ;;  %v6961_v25 = vld [vmem:[%s8069_s28 + $0x78] sm:$0xff]  }
  0xba   : > { %7317 = vmatprep.mubr.bf16.mxu0 %v6452_v60  ;;  %v8627_v54 = vld [vmem:[#allocation2 + $0xbc] sm:$0x1]  ;;  %v1485_v11 = vshrl.u32 %v1087_v4, 16  ;;  %v1488_v14 = vshll.u32 %v1087_v4, 16  ;;  %v6477_v16 = vcombine.low %v1087_v4, %v8615_v62  ;;  %v6491_v36 = vrot.slane %v2107_v45, 9 }
  0xbb   : > { %v1496_v19 = vrot.slane %v1494_v21, 5  ;;  %v1500_v9 = vrot.slane %v1498_v37, 4  ;;  %v1504_v2 = vshll.u32 %v8627_v54, 16  ;;  %v8637_v44 = vsel %vm8570_vm14, %v2178_v8, %v2179_v58  ;;  %v7958_v21 = vld [vmem:[#allocation2 + $0x4c] sm:$0xf]  ;;  %v7878_v58 = vld [vmem:[#allocation2 + $0x24] sm:$0xff]  }
  0xbc   : > { %v1487_v28 = vrot.slane %v1485_v11, 4  ;;  %v1490_v30 = vrot.slane %v1488_v14, 5  ;;  %7366 = vmatmul.mubr.bf16.gmra.mxu1 %v6477_v16  ;;  %v2190_v40 = vrot.slane %v7956_v47, 5  ;;  %v2193_v60 = vrot.slane %v7957_v33, 5  ;;  %v7959_v3 = vld [vmem:[#allocation2 + $0x50] sm:$0x1] }
  0xbd   : > { %v1501_v41 = vor.u32 %v1500_v9, %v1496_v19  ;;  %v1506_v42 = vrot.slane %v1504_v2, 5  ;;  %7433 = vmatprep.mubr.bf16.mxu1 %v7875_v5  ;;  %v6492_v4 = vrot.slane %v2108_v10, 9  ;;  %v2197_v37 = vrot.slane %v7958_v21, 5  ;;  %v7876_v16 = vld [vmem:[#allocation2 + $0x18] sm:$0xff]   ;;  %v2111_v47 = vld [vmem:[#allocation2 + $0x6c] sm:$0xe] }
  0xbe   : > { %v1491_v61 = vor.u32 %v1490_v30, %v1487_v28  ;;  %v8641_v50 = vsel %vm8570_vm14, %v2185_v18, %v2186_v24  ;;  %v2192_v45 = vrot.slane %v2190_v40, 4  ;;  %v2200_v5 = vrot.slane %v7959_v3, 5  ;;  %v7960_v18 = vld [vmem:[#allocation2 + $0x58] sm:$0xf]  ;;  %v7961_v28 = vld [vmem:[#allocation2 + $0x5c] sm:$0x1] }
  0xbf   : > { %v1502_v11 = vrot.slane %v1501_v41, 4  ;;  %v8645_v8 = vsel %vm8570_vm14, %v6491_v36, %v2190_v40  ;;  %v2199_v9 = vrot.slane %v2197_v37, 4  ;;  %v6493_v2 = vrot.slane %v2109_v15, 9  ;;  %v2110_v41 = vld [vmem:[#allocation2 + $0x60] sm:$0xe]  ;;  %v7963_v39 = vld [vmem:[%s10646_s1 + $0x138] sm:$0xff]  }
  0xc0   : > { %v1492_v14 = vrot.slane %v1491_v61, 4  ;;  %v8651_v20 = vsel %vm8570_vm14, %v2192_v45, %v2193_v60  ;;  %v2204_v24 = vrot.slane %v7960_v18, 5  ;;  %v2207_v30 = vrot.slane %v7961_v28, 5  ;;  %v2112_v40 = vld [vmem:[#allocation2 + $0x78] sm:$0xe]  ;;  %v7879_v28 = vld [vmem:[#allocation2 + $0x30] sm:$0xff]  }
  0xc1   : > { %v1507_v10 = vsel %vm8092_vm4, %v1502_v11, %v1506_v42  ;;  %v6505_v36 = vcombine.low %v8621_v1, %v8637_v44  ;;  %v6506_v15 = vcombine.low %v8633_v31, %v8641_v50  ;;  %v8661_v42 = vsel %vm8570_vm14, %v6492_v4, %v2197_v37  ;;  %v7890_v11 = vld [vmem:[%s10646_s1 + $0x170] sm:$0xff]   ;;  %v7899_v22 = vld [vmem:[%s10646_s1 + $0x158] sm:$0xff]   ;;  %v7885_v1 = vld [vmem:[#allocation2 + $0x60] sm:$0xff]  }
  0xc2   : > { %v1497_v61 = vsel %vm8092_vm4, %v1492_v14, %v1496_v19  ;;  %v6507_v60 = vcombine.low %v8645_v8, %v8651_v20  ;;  %v8667_v21 = vsel %vm8570_vm14, %v2199_v9, %v2200_v5  ;;  %v2206_v19 = vrot.slane %v2204_v24, 4  ;;  %v2113_v14 = vld [vmem:[#allocation2 + $0x84] sm:$0xe]  ;;  %v2114_v18 = vld [vmem:[#allocation2 + $0x90] sm:$0xe]  ;;  %v7888_v8 = vld [vmem:[#allocation2 + $0x78] sm:$0xff]  }
  0xc3   : > { %v6453_v33 = vcombine.low %v1497_v61, %v1507_v10  ;;  %v8674_v45 = vsel %vm8570_vm14, %v6493_v2, %v2204_v24  ;;  %v6494_v4 = vrot.slane %v2110_v41, 9  ;;  %v2211_v37 = vrot.slane %v8407_v49, 5  ;;  %v8846_v50 = vld [vmem:[#allocation2 + $0x20] sm:$0x1] }
  0xc4   : > { %7434 = vmatmul.mubr.bf16.vlgmr.msra.gmra.mxu1 %v7876_v16  ;;  %v6495_v3 = vrot.slane %v2111_v47, 9  ;;  %v8679_v5 = vsel %vm8570_vm14, %v2206_v19, %v2207_v30  ;;  %v2218_v9 = vrot.slane %v8435_v35, 5  ;;  %v6496_v10 = vrot.slane %v2112_v40, 9  ;;  %v7962_v35 = vld [vmem:[%s10646_s1 + $0x178] sm:$0xff]  }
  0xc5   : > { %7318 = vmatmul.mubr.bf16.gmra.mxu0 %v6453_v33  ;;  %7437 = vmatprep.mubr.bf16.mxu1 %v7878_v58  ;;  %v2225_v16 = vrot.slane %v8471_v53, 5  ;;  %v6508_v49 = vcombine.low %v8661_v42, %v8667_v21  ;;  %v2213_v2 = vrot.slane %v2211_v37, 4  ;;  %v2214_v58 = vrot.slane %v8412_v32, 5  ;;  %v7894_v32 = vld [vmem:[%s10646_s1 + $0x168] sm:$0xff]   ;;  %v2115_v40 = vld [vmem:[#allocation2 + $0x9c] sm:$0xe] }
  0xc6   : > { %7385 = vmatprep.mubr.bf16.mxu0 %v6502_v17  ;;  %v2221_v24 = vrot.slane %v8437_v46, 5  ;;  %7514 = vmatpush3.bf16.msra.mxu1 %v7962_v35  ;;  %v2228_v17 = vrot.slane %v8473_v55, 5  ;;  %v8705_v30 = vsel %vm8570_vm14, %v6494_v4, %v2211_v37  ;;  %v6497_v41 = vrot.slane %v2113_v14, 9  ;;  %v7881_v33 = vld [vmem:[#allocation2 + $0x3c] sm:$0xff]   ;;  %v2116_v4 = vld [vmem:[#allocation2 + $0xa8] sm:$0xe] }
  0xc7   : > { %7515 = vmatprep.subr.bf16.mxu1 %v7890_v11  ;;  %v8697_v12 = vsel %vm8570_vm14, %v6496_v10, %v2225_v16  ;;  %v2227_v13 = vrot.slane %v2225_v16, 4  ;;  %v2232_v47 = vrot.slane %v8484_v26, 5  ;;  %v2235_v61 = vrot.slane %v8486_v27, 5  ;;  %v7877_v26 = vld [vmem:[%s10646_s1 + $0x130] sm:$0xff]   ;;  %v8863_v46 = vld [vmem:[#allocation2 + $0x18] sm:$0xe] }
  0xc8   : > { %v8711_v19 = vsel %vm8570_vm14, %v6495_v3, %v2218_v9  ;;  %v8713_v55 = vrot.slane %v2218_v9, 4  ;;  %v6498_v16 = vrot.slane %v2114_v18, 9  ;;  %v8724_v27 = vsel %vm8570_vm14, %v2213_v2, %v2214_v58  ;;  %v2117_v9 = vld [vmem:[#allocation2 + $0xb4] sm:$0xe] }
  0xc9   : > { %v8717_v10 = vsel %vm8570_vm14, %v2227_v13, %v2228_v17  ;;  %v8730_v3 = vsel %vm8570_vm14, %v6497_v41, %v2232_v47  ;;  %v2234_v14 = vrot.slane %v2232_v47, 4  ;;  %v2239_v18 = vrot.slane %v8521_v59, 5 }
  0xca   : > { %7516 = vmatpush3.bf16.msra.mxu1 %v7890_v11  ;;  %v2242_v35 = vrot.slane %v8523_v6, 5  ;;  %v6499_v13 = vrot.slane %v2115_v40, 9  ;;  %v2246_v2 = vrot.slane %v8539_v51, 5  ;;  %v7895_v11 = vld [vmem:[%s10646_s1 + $0x160] sm:$0xff]   ;;  %v2249_v17 = vrot.slane %v8541_v52, 5  ;;  %v8750_v6 = vld [vmem:[%s10646_s1 + $0x128] sm:$0xff]  }
  0xcb   : > { %7517 = vmatprep.subr.bf16.mxu1 %v7894_v32  ;;  %v8737_v58 = vsel %vm8570_vm14, %v2234_v14, %v2235_v61  ;;  %v6500_v41 = vrot.slane %v2116_v4, 9  ;;  %v2253_v59 = vrot.slane %v8561_v56, 5  ;;  %v2241_v52 = vrot.slane %v2239_v18, 4 }
  0xcc   : > { %7438 = vmatmul.mubr.bf16.gmra.mxu1 %v7879_v28  ;;  %v8756_v28 = vsel %vm8570_vm14, %v6498_v16, %v2239_v18  ;;  %v8760_v56 = vsel %vm8570_vm14, %v6499_v13, %v2246_v2  ;;  %v2248_v47 = vrot.slane %v2246_v2, 4  ;;  %v488_v16 = vld [vmem:[#allocation2 + $0xc0] sm:$0x1]  ;;  %v6501_v38 = vrot.slane %v2117_v9, 9  ;;  %v2971_v18 = vld [vmem:[#allocation2 + $0xc] sm:$0xf] }
  0xcd   : > { %7386 = vmatmul.mubr.bf16.vlgmr.msra.gmra.mxu0 %v6503_v0  ;;  %7441 = vmatprep.mubr.bf16.mxu1 %v7881_v33  ;;  %v7882_v0 = vld [vmem:[#allocation2 + $0x48] sm:$0xff]   ;;  %v8771_v61 = vsel %vm8570_vm14, %v6500_v41, %v2253_v59  ;;  %v2255_v40 = vrot.slane %v2253_v59, 4  ;;  %v2256_v33 = vrot.slane %v8563_v57, 5  ;;  %v8776_v4 = vsel %vm8570_vm14, %v2241_v52, %v2242_v35  ;;  %v8793_v2 = vld [vmem:[#allocation2 + $0x10] sm:$0xf]  ;;  %v7884_v9 = vld [vmem:[#allocation2 + $0x54] sm:$0xff]  }
  0xce   : > { %7466 = vmatpush3.bf16.msra.mxu0 %v7963_v39  ;;  %7389 = vmatprep.mubr.bf16.mxu0 %v6504_v7  ;;  %v2260_v7 = vrot.slane %v8615_v62, 5  ;;  %v2263_v14 = vrot.slane %v8627_v54, 5  ;;  %v6865_v13 = vunpack.c.l.bf16 %v6961_v25  ;;  %v6866_v59 = vunpack.c.h.bf16 %v6961_v25  ;;  %v7964_v52 = vld [vmem:[%s10647_s2] ss:$0 sm:$0xff]  ;;  %v2974_v62 = vld [vmem:[#allocation2 + $0x18] sm:$0xf] }
  0xcf   : > { %7467 = vmatprep.subr.bf16.mxu0 %v7877_v26  ;;  %7518 = vmatpush3.bf16.msra.mxu1 %v7894_v32  ;;  %v8787_v32 = vsel %vm8570_vm14, %v2248_v47, %v2249_v17  ;;  %v8791_v35 = vsel %vm8570_vm14, %v2255_v40, %v2256_v33  ;;  %v489_v47 = vsel %vm8107_vm6, 0, %v488_v16  ;;  %v8808_v40 = vld [vmem:[#allocation2 + $0x14] sm:$0x1]  ;;  %v3020_v33 = vshrl.u32 %v2971_v18, 16 }
  0xd0   : > { %7519 = vmatprep.subr.bf16.mxu1 %v7895_v11  ;;  %v8801_v41 = vsel %vm8570_vm14, %v6501_v38, %v2260_v7  ;;  %v2262_v17 = vrot.slane %v2260_v7, 4  ;;  %v375_v39 = vmul.f32 %v7964_v52, %v6865_v13  ;;  %v7883_v38 = vld [vmem:[%s10646_s1 + $0x120] sm:$0xff]   ;;  %490 = vst [vmem:[#allocation2 + $0xc0] sm:$0x1] %v489_v47  ;;  %v3023_v25 = vshll.u32 %v2971_v18, 16  ;;  %v7900_v54 = vld [vmem:[%s10646_s1 + $0x150] sm:$0xff]  }
  0xd1   : > { %v3029_v7 = vshll.u32 %v8793_v2, 16  ;;  %v3033_v16 = vshrl.u32 %v8793_v2, 16  ;;  %v8820_v13 = vld [vmem:[#allocation2 + $0x1c] sm:$0xf]  ;;  %v376_v57 = vmul.f32 %v7964_v52, %v6866_v59  ;;  %v3039_v37 = vshll.u32 %v8808_v40, 16 }
  0xd2   : > { %7468 = vmatpush3.bf16.msra.mxu0 %v7877_v26  ;;  %v8816_v26 = vsel %vm8570_vm14, %v2262_v17, %v2263_v14  ;;  %v7965_v14 = vld [vmem:[%s10648_s3] ss:$0 sm:$0xff]  ;;  %v3022_v17 = vrot.slane %v3020_v33, 4  ;;  %v3047_v33 = vshll.u32 %v2974_v62, 16  ;;  %v3793_v23 = vrot.slane %v8808_v40, 5 }
  0xd3   : > { %7469 = vmatprep.subr.bf16.mxu0 %v8750_v6  ;;  %7520 = vmatpush3.bf16.msra.mxu1 %v7895_v11  ;;  %v414_v18 = vadd.f32 %v7965_v14, %v375_v39  ;;  %v8833_v47 = vrot.slane %v3029_v7, 5  ;;  %v3035_v51 = vrot.slane %v3033_v16, 4  ;;  %v415_v59 = vadd.f32 %v7965_v14, %v376_v57  ;;  %v3724_v16 = vld [vmem:[#allocation2 + $0xc] sm:$0xe]  ;;  %v7891_v14 = vld [vmem:[%s10646_s1 + $0x110] sm:$0xff]  }
  0xd4   : > { %7442 = vmatmul.mubr.bf16.gmra.mxu1 %v7882_v0  ;;  %7521 = vmatprep.subr.bf16.mxu1 %v7899_v22  ;;  %v3025_v0 = vrot.slane %v3023_v25, 5  ;;  %v3044_v39 = vshrl.u32 %v2974_v62, 16  ;;  %v7904_v25 = vld [vmem:[%s10646_s1 + $0x148] sm:$0xff]   ;;  %v3057_v11 = vshrl.u32 %v8820_v13, 16 }
  0xd5   : > { %7390 = vmatmul.mubr.bf16.gmra.mxu0 %v6505_v36  ;;  %7445 = vmatprep.mubr.bf16.mxu1 %v7884_v9  ;;  %v6769_v52 = vpack.c.bf16 %v414_v18, %v414_v18  ;;  %v7886_v36 = vld [vmem:[%s10646_s1 + $0x118] sm:$0xff]   ;;  %v3036_v31 = vor.u32 %v3035_v51, %v8833_v47  ;;  %v8857_v51 = vsel %vm8570_vm14, %v8713_v55, %v2221_v24  ;;  %v7905_v55 = vld [vmem:[%s10646_s1 + $0x140] sm:$0xff]  }
  0xd6   : > { %7393 = vmatprep.mubr.bf16.mxu0 %v6506_v15  ;;  %7470 = vmatpush3.bf16.msra.mxu0 %v8750_v6  ;;  %v3026_v9 = vor.u32 %v3025_v0, %v3022_v17  ;;  %v3053_v15 = vshll.u32 %v8820_v13, 16  ;;  %v6770_v6 = vpack.c.bf16 %v415_v59, %v415_v59  ;;  %v3046_v7 = vrot.slane %v3044_v39, 4 }
  0xd7   : > { %7471 = vmatprep.subr.bf16.mxu0 %v7883_v38  ;;  %7522 = vmatpush3.bf16.msra.mxu1 %v7899_v22  ;;  %v879_v57 = vshrl.u32 %v6769_v52, 16  ;;  %v882_v62 = vshll.u32 %v6769_v52, 16  ;;  %v7887_v22 = vld [vmem:[#allocation2 + $0x6c] sm:$0xff]   ;;  %v3041_v17 = vrot.slane %v3039_v37, 5  ;;  %v3049_v0 = vrot.slane %v3047_v33, 5 }
  0xd8   : > { %7523 = vmatprep.subr.bf16.mxu1 %v7900_v54  ;;  %v3027_v18 = vrot.slane %v3026_v9, 4  ;;  %v887_v52 = vshrl.u32 %v6770_v6, 16  ;;  %v890_v39 = vshll.u32 %v6770_v6, 16  ;;  %v1050_v24 = vld [vmem:[#allocation2 + $0xc0] sm:$0xf]  ;;  %v3037_v44 = vrot.slane %v3036_v31, 4 }
  0xd9   : > { %v881_v59 = vrot.slane %v879_v57, 7  ;;  %v3050_v53 = vor.u32 %v3049_v0, %v3046_v7  ;;  %v8868_v9 = vrot.slane %v3053_v15, 5  ;;  %v3063_v37 = vshll.u32 %v8846_v50, 16  ;;  %v7896_v31 = vld [vmem:[%s10646_s1 + $0x108] sm:$0xff]  }
  0xda   : > { %7472 = vmatpush3.bf16.msra.mxu0 %v7883_v38  ;;  %v6511_v38 = vcombine.low %v8711_v19, %v8857_v51  ;;  %v8873_v57 = vrot.slane %v887_v52, 7  ;;  %v6574_v7 = vrot.slane %v3724_v16, 9  ;;  %v8886_v0 = vld [vmem:[#allocation2 + $0x28] sm:$0xf]  ;;  %v3042_v42 = vsel %vm8092_vm4, %v3037_v44, %v3041_v17 }
  0xdb   : > { %7473 = vmatprep.subr.bf16.mxu0 %v7886_v36  ;;  %7524 = vmatpush3.bf16.msra.mxu1 %v7900_v54  ;;  %v884_v33 = vor.u32 %v882_v62, %v881_v59  ;;  %v885_v6 = vrot.slane %v881_v59, 4  ;;  %v2977_v54 = vld [vmem:[#allocation2 + $0x24] sm:$0xf]  ;;  %v8884_v15 = vrot.slane %v3050_v53, 4  ;;  %v3059_v62 = vrot.slane %v3057_v11, 4  ;;  %v8900_v11 = vld [vmem:[%s10646_s1 + $0x1f8] sm:$0xff]  }
  0xdc   : > { %7446 = vmatmul.mubr.bf16.gmra.mxu1 %v7885_v1  ;;  %7525 = vmatprep.subr.bf16.mxu1 %v7904_v25  ;;  %v3032_v1 = vsel %vm8092_vm4, %v3027_v18, %v8833_v47  ;;  %v892_v20 = vor.u32 %v890_v39, %v8873_v57  ;;  %v3790_v53 = vrot.slane %v8793_v2, 5  ;;  %v7892_v47 = vld [vmem:[#allocation2 + $0x84] sm:$0xff]   ;;  %v3800_v44 = vrot.slane %v8846_v50, 5  ;;  %v8923_v39 = vld [vmem:[#allocation2 + $0x2c] sm:$0x1] }
  0xdd   : > { %7394 = vmatmul.mubr.bf16.gmra.mxu0 %v6507_v60  ;;  %7449 = vmatprep.mubr.bf16.mxu1 %v7887_v22  ;;  %v1051_v60 = vsel %vm8153_vm10, %v884_v33, %v1050_v24  ;;  %v8894_v22 = vrot.slane %v3063_v37, 5  ;;  %v3060_v21 = vor.u32 %v3059_v62, %v8868_v9  ;;  %v3068_v17 = vshrl.u32 %v2977_v54, 16  ;;  %v7901_v50 = vld [vmem:[%s10646_s1 + $0x100] sm:$0xff]  }
  0xde   : > { %7397 = vmatprep.mubr.bf16.mxu0 %v6508_v49  ;;  %7474 = vmatpush3.bf16.msra.mxu0 %v7886_v36  ;;  %1052 = vst [vmem:[#allocation2 + $0xc0] sm:$0xf] %v1051_v60  ;;  %v6575_v49 = vrot.slane %v8863_v46, 9  ;;  %v893_v2 = vsel %vm8161_vm11, %v885_v6, %v892_v20  ;;  %v8911_v36 = vsel %vm8570_vm14, %v6574_v7, %v3790_v53  ;;  %v3792_v16 = vrot.slane %v3790_v53, 4  ;;  %v8937_v6 = vld [vmem:[#allocation2 + $0x34] sm:$0xf] }
  0xdf   : > { %7475 = vmatprep.subr.bf16.mxu0 %v7891_v14  ;;  %7526 = vmatpush3.bf16.msra.mxu1 %v7904_v25  ;;  %v3797_v25 = vrot.slane %v8820_v13, 5  ;;  %1053 = vst [vmem:[#allocation2 + $0xc4] sm:$0xf] %v893_v2  ;;  %v8914_v18 = vrot.slane %v3060_v21, 4  ;;  %v3071_v40 = vshll.u32 %v2977_v54, 16  ;;  %v8917_v59 = vcombine.low %v3032_v1, %v3042_v42 }
  0xe0   : > { %7527 = vmatprep.subr.bf16.mxu1 %v7905_v55  ;;  %v8921_v29 = vsel %vm8570_vm14, %v3792_v16, %v3793_v23  ;;  %v3077_v46 = vshll.u32 %v8886_v0, 16  ;;  %v2980_v13 = vld [vmem:[#allocation2 + $0x30] sm:$0xf]  ;;  %v3070_v37 = vrot.slane %v3068_v17, 4  ;;  %v3726_v62 = vld [vmem:[#allocation2 + $0x24] sm:$0xe]  ;;  %v10672_v7 = vcombine.low %v8674_v45, %v8679_v5 }
  0xe1   : > { %v3799_v52 = vrot.slane %v3797_v25, 4  ;;  %v8935_v24 = vsel %vm8570_vm14, %v6575_v49, %v3797_v25  ;;  %v3073_v33 = vrot.slane %v3071_v40, 5  ;;  %v3066_v54 = vsel %vm8092_vm4, %v8914_v18, %v8894_v22  ;;  %v3727_v25 = vld [vmem:[#allocation2 + $0x30] sm:$0xe] }
  0xe2   : > { %7476 = vmatpush3.bf16.msra.mxu0 %v7891_v14  ;;  %v3056_v14 = vsel %vm8092_vm4, %v8884_v15, %v8868_v9  ;;  %v3079_v1 = vrot.slane %v3077_v46, 5  ;;  %v3081_v9 = vshrl.u32 %v8886_v0, 16  ;;  %v8946_v15 = vld [vmem:[#allocation2 + $0x38] sm:$0x1]  ;;  %v3087_v22 = vshll.u32 %v8923_v39, 16  ;;  %v7893_v18 = vld [vmem:[#allocation2 + $0x90] sm:$0xff]  }
  0xe3   : > { %7477 = vmatprep.subr.bf16.mxu0 %v7896_v31  ;;  %7528 = vmatpush3.bf16.msra.mxu1 %v7905_v55  ;;  %v6590_v55 = vcombine.low %v8911_v36, %v8921_v29  ;;  %v8959_v20 = vsel %vm8570_vm14, %v3799_v52, %v3800_v44  ;;  %v3074_v60 = vor.u32 %v3073_v33, %v3070_v37  ;;  %v3092_v53 = vshrl.u32 %v2980_v13, 16  ;;  %v2983_v37 = vld [vmem:[#allocation2 + $0x3c] sm:$0xf] }
  0xe4   : > { %7450 = vmatmul.mubr.bf16.gmra.mxu1 %v7888_v8  ;;  %7609 = vmatprep.subr.bf16.mxu1 %v8900_v11  ;;  %v8955_v8 = vld [vmem:[%s10646_s1 + $0x1b8] sm:$0xff]   ;;  %v10673_v42 = vcombine.low %v8705_v30, %v8724_v27  ;;  %v3083_v45 = vrot.slane %v3081_v9, 4  ;;  %v3095_v5 = vshll.u32 %v2980_v13, 16  ;;  %v3105_v21 = vshrl.u32 %v8937_v6, 16 }
  0xe5   : > { %7398 = vmatmul.mubr.bf16.gmra.mxu0 %v10672_v7  ;;  %7453 = vmatprep.mubr.bf16.mxu1 %v7892_v47  ;;  %v3101_v47 = vshll.u32 %v8937_v6, 16  ;;  %v3075_v23 = vrot.slane %v3074_v60, 4  ;;  %v3089_v49 = vrot.slane %v3087_v22, 5  ;;  %v3094_v2 = vrot.slane %v3092_v53, 4  ;;  %v7897_v27 = vld [vmem:[#allocation2 + $0x9c] sm:$0xff]  }
  0xe6   : > { %7401 = vmatprep.mubr.bf16.mxu0 %v10673_v42  ;;  %7478 = vmatpush3.bf16.msra.mxu0 %v7896_v31  ;;  %v3111_v16 = vshll.u32 %v8946_v15, 16  ;;  %v3084_v44 = vor.u32 %v3083_v45, %v3079_v1  ;;  %v3097_v17 = vrot.slane %v3095_v5, 5  ;;  %v3107_v30 = vrot.slane %v3105_v21, 4  ;;  %v8977_v22 = vld [vmem:[#allocation2 + $0x40] sm:$0xf] }
  0xe7   : > { %7479 = vmatprep.subr.bf16.mxu0 %v7901_v50  ;;  %v8968_v40 = vrot.slane %v3101_v47, 5  ;;  %v3080_v31 = vsel %vm8092_vm4, %v3075_v23, %v3079_v1  ;;  %v6576_v46 = vrot.slane %v3726_v62, 9  ;;  %v3804_v13 = vrot.slane %v8886_v0, 5  ;;  %v9003_v23 = vld [vmem:[#allocation2 + $0x44] sm:$0x1] }
  0xe8   : > { %v8972_v52 = vrot.slane %v3111_v16, 5  ;;  %v3085_v33 = vrot.slane %v3084_v44, 4  ;;  %v3098_v9 = vor.u32 %v3097_v17, %v3094_v2  ;;  %v3807_v60 = vrot.slane %v8923_v39, 5  ;;  %v7898_v44 = vld [vmem:[#allocation2 + $0xa8] sm:$0xff]   ;;  %v7902_v17 = vld [vmem:[#allocation2 + $0xb4] sm:$0xff]  }
  0xe9   : > { %v3108_v7 = vor.u32 %v3107_v30, %v8968_v40  ;;  %v8982_v1 = vsel %vm8570_vm14, %v6576_v46, %v3804_v13  ;;  %v3806_v53 = vrot.slane %v3804_v13, 4  ;;  %v6577_v62 = vrot.slane %v3727_v25, 9  ;;  %v9027_v25 = vld [vmem:[#allocation2 + $0x50] sm:$0x1] }
  0xea   : > { %7480 = vmatpush3.bf16.msra.mxu0 %v7901_v50  ;;  %v3811_v0 = vrot.slane %v8937_v6, 5  ;;  %v3090_v50 = vsel %vm8092_vm4, %v3085_v33, %v3089_v49  ;;  %v8987_v42 = vrot.slane %v3098_v9, 4  ;;  %v3814_v39 = vrot.slane %v8946_v15, 5  ;;  %v3729_v33 = vld [vmem:[#allocation2 + $0x48] sm:$0xe] }
  0xeb   : > { %7561 = vmatprep.subr.bf16.mxu0 %v8955_v8  ;;  %v8989_v45 = vrot.slane %v3108_v7, 4  ;;  %v8995_v5 = vcombine.low %v3056_v14, %v3066_v54  ;;  %v6591_v6 = vcombine.low %v8935_v24, %v8959_v20  ;;  %v9001_v47 = vsel %vm8570_vm14, %v3806_v53, %v3807_v60  ;;  %v2986_v14 = vld [vmem:[#allocation2 + $0x48] sm:$0xf]  ;;  %v9018_v54 = vld [vmem:[#allocation2 + $0x4c] sm:$0xf] }
  0xec   : > { %7454 = vmatmul.mubr.bf16.gmra.mxu1 %v7893_v18  ;;  %v3813_v21 = vrot.slane %v3811_v0, 4  ;;  %v10674_v15 = vcombine.low %v8697_v12, %v8717_v10  ;;  %v9008_v49 = vcombine.low %v3080_v31, %v3090_v50  ;;  %v3104_v19 = vsel %vm8092_vm4, %v8987_v42, %v8968_v40  ;;  %v3728_v18 = vld [vmem:[#allocation2 + $0x3c] sm:$0xe] }
  0xed   : > { %7402 = vmatmul.mubr.bf16.gmra.mxu0 %v6511_v38  ;;  %7457 = vmatprep.mubr.bf16.mxu1 %v7897_v27  ;;  %v9016_v51 = vsel %vm8570_vm14, %v6577_v62, %v3811_v0  ;;  %v3116_v38 = vshrl.u32 %v2983_v37, 16  ;;  %v3114_v12 = vsel %vm8092_vm4, %v8989_v45, %v8972_v52  ;;  %v6592_v10 = vcombine.low %v8982_v1, %v9001_v47 }
  0xee   : > { %7405 = vmatprep.mubr.bf16.mxu0 %v10674_v15  ;;  %v3119_v2 = vshll.u32 %v2983_v37, 16  ;;  %v3125_v16 = vshll.u32 %v8977_v22, 16  ;;  %v9031_v40 = vsel %vm8570_vm14, %v3813_v21, %v3814_v39  ;;  %v3129_v27 = vshrl.u32 %v8977_v22, 16 }
  0xef   : > { %v3118_v30 = vrot.slane %v3116_v38, 4  ;;  %v3135_v31 = vshll.u32 %v9003_v23, 16  ;;  %v3140_v13 = vshrl.u32 %v2986_v14, 16  ;;  %v3143_v37 = vshll.u32 %v2986_v14, 16  ;;  %v2989_v38 = vld [vmem:[#allocation2 + $0x54] sm:$0xf] }
  0xf0   : > { %v3121_v52 = vrot.slane %v3119_v2, 5  ;;  %v3127_v46 = vrot.slane %v3125_v16, 5  ;;  %v3131_v9 = vrot.slane %v3129_v27, 4  ;;  %v3149_v60 = vshll.u32 %v9018_v54, 16 }
  0xf1   : > { %v3137_v7 = vrot.slane %v3135_v31, 5  ;;  %v3153_v53 = vshrl.u32 %v9018_v54, 16  ;;  %v3142_v0 = vrot.slane %v3140_v13, 4  ;;  %v3145_v50 = vrot.slane %v3143_v37, 5 }
  0xf2   : > { %v3122_v62 = vor.u32 %v3121_v52, %v3118_v30  ;;  %v3159_v42 = vshll.u32 %v9027_v25, 16  ;;  %v3132_v45 = vor.u32 %v3131_v9, %v3127_v46  ;;  %v3151_v39 = vrot.slane %v3149_v60, 5  ;;  %v7903_v9 = vld [vmem:[#allocation2 + $0xc0] sm:$0xff]  }
  0xf3   : > { %v3155_v21 = vrot.slane %v3153_v53, 4  ;;  %v6578_v15 = vrot.slane %v3728_v18, 9  ;;  %v10675_v14 = vcombine.low %v8730_v3, %v8737_v58  ;;  %v3146_v16 = vor.u32 %v3145_v50, %v3142_v0 }
  0xf4   : > { %7458 = vmatmul.mubr.bf16.gmra.mxu1 %v7898_v44  ;;  %v3123_v2 = vrot.slane %v3122_v62, 4  ;;  %v3161_v27 = vrot.slane %v3159_v42, 5  ;;  %v3818_v30 = vrot.slane %v8977_v22, 5  ;;  %v10676_v31 = vcombine.low %v8756_v28, %v8776_v4  ;;  %v2991_v62 = vld [vmem:[#allocation2 + $0x5c] sm:$0x1] }
  0xf5   : > { %7406 = vmatmul.mubr.bf16.gmra.mxu0 %v10675_v14  ;;  %7461 = vmatprep.mubr.bf16.mxu1 %v7902_v17  ;;  %v3133_v44 = vrot.slane %v3132_v45, 4  ;;  %v3156_v52 = vor.u32 %v3155_v21, %v3151_v39  ;;  %v3821_v13 = vrot.slane %v9003_v23, 5  ;;  %v6579_v18 = vrot.slane %v3729_v33, 9  ;;  %v2990_v23 = vld [vmem:[#allocation2 + $0x58] sm:$0xf] }
  0xf6   : > { %7409 = vmatprep.mubr.bf16.mxu0 %v10676_v31  ;;  %v3128_v37 = vsel %vm8092_vm4, %v3123_v2, %v3127_v46  ;;  %v3147_v3 = vrot.slane %v3146_v16, 4  ;;  %v9050_v58 = vsel %vm8570_vm14, %v6578_v15, %v3818_v30  ;;  %v3820_v17 = vrot.slane %v3818_v30, 4  ;;  %v9072_v42 = vld [vmem:[#allocation2 + $0x64] sm:$0xf]  ;;  %v9074_v45 = vld [vmem:[#allocation2 + $0x68] sm:$0x1] }
  0xf7   : > { %v9052_v22 = vcombine.low %v3104_v19, %v3114_v12  ;;  %v3138_v28 = vsel %vm8092_vm4, %v3133_v44, %v3137_v7  ;;  %v3157_v4 = vrot.slane %v3156_v52, 4  ;;  %v3825_v60 = vrot.slane %v9018_v54, 5  ;;  %v2992_v19 = vld [vmem:[#allocation2 + $0x60] sm:$0xf]  ;;  %v3730_v2 = vld [vmem:[#allocation2 + $0x54] sm:$0xe] }
  0xf8   : > { %v6593_v33 = vcombine.low %v9016_v51, %v9031_v40  ;;  %v9061_v46 = vsel %vm8570_vm14, %v3820_v17, %v3821_v13  ;;  %v3828_v53 = vrot.slane %v9027_v25, 5  ;;  %v3164_v0 = vshrl.u32 %v2989_v38, 16  ;;  %v3001_v40 = vld [vmem:[#allocation2 + $0x84] sm:$0xf] }
  0xf9   : > { %v9064_v12 = vcombine.low %v3128_v37, %v3138_v28  ;;  %v3152_v7 = vsel %vm8092_vm4, %v3147_v3, %v3151_v39  ;;  %v3162_v54 = vsel %vm8092_vm4, %v3157_v4, %v3161_v27  ;;  %v6594_v50 = vcombine.low %v9050_v58, %v9061_v46  ;;  %v9196_v58 = vld [vmem:[#allocation2 + $0x88] sm:$0xf] }
  0xfa   : > { %v9078_v25 = vsel %vm8570_vm14, %v6579_v18, %v3825_v60  ;;  %v3166_v21 = vrot.slane %v3164_v0, 4  ;;  %v3167_v15 = vshll.u32 %v2989_v38, 16  ;;  %v3173_v14 = vshll.u32 %v2990_v23, 16  ;;  %v7908_v46 = vld [vmem:[%s10646_s1 + $0x1a8] sm:$0xff]  }
  0xfb   : > { %v3827_v39 = vrot.slane %v3825_v60, 4  ;;  %v3177_v16 = vshrl.u32 %v2990_v23, 16  ;;  %v3183_v30 = vshll.u32 %v2991_v62, 16  ;;  %v3188_v27 = vshrl.u32 %v2992_v19, 16 }
  0xfc   : > { %7462 = vmatmul.mubr.bf16.gmra.mxu1 %v7903_v9  ;;  %v10677_v31 = vcombine.low %v8760_v56, %v8787_v32  ;;  %v9086_v44 = vcombine.low %v3152_v7, %v3162_v54  ;;  %v3169_v52 = vrot.slane %v3167_v15, 5  ;;  %v3175_v13 = vrot.slane %v3173_v14, 5  ;;  %v3731_v7 = vld [vmem:[#allocation2 + $0x60] sm:$0xe] }
  0xfd   : > { %7529 = vmatprep.mubr.bf16.mxu1 %v6590_v55  ;;  %v3191_v38 = vshll.u32 %v2992_v19, 16  ;;  %v10678_v18 = vcombine.low %v8771_v61, %v8791_v35  ;;  %v3179_v37 = vrot.slane %v3177_v16, 4  ;;  %v3185_v3 = vrot.slane %v3183_v30, 5 }
  0xfe   : > { %7410 = vmatmul.mubr.bf16.gmra.mxu0 %v10677_v31  ;;  %v3190_v17 = vrot.slane %v3188_v27, 4  ;;  %v3197_v9 = vshll.u32 %v9072_v42, 16  ;;  %v3170_v56 = vor.u32 %v3169_v52, %v3166_v21  ;;  %v3201_v28 = vshrl.u32 %v9072_v42, 16  ;;  %v7912_v27 = vld [vmem:[%s10646_s1 + $0x1f0] sm:$0xff]  }
  0xff   : > { %7413 = vmatprep.mubr.bf16.mxu0 %v10678_v18  ;;  %v3193_v32 = vrot.slane %v3191_v38, 5  ;;  %v3207_v36 = vshll.u32 %v9074_v45, 16  ;;  %v3180_v29 = vor.u32 %v3179_v37, %v3175_v13  ;;  %v6580_v4 = vrot.slane %v3730_v2, 9  ;;  %v2995_v2 = vld [vmem:[#allocation2 + $0x6c] sm:$0xf] }
 0x100   : > { %v9094_v55 = vrot.slane %v3197_v9, 5  ;;  %v3832_v60 = vrot.slane %v2990_v23, 5  ;;  %v9098_v61 = vsel %vm8570_vm14, %v3827_v39, %v3828_v53  ;;  %v3171_v35 = vrot.slane %v3170_v56, 4  ;;  %v9111_v39 = vld [vmem:[#allocation2 + $0x70] sm:$0xf]  ;;  %v7914_v56 = vld [vmem:[%s10646_s1 + $0x1e8] sm:$0xff]  }
 0x101   : > { %v3194_v0 = vor.u32 %v3193_v32, %v3190_v17  ;;  %v3203_v19 = vrot.slane %v3201_v28, 4  ;;  %v3181_v54 = vrot.slane %v3180_v29, 4  ;;  %v9100_v21 = vrot.slane %v3207_v36, 5  ;;  %v9126_v38 = vld [vmem:[#allocation2 + $0x74] sm:$0x1] }
 0x102   : > { %v3834_v15 = vrot.slane %v3832_v60, 4  ;;  %v3835_v14 = vrot.slane %v2991_v62, 5  ;;  %v3176_v16 = vsel %vm8092_vm4, %v3171_v35, %v3175_v13  ;;  %v9109_v53 = vsel %vm8570_vm14, %v6580_v4, %v3832_v60  ;;  %v3732_v29 = vld [vmem:[#allocation2 + $0x6c] sm:$0xe] }
 0x103   : > { %v9104_v30 = vrot.slane %v3194_v0, 4  ;;  %v3204_v23 = vor.u32 %v3203_v19, %v9094_v55  ;;  %v3186_v62 = vsel %vm8092_vm4, %v3181_v54, %v3185_v3  ;;  %v6581_v52 = vrot.slane %v3731_v7, 9  ;;  %v2998_v3 = vld [vmem:[#allocation2 + $0x78] sm:$0xf] }
 0x104   : > { %7530 = vmatmul.mubr.bf16.vlgmr.msra.gmra.mxu1 %v6591_v6  ;;  %v9123_v31 = vsel %vm8570_vm14, %v3834_v15, %v3835_v14  ;;  %v3839_v13 = vrot.slane %v9072_v42, 5  ;;  %v10679_v18 = vcombine.low %v8801_v41, %v8816_v26  ;;  %v6595_v24 = vcombine.low %v9078_v25, %v9098_v61  ;;  %v9139_v42 = vld [vmem:[#allocation2 + $0x7c] sm:$0xf] }
 0x105   : > { %7533 = vmatprep.mubr.bf16.mxu1 %v6592_v10  ;;  %v9136_v20 = vcombine.low %v3176_v16, %v3186_v62  ;;  %v3205_v6 = vrot.slane %v3204_v23, 4  ;;  %v3842_v37 = vrot.slane %v9074_v45, 5  ;;  %v3200_v41 = vsel %vm8092_vm4, %v9104_v30, %v9094_v55  ;;  %v9146_v10 = vld [vmem:[#allocation2 + $0x80] sm:$0x1]  ;;  %7610 = vmatpush3.bf16.msra.mxu1 %v8900_v11 }
 0x106   : > { %7414 = vmatmul.mubr.bf16.gmra.mxu0 %v10679_v18  ;;  %v3841_v26 = vrot.slane %v3839_v13, 4  ;;  %v3212_v1 = vshrl.u32 %v2995_v2, 16  ;;  %v3215_v47 = vshll.u32 %v2995_v2, 16  ;;  %v6596_v45 = vcombine.low %v9109_v53, %v9123_v31  ;;  %7611 = vmatprep.subr.bf16.mxu1 %v7912_v27  ;;  %v7915_v23 = vld [vmem:[%s10646_s1 + $0x1e0] sm:$0xff]   ;;  %v9182_v18 = vpop.f32.mrf.mxu1 }
 0x107   : > { %7481 = vmatprep.mubr.bf16.mxu0 %v8917_v59  ;;  %v3221_v17 = vshll.u32 %v9111_v39, 16  ;;  %v3225_v9 = vshrl.u32 %v9111_v39, 16  ;;  %v3231_v59 = vshll.u32 %v9126_v38, 16  ;;  %v3210_v32 = vsel %vm8092_vm4, %v3205_v6, %v9100_v21  ;;  %v7907_v21 = vld [vmem:[%s10646_s1 + $0x1b0] sm:$0xff]  }
 0x108   : > { %v9162_v11 = vsel %vm8570_vm14, %v6581_v52, %v3839_v13  ;;  %v3214_v28 = vrot.slane %v3212_v1, 4  ;;  %v3217_v36 = vrot.slane %v3215_v47, 5  ;;  %v9166_v55 = vsel %vm8570_vm14, %v3841_v26, %v3842_v37  ;;  %v3733_v13 = vld [vmem:[#allocation2 + $0x78] sm:$0xe] }
 0x109   : > { %v3223_v4 = vrot.slane %v3221_v17, 5  ;;  %v3227_v60 = vrot.slane %v3225_v9, 4  ;;  %v3233_v35 = vrot.slane %v3231_v59, 5  ;;  %v3236_v19 = vshrl.u32 %v2998_v3, 16  ;;  %7612 = vmatpush3.bf16.msra.mxu1 %v7912_v27  ;;  %v7917_v59 = vld [vmem:[%s10646_s1 + $0x1d8] sm:$0xff]  }
 0x10a   : > { %v3218_v0 = vor.u32 %v3217_v36, %v3214_v28  ;;  %v3239_v7 = vshll.u32 %v2998_v3, 16  ;;  %v3245_v54 = vshll.u32 %v9139_v42, 16  ;;  %v3249_v14 = vshrl.u32 %v9139_v42, 16  ;;  %7613 = vmatprep.subr.bf16.mxu1 %v7914_v56  ;;  %v9218_v28 = vpop.f32.mrf.mxu1 }
 0x10b   : > { %v3228_v15 = vor.u32 %v3227_v60, %v3223_v4  ;;  %v3255_v16 = vshll.u32 %v9146_v10, 16  ;;  %v6582_v30 = vrot.slane %v3732_v29, 9  ;;  %v3238_v27 = vrot.slane %v3236_v19, 4  ;;  %v3004_v19 = vld [vmem:[#allocation2 + $0x90] sm:$0xf] }
 0x10c   : > { %7534 = vmatmul.mubr.bf16.gmra.mxu1 %v6593_v33  ;;  %v3219_v2 = vrot.slane %v3218_v0, 4  ;;  %v3241_v62 = vrot.slane %v3239_v7, 5  ;;  %v9180_v52 = vrot.slane %v3245_v54, 5  ;;  %v9188_v6 = vcombine.low %v3200_v41, %v3210_v32  ;;  %v9206_v41 = vld [vmem:[#allocation2 + $0x8c] sm:$0x1]  ;;  %v9216_v32 = vpop.f32.mrf.mxu0  ;;  %v7909_v7 = vld [vmem:[%s10646_s1 + $0x1a0] sm:$0xff]   ;;  %v9256_v61 = vpop.f32.mrf.mxu1 }
 0x10d   : > { %7537 = vmatprep.mubr.bf16.mxu1 %v6594_v50  ;;  %v3229_v37 = vrot.slane %v3228_v15, 4  ;;  %v3251_v3 = vrot.slane %v3249_v14, 4  ;;  %v3846_v51 = vrot.slane %v9111_v39, 5  ;;  %v6597_v33 = vcombine.low %v9162_v11, %v9166_v55  ;;  %7614 = vmatpush3.bf16.msra.mxu1 %v7914_v56 }
 0x10e   : > { %7482 = vmatmul.mubr.bf16.vlgmr.msra.gmra.mxu0 %v8995_v5  ;;  %v3242_v26 = vor.u32 %v3241_v62, %v3238_v27  ;;  %v3257_v5 = vrot.slane %v3255_v16, 5  ;;  %v3849_v1 = vrot.slane %v9126_v38, 5  ;;  %v3224_v50 = vsel %vm8092_vm4, %v3219_v2, %v3223_v4  ;;  %7615 = vmatprep.subr.bf16.mxu1 %v7915_v23  ;;  %v9236_v16 = vld [vmem:[#allocation2 + $0x94] sm:$0xf]  ;;  %v9249_v62 = vld [vmem:[#allocation2 + $0x98] sm:$0x1]  ;;  %v9254_v25 = vpop.f32.mrf.mxu0 }
 0x10f   : > { %7562 = vmatpush3.bf16.msra.mxu0 %v8955_v8  ;;  %7485 = vmatprep.mubr.bf16.mxu0 %v9008_v49  ;;  %v3234_v8 = vsel %vm8092_vm4, %v3229_v37, %v3233_v35  ;;  %v3252_v49 = vor.u32 %v3251_v3, %v9180_v52  ;;  %v3848_v39 = vrot.slane %v3846_v51, 4  ;;  %v9210_v47 = vsel %vm8570_vm14, %v6582_v30, %v3846_v51  ;;  %v3734_v3 = vld [vmem:[#allocation2 + $0x84] sm:$0xe]  ;;  %v7910_v51 = vld [vmem:[%s10646_s1 + $0x198] sm:$0xff]  }
 0x110   : > { %7563 = vmatprep.subr.bf16.mxu0 %v7907_v21  ;;  %v3243_v38 = vrot.slane %v3242_v26, 4  ;;  %v6583_v17 = vrot.slane %v3733_v13, 9  ;;  %v3853_v9 = vrot.slane %v9139_v42, 5  ;;  %v3260_v29 = vshrl.u32 %v3001_v40, 16 }
 0x111   : > { %v3253_v36 = vrot.slane %v3252_v49, 4  ;;  %v9222_v56 = vsel %vm8570_vm14, %v3848_v39, %v3849_v1  ;;  %v3263_v4 = vshll.u32 %v3001_v40, 16  ;;  %v9224_v60 = vcombine.low %v3224_v50, %v3234_v8  ;;  %7616 = vmatpush3.bf16.msra.mxu1 %v7915_v23  ;;  %v7918_v23 = vld [vmem:[%s10646_s1 + $0x1d0] sm:$0xff]  }
 0x112   : > { %v3248_v42 = vsel %vm8092_vm4, %v3243_v38, %v9180_v52  ;;  %v3855_v35 = vrot.slane %v3853_v9, 4  ;;  %v3856_v0 = vrot.slane %v9146_v10, 5  ;;  %v3262_v15 = vrot.slane %v3260_v29, 4  ;;  %7617 = vmatprep.subr.bf16.mxu1 %v7917_v59  ;;  %v9277_v1 = vld [vmem:[#allocation2 + $0x90] sm:$0xe]  ;;  %v7920_v38 = vld [vmem:[%s10646_s1 + $0x1c8] sm:$0xff]  }
 0x113   : > { %7564 = vmatpush3.bf16.msra.mxu0 %v7907_v21  ;;  %v3258_v54 = vsel %vm8092_vm4, %v3253_v36, %v3257_v5  ;;  %v3265_v21 = vrot.slane %v3263_v4, 5  ;;  %v3269_v14 = vshll.u32 %v9196_v58, 16  ;;  %v6598_v10 = vcombine.low %v9210_v47, %v9222_v56 }
 0x114   : > { %7565 = vmatprep.subr.bf16.mxu0 %v7908_v46  ;;  %7538 = vmatmul.mubr.bf16.gmra.mxu1 %v6595_v24  ;;  %v9245_v30 = vsel %vm8570_vm14, %v6583_v17, %v3853_v9  ;;  %v3273_v2 = vshrl.u32 %v9196_v58, 16  ;;  %v3279_v27 = vshll.u32 %v9206_v41, 16  ;;  %v9262_v24 = vcombine.low %v3248_v42, %v3258_v54  ;;  %v9285_v17 = vpop.f32.mrf.mxu0  ;;  %v9287_v9 = vpop.f32.mrf.mxu1  ;;  %v7913_v54 = vld [vmem:[%s10646_s1 + $0x190] sm:$0xff]  }
 0x115   : > { %7541 = vmatprep.mubr.bf16.mxu1 %v6596_v45  ;;  %v3266_v52 = vor.u32 %v3265_v21, %v3262_v15  ;;  %v9264_v13 = vrot.slane %v3269_v14, 5  ;;  %v3284_v37 = vshrl.u32 %v3004_v19, 16  ;;  %v3287_v31 = vshll.u32 %v3004_v19, 16  ;;  %7618 = vmatpush3.bf16.msra.mxu1 %v7917_v59  ;;  %10680 = vst [vmem:[#allocation3_spill] sm:$0xff] %v9287_v9 }
 0x116   : > { %7486 = vmatmul.mubr.bf16.gmra.mxu0 %v9052_v22  ;;  %v9272_v22 = vsel %vm8570_vm14, %v3855_v35, %v3856_v0  ;;  %v3275_v53 = vrot.slane %v3273_v2, 4  ;;  %v3293_v45 = vshll.u32 %v9236_v16, 16  ;;  %v3297_v5 = vshrl.u32 %v9236_v16, 16  ;;  %7619 = vmatprep.subr.bf16.mxu1 %v7918_v23 }
 0x117   : > { %7489 = vmatprep.mubr.bf16.mxu0 %v9064_v12  ;;  %7566 = vmatpush3.bf16.msra.mxu0 %v7908_v46  ;;  %v3267_v40 = vrot.slane %v3266_v52, 4  ;;  %v3286_v26 = vrot.slane %v3284_v37, 4  ;;  %v3303_v12 = vshll.u32 %v9249_v62, 16  ;;  %v9279_v46 = vld [vmem:[#allocation2 + $0x9c] sm:$0xf]  ;;  %v3281_v8 = vrot.slane %v3279_v27, 5  ;;  %v9316_v37 = vpop.f32.mrf.mxu1 }
 0x118   : > { %7567 = vmatprep.subr.bf16.mxu0 %v7909_v7  ;;  %v3276_v50 = vor.u32 %v3275_v53, %v9264_v13  ;;  %v3289_v49 = vrot.slane %v3287_v31, 5  ;;  %v3295_v39 = vrot.slane %v3293_v45, 5  ;;  %v6599_v36 = vcombine.low %v9245_v30, %v9272_v22  ;;  %v9308_v52 = vld [vmem:[#allocation2 + $0xa4] sm:$0x1]  ;;  %v3010_v53 = vld [vmem:[#allocation2 + $0xa8] sm:$0xf] }
 0x119   : > { %v3299_v29 = vrot.slane %v3297_v5, 4  ;;  %v6584_v4 = vrot.slane %v3734_v3, 9  ;;  %v3860_v59 = vrot.slane %v9196_v58, 5  ;;  %v3272_v42 = vsel %vm8092_vm4, %v3267_v40, %v9264_v13  ;;  %v9300_v58 = vld [vmem:[#allocation2 + $0xa0] sm:$0xf]  ;;  %7620 = vmatpush3.bf16.msra.mxu1 %v7918_v23  ;;  %v9314_v23 = vpop.f32.mrf.mxu0 }
 0x11a   : > { %v3277_v35 = vrot.slane %v3276_v50, 4  ;;  %v3290_v0 = vor.u32 %v3289_v49, %v3286_v26  ;;  %v3863_v19 = vrot.slane %v9206_v41, 5  ;;  %v3305_v21 = vrot.slane %v3303_v12, 5  ;;  %7621 = vmatprep.subr.bf16.mxu1 %v7920_v38  ;;  %10681 = vst [vmem:[#allocation4_spill] sm:$0xff] %v9314_v23  ;;  %v9327_v31 = vld [vmem:[#allocation2 + $0xac] sm:$0xf]  ;;  %v9352_v49 = vpop.f32.mrf.mxu1 }
 0x11b   : > { %7568 = vmatpush3.bf16.msra.mxu0 %v7909_v7  ;;  %v3300_v15 = vor.u32 %v3299_v29, %v3295_v39  ;;  %v3862_v14 = vrot.slane %v3860_v59, 4  ;;  %v3867_v2 = vrot.slane %v9236_v16, 5  ;;  %v6585_v27 = vrot.slane %v9277_v1, 9  ;;  %v7921_v16 = vld [vmem:[%s10646_s1 + $0x1c0] sm:$0xff]   ;;  %v9334_v45 = vld [vmem:[#allocation2 + $0xb0] sm:$0x1] }
 0x11c   : > { %7569 = vmatprep.subr.bf16.mxu0 %v7910_v51  ;;  %7542 = vmatmul.mubr.bf16.gmra.mxu1 %v6597_v33  ;;  %v3282_v41 = vsel %vm8092_vm4, %v3277_v35, %v3281_v8  ;;  %v3291_v7 = vrot.slane %v3290_v0, 4  ;;  %v3308_v13 = vshrl.u32 %v9279_v46, 16  ;;  %v3861_v55 = vsel %vm8570_vm14, %v6584_v4, %v3860_v59  ;;  %v3736_v5 = vld [vmem:[#allocation2 + $0x9c] sm:$0xe]  ;;  %v9626_v23 = vld [vmem:[#allocation2 + $0x74] sm:$0x1] }
 0x11d   : > { %7545 = vmatprep.mubr.bf16.mxu1 %v6598_v10  ;;  %v3301_v11 = vrot.slane %v3300_v15, 4  ;;  %v3864_v33 = vsel %vm8570_vm14, %v3862_v14, %v3863_v19  ;;  %v3870_v3 = vrot.slane %v9249_v62, 5  ;;  %v3869_v56 = vrot.slane %v3867_v2, 4  ;;  %7622 = vmatpush3.bf16.msra.mxu1 %v7920_v38 }
 0x11e   : > { %7490 = vmatmul.mubr.bf16.gmra.mxu0 %v9086_v44  ;;  %v9330_v44 = vcombine.low %v3272_v42, %v3282_v41  ;;  %v3296_v47 = vsel %vm8092_vm4, %v3291_v7, %v3295_v39  ;;  %v3310_v10 = vrot.slane %v3308_v13, 4  ;;  %v3311_v62 = vshll.u32 %v9279_v46, 16  ;;  %7623 = vmatprep.subr.bf16.mxu1 %v7921_v16  ;;  %v9350_v46 = vpop.f32.mrf.mxu0  ;;  %v3737_v13 = vld [vmem:[#allocation2 + $0xa8] sm:$0xe] }
 0x11f   : > { %7493 = vmatprep.mubr.bf16.mxu0 %v9136_v20  ;;  %7570 = vmatpush3.bf16.msra.mxu0 %v7910_v51  ;;  %v3306_v40 = vsel %vm8092_vm4, %v3301_v11, %v3305_v21  ;;  %v3317_v26 = vshll.u32 %v9300_v58, 16  ;;  %v3321_v20 = vshrl.u32 %v9300_v58, 16  ;;  %v7916_v51 = vld [vmem:[%s10646_s1 + $0x188] sm:$0xff]   ;;  %v6600_v1 = vcombine.low %v3861_v55, %v3864_v33  ;;  %v9374_v55 = vpop.f32.mrf.mxu1 }
 0x120   : > { %7571 = vmatprep.subr.bf16.mxu0 %v7913_v54  ;;  %v9344_v12 = vcombine.low %v3296_v47, %v3306_v40  ;;  %v9348_v50 = vsel %vm8570_vm14, %v6585_v27, %v3867_v2  ;;  %v3332_v8 = vshrl.u32 %v3010_v53, 16  ;;  %v3313_v39 = vrot.slane %v3311_v62, 5  ;;  %v7919_v2 = vld [vmem:[%s10646_s1 + $0x180] sm:$0xff]   ;;  %v9372_v11 = vpop.f32.mrf.mxu0  ;;  %v3013_v47 = vld [vmem:[#allocation2 + $0xb4] sm:$0xf] }
 0x121   : > { %v9354_v29 = vrot.slane %v3317_v26, 5  ;;  %v3323_v4 = vrot.slane %v3321_v20, 4  ;;  %v3327_v59 = vshll.u32 %v9308_v52, 16  ;;  %v3871_v38 = vsel %vm8570_vm14, %v3869_v56, %v3870_v3  ;;  %7624 = vmatpush3.bf16.msra.mxu1 %v7921_v16 }
 0x122   : > { %v3334_v42 = vrot.slane %v3332_v8, 4  ;;  %v3335_v35 = vshll.u32 %v3010_v53, 16  ;;  %v3341_v0 = vshll.u32 %v9327_v31, 16  ;;  %v3314_v19 = vor.u32 %v3313_v39, %v3310_v10 }
 0x123   : > { %7572 = vmatpush3.bf16.msra.mxu0 %v7913_v54  ;;  %v3324_v15 = vor.u32 %v3323_v4, %v9354_v29  ;;  %v3345_v21 = vshrl.u32 %v9327_v31, 16  ;;  %v3351_v14 = vshll.u32 %v9334_v45, 16  ;;  %v6586_v7 = vrot.slane %v3736_v5, 9  ;;  %v9405_v5 = vpop.f32.mrf.mxu0  ;;  %v3015_v4 = vld [vmem:[#allocation2 + $0xbc] sm:$0x1] }
 0x124   : > { %7573 = vmatprep.subr.bf16.mxu0 %v7916_v51  ;;  %7546 = vmatmul.mubr.bf16.gmra.mxu1 %v6599_v36  ;;  %v3337_v54 = vrot.slane %v3335_v35, 5  ;;  %v9369_v41 = vrot.slane %v3341_v0, 5  ;;  %v3874_v27 = vrot.slane %v9300_v58, 5  ;;  %v9377_v33 = vrot.slane %v3314_v19, 4  ;;  %v538_v35 = vld [vmem:[#allocation2 + $0xc8] sm:$0x1] }
 0x125   : > { %7549 = vmatprep.mubr.bf16.mxu1 %v6600_v1  ;;  %v9379_v16 = vrot.slane %v3324_v15, 4  ;;  %v9381_v30 = vrot.slane %v3327_v59, 5  ;;  %v3347_v22 = vrot.slane %v3345_v21, 4  ;;  %v3877_v53 = vrot.slane %v9308_v52, 5  ;;  %v9407_v1 = vpop.f32.mrf.mxu1  ;;  %v3016_v21 = vld [vmem:[#allocation2 + $0xc0] sm:$0xf] }
 0x126   : > { %7494 = vmatmul.mubr.bf16.gmra.mxu0 %v9188_v6  ;;  %v3338_v36 = vor.u32 %v3337_v54, %v3334_v42  ;;  %v3875_v58 = vsel %vm8570_vm14, %v6586_v7, %v3874_v27  ;;  %v3876_v3 = vrot.slane %v3874_v27, 4  ;;  %v6601_v6 = vcombine.low %v9348_v50, %v3871_v38  ;;  %10682 = vst [vmem:[#allocation5_spill] sm:$0xff] %v9407_v1  ;;  %v9426_v27 = vld [vmem:[#allocation2 + $0xc4] sm:$0xf] }
 0x127   : > { %7497 = vmatprep.mubr.bf16.mxu0 %v9224_v60  ;;  %7574 = vmatpush3.bf16.msra.mxu0 %v7916_v51  ;;  %v3348_v56 = vor.u32 %v3347_v22, %v9369_v41  ;;  %v9389_v10 = vrot.slane %v3351_v14, 5  ;;  %v6587_v40 = vrot.slane %v3737_v13, 9  ;;  %v9394_v60 = vld [vmem:[%s10646_s1 + $0x238] sm:$0xff]   ;;  %v3320_v62 = vsel %vm8092_vm4, %v9377_v33, %v9354_v29  ;;  %v3738_v13 = vld [vmem:[#allocation2 + $0xb4] sm:$0xe]  ;;  %v9430_v33 = vpop.f32.mrf.mxu1 }
 0x128   : > { %7575 = vmatprep.subr.bf16.mxu0 %v7919_v2  ;;  %v9400_v52 = vrot.slane %v3338_v36, 4  ;;  %v3878_v26 = vsel %vm8570_vm14, %v3876_v3, %v3877_v53  ;;  %v3881_v20 = vrot.slane %v9327_v31, 5  ;;  %v3014_v51 = vld [vmem:[#allocation2 + $0xb8] sm:$0xf]  ;;  %v3884_v39 = vrot.slane %v9334_v45, 5 }
 0x129   : > { %v3349_v50 = vrot.slane %v3348_v56, 4  ;;  %v6602_v8 = vcombine.low %v3875_v58, %v3878_v26  ;;  %v3356_v59 = vshrl.u32 %v3013_v47, 16  ;;  %v3330_v29 = vsel %vm8092_vm4, %v9379_v16, %v9381_v30  ;;  %v9440_v48 = vpop.f32.mrf.mxu1 }
 0x12a   : > { %v3882_v38 = vsel %vm8570_vm14, %v6587_v40, %v3881_v20  ;;  %v3883_v31 = vrot.slane %v3881_v20, 4  ;;  %v3359_v42 = vshll.u32 %v3013_v47, 16  ;;  %v3344_v0 = vsel %vm8092_vm4, %v9400_v52, %v9369_v41  ;;  %v9428_v41 = vpop.f32.mrf.mxu0 }
 0x12b   : > { %7576 = vmatpush3.bf16.msra.mxu0 %v7919_v2  ;;  %v3358_v45 = vrot.slane %v3356_v59, 4  ;;  %v3365_v19 = vshll.u32 %v3014_v51, 16  ;;  %v3369_v15 = vshrl.u32 %v3014_v51, 16  ;;  %v3354_v14 = vsel %vm8092_vm4, %v3349_v50, %v9389_v10  ;;  %10683 = vst [vmem:[#allocation6_spill] sm:$0xff] %v9428_v41 }
 0x12c   : > { %7657 = vmatprep.subr.bf16.mxu0 %v9394_v60  ;;  %7550 = vmatmul.mubr.bf16.gmra.mxu1 %v6601_v6  ;;  %v3885_v54 = vsel %vm8570_vm14, %v3883_v31, %v3884_v39  ;;  %v3361_v2 = vrot.slane %v3359_v42, 5  ;;  %v3375_v7 = vshll.u32 %v3015_v4, 16  ;;  %v539_v36 = vsel %vm8116_vm9, 0, %v538_v35  ;;  %v9438_v50 = vpop.f32.mrf.mxu0 }
 0x12d   : > { %7553 = vmatprep.mubr.bf16.mxu1 %v6602_v8  ;;  %v6603_v16 = vcombine.low %v3882_v38, %v3885_v54  ;;  %v3367_v30 = vrot.slane %v3365_v19, 5  ;;  %v3371_v22 = vrot.slane %v3369_v15, 4  ;;  %540 = vst [vmem:[#allocation2 + $0xc8] sm:$0x1] %v539_v36  ;;  %v3380_v53 = vshrl.u32 %v3016_v21, 16 }
 0x12e   : > { %7498 = vmatmul.mubr.bf16.gmra.mxu0 %v9262_v24  ;;  %v3362_v58 = vor.u32 %v3361_v2, %v3358_v45  ;;  %v3377_v3 = vrot.slane %v3375_v7, 5  ;;  %v3383_v47 = vshll.u32 %v3016_v21, 16  ;;  %v3389_v56 = vshll.u32 %v9426_v27, 16  ;;  %v3739_v45 = vld [vmem:[#allocation2 + $0xc0] sm:$0xe]  ;;  %v9461_v2 = vpop.f32.mrf.mxu0  ;;  %v9463_v7 = vpop.f32.mrf.mxu1 }
 0x12f   : > { %7501 = vmatprep.mubr.bf16.mxu0 %v9330_v44  ;;  %v3372_v6 = vor.u32 %v3371_v22, %v3367_v30  ;;  %v3393_v10 = vshrl.u32 %v9426_v27, 16  ;;  %v6588_v24 = vrot.slane %v3738_v13, 9  ;;  %v3382_v52 = vrot.slane %v3380_v53, 4  ;;  %v4607_v15 = vld [vmem:[#allocation2 + $0x18] sm:$0xf] }
 0x130   : > { %v3363_v40 = vrot.slane %v3362_v58, 4  ;;  %v3385_v26 = vrot.slane %v3383_v47, 5  ;;  %v3888_v20 = vrot.slane %v3014_v51, 5  ;;  %v9442_v8 = vrot.slane %v3389_v56, 5  ;;  %v4610_v22 = vld [vmem:[#allocation2 + $0x24] sm:$0xf] }
 0x131   : > { %v3373_v44 = vrot.slane %v3372_v6, 4  ;;  %v3395_v39 = vrot.slane %v3393_v10, 4  ;;  %v3891_v59 = vrot.slane %v3015_v4, 5  ;;  %v894_v38 = vrot.slane %v8873_v57, 4 }
 0x132   : > { %v6562_v31 = vcombine.low %v3320_v62, %v3330_v29  ;;  %v3889_v42 = vsel %vm8570_vm14, %v6588_v24, %v3888_v20  ;;  %v3890_v35 = vrot.slane %v3888_v20, 4  ;;  %v3368_v51 = vsel %vm8092_vm4, %v3363_v40, %v3367_v30  ;;  %v9457_v62 = vld [vmem:[#allocation2 + $0x1c] sm:$0xf]  ;;  %v9459_v29 = vld [vmem:[#allocation2 + $0x20] sm:$0x1]  ;;  %v9481_v40 = vpop.f32.mrf.mxu0 }
 0x133   : > { %v3378_v19 = vsel %vm8092_vm4, %v3373_v44, %v3377_v3  ;;  %v6563_v21 = vcombine.low %v3344_v0, %v3354_v14  ;;  %v3386_v54 = vor.u32 %v3385_v26, %v3382_v52  ;;  %v9455_v57 = vadd.f32 %v9182_v18, %v9216_v32  ;;  %v9470_v3 = vld [vmem:[#allocation2 + $0x28] sm:$0xf]  ;;  %v9483_v52 = vpop.f32.mrf.mxu1 }
 0x134   : > { %7554 = vmatmul.mubr.bf16.gmra.mxu1 %v6603_v16  ;;  %v3892_v4 = vsel %vm8570_vm14, %v3890_v35, %v3891_v59  ;;  %v1054_v0 = vld [vmem:[#allocation2 + $0xc8] sm:$0x1]  ;;  %v3396_v14 = vor.u32 %v3395_v39, %v9442_v8  ;;  %v6589_v16 = vrot.slane %v3739_v45, 9  ;;  %v3895_v30 = vrot.slane %v9426_v27, 5  ;;  %10684 = vst [vmem:[#allocation7_spill] sm:$0xff] %v9483_v52 }
 0x135   : > { %v6604_v13 = vcombine.low %v3889_v42, %v3892_v4  ;;  %v6564_v18 = vcombine.low %v3368_v51, %v3378_v19  ;;  %v1055_v32 = vsel %vm8107_vm6, %v894_v38, %v1054_v0  ;;  %v4656_v36 = vshrl.u32 %v4607_v15, 16  ;;  %v9490_v0 = vpop.f32.mrf.mxu0 }
 0x136   : > { %7502 = vmatmul.mubr.bf16.gmra.mxu0 %v9344_v12  ;;  %v4659_v58 = vshll.u32 %v4607_v15, 16  ;;  %1056 = vst [vmem:[#allocation2 + $0xc8] sm:$0x1] %v1055_v32  ;;  %v4665_v12 = vshll.u32 %v9457_v62, 16  ;;  %v4669_v53 = vshrl.u32 %v9457_v62, 16  ;;  %v4675_v47 = vshll.u32 %v9459_v29, 16 }
 0x137   : > { %7505 = vmatprep.mubr.bf16.mxu0 %v6562_v31  ;;  %7557 = vmatprep.mubr.bf16.mxu1 %v6604_v13  ;;  %v9477_v27 = vadd.f32 %v9218_v28, %v9254_v25  ;;  %v4658_v6 = vrot.slane %v4656_v36, 4  ;;  %v4680_v10 = vshrl.u32 %v4610_v22, 16  ;;  %v4683_v24 = vshll.u32 %v4610_v22, 16  ;;  %10685 = vst [vmem:[#allocation8_spill] sm:$0xff] %v9490_v0  ;;  %v9492_v13 = vpop.f32.mrf.mxu1  ;;  %v7928_v0 = vld [vmem:[#allocation2 + $0x48] sm:$0xff]  }
 0x138   : > { %v4661_v56 = vrot.slane %v4659_v58, 5  ;;  %v3387_v26 = vrot.slane %v3386_v54, 4  ;;  %v4667_v20 = vrot.slane %v4665_v12, 5  ;;  %v4671_v44 = vrot.slane %v4669_v53, 4  ;;  %v4613_v54 = vld [vmem:[#allocation2 + $0x30] sm:$0xf] }
 0x139   : > { %v4689_v39 = vshll.u32 %v9470_v3, 16  ;;  %v4682_v38 = vrot.slane %v4680_v10, 4  ;;  %v4685_v31 = vrot.slane %v4683_v24, 5  ;;  %v4693_v28 = vshrl.u32 %v9470_v3, 16 }
 0x13a   : > { %v4662_v59 = vor.u32 %v4661_v56, %v4658_v6  ;;  %v4672_v25 = vor.u32 %v4671_v44, %v4667_v20  ;;  %v4677_v42 = vrot.slane %v4675_v47, 5  ;;  %v4699_v45 = vshll.u32 %v9479_v43, 16  ;;  %v9503_v56 = vld [vmem:[#allocation2 + $0x34] sm:$0xf]  ;;  %v9510_v44 = vld [vmem:[#allocation2 + $0x38] sm:$0x1] }
 0x13b   : > { %v9487_v35 = vrot.slane %v4689_v39, 5  ;;  %v3397_v51 = vrot.slane %v3396_v14, 4  ;;  %v4686_v15 = vor.u32 %v4685_v31, %v4682_v38  ;;  %v4695_v4 = vrot.slane %v4693_v28, 4 }
 0x13c   : > { %v4663_v19 = vrot.slane %v4662_v59, 4  ;;  %v3896_v22 = vsel %vm8570_vm14, %v6589_v16, %v3895_v30  ;;  %v3897_v32 = vrot.slane %v3895_v30, 4  ;;  %v4673_v36 = vrot.slane %v4672_v25, 4  ;;  %v9512_v59 = vpop.f32.mrf.mxu0 }
 0x13d   : > { %v4701_v58 = vrot.slane %v4699_v45, 5  ;;  %v3018_v12 = vld [vmem:[#allocation2 + $0xc8] sm:$0x1]  ;;  %v4687_v53 = vrot.slane %v4686_v15, 4  ;;  %v4696_v47 = vor.u32 %v4695_v4, %v9487_v35  ;;  %v9501_v6 = vadd.f32 %v9316_v37, %v9350_v46  ;;  %v9514_v37 = vpop.f32.mrf.mxu1  ;;  %v4616_v45 = vld [vmem:[#allocation2 + $0x3c] sm:$0xf] }
 0x13e   : > { %7506 = vmatmul.mubr.bf16.gmra.mxu0 %v6563_v21  ;;  %v4668_v14 = vsel %vm8092_vm4, %v4663_v19, %v4667_v20  ;;  %v3399_v21 = vshll.u32 %v3018_v12, 16  ;;  %v3898_v10 = vrot.slane %v3018_v12, 5  ;;  %v4678_v16 = vsel %vm8092_vm4, %v4673_v36, %v4677_v42  ;;  %v9523_v19 = vld [vmem:[#allocation2 + $0x40] sm:$0xf]  ;;  %v7922_v4 = vld [vmem:[#allocation2 + $0x18] sm:$0xff]  }
 0x13f   : > { %7509 = vmatprep.mubr.bf16.mxu0 %v6564_v18  ;;  %v4704_v30 = vshrl.u32 %v4613_v54, 16  ;;  %v3392_v18 = vsel %vm8092_vm4, %v3387_v26, %v9442_v8  ;;  %v6638_v24 = vcombine.low %v4668_v14, %v4678_v16  ;;  %v4697_v20 = vrot.slane %v4696_v47, 4  ;;  %v9530_v36 = vld [vmem:[#allocation2 + $0x44] sm:$0x1]  ;;  %v9536_v47 = vpop.f32.mrf.mxu0 }
 0x140   : > { %v4707_v39 = vshll.u32 %v4613_v54, 16  ;;  %v3401_v46 = vrot.slane %v3399_v21, 5  ;;  %v3899_v38 = vsel %vm8570_vm14, %v3897_v32, %v3898_v10  ;;  %v4713_v28 = vshll.u32 %v9503_v56, 16 }
 0x141   : > { %v4706_v31 = vrot.slane %v4704_v30, 4  ;;  %v6605_v25 = vcombine.low %v3896_v22, %v3899_v38  ;;  %v4692_v8 = vsel %vm8092_vm4, %v4687_v53, %v9487_v35  ;;  %v4717_v42 = vshrl.u32 %v9503_v56, 16  ;;  %v4619_v38 = vld [vmem:[#allocation2 + $0x48] sm:$0xf] }
 0x142   : > { %v4709_v26 = vrot.slane %v4707_v39, 5  ;;  %v3402_v15 = vsel %vm8092_vm4, %v3397_v51, %v3401_v46  ;;  %v4702_v54 = vsel %vm8092_vm4, %v4697_v20, %v4701_v58  ;;  %v4715_v32 = vrot.slane %v4713_v28, 5  ;;  %v9538_v51 = vpop.f32.mrf.mxu1 }
 0x143   : > { %v4723_v22 = vshll.u32 %v9510_v44, 16  ;;  %v6565_v12 = vcombine.low %v3392_v18, %v3402_v15  ;;  %7558 = vmatmul.mubr.bf16.gmra.mxu1 %v6605_v25  ;;  %v4719_v14 = vrot.slane %v4717_v42, 4  ;;  %v9534_v53 = vadd.f32 %v9352_v49, %v9372_v11  ;;  %v9547_v42 = vpop.f32.mrf.mxu0 }
 0x144   : > { %v4710_v35 = vor.u32 %v4709_v26, %v4706_v31  ;;  %7625 = vmatprep.mubr.bf16.mxu1 %v6638_v24  ;;  %v4728_v58 = vshrl.u32 %v4616_v45, 16  ;;  %v4731_v10 = vshll.u32 %v4616_v45, 16  ;;  %v4737_v16 = vshll.u32 %v9523_v19, 16  ;;  %v9545_v26 = vld [vmem:[#allocation2 + $0x4c] sm:$0xf]  ;;  %v9549_v45 = vpop.f32.mrf.mxu1 }
 0x145   : > { %v4725_v21 = vrot.slane %v4723_v22, 5  ;;  %v4720_v18 = vor.u32 %v4719_v14, %v4715_v32  ;;  %v4741_v20 = vshrl.u32 %v9523_v19, 16  ;;  %v4747_v39 = vshll.u32 %v9530_v36, 16  ;;  %10686 = vst [vmem:[#allocation9_spill] sm:$0xff] %v9549_v45 }
 0x146   : > { %7510 = vmatmul.mubr.bf16.gmra.mxu0 %v6565_v12  ;;  %v4711_v30 = vrot.slane %v4710_v35, 4  ;;  %v4730_v49 = vrot.slane %v4728_v58, 4  ;;  %v4733_v11 = vrot.slane %v4731_v10, 5  ;;  %v4739_v46 = vrot.slane %v4737_v16, 5  ;;  %v9555_v12 = vld [vmem:[#allocation2 + $0x50] sm:$0x1] }
 0x147   : > { %7577 = vmatprep.mubr.bf16.mxu0 %v7922_v4  ;;  %v6639_v31 = vcombine.low %v4692_v8, %v4702_v54  ;;  %v4721_v28 = vrot.slane %v4720_v18, 4  ;;  %v4743_v25 = vrot.slane %v4741_v20, 4  ;;  %v4749_v22 = vrot.slane %v4747_v39, 5  ;;  %v7924_v8 = vld [vmem:[#allocation2 + $0x24] sm:$0xff]   ;;  %v7925_v54 = vld [vmem:[#allocation2 + $0x30] sm:$0xff]  }
 0x148   : > { %v4716_v24 = vsel %vm8092_vm4, %v4711_v30, %v4715_v32  ;;  %v4734_v15 = vor.u32 %v4733_v11, %v4730_v49  ;;  %v9553_v4 = vadd.f32 %v9430_v33, %v9438_v50  ;;  %v4752_v14 = vshrl.u32 %v4619_v38, 16  ;;  %v7926_v10 = vld [vmem:[%s10646_s1 + $0x230] sm:$0xff]   ;;  %v9565_v11 = vld [vmem:[#allocation2 + $0x58] sm:$0xf] }
 0x149   : > { %v4726_v32 = vsel %vm8092_vm4, %v4721_v28, %v4725_v21  ;;  %v4744_v35 = vor.u32 %v4743_v25, %v4739_v46  ;;  %v4755_v58 = vshll.u32 %v4619_v38, 16  ;;  %v4761_v18 = vshll.u32 %v9545_v26, 16  ;;  %v4622_v50 = vld [vmem:[#allocation2 + $0x54] sm:$0xf]  ;;  %v9567_v38 = vpop.f32.mrf.mxu0  ;;  %v9569_v28 = vpop.f32.mrf.mxu1 }
 0x14a   : > { %v6640_v16 = vcombine.low %v4716_v24, %v4726_v32  ;;  %v4735_v30 = vrot.slane %v4734_v15, 4  ;;  %v4765_v33 = vshrl.u32 %v9545_v26, 16  ;;  %v4754_v39 = vrot.slane %v4752_v14, 4  ;;  %10687 = vst [vmem:[#allocation10_spill] sm:$0xff] %v9567_v38  ;;  %v9577_v32 = vld [vmem:[#allocation2 + $0x5c] sm:$0x1] }
 0x14b   : > { %7626 = vmatmul.mubr.bf16.vlgmr.msra.gmra.mxu1 %v6639_v31  ;;  %v4745_v20 = vrot.slane %v4744_v35, 4  ;;  %v4757_v49 = vrot.slane %v4755_v58, 5  ;;  %v4771_v21 = vshll.u32 %v9555_v12, 16  ;;  %v4763_v25 = vrot.slane %v4761_v18, 5 }
 0x14c   : > { %7629 = vmatprep.mubr.bf16.mxu1 %v6640_v16  ;;  %v4740_v24 = vsel %vm8092_vm4, %v4735_v30, %v4739_v46  ;;  %v4767_v15 = vrot.slane %v4765_v33, 4  ;;  %v9575_v31 = vadd.f32 %v9440_v48, %v9461_v2  ;;  %v4776_v52 = vshrl.u32 %v4622_v50, 16  ;;  %v7929_v48 = vld [vmem:[%s10646_s1 + $0x228] sm:$0xff]  }
 0x14d   : > { %v4750_v35 = vsel %vm8092_vm4, %v4745_v20, %v4749_v22  ;;  %v4758_v14 = vor.u32 %v4757_v49, %v4754_v39  ;;  %v4773_v58 = vrot.slane %v4771_v21, 5  ;;  %v4779_v30 = vshll.u32 %v4622_v50, 16  ;;  %v9588_v20 = vpop.f32.mrf.mxu0  ;;  %v4625_v49 = vld [vmem:[#allocation2 + $0x60] sm:$0xf] }
 0x14e   : > { %7578 = vmatmul.mubr.bf16.vlgmr.msra.gmra.mxu0 %v7924_v8  ;;  %v6641_v16 = vcombine.low %v4740_v24, %v4750_v35  ;;  %v4768_v46 = vor.u32 %v4767_v15, %v4763_v25  ;;  %v4785_v18 = vshll.u32 %v9565_v11, 16  ;;  %v4778_v8 = vrot.slane %v4776_v52, 4  ;;  %v7927_v21 = vld [vmem:[#allocation2 + $0x3c] sm:$0xff]   ;;  %v9598_v35 = vld [vmem:[#allocation2 + $0x64] sm:$0xf] }
 0x14f   : > { %7658 = vmatpush3.bf16.msra.mxu0 %v9394_v60  ;;  %7581 = vmatprep.mubr.bf16.mxu0 %v7925_v54  ;;  %v4759_v2 = vrot.slane %v4758_v14, 4  ;;  %v4789_v22 = vshrl.u32 %v9565_v11, 16  ;;  %v4795_v33 = vshll.u32 %v9577_v32, 16  ;;  %v9590_v60 = vpop.f32.mrf.mxu1  ;;  %v4781_v39 = vrot.slane %v4779_v30, 5  ;;  %v9600_v14 = vld [vmem:[#allocation2 + $0x68] sm:$0x1] }
 0x150   : > { %7659 = vmatprep.subr.bf16.mxu0 %v7926_v10  ;;  %10688 = vst [vmem:[#allocation11_spill] sm:$0xff] %v9590_v60  ;;  %v4769_v54 = vrot.slane %v4768_v46, 4  ;;  %v4787_v50 = vrot.slane %v4785_v18, 5  ;;  %v9596_v52 = vadd.f32 %v9463_v7, %v9481_v40  ;;  %v9606_v1 = vadd.f32 %v9492_v13, %v9512_v59  ;;  %v7932_v40 = vld [vmem:[%s10646_s1 + $0x220] sm:$0xff]  }
 0x151   : > { %v4764_v24 = vsel %vm8092_vm4, %v4759_v2, %v4763_v25  ;;  %v4791_v15 = vrot.slane %v4789_v22, 4  ;;  %v4782_v30 = vor.u32 %v4781_v39, %v4778_v8  ;;  %v4797_v18 = vrot.slane %v4795_v33, 5  ;;  %v9611_v22 = vpop.f32.mrf.mxu0  ;;  %v9613_v41 = vpop.f32.mrf.mxu1 }
 0x152   : > { %10689 = vst [vmem:[#allocation12_spill] sm:$0xff] %v9596_v52  ;;  %v4774_v46 = vsel %vm8092_vm4, %v4769_v54, %v4773_v58  ;;  %10690 = vst [vmem:[#allocation13_spill] sm:$0xff] %v9606_v1  ;;  %v4800_v2 = vshrl.u32 %v4625_v49, 16  ;;  %v4809_v8 = vshll.u32 %v9598_v35, 16  ;;  %v4813_v13 = vshrl.u32 %v9598_v35, 16 }
 0x153   : > { %7660 = vmatpush3.bf16.msra.mxu0 %v7926_v10  ;;  %7630 = vmatmul.mubr.bf16.gmra.mxu1 %v6641_v16  ;;  %v6642_v25 = vcombine.low %v4764_v24, %v4774_v46  ;;  %v4792_v7 = vor.u32 %v4791_v15, %v4787_v50  ;;  %v4803_v10 = vshll.u32 %v4625_v49, 16  ;;  %10691 = vst [vmem:[#allocation14_spill] sm:$0xff] %v9611_v22  ;;  %v4783_v58 = vrot.slane %v4782_v30, 4  ;;  %v4628_v16 = vld [vmem:[#allocation2 + $0x6c] sm:$0xf] }
 0x154   : > { %7661 = vmatprep.subr.bf16.mxu0 %v7929_v48  ;;  %v4819_v59 = vshll.u32 %v9600_v14, 16  ;;  %v4802_v54 = vrot.slane %v4800_v2, 4  ;;  %v9620_v49 = vadd.f32 %v9514_v37, %v9536_v47  ;;  %v9622_v24 = vld [vmem:[#allocation2 + $0x70] sm:$0xf]  ;;  %v4811_v46 = vrot.slane %v4809_v8, 5  ;;  %v9633_v47 = vpop.f32.mrf.mxu0  ;;  %v7930_v8 = vld [vmem:[#allocation2 + $0x54] sm:$0xff]  }
 0x155   : > { %7633 = vmatprep.mubr.bf16.mxu1 %v6642_v25  ;;  %v4793_v33 = vrot.slane %v4792_v7, 4  ;;  %v4805_v39 = vrot.slane %v4803_v10, 5  ;;  %v4788_v15 = vsel %vm8092_vm4, %v4783_v58, %v4787_v50  ;;  %v4815_v30 = vrot.slane %v4813_v13, 4  ;;  %v4631_v22 = vld [vmem:[#allocation2 + $0x78] sm:$0xf] }
 0x156   : > { %7582 = vmatmul.mubr.bf16.gmra.mxu0 %v7927_v21  ;;  %10692 = vst [vmem:[#allocation15_spill] sm:$0xff] %v9620_v49  ;;  %v4821_v9 = vrot.slane %v4819_v59, 5  ;;  %v4824_v7 = vshrl.u32 %v4628_v16, 16  ;;  %v4827_v37 = vshll.u32 %v4628_v16, 16  ;;  %v4833_v10 = vshll.u32 %v9622_v24, 16 }
 0x157   : > { %7585 = vmatprep.mubr.bf16.mxu0 %v7928_v0  ;;  %7662 = vmatpush3.bf16.msra.mxu0 %v7929_v48  ;;  %v4798_v21 = vsel %vm8092_vm4, %v4793_v33, %v4797_v18  ;;  %v4806_v25 = vor.u32 %v4805_v39, %v4802_v54  ;;  %v7935_v0 = vld [vmem:[%s10646_s1 + $0x218] sm:$0xff]   ;;  %v9635_v48 = vpop.f32.mrf.mxu1  ;;  %v4816_v2 = vor.u32 %v4815_v30, %v4811_v46  ;;  %v4837_v58 = vshrl.u32 %v9622_v24, 16  ;;  %v7931_v33 = vld [vmem:[#allocation2 + $0x60] sm:$0xff]  }
 0x158   : > { %7663 = vmatprep.subr.bf16.mxu0 %v7932_v40  ;;  %10693 = vst [vmem:[#allocation16_spill] sm:$0xff] %v9635_v48  ;;  %v6643_v50 = vcombine.low %v4788_v15, %v4798_v21  ;;  %v4826_v13 = vrot.slane %v4824_v7, 4  ;;  %v4829_v59 = vrot.slane %v4827_v37, 5  ;;  %v4843_v16 = vshll.u32 %v9626_v23, 16  ;;  %v9648_v7 = vld [vmem:[#allocation2 + $0x80] sm:$0x1]  ;;  %v9650_v37 = vpop.f32.mrf.mxu0 }
 0x159   : > { %v4807_v18 = vrot.slane %v4806_v25, 4  ;;  %v4817_v54 = vrot.slane %v4816_v2, 4  ;;  %v4835_v39 = vrot.slane %v4833_v10, 5  ;;  %v4839_v60 = vrot.slane %v4837_v58, 4  ;;  %v9646_v25 = vld [vmem:[#allocation2 + $0x7c] sm:$0xf] }
 0x15a   : > { %v4830_v30 = vor.u32 %v4829_v59, %v4826_v13  ;;  %v9644_v21 = vadd.f32 %v9538_v51, %v9547_v42  ;;  %10695 = vst [vmem:[#allocation18_spill] sm:$0xff] %v9650_v37  ;;  %v4845_v10 = vrot.slane %v4843_v16, 5  ;;  %v9659_v51 = vadd.f32 %v9569_v28, %v9588_v20  ;;  %v7941_v59 = vld [vmem:[%s10646_s1 + $0x208] sm:$0xff]   ;;  %v4634_v28 = vld [vmem:[#allocation2 + $0x84] sm:$0xf] }
 0x15b   : > { %7664 = vmatpush3.bf16.msra.mxu0 %v7932_v40  ;;  %7634 = vmatmul.mubr.bf16.gmra.mxu1 %v6643_v50  ;;  %v4812_v15 = vsel %vm8092_vm4, %v4807_v18, %v4811_v46  ;;  %v7938_v40 = vld [vmem:[%s10646_s1 + $0x210] sm:$0xff]   ;;  %v7359_v50 = vpop.f32.mrf.mxu1  ;;  %v4822_v46 = vsel %vm8092_vm4, %v4817_v54, %v4821_v9  ;;  %v4840_v2 = vor.u32 %v4839_v60, %v4835_v39  ;;  %v4848_v18 = vshrl.u32 %v4631_v22, 16  ;;  %v9669_v54 = vld [vmem:[#allocation2 + $0x88] sm:$0xf]  ;;  %v9748_v52 = vld [vmem:[#allocation2 + $0xc4] sm:$0xf] }
 0x15c   : > { %10694 = vst [vmem:[#allocation17_spill] sm:$0xff] %v9644_v21  ;;  %7665 = vmatprep.subr.bf16.mxu0 %v7935_v0  ;;  %10696 = vst [vmem:[#allocation19_spill] sm:$0xff] %v9659_v51  ;;  %v6644_v42 = vcombine.low %v4812_v15, %v4822_v46  ;;  %v4831_v58 = vrot.slane %v4830_v30, 4  ;;  %v4851_v13 = vshll.u32 %v4631_v22, 16  ;;  %v4857_v9 = vshll.u32 %v9646_v25, 16 }
 0x15d   : > { %v4841_v48 = vrot.slane %v4840_v2, 4  ;;  %v4861_v60 = vshrl.u32 %v9646_v25, 16  ;;  %v4867_v16 = vshll.u32 %v9648_v7, 16  ;;  %v9671_v15 = vld [vmem:[#allocation2 + $0x8c] sm:$0x1]  ;;  %v4881_v45 = vshll.u32 %v9669_v54, 16 }
 0x15e   : > { %7586 = vmatmul.mubr.bf16.gmra.mxu0 %v7930_v8  ;;  %7637 = vmatprep.mubr.bf16.mxu1 %v6644_v42  ;;  %v4836_v20 = vsel %vm8092_vm4, %v4831_v58, %v4835_v39  ;;  %v4850_v8 = vrot.slane %v4848_v18, 4  ;;  %v4853_v22 = vrot.slane %v4851_v13, 5  ;;  %v4859_v46 = vrot.slane %v4857_v9, 5  ;;  %v7933_v42 = vld [vmem:[#allocation2 + $0x6c] sm:$0xff]   ;;  %v7934_v18 = vld [vmem:[#allocation2 + $0x78] sm:$0xff]   ;;  %10713 = vst [vmem:[#allocation36_spill] sm:$0xff] %v9748_v52 }
 0x15f   : > { %7589 = vmatprep.mubr.bf16.mxu0 %v7931_v33  ;;  %7666 = vmatpush3.bf16.msra.mxu0 %v7935_v0  ;;  %v7311_v33 = vpop.f32.mrf.mxu0  ;;  %v9673_v0 = vpop.f32.mrf.mxu1  ;;  %v4846_v30 = vsel %vm8092_vm4, %v4841_v48, %v4845_v10  ;;  %v4863_v2 = vrot.slane %v4861_v60, 4  ;;  %v4869_v37 = vrot.slane %v4867_v16, 5  ;;  %v4872_v39 = vshrl.u32 %v4634_v28, 16  ;;  %v4637_v60 = vld [vmem:[#allocation2 + $0x90] sm:$0xf] }
 0x160   : > { %7667 = vmatprep.subr.bf16.mxu0 %v7938_v40  ;;  %10697 = vst [vmem:[#allocation20_spill] sm:$0xff] %v9673_v0  ;;  %v6645_v51 = vcombine.low %v4836_v20, %v4846_v30  ;;  %v4854_v21 = vor.u32 %v4853_v22, %v4850_v8  ;;  %v4875_v58 = vshll.u32 %v4634_v28, 16  ;;  %v4885_v38 = vshrl.u32 %v9669_v54, 16  ;;  %v7944_v20 = vld [vmem:[%s10646_s1 + $0x200] sm:$0xff]  }
 0x161   : > { %v4864_v13 = vor.u32 %v4863_v2, %v4859_v46  ;;  %v4891_v49 = vshll.u32 %v9671_v15, 16  ;;  %v4874_v48 = vrot.slane %v4872_v39, 4  ;;  %v9682_v9 = vadd.f32 %v9613_v41, %v9633_v47  ;;  %v9684_v16 = vpop.f32.mrf.mxu0  ;;  %v7360_v28 = vpop.f32.mrf.mxu1  ;;  %v9695_v2 = vld [vmem:[#allocation2 + $0x98] sm:$0x1] }
 0x162   : > { %v4855_v0 = vrot.slane %v4854_v21, 4  ;;  %v4877_v10 = vrot.slane %v4875_v58, 5  ;;  %10699 = vst [vmem:[#allocation22_spill] sm:$0xff] %v9684_v16  ;;  %v4883_v22 = vrot.slane %v4881_v45, 5  ;;  %v9693_v30 = vadd.f32 %v7359_v50, %v7311_v33  ;;  %10702 = vst [vmem:[#allocation25_spill] sm:$0xff] %v9695_v2 }
 0x163   : > { %7668 = vmatpush3.bf16.msra.mxu0 %v7938_v40  ;;  %7638 = vmatmul.mubr.bf16.gmra.mxu1 %v6645_v51  ;;  %10698 = vst [vmem:[#allocation21_spill] sm:$0xff] %v9682_v9  ;;  %v4865_v8 = vrot.slane %v4864_v13, 4  ;;  %v4887_v40 = vrot.slane %v4885_v38, 4  ;;  %v9689_v51 = vld [vmem:[#allocation2 + $0x94] sm:$0xf]  ;;  %v4893_v47 = vrot.slane %v4891_v49, 5  ;;  %v7312_v49 = vpop.f32.mrf.mxu0  ;;  %v9701_v50 = vpop.f32.mrf.mxu1 }
 0x164   : > { %7669 = vmatprep.subr.bf16.mxu0 %v7941_v59  ;;  %10700 = vst [vmem:[#allocation23_spill] sm:$0xff] %v9689_v51  ;;  %v4860_v21 = vsel %vm8092_vm4, %v4855_v0, %v4859_v46  ;;  %v4878_v41 = vor.u32 %v4877_v10, %v4874_v48  ;;  %10701 = vst [vmem:[#allocation24_spill] sm:$0xff] %v9693_v30  ;;  %v4896_v13 = vshrl.u32 %v4637_v60, 16  ;;  %v4899_v45 = vshll.u32 %v4637_v60, 16  ;;  %v4640_v46 = vld [vmem:[#allocation2 + $0x9c] sm:$0xf] }
 0x165   : > { %v4870_v39 = vsel %vm8092_vm4, %v4865_v8, %v4869_v37  ;;  %v4888_v58 = vor.u32 %v4887_v40, %v4883_v22  ;;  %v4909_v0 = vshrl.u32 %v9689_v51, 16  ;;  %10703 = vst [vmem:[#allocation26_spill] sm:$0xff] %v9701_v50  ;;  %v4915_v37 = vshll.u32 %v9695_v2, 16  ;;  %v9704_v10 = vld [vmem:[#allocation2 + $0xa0] sm:$0xf]  ;;  %v7936_v60 = vld [vmem:[#allocation2 + $0x84] sm:$0xff]   ;;  %v9713_v1 = vpop.f32.mrf.mxu0 }
 0x166   : > { %7590 = vmatmul.mubr.bf16.gmra.mxu0 %v7933_v42  ;;  %v6646_v38 = vcombine.low %v4860_v21, %v4870_v39  ;;  %v4879_v16 = vrot.slane %v4878_v41, 4  ;;  %v4905_v42 = vshll.u32 %v9689_v51, 16  ;;  %v4901_v48 = vrot.slane %v4899_v45, 5  ;;  %v9708_v21 = vld [vmem:[#allocation2 + $0xa4] sm:$0x1]  ;;  %v7937_v39 = vld [vmem:[#allocation2 + $0x90] sm:$0xff]  }
 0x167   : > { %7593 = vmatprep.mubr.bf16.mxu0 %v7934_v18  ;;  %7670 = vmatpush3.bf16.msra.mxu0 %v7941_v59  ;;  %v4889_v33 = vrot.slane %v4888_v58, 4  ;;  %v4898_v18 = vrot.slane %v4896_v13, 4  ;;  %v4911_v40 = vrot.slane %v4909_v0, 4  ;;  %v4917_v13 = vrot.slane %v4915_v37, 5  ;;  %10704 = vst [vmem:[#allocation27_spill] sm:$0xff] %v9713_v1 }
 0x168   : > { %7671 = vmatprep.subr.bf16.mxu0 %v7944_v20  ;;  %7641 = vmatprep.mubr.bf16.mxu1 %v6646_v38  ;;  %v4884_v59 = vsel %vm8092_vm4, %v4879_v16, %v4883_v22  ;;  %v4907_v8 = vrot.slane %v4905_v42, 5  ;;  %v4920_v45 = vshrl.u32 %v4640_v46, 16  ;;  %v4923_v9 = vshll.u32 %v4640_v46, 16  ;;  %v7363_v16 = vpop.f32.mrf.mxu1  ;;  %v9719_v46 = vld [vmem:[#allocation2 + $0xac] sm:$0xf] }
 0x169   : > { %v4894_v41 = vsel %vm8092_vm4, %v4889_v33, %v4893_v47  ;;  %v4902_v58 = vor.u32 %v4901_v48, %v4898_v18  ;;  %v4929_v38 = vshll.u32 %v9704_v10, 16  ;;  %v4933_v0 = vshrl.u32 %v9704_v10, 16  ;;  %v4643_v47 = vld [vmem:[#allocation2 + $0xa8] sm:$0xf]  ;;  %10706 = vst [vmem:[#allocation29_spill] sm:$0xff] %v9719_v46 }
 0x16a   : > { %v6647_v50 = vcombine.low %v4884_v59, %v4894_v41  ;;  %v4912_v30 = vor.u32 %v4911_v40, %v4907_v8  ;;  %v4922_v42 = vrot.slane %v4920_v45, 4  ;;  %v4939_v2 = vshll.u32 %v9708_v21, 16  ;;  %v5361_v51 = vld [vmem:[#allocation2 + $0x24] sm:$0xe] }
 0x16b   : > { %7672 = vmatpush3.bf16.msra.mxu0 %v7944_v20  ;;  %v4903_v22 = vrot.slane %v4902_v58, 4  ;;  %v4925_v18 = vrot.slane %v4923_v9, 5  ;;  %v4931_v20 = vrot.slane %v4929_v38, 5  ;;  %v9717_v48 = vadd.f32 %v7360_v28, %v7312_v49  ;;  %v7939_v28 = vld [vmem:[#allocation2 + $0x9c] sm:$0xff]  }
 0x16c   : > { %7642 = vmatmul.mubr.bf16.gmra.mxu1 %v6647_v50  ;;  %v4913_v33 = vrot.slane %v4912_v30, 4  ;;  %v4935_v59 = vrot.slane %v4933_v0, 4  ;;  %v4941_v40 = vrot.slane %v4939_v2, 5  ;;  %v4944_v30 = vshrl.u32 %v4643_v47, 16  ;;  %v9727_v50 = vpop.f32.mrf.mxu1 }
 0x16d   : > { %10705 = vst [vmem:[#allocation28_spill] sm:$0xff] %v9717_v48  ;;  %v4908_v37 = vsel %vm8092_vm4, %v4903_v22, %v4907_v8  ;;  %v4926_v58 = vor.u32 %v4925_v18, %v4922_v42  ;;  %v4947_v9 = vshll.u32 %v4643_v47, 16  ;;  %10708 = vst [vmem:[#allocation31_spill] sm:$0xff] %v9727_v50  ;;  %v4953_v8 = vshll.u32 %v9719_v46, 16  ;;  %v4646_v22 = vld [vmem:[#allocation2 + $0xb4] sm:$0xf] }
 0x16e   : > { %7594 = vmatmul.mubr.bf16.gmra.mxu0 %v7936_v60  ;;  %v4918_v41 = vsel %vm8092_vm4, %v4913_v33, %v4917_v13  ;;  %v9725_v60 = vld [vmem:[#allocation2 + $0xb0] sm:$0x1]  ;;  %v4936_v38 = vor.u32 %v4935_v59, %v4931_v20  ;;  %v4946_v0 = vrot.slane %v4944_v30, 4  ;;  %v4957_v13 = vshrl.u32 %v9719_v46, 16  ;;  %v9735_v33 = vld [vmem:[#allocation2 + $0xb8] sm:$0xf] }
 0x16f   : > { %7597 = vmatprep.mubr.bf16.mxu0 %v7937_v39  ;;  %10707 = vst [vmem:[#allocation30_spill] sm:$0xff] %v9725_v60  ;;  %v6648_v49 = vcombine.low %v4908_v37, %v4918_v41  ;;  %v4927_v2 = vrot.slane %v4926_v58, 4  ;;  %v4949_v48 = vrot.slane %v4947_v9, 5  ;;  %10711 = vst [vmem:[#allocation34_spill] sm:$0xff] %v9735_v33  ;;  %v7940_v37 = vld [vmem:[#allocation2 + $0xa8] sm:$0xff]   ;;  %v4955_v59 = vrot.slane %v4953_v8, 5 }
 0x170   : > { %v7315_v45 = vpop.f32.mrf.mxu0  ;;  %v4937_v18 = vrot.slane %v4936_v38, 4  ;;  %v9741_v30 = vld [vmem:[#allocation2 + $0xbc] sm:$0x1]  ;;  %v4968_v9 = vshrl.u32 %v4646_v22, 16  ;;  %v4971_v47 = vshll.u32 %v4646_v22, 16  ;;  %v5454_v34 = vrot.slane %v9545_v26, 5 }
 0x171   : > { %v9729_v39 = vadd.f32 %v7363_v16, %v7315_v45  ;;  %7645 = vmatprep.mubr.bf16.mxu1 %v6648_v49  ;;  %v4963_v16 = vshll.u32 %v9725_v60, 16  ;;  %v4932_v41 = vsel %vm8092_vm4, %v4927_v2, %v4931_v20  ;;  %v4950_v58 = vor.u32 %v4949_v48, %v4946_v0  ;;  %10712 = vst [vmem:[#allocation35_spill] sm:$0xff] %v9741_v30  ;;  %v4649_v20 = vld [vmem:[#allocation2 + $0xc0] sm:$0xf] }
 0x172   : > { %v9733_v42 = vpop.f32.mrf.mxu0  ;;  %v4959_v45 = vrot.slane %v4957_v13, 4  ;;  %v4942_v50 = vsel %vm8092_vm4, %v4937_v18, %v4941_v40  ;;  %v4977_v49 = vshll.u32 %v9735_v33, 16  ;;  %v4970_v46 = vrot.slane %v4968_v9, 4  ;;  %v7943_v40 = vld [vmem:[#allocation2 + $0xc0] sm:$0xff]  }
 0x173   : > { %10709 = vst [vmem:[#allocation32_spill] sm:$0xff] %v9729_v39  ;;  %10710 = vst [vmem:[#allocation33_spill] sm:$0xff] %v9733_v42  ;;  %v7364_v39 = vpop.f32.mrf.mxu1  ;;  %v4965_v42 = vrot.slane %v4963_v16, 5  ;;  %v6649_v8 = vcombine.low %v4932_v41, %v4942_v50  ;;  %v4951_v1 = vrot.slane %v4950_v58, 4  ;;  %v4973_v48 = vrot.slane %v4971_v47, 5 }
 0x174   : > { %v7316_v38 = vpop.f32.mrf.mxu0  ;;  %v4960_v60 = vor.u32 %v4959_v45, %v4955_v59  ;;  %v4979_v2 = vrot.slane %v4977_v49, 5  ;;  %v4981_v0 = vshrl.u32 %v9735_v33, 16  ;;  %v4987_v13 = vshll.u32 %v9741_v30, 16  ;;  %v9757_v41 = vld [vmem:[#allocation2 + $0xc8] sm:$0x1]  ;;  %v7942_v45 = vld [vmem:[#allocation2 + $0xb4] sm:$0xff]  }
 0x175   : > { %7646 = vmatmul.mubr.bf16.gmra.mxu1 %v6649_v8  ;;  %v9753_v22 = vadd.f32 %v7364_v39, %v7316_v38  ;;  %v9755_v18 = vpop.f32.mrf.mxu1  ;;  %10716 = vst [vmem:[#allocation39_spill] sm:$0xff] %v9757_v41  ;;  %v4992_v58 = vshrl.u32 %v4649_v20, 16  ;;  %v4995_v49 = vshll.u32 %v4649_v20, 16  ;;  %v5001_v8 = vshll.u32 %v9748_v52, 16 }
 0x176   : > { %7598 = vmatmul.mubr.bf16.gmra.mxu0 %v7939_v28  ;;  %v4956_v28 = vsel %vm8092_vm4, %v4951_v1, %v4955_v59  ;;  %v4961_v50 = vrot.slane %v4960_v60, 4  ;;  %10715 = vst [vmem:[#allocation38_spill] sm:$0xff] %v9755_v18  ;;  %v4983_v47 = vrot.slane %v4981_v0, 4  ;;  %v4989_v16 = vrot.slane %v4987_v13, 5  ;;  %v4652_v60 = vld [vmem:[#allocation2 + $0xcc] sm:$0xf] }
 0x177   : > { %7601 = vmatprep.mubr.bf16.mxu0 %v7940_v37  ;;  %10714 = vst [vmem:[#allocation37_spill] sm:$0xff] %v9753_v22  ;;  %v4974_v37 = vor.u32 %v4973_v48, %v4970_v46  ;;  %v5005_v1 = vshrl.u32 %v9748_v52, 16  ;;  %v4994_v46 = vrot.slane %v4992_v58, 4  ;;  %v9763_v48 = vld [vmem:[#allocation2 + $0xd0] sm:$0xf]  ;;  %v4997_v13 = vrot.slane %v4995_v49, 5 }
 0x178   : > { %v4966_v9 = vsel %vm8092_vm4, %v4961_v50, %v4965_v42  ;;  %v4984_v38 = vor.u32 %v4983_v47, %v4979_v2  ;;  %v5003_v22 = vrot.slane %v5001_v8, 5  ;;  %v5011_v30 = vshll.u32 %v9757_v41, 16  ;;  %v5360_v8 = vld [vmem:[#allocation2 + $0x18] sm:$0xe] }
 0x179   : > { %v6650_v39 = vcombine.low %v4956_v28, %v4966_v9  ;;  %v4975_v59 = vrot.slane %v4974_v37, 4  ;;  %v5007_v18 = vrot.slane %v5005_v1, 4  ;;  %v5016_v50 = vshrl.u32 %v4652_v60, 16  ;;  %v9770_v9 = vld [vmem:[#allocation2 + $0xd4] sm:$0x1] }
 0x17a   : > { %v4985_v20 = vrot.slane %v4984_v38, 4  ;;  %v5019_v52 = vshll.u32 %v4652_v60, 16  ;;  %v4998_v28 = vor.u32 %v4997_v13, %v4994_v46  ;;  %v5013_v47 = vrot.slane %v5011_v30, 5  ;;  %v9776_v46 = vpop.f32.mrf.mxu0 }
 0x17b   : > { %7649 = vmatprep.mubr.bf16.mxu1 %v6650_v39  ;;  %v4980_v42 = vsel %vm8092_vm4, %v4975_v59, %v4979_v2  ;;  %v5008_v37 = vor.u32 %v5007_v18, %v5003_v22  ;;  %v5025_v49 = vshll.u32 %v9763_v48, 16  ;;  %v5018_v39 = vrot.slane %v5016_v50, 4 }
 0x17c   : > { %v7367_v0 = vpop.f32.mrf.mxu1  ;;  %v4990_v1 = vsel %vm8092_vm4, %v4985_v20, %v4989_v16  ;;  %v5021_v2 = vrot.slane %v5019_v52, 5  ;;  %v5029_v59 = vshrl.u32 %v9763_v48, 16  ;;  %v5035_v41 = vshll.u32 %v9770_v9, 16  ;;  %v7945_v16 = vld [vmem:[#allocation2 + $0xcc] sm:$0xff]  }
 0x17d   : > { %v6651_v60 = vcombine.low %v4980_v42, %v4990_v1  ;;  %v5009_v38 = vrot.slane %v5008_v37, 4  ;;  %v5027_v18 = vrot.slane %v5025_v49, 5  ;;  %v6662_v33 = vrot.slane %v5360_v8, 9 }
 0x17e   : > { %7602 = vmatmul.mubr.bf16.gmra.mxu0 %v7942_v45  ;;  %v9768_v58 = vpop.f32.mrf.mxu1  ;;  %v4999_v45 = vrot.slane %v4998_v28, 4  ;;  %v5022_v13 = vor.u32 %v5021_v2, %v5018_v39  ;;  %v5426_v20 = vrot.slane %v9457_v62, 5  ;;  %v5429_v50 = vrot.slane %v9459_v29, 5  ;;  %v5362_v28 = vld [vmem:[#allocation2 + $0x30] sm:$0xe] }
 0x17f   : > { %10717 = vst [vmem:[#allocation40_spill] sm:$0xff] %v9768_v58  ;;  %7605 = vmatprep.mubr.bf16.mxu0 %v7943_v40  ;;  %v5031_v58 = vrot.slane %v5029_v59, 4  ;;  %7650 = vmatmul.mubr.bf16.gmra.mxu1 %v6651_v60  ;;  %v5014_v40 = vsel %vm8092_vm4, %v5009_v38, %v5013_v47  ;;  %v5037_v8 = vrot.slane %v5035_v41, 5  ;;  %v6663_v59 = vrot.slane %v5361_v51, 9 }
 0x180   : > { %v7368_v30 = vpop.f32.mrf.mxu1  ;;  %v5004_v52 = vsel %vm8092_vm4, %v4999_v45, %v5003_v22  ;;  %v5023_v49 = vrot.slane %v5022_v13, 4  ;;  %v5427_v39 = vsel %vm8570_vm14, %v6662_v33, %v5426_v20  ;;  %v5428_v2 = vrot.slane %v5426_v20, 4  ;;  %v5363_v20 = vld [vmem:[#allocation2 + $0x3c] sm:$0xe] }
 0x181   : > { %v6652_v37 = vcombine.low %v5004_v52, %v5014_v40  ;;  %v5032_v1 = vor.u32 %v5031_v58, %v5027_v18  ;;  %v10718_v22 = vrot.slane %v9470_v3, 5  ;;  %v6664_v38 = vrot.slane %v5362_v28, 9 }
 0x182   : > { %v9783_v42 = vpop.f32.mrf.mxu1  ;;  %v5028_v62 = vsel %vm8092_vm4, %v5023_v49, %v5027_v18  ;;  %v5440_v58 = vrot.slane %v9503_v56, 5  ;;  %v5430_v51 = vsel %vm8570_vm14, %v5428_v2, %v5429_v50  ;;  %v10720_v52 = vrot.slane %v9479_v43, 5  ;;  %v5364_v56 = vld [vmem:[#allocation2 + $0x48] sm:$0xe] }
 0x183   : > { %v5435_v60 = vrot.slane %v10718_v22, 4  ;;  %7653 = vmatprep.mubr.bf16.mxu1 %v6652_v37  ;;  %v5033_v29 = vrot.slane %v5032_v1, 4  ;;  %v10719_v33 = vmov %v10718_v22  ;;  %v6678_v3 = vcombine.low %v5427_v39, %v5430_v51  ;;  %v5365_v37 = vld [vmem:[#allocation2 + $0x54] sm:$0xe] }
 0x184   : > { %v9791_v47 = vpop.f32.mrf.mxu1  ;;  %v5434_v13 = vsel %vm8570_vm14, %v6663_v59, %v10719_v33  ;;  %v5441_v43 = vsel %vm8570_vm14, %v6664_v38, %v5440_v58  ;;  %v5442_v2 = vrot.slane %v5440_v58, 4  ;;  %v5443_v59 = vrot.slane %v9510_v44, 5 }
 0x185   : > { %v7319_v45 = vpop.f32.mrf.mxu0  ;;  %v5437_v18 = vsel %vm8570_vm14, %v5435_v60, %v10720_v52  ;;  %v5038_v50 = vsel %vm8092_vm4, %v5033_v29, %v5037_v8  ;;  %v6665_v60 = vrot.slane %v5363_v20, 9  ;;  %v5366_v8 = vld [vmem:[#allocation2 + $0x60] sm:$0xe]  ;;  %v5457_v38 = vrot.slane %v9555_v12, 5 }
 0x186   : > { %v9796_v41 = vadd.f32 %v7367_v0, %v7319_v45  ;;  %7606 = vmatmul.mubr.bf16.gmra.mxu0 %v7945_v16  ;;  %v9808_v40 = vpop.f32.mrf.mxu1  ;;  %v5450_v0 = vrot.slane %v9530_v36, 5  ;;  %v6679_v28 = vcombine.low %v5434_v13, %v5437_v18  ;;  %v6653_v49 = vcombine.low %v5028_v62, %v5038_v50  ;;  %v5367_v13 = vld [vmem:[#allocation2 + $0x6c] sm:$0xe] }
 0x187   : > { %v9811_v16 = vpop.f32.mrf.mxu0  ;;  %7673 = vmatprep.mubr.bf16.mxu0 %v6678_v3  ;;  %v5447_v36 = vrot.slane %v9523_v19, 5  ;;  %v6666_v45 = vrot.slane %v5364_v56, 9  ;;  %v5444_v62 = vsel %vm8570_vm14, %v5442_v2, %v5443_v59  ;;  %v6667_v44 = vrot.slane %v5365_v37, 9 }
 0x188   : > { %v7436_v1 = vpop.f32.mrf.mxu1  ;;  %7654 = vmatmul.mubr.bf16.gmra.mxu1 %v6653_v49  ;;  %v5464_v58 = vrot.slane %v9577_v32, 5  ;;  %v6680_v19 = vcombine.low %v5441_v43, %v5444_v62  ;;  %v5456_v52 = vrot.slane %v5454_v34, 4  ;;  %v5461_v18 = vrot.slane %v9565_v11, 5 }
 0x189   : > { %v7320_v22 = vpop.f32.mrf.mxu0  ;;  %v5449_v33 = vrot.slane %v5447_v36, 4  ;;  %v6668_v20 = vrot.slane %v5366_v8, 9  ;;  %v5448_v12 = vsel %vm8570_vm14, %v6665_v60, %v5447_v36  ;;  %v5468_v50 = vrot.slane %v9598_v35, 5 }
 0x18a   : > { %v9820_v39 = vadd.f32 %v7368_v30, %v7320_v22  ;;  %v9824_v29 = vpop.f32.mrf.mxu1  ;;  %v5455_v30 = vsel %vm8570_vm14, %v6666_v45, %v5454_v34  ;;  %v5471_v3 = vrot.slane %v9600_v14, 5  ;;  %v5458_v11 = vsel %vm8570_vm14, %v5456_v52, %v5457_v38 }
 0x18b   : > { %v9828_v51 = vpop.f32.mrf.mxu0  ;;  %v5451_v32 = vsel %vm8570_vm14, %v5449_v33, %v5450_v0  ;;  %v9846_v43 = vsel %vm8570_vm14, %v6667_v44, %v5461_v18  ;;  %v6669_v2 = vrot.slane %v5367_v13, 9  ;;  %v6682_v0 = vcombine.low %v5455_v30, %v5458_v11  ;;  %v5369_v44 = vld [vmem:[#allocation2 + $0x84] sm:$0xe] }
 0x18c   : > { %v7439_v26 = vpop.f32.mrf.mxu1  ;;  %v5463_v22 = vrot.slane %v5461_v18, 4  ;;  %v9850_v35 = vsel %vm8570_vm14, %v6668_v20, %v5468_v50  ;;  %v1987_v14 = vadd.f32 %v9256_v61, %v9285_v17  ;;  %v5475_v45 = vrot.slane %v9622_v24, 5 }
 0x18d   : > { %v7387_v56 = vpop.f32.mrf.mxu0  ;;  %v5478_v34 = vrot.slane %v9626_v23, 5  ;;  %v6681_v17 = vcombine.low %v5448_v12, %v5451_v32  ;;  %v6671_v30 = vrot.slane %v5369_v44, 9  ;;  %v5489_v52 = vrot.slane %v9669_v54, 5  ;;  %v5371_v12 = vld [vmem:[#allocation2 + $0x9c] sm:$0xe] }
 0x18e   : > { %v2556_v37 = vadd.f32 %v7387_v56, %v9455_v57  ;;  %7674 = vmatmul.mubr.bf16.vlgmr.msra.gmra.mxu0 %v6679_v28  ;;  %v9840_v49 = vpop.f32.mrf.mxu1  ;;  %v5470_v57 = vrot.slane %v5468_v50, 4  ;;  %v5465_v62 = vsel %vm8570_vm14, %v5463_v22, %v5464_v58  ;;  %v9874_v23 = vsel %vm8570_vm14, %v6669_v2, %v5475_v45 }
 0x18f   : > { %v2427_v59 = vpop.f32.mrf.mxu0  ;;  %7677 = vmatprep.mubr.bf16.mxu0 %v6680_v19  ;;  %v5477_v24 = vrot.slane %v5475_v45, 4  ;;  %v5492_v56 = vrot.slane %v9671_v15, 5  ;;  %v5482_v54 = vrot.slane %v9646_v25, 5  ;;  %v9891_v11 = vsel %vm8570_vm14, %v6671_v30, %v5489_v52 }
 0x190   : > { %v9855_v28 = vadd.f32 %v2427_v59, %v9477_v27  ;;  %v9858_v60 = vadd.f32 %v9791_v47, %v2556_v37  ;;  %v7440_v36 = vpop.f32.mrf.mxu1  ;;  %v5472_v38 = vsel %vm8570_vm14, %v5470_v57, %v5471_v3  ;;  %v6683_v47 = vcombine.low %v9846_v43, %v5465_v62  ;;  %v5368_v59 = vld [vmem:[#allocation2 + $0x78] sm:$0xe] }
 0x191   : > { %v7388_v8 = vpop.f32.mrf.mxu0  ;;  %v6684_v19 = vcombine.low %v9850_v35, %v5472_v38  ;;  %v5479_v20 = vsel %vm8570_vm14, %v5477_v24, %v5478_v34  ;;  %v5491_v15 = vrot.slane %v5489_v52, 4  ;;  %v6673_v22 = vrot.slane %v5371_v12, 9  ;;  %v10723_v12 = vld [vmem:[#allocation12_spill] sm:$0xff] }
 0x192   : > { %v2557_v61 = vadd.f32 %v7388_v8, %v1987_v14  ;;  %v9866_v27 = vpop.f32.mrf.mxu1  ;;  %v6685_v3 = vcombine.low %v9874_v23, %v5479_v20  ;;  %v5503_v35 = vrot.slane %v9704_v10, 5  ;;  %v5506_v25 = vrot.slane %v9708_v21, 5  ;;  %v10744_v23 = vld [vmem:[#allocation21_spill] sm:$0xff] }
 0x193   : > { %v9870_v33 = vpop.f32.mrf.mxu0  ;;  %v6670_v14 = vrot.slane %v5368_v59, 9  ;;  %v5484_v62 = vrot.slane %v5482_v54, 4  ;;  %v5485_v21 = vrot.slane %v9648_v7, 5 }
 0x194   : > { %v9876_v58 = vadd.f32 %v7436_v1, %v2557_v61  ;;  %v7443_v13 = vpop.f32.mrf.mxu1  ;;  %v2003_v1 = vadd.f32 %v9374_v55, %v9405_v5  ;;  %v9901_v5 = vsel %vm8570_vm14, %v5491_v15, %v5492_v56  ;;  %v9912_v45 = vsel %vm8570_vm14, %v6673_v22, %v5503_v35  ;;  %v10725_v15 = vld [vmem:[#allocation25_spill] sm:$0xff] }
 0x195   : > { %v7391_v18 = vpop.f32.mrf.mxu0  ;;  %v5505_v10 = vrot.slane %v5503_v35, 4  ;;  %v5499_v59 = vrot.slane %v10725_v15, 5  ;;  %v10726_v35 = vld [vmem:[#allocation13_spill] sm:$0xff] }
 0x196   : > { %v2560_v32 = vadd.f32 %v7391_v18, %v9501_v6  ;;  %7678 = vmatmul.mubr.bf16.gmra.mxu0 %v6681_v17  ;;  %v9883_v50 = vpop.f32.mrf.mxu1  ;;  %v10722_v18 = vld [vmem:[#allocation23_spill] sm:$0xff] }
 0x197   : > { %v2443_v37 = vpop.f32.mrf.mxu0  ;;  %7681 = vmatprep.mubr.bf16.mxu0 %v6682_v0  ;;  %v9919_v44 = vsel %vm8570_vm14, %v5505_v10, %v5506_v25  ;;  %v5496_v20 = vrot.slane %v10722_v18, 5  ;;  %v10732_v18 = vld [vmem:[#allocation17_spill] sm:$0xff] }
 0x198   : > { %v9894_v43 = vadd.f32 %v2443_v37, %v9534_v53  ;;  %v9896_v6 = vadd.f32 %v7439_v26, %v2560_v32  ;;  %v7444_v2 = vpop.f32.mrf.mxu1  ;;  %v6687_v53 = vcombine.low %v9891_v11, %v9901_v5 }
 0x199   : > { %v7392_v55 = vpop.f32.mrf.mxu0  ;;  %v5498_v11 = vrot.slane %v5496_v20, 4 }
 0x19a   : > { %v2561_v0 = vadd.f32 %v7392_v55, %v2003_v1  ;;  %v9904_v57 = vpop.f32.mrf.mxu1 }
 0x19b   : > { %v9908_v26 = vpop.f32.mrf.mxu0 }
 0x19c   : > { %v9914_v34 = vadd.f32 %v7440_v36, %v2561_v0  ;;  %v7447_v8 = vpop.f32.mrf.mxu1  ;;  %v5483_v36 = vsel %vm8570_vm14, %v6670_v14, %v5482_v54  ;;  %v10727_v14 = vld [vmem:[#allocation15_spill] sm:$0xff] }
 0x19d   : > { %v7395_v38 = vpop.f32.mrf.mxu0 }
 0x19e   : > { %v2564_v61 = vadd.f32 %v7395_v38, %v9553_v4  ;;  %7682 = vmatmul.mubr.bf16.gmra.mxu0 %v6683_v47  ;;  %v9922_v17 = vpop.f32.mrf.mxu1  ;;  %v5486_v4 = vsel %vm8570_vm14, %v5484_v62, %v5485_v21  ;;  %v5370_v47 = vld [vmem:[#allocation2 + $0x90] sm:$0xe]  ;;  %v5500_v21 = vsel %vm8570_vm14, %v5498_v11, %v5499_v59  ;;  %v5372_v38 = vld [vmem:[#allocation2 + $0xa8] sm:$0xe] }
 0x19f   : > { %10721 = vst [vmem:[#allocation41_spill] sm:$0xff] %v9922_v17  ;;  %v2459_v24 = vpop.f32.mrf.mxu0  ;;  %7685 = vmatprep.mubr.bf16.mxu0 %v6684_v19  ;;  %v6686_v37 = vcombine.low %v5483_v36, %v5486_v4  ;;  %v6672_v54 = vrot.slane %v5370_v47, 9  ;;  %v10731_v4 = vld [vmem:[#allocation9_spill] sm:$0xff]  ;;  %v10735_v11 = vld [vmem:[#allocation30_spill] sm:$0xff] }
 0x1a0   : > { %v9929_v7 = vadd.f32 %v2459_v24, %v9575_v31  ;;  %v9931_v30 = vadd.f32 %v7443_v13, %v2564_v61  ;;  %v7448_v52 = vpop.f32.mrf.mxu1  ;;  %v10729_v61 = vld [vmem:[#allocation29_spill] sm:$0xff]  ;;  %v5513_v59 = vrot.slane %v10735_v11, 5  ;;  %v5374_v11 = vld [vmem:[#allocation2 + $0xc0] sm:$0xe] }
 0x1a1   : > { %v7396_v56 = vpop.f32.mrf.mxu0  ;;  %v5497_v0 = vsel %vm8570_vm14, %v6672_v54, %v5496_v20  ;;  %v5510_v24 = vrot.slane %v10729_v61, 5  ;;  %v10738_v61 = vld [vmem:[#allocation19_spill] sm:$0xff] }
 0x1a2   : > { %v2565_v32 = vadd.f32 %v7396_v56, %v10723_v12  ;;  %v9937_v1 = vpop.f32.mrf.mxu1 }
 0x1a3   : > { %10724 = vst [vmem:[#allocation23_spill] sm:$0xff] %v9937_v1  ;;  %v9939_v19 = vpop.f32.mrf.mxu0  ;;  %v6676_v1 = vrot.slane %v5374_v11, 9 }
 0x1a4   : > { %v9941_v31 = vadd.f32 %v7444_v2, %v2565_v32  ;;  %v7451_v13 = vpop.f32.mrf.mxu1  ;;  %v6688_v32 = vcombine.low %v5497_v0, %v5500_v21  ;;  %v5373_v21 = vld [vmem:[#allocation2 + $0xb4] sm:$0xe] }
 0x1a5   : > { %v7399_v22 = vpop.f32.mrf.mxu0 }
 0x1a6   : > { %v2568_v55 = vadd.f32 %v7399_v22, %v10726_v35  ;;  %7686 = vmatmul.mubr.bf16.gmra.mxu0 %v6685_v3  ;;  %v2876_v5 = vpop.f32.mrf.mxu1  ;;  %v10730_v3 = vld [vmem:[#allocation10_spill] sm:$0xff]  ;;  %v5512_v22 = vrot.slane %v5510_v24, 4 }
 0x1a7   : > { %v2475_v25 = vpop.f32.mrf.mxu0  ;;  %7689 = vmatprep.mubr.bf16.mxu0 %v6686_v37  ;;  %v2027_v47 = vadd.f32 %v10731_v4, %v10730_v3  ;;  %v6674_v37 = vrot.slane %v5372_v38, 9 }
 0x1a8   : > { %v9948_v10 = vadd.f32 %v2475_v25, %v10727_v14  ;;  %v9950_v62 = vadd.f32 %v7447_v8, %v2568_v55  ;;  %v7452_v2 = vpop.f32.mrf.mxu1  ;;  %v10736_v55 = vld [vmem:[#allocation14_spill] sm:$0xff]  ;;  %v10737_v25 = vld [vmem:[#allocation11_spill] sm:$0xff] }
 0x1a9   : > { %v7400_v36 = vpop.f32.mrf.mxu0  ;;  %v2040_v14 = vadd.f32 %v10737_v25, %v10736_v55  ;;  %v5511_v0 = vsel %vm8570_vm14, %v6674_v37, %v5510_v24  ;;  %v10741_v55 = vld [vmem:[#allocation36_spill] sm:$0xff]  ;;  %v10742_v25 = vld [vmem:[#allocation18_spill] sm:$0xff] }
 0x1aa   : > { %10728 = vst [vmem:[#allocation12_spill] sm:$0xff] %v9950_v62  ;;  %v2569_v56 = vadd.f32 %v7400_v36, %v10732_v18  ;;  %v2879_v12 = vpop.f32.mrf.mxu1  ;;  %v10746_v62 = vld [vmem:[#allocation39_spill] sm:$0xff] }
 0x1ab   : > { %v2478_v20 = vpop.f32.mrf.mxu0  ;;  %v5527_v17 = vrot.slane %v10746_v62, 5 }
 0x1ac   : > { %v9958_v54 = vadd.f32 %v2478_v20, %v2027_v47  ;;  %v9960_v8 = vadd.f32 %v7448_v52, %v2569_v56  ;;  %v7455_v15 = vpop.f32.mrf.mxu1  ;;  %v10739_v52 = vld [vmem:[#allocation34_spill] sm:$0xff]  ;;  %v5514_v20 = vsel %vm8570_vm14, %v5512_v22, %v5513_v59 }
 0x1ad   : > { %v7403_v35 = vpop.f32.mrf.mxu0  ;;  %v5517_v38 = vrot.slane %v10739_v52, 5  ;;  %v6675_v52 = vrot.slane %v5373_v21, 9 }
 0x1ae   : > { %10733 = vst [vmem:[#allocation25_spill] sm:$0xff] %v9958_v54  ;;  %10734 = vst [vmem:[#allocation13_spill] sm:$0xff] %v9960_v8  ;;  %v2572_v3 = vadd.f32 %v7403_v35, %v10738_v61  ;;  %7690 = vmatmul.mubr.bf16.gmra.mxu0 %v6687_v53  ;;  %v2892_v36 = vpop.f32.mrf.mxu1  ;;  %v5524_v35 = vrot.slane %v10741_v55, 5  ;;  %v10743_v61 = vld [vmem:[#allocation16_spill] sm:$0xff] }
 0x1af   : > { %v2491_v4 = vpop.f32.mrf.mxu0  ;;  %7693 = vmatprep.mubr.bf16.mxu0 %v6688_v32  ;;  %v2043_v32 = vadd.f32 %v10743_v61, %v10742_v25  ;;  %v10747_v61 = vld [vmem:[#allocation22_spill] sm:$0xff] }
 0x1b0   : > { %v2570_v47 = vadd.f32 %v2491_v4, %v2040_v14  ;;  %v9969_v18 = vadd.f32 %v7451_v13, %v2572_v3  ;;  %v7456_v56 = vpop.f32.mrf.mxu1  ;;  %v6690_v13 = vcombine.low %v5511_v0, %v5514_v20  ;;  %v5519_v3 = vrot.slane %v5517_v38, 4  ;;  %v10745_v4 = vld [vmem:[#allocation35_spill] sm:$0xff] }
 0x1b1   : > { %v7404_v53 = vpop.f32.mrf.mxu0  ;;  %v5526_v54 = vrot.slane %v5524_v35, 4  ;;  %v10750_v0 = vcombine.low %v9912_v45, %v9919_v44  ;;  %v5375_v44 = vld [vmem:[#allocation2 + $0xcc] sm:$0xe] }
 0x1b2   : > { %10740 = vst [vmem:[#allocation15_spill] sm:$0xff] %v9969_v18  ;;  %v2573_v8 = vadd.f32 %v7404_v53, %v10744_v23  ;;  %v9977_v24 = vadd.f32 %v2876_v5, %v2570_v47  ;;  %v2895_v37 = vpop.f32.mrf.mxu1  ;;  %v5520_v18 = vrot.slane %v10745_v4, 5  ;;  %v10748_v23 = vld [vmem:[#allocation20_spill] sm:$0xff]  ;;  %v5525_v4 = vsel %vm8570_vm14, %v6676_v1, %v5524_v35 }
 0x1b3   : > { %v2494_v14 = vpop.f32.mrf.mxu0  ;;  %v2056_v5 = vadd.f32 %v10748_v23, %v10747_v61  ;;  %v10749_v47 = vld [vmem:[#allocation24_spill] sm:$0xff]  ;;  %v5528_v45 = vsel %vm8570_vm14, %v5526_v54, %v5527_v17  ;;  %v5534_v1 = vrot.slane %v9770_v9, 5 }
 0x1b4   : > { %v2571_v22 = vadd.f32 %v2494_v14, %v2043_v32  ;;  %v9980_v59 = vadd.f32 %v7452_v2, %v2573_v8  ;;  %v7459_v55 = vpop.f32.mrf.mxu1  ;;  %v5518_v2 = vsel %vm8570_vm14, %v6675_v52, %v5517_v38  ;;  %v5521_v62 = vsel %vm8570_vm14, %v5519_v3, %v5520_v18  ;;  %v10753_v52 = vld [vmem:[#allocation28_spill] sm:$0xff] }
 0x1b5   : > { %v7407_v25 = vpop.f32.mrf.mxu0  ;;  %v5531_v8 = vrot.slane %v9763_v48, 5  ;;  %v6691_v48 = vcombine.low %v5518_v2, %v5521_v62  ;;  %v6692_v23 = vcombine.low %v5525_v4, %v5528_v45 }
 0x1b6   : > { %v2576_v53 = vadd.f32 %v7407_v25, %v10749_v47  ;;  %v9986_v21 = vadd.f32 %v2879_v12, %v2571_v22  ;;  %7694 = vmatmul.mubr.bf16.gmra.mxu0 %v10750_v0  ;;  %v2908_v20 = vpop.f32.mrf.mxu1  ;;  %v10751_v22 = vld [vmem:[#allocation27_spill] sm:$0xff]  ;;  %v10752_v25 = vld [vmem:[#allocation26_spill] sm:$0xff]  ;;  %v10754_v0 = vld [vmem:[#allocation33_spill] sm:$0xff] }
 0x1b7   : > { %v2507_v11 = vpop.f32.mrf.mxu0  ;;  %7697 = vmatprep.mubr.bf16.mxu0 %v6690_v13  ;;  %v2059_v38 = vadd.f32 %v10752_v25, %v10751_v22  ;;  %v5533_v47 = vrot.slane %v5531_v8, 4  ;;  %v10756_v25 = vld [vmem:[#allocation32_spill] sm:$0xff] }
 0x1b8   : > { %v2574_v32 = vadd.f32 %v2507_v11, %v2056_v5  ;;  %v9996_v14 = vadd.f32 %v7455_v15, %v2576_v53  ;;  %v7460_v12 = vpop.f32.mrf.mxu1  ;;  %v6677_v5 = vrot.slane %v5375_v44, 9  ;;  %v10755_v11 = vld [vmem:[#allocation31_spill] sm:$0xff] }
 0x1b9   : > { %v7408_v13 = vpop.f32.mrf.mxu0  ;;  %v2072_v22 = vadd.f32 %v10755_v11, %v10754_v0  ;;  %v5535_v9 = vsel %vm8570_vm14, %v5533_v47, %v5534_v1 }
 0x1ba   : > { %v2577_v61 = vadd.f32 %v7408_v13, %v10753_v52  ;;  %v10005_v18 = vadd.f32 %v2892_v36, %v2574_v32  ;;  %v2911_v3 = vpop.f32.mrf.mxu1  ;;  %v5532_v32 = vsel %vm8570_vm14, %v6677_v5, %v5531_v8 }
 0x1bb   : > { %v2510_v15 = vpop.f32.mrf.mxu0 }
 0x1bc   : > { %v2575_v35 = vadd.f32 %v2510_v15, %v2059_v38  ;;  %v10008_v53 = vadd.f32 %v7456_v56, %v2577_v61  ;;  %v7463_v17 = vpop.f32.mrf.mxu1  ;;  %v10757_v38 = vld [vmem:[#allocation38_spill] sm:$0xff]  ;;  %v6693_v15 = vcombine.low %v5532_v32, %v5535_v9  ;;  %v10761_v9 = vld [vmem:[#allocation3_spill] sm:$0xff] }
 0x1bd   : > { %v2075_v52 = vadd.f32 %v10757_v38, %v9776_v46 }
 0x1be   : > { %v7411_v54 = vpop.f32.mrf.mxu0  ;;  %v10013_v36 = vadd.f32 %v2895_v37, %v2575_v35  ;;  %7698 = vmatmul.mubr.bf16.gmra.mxu0 %v6691_v48  ;;  %v2924_v2 = vpop.f32.mrf.mxu1  ;;  %v10758_v37 = vld [vmem:[#allocation37_spill] sm:$0xff] }
 0x1bf   : > { %v2580_v13 = vadd.f32 %v7411_v54, %v10756_v25  ;;  %7701 = vmatprep.mubr.bf16.mxu0 %v6692_v23 }
 0x1c0   : > { %v2523_v62 = vpop.f32.mrf.mxu0  ;;  %v7464_v45 = vpop.f32.mrf.mxu1 }
 0x1c1   : > { %v2578_v56 = vadd.f32 %v2523_v62, %v2072_v22  ;;  %v10019_v4 = vadd.f32 %v7459_v55, %v2580_v13  ;;  %v10759_v55 = vld [vmem:[#allocation40_spill] sm:$0xff] }
 0x1c2   : > { %v7412_v44 = vpop.f32.mrf.mxu0  ;;  %v2927_v23 = vpop.f32.mrf.mxu1  ;;  %v2088_v47 = vadd.f32 %v10759_v55, %v9811_v16 }
 0x1c3   : > { %v2581_v61 = vadd.f32 %v7412_v44, %v10758_v37  ;;  %v10024_v48 = vadd.f32 %v2908_v20, %v2578_v56  ;;  %v2939_v37 = vadd.f32 %v9808_v40, %v9855_v28 }
 0x1c4   : > { %v2526_v35 = vpop.f32.mrf.mxu0  ;;  %v7531_v63 = vpop.f32.mrf.mxu1 }
 0x1c5   : > { %v2579_v54 = vadd.f32 %v2526_v35, %v2075_v52  ;;  %v10026_v8 = vadd.f32 %v7460_v12, %v2581_v61  ;;  %v2091_v12 = vadd.f32 %v9783_v42, %v9828_v51 }
 0x1c6   : > { %v7415_v5 = vpop.f32.mrf.mxu0  ;;  %7702 = vmatmul.mubr.bf16.gmra.mxu0 %v6693_v15  ;;  %v4062_v46 = vpop.f32.mrf.mxu1 }
 0x1c7   : > { %v2584_v1 = vadd.f32 %v7415_v5, %v9796_v41  ;;  %v10031_v0 = vadd.f32 %v2911_v3, %v2579_v54  ;;  %v10760_v3 = vld [vmem:[#allocation4_spill] sm:$0xff] }
 0x1c8   : > { %v2539_v11 = vpop.f32.mrf.mxu0  ;;  %v10035_v25 = vpop.f32.mrf.mxu1  ;;  %v1979_v56 = vadd.f32 %v10761_v9, %v10760_v3 }
 0x1c9   : > { %v2582_v20 = vadd.f32 %v2539_v11, %v2088_v47  ;;  %v10033_v22 = vadd.f32 %v7463_v17, %v2584_v1 }
 0x1ca   : > { %v7416_v13 = vpop.f32.mrf.mxu0  ;;  %v10042_v16 = vpop.f32.mrf.mxu1  ;;  %v2555_v42 = vadd.f32 %v9870_v33, %v1979_v56 }
 0x1cb   : > { %v2585_v62 = vadd.f32 %v7416_v13, %v9820_v39  ;;  %v10040_v32 = vadd.f32 %v2924_v2, %v2582_v20  ;;  %v2943_v20 = vadd.f32 %v9840_v49, %v9894_v43 }
 0x1cc   : > { %v2542_v41 = vpop.f32.mrf.mxu0  ;;  %v7535_v17 = vpop.f32.mrf.mxu1  ;;  %v2940_v5 = vadd.f32 %v9824_v29, %v2555_v42 }
 0x1cd   : > { %v2583_v44 = vadd.f32 %v2542_v41, %v2091_v12  ;;  %v10046_v38 = vadd.f32 %v7464_v45, %v2585_v62 }
 0x1ce   : > { %v7483_v52 = vpop.f32.mrf.mxu0  ;;  %v10054_v2 = vpop.f32.mrf.mxu1 }
 0x1cf   : > { %v10051_v51 = vadd.f32 %v2927_v23, %v2583_v44  ;;  %v3694_v39 = vadd.f32 %v7483_v52, %v9858_v60  ;;  %v10762_v60 = vld [vmem:[#allocation6_spill] sm:$0xff]  ;;  %v10763_v23 = vld [vmem:[#allocation5_spill] sm:$0xff] }
 0x1d0   : > { %v3565_v61 = vpop.f32.mrf.mxu0  ;;  %v10058_v54 = vpop.f32.mrf.mxu1  ;;  %v1995_v47 = vadd.f32 %v10763_v23, %v10762_v60 }
 0x1d1   : > { %v3692_v15 = vadd.f32 %v3565_v61, %v2939_v37  ;;  %v10056_v35 = vadd.f32 %v7531_v63, %v3694_v39 }
 0x1d2   : > { %v7484_v45 = vpop.f32.mrf.mxu0  ;;  %v10066_v28 = vpop.f32.mrf.mxu1  ;;  %v2559_v29 = vadd.f32 %v9908_v26, %v1995_v47  ;;  %v10764_v26 = vld [vmem:[#allocation8_spill] sm:$0xff] }
 0x1d3   : > { %v10062_v55 = vadd.f32 %v7484_v45, %v9876_v58  ;;  %v10064_v40 = vadd.f32 %v4062_v46, %v3692_v15 }
 0x1d4   : > { %v3568_v33 = vpop.f32.mrf.mxu0  ;;  %v7539_v63 = vpop.f32.mrf.mxu1  ;;  %v2944_v9 = vadd.f32 %v9866_v27, %v2559_v29 }
 0x1d5   : > { %v10070_v1 = vadd.f32 %v3568_v33, %v2940_v5 }
 0x1d6   : > { %v7487_v11 = vpop.f32.mrf.mxu0  ;;  %v10076_v13 = vpop.f32.mrf.mxu1 }
 0x1d7   : > { %v3698_v58 = vadd.f32 %v7487_v11, %v9896_v6  ;;  %v10765_v6 = vld [vmem:[#allocation7_spill] sm:$0xff]  ;;  %v10766_v11 = vld [vmem:[#allocation41_spill] sm:$0xff] }
 0x1d8   : > { %v3581_v46 = vpop.f32.mrf.mxu0  ;;  %v10082_v41 = vpop.f32.mrf.mxu1  ;;  %v2011_v44 = vadd.f32 %v10765_v6, %v10764_v26  ;;  %v10771_v26 = vld [vmem:[#allocation23_spill] sm:$0xff] }
 0x1d9   : > { %v10078_v12 = vadd.f32 %v3581_v46, %v2943_v20  ;;  %v10080_v62 = vadd.f32 %v7535_v17, %v3698_v58  ;;  %v2947_v17 = vadd.f32 %v9883_v50, %v9929_v7  ;;  %v2951_v20 = vadd.f32 %v10766_v11, %v9948_v10 }
 0x1da   : > { %v7488_v3 = vpop.f32.mrf.mxu0  ;;  %v10088_v49 = vpop.f32.mrf.mxu1  ;;  %v2563_v39 = vadd.f32 %v9939_v19, %v2011_v44  ;;  %v10772_v44 = vld [vmem:[#allocation13_spill] sm:$0xff] }
 0x1db   : > { %v10086_v56 = vadd.f32 %v7488_v3, %v9914_v34 }
 0x1dc   : > { %v3584_v43 = vpop.f32.mrf.mxu0  ;;  %v7543_v37 = vpop.f32.mrf.mxu1  ;;  %v2948_v60 = vadd.f32 %v9904_v57, %v2563_v39 }
 0x1dd   : > { %v10092_v52 = vadd.f32 %v3584_v43, %v2944_v9  ;;  %v10770_v43 = vld [vmem:[#allocation25_spill] sm:$0xff] }
 0x1de   : > { %v7491_v42 = vpop.f32.mrf.mxu0  ;;  %v10098_v61 = vpop.f32.mrf.mxu1  ;;  %v2952_v6 = vadd.f32 %v10771_v26, %v10770_v43 }
 0x1df   : > { %v3702_v27 = vadd.f32 %v7491_v42, %v9931_v30 }
 0x1e0   : > { %v3597_v34 = vpop.f32.mrf.mxu0  ;;  %v10104_v5 = vpop.f32.mrf.mxu1 }
 0x1e1   : > { %v10100_v15 = vadd.f32 %v3597_v34, %v2947_v17  ;;  %v10102_v45 = vadd.f32 %v7539_v63, %v3702_v27  ;;  %v10767_v63 = vld [vmem:[#allocation12_spill] sm:$0xff] }
 0x1e2   : > { %v7492_v33 = vpop.f32.mrf.mxu0  ;;  %v10110_v50 = vpop.f32.mrf.mxu1 }
 0x1e3   : > { %v10108_v23 = vadd.f32 %v7492_v33, %v9941_v31  ;;  %v10774_v33 = vld [vmem:[#allocation15_spill] sm:$0xff] }
 0x1e4   : > { %v3600_v7 = vpop.f32.mrf.mxu0  ;;  %v7547_v30 = vpop.f32.mrf.mxu1 }
 0x1e5   : > { %v10112_v19 = vadd.f32 %v3600_v7, %v2948_v60 }
 0x1e6   : > { %v7495_v47 = vpop.f32.mrf.mxu0  ;;  %v10117_v58 = vpop.f32.mrf.mxu1 }
 0x1e7   : > { %v3706_v29 = vadd.f32 %v7495_v47, %v10767_v63  ;;  %10768 = vst [vmem:[#allocation29_spill] sm:$0xff] %v10117_v58 }
 0x1e8   : > { %v3613_v46 = vpop.f32.mrf.mxu0  ;;  %v10123_v31 = vpop.f32.mrf.mxu1 }
 0x1e9   : > { %v10119_v3 = vadd.f32 %v3613_v46, %v2951_v20  ;;  %v10121_v57 = vadd.f32 %v7543_v37, %v3706_v29  ;;  %10769 = vst [vmem:[#allocation10_spill] sm:$0xff] %v10123_v31 }
 0x1ea   : > { %v7496_v9 = vpop.f32.mrf.mxu0  ;;  %v10130_v17 = vpop.f32.mrf.mxu1 }
 0x1eb   : > { %v10128_v42 = vadd.f32 %v7496_v9, %v10772_v44  ;;  %10773 = vst [vmem:[#allocation9_spill] sm:$0xff] %v10130_v17 }
 0x1ec   : > { %v3616_v10 = vpop.f32.mrf.mxu0  ;;  %v7551_v27 = vpop.f32.mrf.mxu1 }
 0x1ed   : > { %v10132_v39 = vadd.f32 %v3616_v10, %v2952_v6 }
 0x1ee   : > { %v7499_v34 = vpop.f32.mrf.mxu0  ;;  %v10135_v37 = vpop.f32.mrf.mxu1 }
 0x1ef   : > { %v3710_v60 = vadd.f32 %v7499_v34, %v10774_v33  ;;  %10775 = vst [vmem:[#allocation17_spill] sm:$0xff] %v10135_v37 }
 0x1f0   : > { %v3629_v7 = vpop.f32.mrf.mxu0  ;;  %v10142_v20 = vpop.f32.mrf.mxu1 }
 0x1f1   : > { %v10138_v47 = vadd.f32 %v3629_v7, %v9977_v24  ;;  %v10140_v11 = vadd.f32 %v7547_v30, %v3710_v60  ;;  %10776 = vst [vmem:[#allocation30_spill] sm:$0xff] %v10142_v20 }
 0x1f2   : > { %v7500_v63 = vpop.f32.mrf.mxu0  ;;  %v10147_v46 = vpop.f32.mrf.mxu1 }
 0x1f3   : > { %v10145_v29 = vadd.f32 %v7500_v63, %v9980_v59  ;;  %10778 = vst [vmem:[#allocation11_spill] sm:$0xff] %v10147_v46 }
 0x1f4   : > { %v3632_v9 = vpop.f32.mrf.mxu0  ;;  %v7555_v26 = vpop.f32.mrf.mxu1 }
 0x1f5   : > { %10777 = vst [vmem:[#allocation14_spill] sm:$0xff] %v10145_v29  ;;  %v10150_v43 = vadd.f32 %v3632_v9, %v9986_v21 }
 0x1f6   : > { %v7503_v6 = vpop.f32.mrf.mxu0  ;;  %v10158_v34 = vpop.f32.mrf.mxu1 }
 0x1f7   : > { %10779 = vst [vmem:[#allocation19_spill] sm:$0xff] %v10150_v43  ;;  %v3714_v44 = vadd.f32 %v7503_v6, %v9996_v14  ;;  %10781 = vst [vmem:[#allocation36_spill] sm:$0xff] %v10158_v34 }
 0x1f8   : > { %v3645_v24 = vpop.f32.mrf.mxu0  ;;  %v10166_v7 = vpop.f32.mrf.mxu1 }
 0x1f9   : > { %v10154_v30 = vadd.f32 %v3645_v24, %v10005_v18  ;;  %v10156_v10 = vadd.f32 %v7551_v27, %v3714_v44  ;;  %10784 = vst [vmem:[#allocation21_spill] sm:$0xff] %v10166_v7 }
 0x1fa   : > { %v7504_v59 = vpop.f32.mrf.mxu0  ;;  %v10174_v6 = vpop.f32.mrf.mxu1 }
 0x1fb   : > { %10780 = vst [vmem:[#allocation34_spill] sm:$0xff] %v10154_v30  ;;  %v10161_v33 = vadd.f32 %v7504_v59, %v10008_v53  ;;  %10786 = vst [vmem:[#allocation39_spill] sm:$0xff] %v10174_v6 }
 0x1fc   : > { %v3648_v60 = vpop.f32.mrf.mxu0 }
 0x1fd   : > { %10782 = vst [vmem:[#allocation18_spill] sm:$0xff] %v10161_v33  ;;  %v10164_v21 = vadd.f32 %v3648_v60, %v10013_v36 }
 0x1fe   : > { %v7507_v63 = vpop.f32.mrf.mxu0 }
 0x1ff   : > { %10783 = vst [vmem:[#allocation16_spill] sm:$0xff] %v10164_v21  ;;  %v3718_v14 = vadd.f32 %v7507_v63, %v10019_v4 }
 0x200   : > { %v3661_v9 = vpop.f32.mrf.mxu0 }
 0x201   : > { %v10170_v18 = vadd.f32 %v3661_v9, %v10024_v48  ;;  %v10172_v27 = vadd.f32 %v7555_v26, %v3718_v14 }
 0x202   : > { %v7508_v44 = vpop.f32.mrf.mxu0 }
 0x203   : > { %10785 = vst [vmem:[#allocation35_spill] sm:$0xff] %v10170_v18  ;;  %v10177_v53 = vadd.f32 %v7508_v44, %v10026_v8  ;;  %v7559_v59 = vpop.f32.mrf.mxu1 }
 0x204   : > { %v3664_v24 = vpop.f32.mrf.mxu0 }
 0x205   : > { %10787 = vst [vmem:[#allocation22_spill] sm:$0xff] %v10177_v53  ;;  %v10180_v36 = vadd.f32 %v3664_v24, %v10031_v0  ;;  %v10182_v7 = vpop.f32.mrf.mxu1 }
 0x206   : > { %v7511_v60 = vpop.f32.mrf.mxu0  ;;  %10789 = vst [vmem:[#allocation24_spill] sm:$0xff] %v10182_v7 }
 0x207   : > { %10788 = vst [vmem:[#allocation20_spill] sm:$0xff] %v10180_v36  ;;  %v3722_v4 = vadd.f32 %v7511_v60, %v10033_v22  ;;  %v10185_v63 = vpop.f32.mrf.mxu1 }
 0x208   : > { %v3677_v48 = vpop.f32.mrf.mxu0  ;;  %10790 = vst [vmem:[#allocation27_spill] sm:$0xff] %v10185_v63 }
 0x209   : > { %v10188_v26 = vadd.f32 %v3677_v48, %v10040_v32  ;;  %v4219_v14 = vadd.f32 %v7559_v59, %v3722_v4  ;;  %v10190_v8 = vpop.f32.mrf.mxu1 }
 0x20a   : > { %v7512_v9 = vpop.f32.mrf.mxu0  ;;  %10792 = vst [vmem:[#allocation28_spill] sm:$0xff] %v10190_v8 }
 0x20b   : > { %10791 = vst [vmem:[#allocation26_spill] sm:$0xff] %v10188_v26  ;;  %v10193_v44 = vadd.f32 %v7512_v9, %v10046_v38  ;;  %v10195_v24 = vpop.f32.mrf.mxu1 }
 0x20c   : > { %v3680_v0 = vpop.f32.mrf.mxu0 }
 0x20d   : > { %10793 = vst [vmem:[#allocation33_spill] sm:$0xff] %v10193_v44  ;;  %v10198_v7 = vadd.f32 %v3680_v0, %v10051_v51  ;;  %v10203_v63 = vpop.f32.mrf.mxu1 }
 0x20e   : > { %v7579_v22 = vpop.f32.mrf.mxu0 }
 0x20f   : > { %10794 = vst [vmem:[#allocation31_spill] sm:$0xff] %v10198_v7  ;;  %v10201_v60 = vadd.f32 %v7579_v22, %v10056_v35  ;;  %v7628_v48 = vpop.f32.mrf.mxu1 }
 0x210   : > { %v4448_v32 = vpop.f32.mrf.mxu0 }
 0x211   : > { %v10206_v59 = vadd.f32 %v4448_v32, %v10064_v40  ;;  %v5204_v44 = vpop.f32.mrf.mxu1 }
 0x212   : > { %v7580_v4 = vpop.f32.mrf.mxu0 }
 0x213   : > { %v10215_v35 = vpop.f32.mrf.mxu1 }
 0x214   : > { %v4451_v38 = vpop.f32.mrf.mxu0 }
 0x215   : > { %v10219_v26 = vpop.f32.mrf.mxu1 }
 0x216   : > { %v7583_v9 = vpop.f32.mrf.mxu0 }
 0x217   : > { %v10209_v8 = vadd.f32 %v7583_v9, %v10080_v62  ;;  %v10228_v62 = vpop.f32.mrf.mxu1 }
 0x218   : > { %v10211_v51 = vpop.f32.mrf.mxu0 }
 0x219   : > { %v10232_v53 = vpop.f32.mrf.mxu1 }
 0x21a   : > { %v10213_v0 = vpop.f32.mrf.mxu0 }
 0x21c   : > { %v10217_v22 = vpop.f32.mrf.mxu0 }
 0x21e   : > { %v7587_v7 = vpop.f32.mrf.mxu0 }
 0x21f   : > { %v10222_v40 = vadd.f32 %v7587_v7, %v10102_v45  ;;  %v10241_v45 = vpop.f32.mrf.mxu1 }
 0x220   : > { %v10224_v32 = vpop.f32.mrf.mxu0 }
 0x221   : > { %v10245_v20 = vpop.f32.mrf.mxu1 }
 0x222   : > { %v10226_v6 = vpop.f32.mrf.mxu0 }
 0x224   : > { %v10230_v9 = vpop.f32.mrf.mxu0 }
 0x226   : > { %v7591_v36 = vpop.f32.mrf.mxu0 }
 0x227   : > { %v10235_v34 = vadd.f32 %v7591_v36, %v10121_v57  ;;  %v10254_v57 = vpop.f32.mrf.mxu1 }
 0x228   : > { %v10237_v18 = vpop.f32.mrf.mxu0 }
 0x229   : > { %10795 = vst [vmem:[#allocation32_spill] sm:$0xff] %v10235_v34  ;;  %v10258_v43 = vpop.f32.mrf.mxu1 }
 0x22a   : > { %v10239_v46 = vpop.f32.mrf.mxu0 }
 0x22c   : > { %v10243_v7 = vpop.f32.mrf.mxu0 }
 0x22e   : > { %v7595_v21 = vpop.f32.mrf.mxu0 }
 0x22f   : > { %v10248_v33 = vadd.f32 %v7595_v21, %v10140_v11  ;;  %v10267_v11 = vpop.f32.mrf.mxu1 }
 0x230   : > { %v10250_v37 = vpop.f32.mrf.mxu0  ;;  %10803 = vst [vmem:[#allocation8_spill] sm:$0xff] %v10267_v11 }
 0x231   : > { %10796 = vst [vmem:[#allocation38_spill] sm:$0xff] %v10248_v33  ;;  %10797 = vst [vmem:[#allocation37_spill] sm:$0xff] %v10250_v37 }
 0x232   : > { %v10252_v30 = vpop.f32.mrf.mxu0 }
 0x233   : > { %10798 = vst [vmem:[#allocation40_spill] sm:$0xff] %v10252_v30  ;;  %v10271_v30 = vpop.f32.mrf.mxu1 }
 0x234   : > { %v10256_v36 = vpop.f32.mrf.mxu0 }
 0x235   : > { %10799 = vst [vmem:[#allocation4_spill] sm:$0xff] %v10256_v36 }
 0x236   : > { %v7599_v17 = vpop.f32.mrf.mxu0 }
 0x237   : > { %v10261_v31 = vadd.f32 %v7599_v17, %v10156_v10  ;;  %v10280_v17 = vpop.f32.mrf.mxu1 }
 0x238   : > { %v10263_v29 = vpop.f32.mrf.mxu0 }
 0x239   : > { %10800 = vst [vmem:[#allocation3_spill] sm:$0xff] %v10261_v31  ;;  %10801 = vst [vmem:[#allocation6_spill] sm:$0xff] %v10263_v29 }
 0x23a   : > { %v10265_v34 = vpop.f32.mrf.mxu0 }
 0x23b   : > { %10802 = vst [vmem:[#allocation5_spill] sm:$0xff] %v10265_v34  ;;  %v10284_v34 = vpop.f32.mrf.mxu1 }
 0x23c   : > { %v10269_v21 = vpop.f32.mrf.mxu0  ;;  %10809 = vst [vmem:[#allocation13_spill] sm:$0xff] %v10284_v34 }
 0x23d   : > { %10804 = vst [vmem:[#allocation7_spill] sm:$0xff] %v10269_v21 }
 0x23e   : > { %v7603_v33 = vpop.f32.mrf.mxu0 }
 0x23f   : > { %v10274_v37 = vadd.f32 %v7603_v33, %v10172_v27  ;;  %v4192_v33 = vadd.f32 %v10035_v25, %v10062_v55  ;;  %v10294_v27 = vpop.f32.mrf.mxu1  ;;  %v4193_v25 = vadd.f32 %v10054_v2, %v10078_v12  ;;  %v4196_v55 = vadd.f32 %v10058_v54, %v10086_v56 }
 0x240   : > { %v10276_v36 = vpop.f32.mrf.mxu0 }
 0x241   : > { %10805 = vst [vmem:[#allocation41_spill] sm:$0xff] %v10274_v37  ;;  %10806 = vst [vmem:[#allocation12_spill] sm:$0xff] %v10276_v36  ;;  %v4582_v54 = vadd.f32 %v10213_v0, %v4196_v55 }
 0x242   : > { %v10278_v58 = vpop.f32.mrf.mxu0 }
 0x243   : > { %10807 = vst [vmem:[#allocation25_spill] sm:$0xff] %v10278_v58  ;;  %v4190_v58 = vadd.f32 %v10042_v16, %v10070_v1  ;;  %v5328_v16 = vadd.f32 %v10203_v63, %v10206_v59  ;;  %v5334_v59 = vadd.f32 %v10215_v35, %v10209_v8 }
 0x244   : > { %v10282_v10 = vpop.f32.mrf.mxu0 }
 0x245   : > { %10808 = vst [vmem:[#allocation23_spill] sm:$0xff] %v10282_v10  ;;  %v4578_v10 = vadd.f32 %v7580_v4, %v4192_v33  ;;  %v4576_v34 = vadd.f32 %v4451_v38, %v4190_v58 }
 0x246   : > { %v7607_v31 = vpop.f32.mrf.mxu0 }
 0x247   : > { %v10286_v29 = vadd.f32 %v7607_v31, %v4219_v14  ;;  %v10300_v31 = vpop.f32.mrf.mxu1  ;;  %v5329_v1 = vadd.f32 %v5204_v44, %v4576_v34 }
 0x248   : > { %v10288_v21 = vpop.f32.mrf.mxu0 }
 0x249   : > { %10810 = vst [vmem:[#allocation15_spill] sm:$0xff] %v10286_v29  ;;  %v5331_v29 = vadd.f32 %v7628_v48, %v4578_v10  ;;  %v10310_v4 = vpop.f32.mrf.mxu1 }
 0x24a   : > { %v10290_v11 = vpop.f32.mrf.mxu0 }
 0x24b   : > { %10811 = vst [vmem:[#allocation42_spill] sm:$0xff] %v10290_v11  ;;  %v5330_v11 = vadd.f32 %v10195_v24, %v10201_v60  ;;  %v4194_v24 = vadd.f32 %v10066_v28, %v10092_v52  ;;  %v4579_v60 = vadd.f32 %v10211_v51, %v4193_v25  ;;  %v5335_v51 = vadd.f32 %v10228_v62, %v4582_v54 }
 0x24c   : > { %v10296_v37 = vpop.f32.mrf.mxu0  ;;  %v4204_v54 = vadd.f32 %v10104_v5, %v10128_v42 }
 0x24d   : > { %10812 = vst [vmem:[#allocation43_spill] sm:$0xff] %v10296_v37  ;;  %v4580_v28 = vadd.f32 %v10217_v22, %v4194_v24  ;;  %v5332_v48 = vadd.f32 %v10219_v26, %v4579_v60  ;;  %v4197_v22 = vadd.f32 %v10076_v13, %v10100_v15  ;;  %v4198_v13 = vadd.f32 %v10088_v49, %v10112_v19 }
 0x24e   : > { %v7675_v36 = vpop.f32.mrf.mxu0  ;;  %v4590_v42 = vadd.f32 %v10239_v46, %v4204_v54  ;;  %v10813_v46 = vld [vmem:[#allocation29_spill] sm:$0xff] }
 0x24f   : > { %v10312_v58 = vadd.f32 %v7675_v36, %v5330_v11  ;;  %v4200_v36 = vadd.f32 %v10082_v41, %v10108_v23  ;;  %v5333_v11 = vadd.f32 %v10232_v53, %v4580_v28  ;;  %v4583_v15 = vadd.f32 %v10224_v32, %v4197_v22  ;;  %v10815_v22 = vld [vmem:[#allocation8_spill] sm:$0xff] }
 0x250   : > { %v5698_v14 = vpop.f32.mrf.mxu0  ;;  %v4584_v55 = vadd.f32 %v10230_v9, %v4198_v13  ;;  %v10817_v13 = vld [vmem:[#allocation10_spill] sm:$0xff] }
 0x251   : > { %v10326_v12 = vadd.f32 %v5698_v14, %v5328_v16  ;;  %v4586_v23 = vadd.f32 %v10226_v6, %v4200_v36  ;;  %v5338_v6 = vadd.f32 %v10241_v45, %v10222_v40  ;;  %v5336_v24 = vadd.f32 %v10245_v20, %v4583_v15 }
 0x252   : > { %v7676_v37 = vpop.f32.mrf.mxu0 }
 0x253   : > { %v10314_v38 = vadd.f32 %v7676_v37, %v5331_v29  ;;  %v10333_v29 = vpop.f32.mrf.mxu1  ;;  %v5339_v60 = vadd.f32 %v10254_v57, %v4586_v23 }
 0x254   : > { %v5701_v2 = vpop.f32.mrf.mxu0 }
 0x255   : > { %v6875_v56 = vpack.c.bf16 %v10314_v38, %v10312_v58  ;;  %v10330_v37 = vadd.f32 %v5701_v2, %v5329_v1  ;;  %v10351_v33 = vpop.f32.mrf.mxu1  ;;  %v4201_v2 = vadd.f32 %v10098_v61, %v10119_v3  ;;  %v4202_v61 = vadd.f32 %v10110_v50, %v10132_v39 }
 0x256   : > { %v7679_v52 = vpop.f32.mrf.mxu0 }
 0x257   : > { %6962 = vst [vmem:[%s10323_s20 + $0x8] sm:$0xff] %v6875_v56   ;;  %v6870_v34 = vpack.c.bf16 %v10330_v37, %v10326_v12  ;;  %v6017_v63 = vadd.f32 %v10330_v37, %v10326_v12  ;;  %v10353_v8 = vadd.f32 %v7679_v52, %v5334_v59  ;;  %v10370_v1 = vpop.f32.mrf.mxu1  ;;  %v5337_v56 = vadd.f32 %v10258_v43, %v4584_v55 }
 0x258   : > { %v5714_v44 = vpop.f32.mrf.mxu0  ;;  %v4587_v3 = vadd.f32 %v10237_v18, %v4201_v2  ;;  %v4205_v18 = vadd.f32 %v10813_v46, %v10138_v47 }
 0x259   : > { %6871 = vst [vmem:[%s10323_s20] sm:$0xff] %v6870_v34   ;;  %v6018_v0 = vadd.f32 %v6017_v63, %v10312_v58  ;;  %v10355_v26 = vadd.f32 %v5714_v44, %v5332_v48  ;;  %v10387_v52 = vpop.f32.mrf.mxu1  ;;  %v4588_v44 = vadd.f32 %v10243_v7, %v4202_v61  ;;  %v5343_v7 = vadd.f32 %v10280_v17, %v4590_v42 }
 0x25a   : > { %v7680_v10 = vpop.f32.mrf.mxu0 }
 0x25b   : > { %v6019_v35 = vadd.f32 %v6018_v0, %v10314_v38  ;;  %v10358_v62 = vadd.f32 %v7680_v10, %v5335_v51  ;;  %v10406_v48 = vpop.f32.mrf.mxu1  ;;  %v10814_v0 = vld [vmem:[#allocation32_spill] sm:$0xff] }
 0x25c   : > { %v5717_v41 = vpop.f32.mrf.mxu0  ;;  %v5342_v36 = vadd.f32 %v10815_v22, %v10814_v0  ;;  %v10827_v0 = vld [vmem:[#allocation18_spill] sm:$0xff] }
 0x25d   : > { %v6020_v53 = vadd.f32 %v6019_v35, %v10355_v26  ;;  %v6885_v14 = vpack.c.bf16 %v10358_v62, %v10353_v8  ;;  %v10367_v25 = vadd.f32 %v5717_v41, %v5333_v11  ;;  %v5340_v11 = vadd.f32 %v10271_v30, %v4587_v3  ;;  %v10816_v35 = vld [vmem:[#allocation14_spill] sm:$0xff]  ;;  %v10818_v41 = vld [vmem:[#allocation13_spill] sm:$0xff]  ;;  %v10424_v47 = vpop.f32.mrf.mxu1 }
 0x25e   : > { %v7683_v16 = vpop.f32.mrf.mxu0  ;;  %v4208_v15 = vadd.f32 %v10817_v13, %v10816_v35  ;;  %v5341_v23 = vadd.f32 %v10818_v41, %v4588_v44  ;;  %v10824_v44 = vld [vmem:[#allocation38_spill] sm:$0xff]  ;;  %v10830_v41 = vld [vmem:[#allocation11_spill] sm:$0xff] }
 0x25f   : > { %6964 = vst [vmem:[%s10323_s20 + $0x18] sm:$0xff] %v6885_v14   ;;  %v6880_v49 = vpack.c.bf16 %v10367_v25, %v10355_v26  ;;  %v6021_v19 = vadd.f32 %v6020_v53, %v10367_v25  ;;  %v10389_v40 = vadd.f32 %v7683_v16, %v5338_v6  ;;  %v10819_v53 = vld [vmem:[#allocation37_spill] sm:$0xff]  ;;  %v10828_v22 = vld [vmem:[#allocation30_spill] sm:$0xff] }
 0x260   : > { %v5730_v32 = vpop.f32.mrf.mxu0  ;;  %v4591_v14 = vadd.f32 %v10819_v53, %v4205_v18  ;;  %v10825_v18 = vld [vmem:[#allocation34_spill] sm:$0xff] }
 0x261   : > { %6963 = vst [vmem:[%s10323_s20 + $0x10] sm:$0xff] %v6880_v49   ;;  %v6022_v9 = vadd.f32 %v6021_v19, %v10353_v8  ;;  %v10391_v20 = vadd.f32 %v5730_v32, %v5336_v24  ;;  %v10820_v19 = vld [vmem:[#allocation19_spill] sm:$0xff]  ;;  %v10821_v32 = vld [vmem:[#allocation9_spill] sm:$0xff]  ;;  %v10831_v53 = vld [vmem:[#allocation6_spill] sm:$0xff] }
 0x262   : > { %v7684_v28 = vpop.f32.mrf.mxu0  ;;  %v4206_v6 = vadd.f32 %v10821_v32, %v10820_v19  ;;  %v5344_v3 = vadd.f32 %v10300_v31, %v4591_v14  ;;  %v10826_v31 = vld [vmem:[#allocation17_spill] sm:$0xff] }
 0x263   : > { %v6023_v45 = vadd.f32 %v6022_v9, %v10358_v62  ;;  %v10394_v57 = vadd.f32 %v7684_v28, %v5339_v60  ;;  %v10822_v60 = vld [vmem:[#allocation40_spill] sm:$0xff] }
 0x264   : > { %v5733_v5 = vpop.f32.mrf.mxu0  ;;  %v4594_v9 = vadd.f32 %v10822_v60, %v4208_v15  ;;  %v10823_v28 = vld [vmem:[#allocation4_spill] sm:$0xff] }
 0x265   : > { %v6024_v43 = vadd.f32 %v6023_v45, %v10391_v20  ;;  %v6895_v34 = vpack.c.bf16 %v10394_v57, %v10389_v40  ;;  %v10403_v63 = vadd.f32 %v5733_v5, %v5337_v56  ;;  %v4592_v45 = vadd.f32 %v10823_v28, %v4206_v6  ;;  %v5297_v5 = vpop.f32.mrf.mxu1  ;;  %v10829_v15 = vld [vmem:[#allocation16_spill] sm:$0xff] }
 0x266   : > { %v7687_v59 = vpop.f32.mrf.mxu0 }
 0x267   : > { %6966 = vst [vmem:[%s10323_s20 + $0x28] sm:$0xff] %v6895_v34   ;;  %v6890_v50 = vpack.c.bf16 %v10403_v63, %v10391_v20  ;;  %v6025_v39 = vadd.f32 %v6024_v43, %v10403_v63  ;;  %v10426_v16 = vadd.f32 %v7687_v59, %v5342_v36  ;;  %v5346_v59 = vadd.f32 %v10294_v27, %v10824_v44 }
 0x268   : > { %v5746_v51 = vpop.f32.mrf.mxu0  ;;  %v4212_v36 = vadd.f32 %v10828_v22, %v10827_v0  ;;  %v10839_v22 = vld [vmem:[#allocation12_spill] sm:$0xff] }
 0x269   : > { %6965 = vst [vmem:[%s10323_s20 + $0x20] sm:$0xff] %v6890_v50   ;;  %v6026_v10 = vadd.f32 %v6025_v39, %v10389_v40  ;;  %v10428_v49 = vadd.f32 %v5746_v51, %v5340_v11  ;;  %v5347_v50 = vadd.f32 %v10310_v4, %v4594_v9  ;;  %v4209_v51 = vadd.f32 %v10826_v31, %v10825_v18  ;;  %v10837_v18 = vld [vmem:[#allocation22_spill] sm:$0xff]  ;;  %v10838_v31 = vld [vmem:[#allocation21_spill] sm:$0xff] }
 0x26a   : > { %v7688_v55 = vpop.f32.mrf.mxu0  ;;  %v5345_v11 = vadd.f32 %v10333_v29, %v4592_v45 }
 0x26b   : > { %v6027_v30 = vadd.f32 %v6026_v10, %v10394_v57  ;;  %v10431_v17 = vadd.f32 %v7688_v55, %v5343_v7  ;;  %v7652_v10 = vpop.f32.mrf.mxu1  ;;  %v4595_v14 = vadd.f32 %v10831_v53, %v4209_v51  ;;  %v4216_v51 = vadd.f32 %v10838_v31, %v10837_v18  ;;  %v10847_v18 = vld [vmem:[#allocation33_spill] sm:$0xff]  ;;  %v10848_v31 = vld [vmem:[#allocation27_spill] sm:$0xff] }
 0x26c   : > { %v5749_v24 = vpop.f32.mrf.mxu0 }
 0x26d   : > { %v6028_v2 = vadd.f32 %v6027_v30, %v10428_v49  ;;  %v6905_v54 = vpack.c.bf16 %v10431_v17, %v10426_v16  ;;  %v10439_v56 = vadd.f32 %v5749_v24, %v5341_v23  ;;  %v4210_v23 = vadd.f32 %v10830_v41, %v10829_v15  ;;  %v10832_v30 = vld [vmem:[#allocation5_spill] sm:$0xff]  ;;  %v10833_v24 = vld [vmem:[#allocation7_spill] sm:$0xff]  ;;  %v10840_v15 = vld [vmem:[#allocation20_spill] sm:$0xff] }
 0x26e   : > { %v7691_v61 = vpop.f32.mrf.mxu0  ;;  %v4598_v29 = vadd.f32 %v10832_v30, %v4212_v36  ;;  %v10841_v41 = vld [vmem:[#allocation39_spill] sm:$0xff] }
 0x26f   : > { %6968 = vst [vmem:[%s10323_s20 + $0x38] sm:$0xff] %v6905_v54   ;;  %v6900_v42 = vpack.c.bf16 %v10439_v56, %v10428_v49  ;;  %v6029_v43 = vadd.f32 %v6028_v2, %v10439_v56  ;;  %v10459_v35 = vadd.f32 %v7691_v61, %v5346_v59  ;;  %v4596_v60 = vadd.f32 %v10833_v24, %v4210_v23  ;;  %v5300_v2 = vpop.f32.mrf.mxu1  ;;  %v10834_v61 = vld [vmem:[#allocation35_spill] sm:$0xff] }
 0x270   : > { %v5762_v34 = vpop.f32.mrf.mxu0  ;;  %v5348_v59 = vadd.f32 %v10370_v1, %v4595_v14  ;;  %v4214_v23 = vadd.f32 %v10841_v41, %v10840_v15  ;;  %v10849_v41 = vld [vmem:[#allocation31_spill] sm:$0xff] }
 0x271   : > { %6967 = vst [vmem:[%s10323_s20 + $0x30] sm:$0xff] %v6900_v42   ;;  %v6030_v39 = vadd.f32 %v6029_v43, %v10426_v16  ;;  %v10452_v46 = vadd.f32 %v5762_v34, %v5344_v3  ;;  %v10835_v3 = vld [vmem:[#allocation36_spill] sm:$0xff]  ;;  %v10836_v34 = vld [vmem:[#allocation3_spill] sm:$0xff]  ;;  %v5349_v0 = vadd.f32 %v10406_v48, %v4596_v60  ;;  %v10842_v48 = vld [vmem:[#allocation41_spill] sm:$0xff] }
 0x272   : > { %v7692_v7 = vpop.f32.mrf.mxu0  ;;  %v4213_v42 = vadd.f32 %v10835_v3, %v10834_v61  ;;  %v5350_v44 = vadd.f32 %v10351_v33, %v10836_v34  ;;  %v7655_v33 = vpop.f32.mrf.mxu1  ;;  %v5354_v53 = vadd.f32 %v10424_v47, %v10842_v48  ;;  %v10844_v60 = vld [vmem:[#allocation23_spill] sm:$0xff] }
 0x273   : > { %v6031_v27 = vadd.f32 %v6030_v39, %v10431_v17  ;;  %v10462_v4 = vadd.f32 %v7692_v7, %v5347_v50  ;;  %v7714_v13 = vpack.i.bf16 %v10326_v12, %v10452_v46  ;;  %v5351_v50 = vadd.f32 %v10387_v52, %v4598_v29 }
 0x274   : > { %v5765_v55 = vpop.f32.mrf.mxu0  ;;  %v4599_v36 = vadd.f32 %v10839_v22, %v4213_v42  ;;  %v7718_v7 = vpack.i.bf16 %v10312_v58, %v10459_v35  ;;  %v10845_v42 = vld [vmem:[#allocation26_spill] sm:$0xff] }
 0x275   : > { %v6032_v19 = vadd.f32 %v6031_v27, %v10452_v46  ;;  %v6915_v32 = vpack.c.bf16 %v10462_v4, %v10459_v35  ;;  %v10473_v6 = vadd.f32 %v5765_v55, %v5345_v11  ;;  %7715 = vxpose.xlu0.b32.start [1/16] %v7714_v13, 128  ;;  %v10843_v55 = vld [vmem:[#allocation25_spill] sm:$0xff]  ;;  %v7720_v3 = vpack.i.bf16 %v10314_v38, %v10462_v4 }
 0x276   : > { %v7695_v9 = vpop.f32.mrf.mxu0  ;;  %v4602_v30 = vadd.f32 %v10843_v55, %v4216_v51  ;;  %v5352_v24 = vadd.f32 %v5297_v5, %v4599_v36  ;;  %v4220_v51 = vadd.f32 %v10848_v31, %v10847_v18 }
 0x277   : > { %6970 = vst [vmem:[%s10323_s20 + $0x48] sm:$0xff] %v6915_v32   ;;  %v6910_v54 = vpack.c.bf16 %v10473_v6, %v10452_v46  ;;  %v6033_v28 = vadd.f32 %v6032_v19, %v10473_v6  ;;  %v7716_v45 = vpack.i.bf16 %v10330_v37, %v10473_v6  ;;  %v10496_v27 = vadd.f32 %v7695_v9, %v5350_v44 }
 0x278   : > { %v5778_v43 = vpop.f32.mrf.mxu0  ;;  %v4600_v9 = vadd.f32 %v10844_v60, %v4214_v23  ;;  %v5355_v5 = vadd.f32 %v7652_v10, %v4602_v30  ;;  %v10850_v23 = vld [vmem:[#allocation28_spill] sm:$0xff] }
 0x279   : > { %6969 = vst [vmem:[%s10323_s20 + $0x40] sm:$0xff] %v6910_v54   ;;  %v6034_v39 = vadd.f32 %v6033_v28, %v10459_v35  ;;  %7717 = vxpose.xlu0.b32.cont [2/16] %v7716_v45, 128  ;;  %v10498_v1 = vadd.f32 %v5778_v43, %v5348_v59  ;;  %v5313_v28 = vpop.f32.mrf.mxu1  ;;  %v10846_v43 = vld [vmem:[#allocation24_spill] sm:$0xff]  ;;  %v4218_v48 = vadd.f32 %v10850_v23, %v10849_v41 }
 0x27a   : > { %v7696_v11 = vpop.f32.mrf.mxu0  ;;  %v4217_v34 = vadd.f32 %v10846_v43, %v10845_v42 }
 0x27b   : > { %v6035_v52 = vadd.f32 %v6034_v39, %v10462_v4  ;;  %v10501_v13 = vadd.f32 %v7696_v11, %v5351_v50  ;;  %v7656_v11 = vpop.f32.mrf.mxu1 }
 0x27c   : > { %v5781_v14 = vpop.f32.mrf.mxu0  ;;  %v4603_v22 = vadd.f32 %v10288_v21, %v4217_v34 }
 0x27d   : > { %v6036_v29 = vadd.f32 %v6035_v52, %v10498_v1  ;;  %v6925_v19 = vpack.c.bf16 %v10501_v13, %v10496_v27  ;;  %v10511_v32 = vadd.f32 %v5781_v14, %v5349_v0  ;;  %7719 = vxpose.xlu0.b32.cont [3/16] %v7718_v7, 128  ;;  %v5353_v0 = vadd.f32 %v5300_v2, %v4600_v9  ;;  %v10852_v14 = vld [vmem:[#allocation42_spill] sm:$0xff]  ;;  %v10853_v9 = vld [vmem:[#allocation43_spill] sm:$0xff] }
 0x27e   : > { %v7699_v54 = vpop.f32.mrf.mxu0  ;;  %v7722_v52 = vpack.i.bf16 %v10355_v26, %v10498_v1  ;;  %v4606_v21 = vadd.f32 %v10852_v14, %v4220_v51  ;;  %v5356_v60 = vadd.f32 %v5313_v28, %v4603_v22  ;;  %v7728_v14 = vpack.i.bf16 %v10358_v62, %v10501_v13 }
 0x27f   : > { %6972 = vst [vmem:[%s10323_s20 + $0x58] sm:$0xff] %v6925_v19   ;;  %v6920_v47 = vpack.c.bf16 %v10511_v32, %v10498_v1  ;;  %v6037_v45 = vadd.f32 %v6036_v29, %v10511_v32  ;;  %v10518_v61 = vadd.f32 %v7699_v54, %v5354_v53  ;;  %v10851_v53 = vld [vmem:[#allocation15_spill] sm:$0xff]  ;;  %v4604_v54 = vadd.f32 %v10853_v9, %v4218_v48 }
 0x280   : > { %v5794_v44 = vpop.f32.mrf.mxu0  ;;  %v5358_v2 = vadd.f32 %v7655_v33, %v10851_v53  ;;  %v7724_v33 = vpack.i.bf16 %v10367_v25, %v10511_v32 }
 0x281   : > { %6971 = vst [vmem:[%s10323_s20 + $0x50] sm:$0xff] %v6920_v47   ;;  %v6038_v59 = vadd.f32 %v6037_v45, %v10496_v27  ;;  %v10526_v50 = vadd.f32 %v5794_v44, %v5352_v24  ;;  %7721 = vxpose.xlu0.b32.cont [4/16] %v7720_v3, 128  ;;  %v7734_v39 = vpack.i.bf16 %v10389_v40, %v10518_v61  ;;  %v5316_v45 = vpop.f32.mrf.mxu1 }
 0x282   : > { %v7700_v36 = vpop.f32.mrf.mxu0  ;;  %v5357_v31 = vadd.f32 %v5316_v45, %v4604_v54 }
 0x283   : > { %v6039_v7 = vadd.f32 %v6038_v59, %v10501_v13  ;;  %v10534_v10 = vadd.f32 %v7700_v36, %v5355_v5  ;;  %v7730_v15 = vpack.i.bf16 %v10391_v20, %v10526_v50  ;;  %v5359_v5 = vadd.f32 %v7656_v11, %v4606_v21 }
 0x284   : > { %v5797_v55 = vpop.f32.mrf.mxu0  ;;  %v7726_v36 = vpack.i.bf16 %v10353_v8, %v10496_v27 }
 0x285   : > { %v6040_v30 = vadd.f32 %v6039_v7, %v10526_v50  ;;  %v6935_v29 = vpack.c.bf16 %v10534_v10, %v10518_v61  ;;  %v5850_v19 = vadd.f32 %v5797_v55, %v5353_v0  ;;  %7723 = vxpose.xlu0.b32.cont [5/16] %v7722_v52, 128  ;;  %v7736_v24 = vpack.i.bf16 %v10394_v57, %v10534_v10 }
 0x286   : > { %v7703_v47 = vpop.f32.mrf.mxu0 }
 0x287   : > { %6974 = vst [vmem:[%s10323_s20 + $0x68] sm:$0xff] %v6935_v29   ;;  %v6930_v3 = vpack.c.bf16 %v5850_v19, %v10526_v50  ;;  %v6041_v42 = vadd.f32 %v6040_v30, %v5850_v19  ;;  %v10554_v43 = vadd.f32 %v7703_v47, %v5358_v2  ;;  %v7732_v34 = vpack.i.bf16 %v10403_v63, %v5850_v19 }
 0x288   : > { %v5810_v44 = vpop.f32.mrf.mxu0 }
 0x289   : > { %6973 = vst [vmem:[%s10323_s20 + $0x60] sm:$0xff] %v6930_v3   ;;  %v6042_v28 = vadd.f32 %v6041_v42, %v10518_v61  ;;  %v5853_v59 = vadd.f32 %v5810_v44, %v5356_v60  ;;  %7725 = vxpose.xlu0.b32.cont [6/16] %v7724_v33, 128  ;;  %v7742_v18 = vpack.i.bf16 %v10426_v16, %v10554_v43 }
 0x28a   : > { %v7704_v51 = vpop.f32.mrf.mxu0 }
 0x28b   : > { %v6043_v0 = vadd.f32 %v6042_v28, %v10534_v10  ;;  %v10562_v22 = vadd.f32 %v7704_v51, %v5359_v5  ;;  %v7738_v11 = vpack.i.bf16 %v10428_v49, %v5853_v59 }
 0x28c   : > { %v5813_v7 = vpop.f32.mrf.mxu0 }
 0x28d   : > { %v6044_v52 = vadd.f32 %v6043_v0, %v5853_v59  ;;  %v6945_v41 = vpack.c.bf16 %v10562_v22, %v10554_v43  ;;  %v5854_v23 = vadd.f32 %v5813_v7, %v5357_v31  ;;  %7727 = vxpose.xlu0.b32.cont [7/16] %v7726_v36, 128  ;;  %7193 = vmatprep.subr.mxu1 %v10562_v22 }
 0x28e   : > { %7194 = vmatpush3.msra.mxu1 %v10431_v17  ;;  %v7744_v48 = vpack.i.bf16 %v10431_v17, %v10562_v22 }
 0x28f   : > { %6976 = vst [vmem:[%s10323_s20 + $0x78] sm:$0xff] %v6945_v41   ;;  %v6940_v53 = vpack.c.bf16 %v5854_v23, %v5853_v59  ;;  %v6045_v2 = vadd.f32 %v6044_v52, %v5854_v23  ;;  %7195 = vmatprep.subr.mxu1 %v10554_v43  ;;  %v7740_v21 = vpack.i.bf16 %v10439_v56, %v5854_v23 }
 0x290   : > { %7196 = vmatpush3.msra.mxu1 %v10426_v16 }
 0x291   : > { %6975 = vst [vmem:[%s10323_s20 + $0x70] sm:$0xff] %v6940_v53   ;;  %v6046_v55 = vadd.f32 %v6045_v2, %v10554_v43  ;;  %7729 = vxpose.xlu0.b32.cont [8/16] %v7728_v14, 128  ;;  %7197 = vmatprep.subr.mxu1 %v5854_v23 }
 0x292   : > { %7198 = vmatpush3.msra.mxu1 %v10439_v56 }
 0x293   : > { %v6047_v17 = vadd.f32 %v6046_v55, %v10562_v22  ;;  %7199 = vmatprep.subr.mxu1 %v5853_v59 }
 0x294   : > { %7200 = vmatpush3.msra.mxu1 %v10428_v49 }
 0x295   : > { %v6048_v30 = vrot.slane %v6047_v17, 4  ;;  %7731 = vxpose.xlu0.b32.cont [9/16] %v7730_v15, 128  ;;  %7201 = vmatprep.subr.mxu1 %v10534_v10 }
 0x296   : > { %7202 = vmatpush3.msra.mxu1 %v10394_v57 }
 0x297   : > { %v6049_v29 = vadd.f32 %v6048_v30, %v6047_v17  ;;  %7203 = vmatprep.subr.mxu1 %v10518_v61 }
 0x298   : > { %7204 = vmatpush3.msra.mxu1 %v10389_v40 }
 0x299   : > { %v6050_v60 = vrot.slane %v6049_v29, 2  ;;  %7733 = vxpose.xlu0.b32.cont [10/16] %v7732_v34, 128  ;;  %7205 = vmatprep.subr.mxu1 %v5850_v19 }
 0x29a   : > { %7206 = vmatpush3.msra.mxu1 %v10403_v63 }
 0x29b   : > { %v6051_v56 = vadd.f32 %v6050_v60, %v6049_v29  ;;  %7207 = vmatprep.subr.mxu1 %v10526_v50 }
 0x29c   : > { %7208 = vmatpush3.msra.mxu1 %v10391_v20 }
 0x29d   : > { %v6052_v49 = vrot.slane %v6051_v56, 1  ;;  %7735 = vxpose.xlu0.b32.cont [11/16] %v7734_v39, 128  ;;  %7209 = vmatprep.subr.mxu1 %v10501_v13 }
 0x29e   : > { %7210 = vmatpush3.msra.mxu1 %v10358_v62 }
 0x29f   : > { %v6053_v15 = vadd.f32 %v6052_v49, %v6051_v56  ;;  %7211 = vmatprep.subr.mxu1 %v10496_v27 }
 0x2a0   : > { %7212 = vmatpush3.msra.mxu1 %v10353_v8 }
 0x2a1   : > { %6054 = vst [vmem:[%s267_s25] sm:$0x1] %v6053_v15  ;;  %7737 = vxpose.xlu0.b32.cont [12/16] %v7736_v24, 128  ;;  %7213 = vmatprep.subr.mxu1 %v10511_v32 }
 0x2a2   : > { %7214 = vmatpush3.msra.mxu1 %v10367_v25 }
 0x2a3   : > { %7215 = vmatprep.subr.mxu1 %v10498_v1 }
 0x2a4   : > { %7216 = vmatpush3.msra.mxu1 %v10355_v26 }
 0x2a5   : > { %7739 = vxpose.xlu0.b32.cont [13/16] %v7738_v11, 128  ;;  %7217 = vmatprep.subr.mxu1 %v10462_v4 }
 0x2a6   : > { %7218 = vmatpush3.msra.mxu1 %v10314_v38 }
 0x2a7   : > { %7219 = vmatprep.subr.mxu1 %v10459_v35 }
 0x2a8   : > { %7220 = vmatpush3.msra.mxu1 %v10312_v58 }
 0x2a9   : > { %7741 = vxpose.xlu0.b32.cont [14/16] %v7740_v21, 128  ;;  %7221 = vmatprep.subr.mxu1 %v10473_v6 }
 0x2aa   : > { %7222 = vmatpush3.msra.mxu1 %v10330_v37 }
 0x2ab   : > { %7223 = vmatprep.subr.mxu1 %v10452_v46 }
 0x2ac   : > { %7224 = vmatpush3.msra.mxu1 %v10326_v12 }
 0x2ad   : > { %7743 = vxpose.xlu0.b32.cont [15/16] %v7742_v18, 128 }
 0x2b1   : > { %7745 = vxpose.xlu0.b32.end [16/16] %v7744_v48, 128 }
 0x2f1   : > { %v7746_v8 = vpop.trf.xlu0 }
 0x2f2   : > { %v7750_v38 = vunpack.i.h.bf16 %v7746_v8  ;;  %v7747_v26 = vunpack.i.l.bf16 %v7746_v8 }
 0x2f4   : > { %6183 = vmatprep.mubr.f32.mxu1 %v7747_v26 }
 0x2f5   : > { %v7751_v62 = vpop.trf.xlu0  ;;  %6184 = vmatmul.mubr.f32.vlgmr.msra.gmra.mxu1 %v7750_v38 }
 0x2f6   : > { %v7755_v58 = vunpack.i.h.bf16 %v7751_v62  ;;  %v7752_v25 = vunpack.i.l.bf16 %v7751_v62 }
 0x2f8   : > { %6188 = vmatprep.mubr.f32.mxu1 %v7752_v25 }
 0x2f9   : > { %v7756_v40 = vpop.trf.xlu0  ;;  %6189 = vmatmul.mubr.f32.gmra.mxu1 %v7755_v58 }
 0x2fa   : > { %v7760_v37 = vunpack.i.h.bf16 %v7756_v40  ;;  %v7757_v20 = vunpack.i.l.bf16 %v7756_v40 }
 0x2fc   : > { %6193 = vmatprep.mubr.f32.mxu1 %v7757_v20 }
 0x2fd   : > { %v7761_v12 = vpop.trf.xlu0  ;;  %6194 = vmatmul.mubr.f32.gmra.mxu1 %v7760_v37 }
 0x2fe   : > { %v7765_v57 = vunpack.i.h.bf16 %v7761_v12  ;;  %v7762_v63 = vunpack.i.l.bf16 %v7761_v12 }
 0x300   : > { %6198 = vmatprep.mubr.f32.mxu1 %v7762_v63 }
 0x301   : > { %v7766_v16 = vpop.trf.xlu0  ;;  %6199 = vmatmul.mubr.f32.gmra.mxu1 %v7765_v57 }
 0x302   : > { %v7770_v46 = vunpack.i.h.bf16 %v7766_v16  ;;  %v7767_v35 = vunpack.i.l.bf16 %v7766_v16 }
 0x304   : > { %6203 = vmatprep.mubr.f32.mxu1 %v7767_v35 }
 0x305   : > { %v7771_v4 = vpop.trf.xlu0  ;;  %6204 = vmatmul.mubr.f32.gmra.mxu1 %v7770_v46 }
 0x306   : > { %v7775_v6 = vunpack.i.h.bf16 %v7771_v4  ;;  %v7772_v27 = vunpack.i.l.bf16 %v7771_v4 }
 0x308   : > { %6208 = vmatprep.mubr.f32.mxu1 %v7772_v27 }
 0x309   : > { %v7776_v1 = vpop.trf.xlu0  ;;  %6209 = vmatmul.mubr.f32.gmra.mxu1 %v7775_v6 }
 0x30a   : > { %v7780_v13 = vunpack.i.h.bf16 %v7776_v1  ;;  %v7777_v32 = vunpack.i.l.bf16 %v7776_v1 }
 0x30c   : > { %6213 = vmatprep.mubr.f32.mxu1 %v7777_v32 }
 0x30d   : > { %v7781_v61 = vpop.trf.xlu0  ;;  %6214 = vmatmul.mubr.f32.gmra.mxu1 %v7780_v13 }
 0x30e   : > { %v7785_v50 = vunpack.i.h.bf16 %v7781_v61  ;;  %v7782_v39 = vunpack.i.l.bf16 %v7781_v61 }
 0x310   : > { %6218 = vmatprep.mubr.f32.mxu1 %v7782_v39 }
 0x311   : > { %v7786_v10 = vpop.trf.xlu0  ;;  %6219 = vmatmul.mubr.f32.gmra.mxu1 %v7785_v50 }
 0x312   : > { %v7790_v19 = vunpack.i.h.bf16 %v7786_v10  ;;  %v7787_v24 = vunpack.i.l.bf16 %v7786_v10 }
 0x314   : > { %6223 = vmatprep.mubr.f32.mxu1 %v7787_v24 }
 0x315   : > { %v7791_v9 = vpop.trf.xlu0  ;;  %6224 = vmatmul.mubr.f32.gmra.mxu1 %v7790_v19 }
 0x316   : > { %v7795_v54 = vunpack.i.h.bf16 %v7791_v9  ;;  %v7792_v47 = vunpack.i.l.bf16 %v7791_v9 }
 0x318   : > { %6228 = vmatprep.mubr.f32.mxu1 %v7792_v47 }
 0x319   : > { %v7796_v33 = vpop.trf.xlu0  ;;  %6229 = vmatmul.mubr.f32.gmra.mxu1 %v7795_v54 }
 0x31a   : > { %v7800_v45 = vunpack.i.h.bf16 %v7796_v33  ;;  %v7797_v3 = vunpack.i.l.bf16 %v7796_v33 }
 0x31c   : > { %6233 = vmatprep.mubr.f32.mxu1 %v7797_v3 }
 0x31d   : > { %v7801_v42 = vpop.trf.xlu0  ;;  %6234 = vmatmul.mubr.f32.gmra.mxu1 %v7800_v45 }
 0x31e   : > { %v7805_v43 = vunpack.i.h.bf16 %v7801_v42  ;;  %v7802_v34 = vunpack.i.l.bf16 %v7801_v42 }
 0x320   : > { %6238 = vmatprep.mubr.f32.mxu1 %v7802_v34 }
 0x321   : > { %v7806_v44 = vpop.trf.xlu0  ;;  %6239 = vmatmul.mubr.f32.gmra.mxu1 %v7805_v43 }
 0x322   : > { %v7810_v5 = vunpack.i.h.bf16 %v7806_v44  ;;  %v7807_v28 = vunpack.i.l.bf16 %v7806_v44 }
 0x324   : > { %6243 = vmatprep.mubr.f32.mxu1 %v7807_v28 }
 0x325   : > { %v7811_v59 = vpop.trf.xlu0  ;;  %6244 = vmatmul.mubr.f32.gmra.mxu1 %v7810_v5 }
 0x326   : > { %v7815_v18 = vunpack.i.h.bf16 %v7811_v59  ;;  %v7812_v31 = vunpack.i.l.bf16 %v7811_v59 }
 0x328   : > { %6248 = vmatprep.mubr.f32.mxu1 %v7812_v31 }
 0x329   : > { %v7816_v51 = vpop.trf.xlu0  ;;  %6249 = vmatmul.mubr.f32.gmra.mxu1 %v7815_v18 }
 0x32a   : > { %v7820_v0 = vunpack.i.h.bf16 %v7816_v51  ;;  %v7817_v22 = vunpack.i.l.bf16 %v7816_v51 }
 0x32c   : > { %6253 = vmatprep.mubr.f32.mxu1 %v7817_v22 }
 0x32d   : > { %v7821_v36 = vpop.trf.xlu0  ;;  %6254 = vmatmul.mubr.f32.gmra.mxu1 %v7820_v0 }
 0x32e   : > { %v7825_v11 = vunpack.i.h.bf16 %v7821_v36  ;;  %v7822_v7 = vunpack.i.l.bf16 %v7821_v36 }
 0x330   : > { %6258 = vmatprep.mubr.f32.mxu1 %v7822_v7 }
 0x331   : > { %6259 = vmatmul.mubr.f32.gmra.mxu1 %v7825_v11 }
 0x3b5   : > { %v7225_v52 = vpop.f32.mrf.mxu1 }
 0x3b7   : > { %v7226_v41 = vpop.f32.mrf.mxu1 }
 0x3b8   : > { %v7227_v23 = vadd.f32 %v7226_v41, %v7225_v52 }
 0x3b9   : > { %v7228_v48 = vpop.f32.mrf.mxu1 }
 0x3ba   : > { %6264 = vst [vmem:[%s10624_s27] sm:$0xff] %v7227_v23 }
 0x3bb   : > { %v7229_v53 = vpop.f32.mrf.mxu1 }
 0x3bc   : > { %v7230_v2 = vadd.f32 %v7229_v53, %v7228_v48 }
 0x3bd   : > { %v7231_v14 = vpop.f32.mrf.mxu1 }
 0x3be   : > { %6265 = vst [vmem:[%s10624_s27 + $0x8] sm:$0xff] %v7230_v2 }
 0x3bf   : > { %v7232_v21 = vpop.f32.mrf.mxu1 }
 0x3c0   : > { %v7233_v55 = vadd.f32 %v7232_v21, %v7231_v14 }
 0x3c1   : > { %v7234_v17 = vpop.f32.mrf.mxu1 }
 0x3c2   : > { %6266 = vst [vmem:[%s10624_s27 + $0x10] sm:$0xff] %v7233_v55 }
 0x3c3   : > { %v7235_v30 = vpop.f32.mrf.mxu1 }
 0x3c4   : > { %v7236_v29 = vadd.f32 %v7235_v30, %v7234_v17 }
 0x3c5   : > { %v7237_v60 = vpop.f32.mrf.mxu1 }
 0x3c6   : > { %6267 = vst [vmem:[%s10624_s27 + $0x18] sm:$0xff] %v7236_v29 }
 0x3c7   : > { %v7238_v56 = vpop.f32.mrf.mxu1 }
 0x3c8   : > { %v7239_v49 = vadd.f32 %v7238_v56, %v7237_v60 }
 0x3c9   : > { %v7240_v15 = vpop.f32.mrf.mxu1 }
 0x3ca   : > { %6268 = vst [vmem:[%s10624_s27 + $0x20] sm:$0xff] %v7239_v49 }
 0x3cb   : > { %v7241_v8 = vpop.f32.mrf.mxu1 }
 0x3cc   : > { %v7242_v38 = vadd.f32 %v7241_v8, %v7240_v15 }
 0x3cd   : > { %v7243_v26 = vpop.f32.mrf.mxu1 }
 0x3ce   : > { %6269 = vst [vmem:[%s10624_s27 + $0x28] sm:$0xff] %v7242_v38 }
 0x3cf   : > { %v7244_v62 = vpop.f32.mrf.mxu1 }
 0x3d0   : > { %v7245_v58 = vadd.f32 %v7244_v62, %v7243_v26 }
 0x3d1   : > { %v7246_v25 = vpop.f32.mrf.mxu1 }
 0x3d2   : > { %6270 = vst [vmem:[%s10624_s27 + $0x30] sm:$0xff] %v7245_v58 }
 0x3d3   : > { %v7247_v40 = vpop.f32.mrf.mxu1 }
 0x3d4   : > { %v7248_v37 = vadd.f32 %v7247_v40, %v7246_v25 }
 0x3d5   : > { %v7249_v20 = vpop.f32.mrf.mxu1 }
 0x3d6   : > { %6271 = vst [vmem:[%s10624_s27 + $0x38] sm:$0xff] %v7248_v37 }
 0x3d7   : > { %v7250_v12 = vpop.f32.mrf.mxu1 }
 0x3d8   : > { %v7251_v57 = vadd.f32 %v7250_v12, %v7249_v20 }
 0x3d9   : > { %v7252_v63 = vpop.f32.mrf.mxu1 }
 0x3da   : > { %6272 = vst [vmem:[%s10624_s27 + $0x40] sm:$0xff] %v7251_v57 }
 0x3db   : > { %v7253_v16 = vpop.f32.mrf.mxu1 }
 0x3dc   : > { %v7254_v46 = vadd.f32 %v7253_v16, %v7252_v63 }
 0x3dd   : > { %v7255_v35 = vpop.f32.mrf.mxu1 }
 0x3de   : > { %6273 = vst [vmem:[%s10624_s27 + $0x48] sm:$0xff] %v7254_v46 }
 0x3df   : > { %v7256_v4 = vpop.f32.mrf.mxu1 }
 0x3e0   : > { %v7257_v6 = vadd.f32 %v7256_v4, %v7255_v35 }
 0x3e1   : > { %v7258_v27 = vpop.f32.mrf.mxu1 }
 0x3e2   : > { %6274 = vst [vmem:[%s10624_s27 + $0x50] sm:$0xff] %v7257_v6 }
 0x3e3   : > { %v7259_v1 = vpop.f32.mrf.mxu1 }
 0x3e4   : > { %v7260_v13 = vadd.f32 %v7259_v1, %v7258_v27 }
 0x3e5   : > { %v7261_v32 = vpop.f32.mrf.mxu1 }
 0x3e6   : > { %6275 = vst [vmem:[%s10624_s27 + $0x58] sm:$0xff] %v7260_v13 }
 0x3e7   : > { %v7262_v61 = vpop.f32.mrf.mxu1 }
 0x3e8   : > { %v7263_v50 = vadd.f32 %v7262_v61, %v7261_v32 }
 0x3e9   : > { %v7264_v39 = vpop.f32.mrf.mxu1 }
 0x3ea   : > { %6276 = vst [vmem:[%s10624_s27 + $0x60] sm:$0xff] %v7263_v50 }
 0x3eb   : > { %v7265_v10 = vpop.f32.mrf.mxu1 }
 0x3ec   : > { %v7266_v19 = vadd.f32 %v7265_v10, %v7264_v39 }
 0x3ed   : > { %v7267_v24 = vpop.f32.mrf.mxu1 }
 0x3ee   : > { %6277 = vst [vmem:[%s10624_s27 + $0x68] sm:$0xff] %v7266_v19 }
 0x3ef   : > { %v7268_v9 = vpop.f32.mrf.mxu1 }
 0x3f0   : > { %v7269_v54 = vadd.f32 %v7268_v9, %v7267_v24 }
 0x3f1   : > { %v7270_v47 = vpop.f32.mrf.mxu1 }
 0x3f2   : > { %6278 = vst [vmem:[%s10624_s27 + $0x70] sm:$0xff] %v7269_v54 }
 0x3f3   : > { %v7271_v33 = vpop.f32.mrf.mxu1 }
 0x3f4   : > { %v7272_v45 = vadd.f32 %v7271_v33, %v7270_v47 }
 0x3f6   : > { %6279 = vst [vmem:[%s10624_s27 + $0x78] sm:$0xff] %v7272_v45 }
 0x3f7 PF: > { %s17_s21 = sadd.s32 1, %s7972_s21  }
 0x3f8   : > { %p14_p4 = scmp.ge.s32.totalorder %s17_s21, 4  }
 0x3fa   :  { %16 = sbr.rel (!%p14_p4) target bundleno = 1 (0x1), region = 93 }

</bundles_post_ra>
